<compile_context>
chip_gen: v7x
topology: tpu7x:2x2x1
jax: 0.10.0
libtpu: 0.0.40
codegen_flags: <defaults>
</compile_context>

<pallas_src>
import jax
import jax.numpy as jnp
from jax.experimental import pallas as pl
from jax.experimental.pallas import tpu as pltpu


def resnet_pointnet_kernel(
    p_ref,            # (Bt, T, dim_pad)   f32
    fc_pos_w_ref,     # (dim_pad, 2h)      bf16
    fc_pos_b_ref,     # (1, 2h)            f32
    blk_fc0_w_ref,    # (5, 2h, h)         bf16
    blk_fc0_b_ref,    # (5, 1, h)          f32
    blk_fc1_w_ref,    # (5, h, h)          bf16
    blk_fc1_b_ref,    # (5, 1, h)          f32
    blk_sc_w_ref,     # (5, 2h, h)         bf16
    fc_c_w_ref,       # (h, c_pad)         bf16
    fc_c_b_ref,       # (1, c_pad)         f32
    out_ref,          # (Bt, c_pad)        f32
):
    Bt, T, _ = p_ref.shape
    h = blk_fc1_w_ref.shape[1]
    M = Bt * T
    relu = lambda v: jnp.maximum(v, 0.0)

    def mm(x, w):
        # bf16 x bf16 MXU matmul with f32 accumulation.
        return jnp.dot(x.astype(jnp.bfloat16), w, preferred_element_type=jnp.float32)

    # ---- fc_pos : (M, dim_pad) @ (dim_pad, 2h) -----------------------------
    p2 = p_ref[...].reshape(M, -1)
    net = mm(p2, fc_pos_w_ref[...]) + fc_pos_b_ref[...]              # (M, 2h) f32

    # ---- block_0 : full 2h input (no pooled concat feeds this block) -------
    hid = mm(relu(net), blk_fc0_w_ref[0]) + blk_fc0_b_ref[0]         # (M, h)
    dx = mm(relu(hid), blk_fc1_w_ref[0]) + blk_fc1_b_ref[0]          # (M, h)
    net3 = (mm(net, blk_sc_w_ref[0]) + dx).reshape(Bt, T, h)         # (Bt, T, h)

    # ---- blocks 1..4 : concat([net, broadcast(pooled)]) removed by splitting
    #      fc_0 / shortcut weights into net-half and pooled-half -------------
    for i in range(1, 5):  # static Python unroll (different weights per block)
        pooled = jnp.max(net3, axis=1)                               # (Bt, h) sublane reduce
        net2 = net3.reshape(M, h)
        w0_top = blk_fc0_w_ref[i, :h, :]                             # (h, h)
        w0_bot = blk_fc0_w_ref[i, h:, :]                             # (h, h)
        ws_top = blk_sc_w_ref[i, :h, :]                              # (h, h)
        ws_bot = blk_sc_w_ref[i, h:, :]                              # (h, h)
        # fc_0(relu(cat(net, pooled))) == relu(net)@w0_top + relu(pooled)@w0_bot + b0
        hid3 = (mm(relu(net2), w0_top).reshape(Bt, T, h)
                + (mm(relu(pooled), w0_bot) + blk_fc0_b_ref[i])[:, None, :])
        dx = mm(relu(hid3.reshape(M, h)), blk_fc1_w_ref[i]) + blk_fc1_b_ref[i]
        # shortcut(cat(net, pooled)) == net@ws_top + pooled@ws_bot (no bias)
        net3 = (mm(net2, ws_top).reshape(Bt, T, h)
                + mm(pooled, ws_bot)[:, None, :]
                + dx.reshape(Bt, T, h))

    # ---- final max-pool over points + fc_c (lane/sublane-dense store) ------
    pooled = jnp.max(net3, axis=1)                                   # (Bt, h)
    c = mm(relu(pooled), fc_c_w_ref[...]) + fc_c_b_ref[...]          # (Bt, c_pad)
    out_ref[...] = c.astype(out_ref.dtype)


def resnet_pointnet(p, params, *, batch_tile=None):
    """p: (B, T, dim) float32 -> (B, c_dim) float32."""
    B, T, dim = p.shape
    two_h = params["fc_pos_w"].shape[1]
    h = two_h // 2
    c_dim = params["fc_c_w"].shape[1]

    # 1) Pad T to a multiple of 8 by repeating the last point (max-pool is
    #    invariant to duplicated points, so this is exact).
    T_pad = pl.cdiv(T, 8) * 8
    if T_pad != T:
        p = jnp.concatenate(
            [p, jnp.repeat(p[:, -1:, :], T_pad - T, axis=1)], axis=1)

    # 2) Zero-pad the input feature dim to 8 (avoid a K=3 MXU contraction).
    dim_pad = max(8, pl.cdiv(dim, 8) * 8)
    fc_pos_w = params["fc_pos_w"]
    if dim_pad != dim:
        p = jnp.pad(p, ((0, 0), (0, 0), (0, dim_pad - dim)))
        fc_pos_w = jnp.pad(fc_pos_w, ((0, dim_pad - dim), (0, 0)))

    # 3) Batch tiling: batch_tile examples per grid step, rounded UP to a
    #    multiple of 8 so the output block is sublane-dense (and the (8,128)
    #    block constraint is always met).  M = batch_tile * T rows per matmul.
    if batch_tile is None:
        batch_tile = pl.cdiv(512, T_pad)          # target >=512 rows per step
    batch_tile = max(8, pl.cdiv(batch_tile, 8) * 8)
    batch_tile = min(batch_tile, pl.cdiv(B, 8) * 8)
    B_pad = pl.cdiv(B, batch_tile) * batch_tile
    if B_pad != B:
        p = jnp.pad(p, ((0, B_pad - B), (0, 0), (0, 0)))

    # 4) Zero-pad c_dim to a multiple of 128 for lane-dense output stores.
    c_pad = max(128, pl.cdiv(c_dim, 128) * 128)
    fc_c_w = params["fc_c_w"]
    fc_c_b = params["fc_c_b"]
    if c_pad != c_dim:
        fc_c_w = jnp.pad(fc_c_w, ((0, 0), (0, c_pad - c_dim)))
        fc_c_b = jnp.pad(fc_c_b, ((0, 0), (0, c_pad - c_dim)))

    bf16 = lambda a: a.astype(jnp.bfloat16)   # MXU-native matmul operands
    grid = B_pad // batch_tile
    zeros2 = lambda b: (0, 0)
    zeros3 = lambda b: (0, 0, 0)

    out = pl.pallas_call(
        resnet_pointnet_kernel,
        out_shape=jax.ShapeDtypeStruct((B_pad, c_pad), jnp.float32),
        grid_spec=pltpu.PrefetchScalarGridSpec(
            num_scalar_prefetch=0,
            grid=(grid,),
            in_specs=[
                pl.BlockSpec((batch_tile, T_pad, dim_pad), lambda b: (b, 0, 0)),
                pl.BlockSpec((dim_pad, two_h), zeros2),
                pl.BlockSpec((1, two_h), zeros2),
                pl.BlockSpec((5, two_h, h), zeros3),
                pl.BlockSpec((5, 1, h), zeros3),
                pl.BlockSpec((5, h, h), zeros3),
                pl.BlockSpec((5, 1, h), zeros3),
                pl.BlockSpec((5, two_h, h), zeros3),
                pl.BlockSpec((h, c_pad), zeros2),
                pl.BlockSpec((1, c_pad), zeros2),
            ],
            out_specs=pl.BlockSpec((batch_tile, c_pad), lambda b: (b, 0)),
        ),
        compiler_params=pltpu.CompilerParams(
            dimension_semantics=("parallel",),
            # above the 32 MiB scoped default, below v7x's 64 MiB physical.
            vmem_limit_bytes=48 * 1024 * 1024,
        ),
    )(
        p,
        bf16(fc_pos_w), params["fc_pos_b"],
        bf16(params["blk_fc0_w"]), params["blk_fc0_b"],
        bf16(params["blk_fc1_w"]), params["blk_fc1_b"],
        bf16(params["blk_sc_w"]),
        bf16(fc_c_w), fc_c_b,
    )
    return out[:B, :c_dim]


def init_params(key, dim=3, hidden_dim=32, c_dim=64):
    """Deterministic synthetic parameters, stored as (in, out) so x @ W.

    Note: the PyTorch module zero-inits fc_1.weight; here we use small random
    values so the kernel exercises non-trivial compute.
    """
    two_h = 2 * hidden_dim
    ks = jax.random.split(key, 10)
    s = 0.1
    return {
        "fc_pos_w": s * jax.random.normal(ks[0], (dim, two_h), jnp.float32),
        "fc_pos_b": s * jax.random.normal(ks[1], (1, two_h), jnp.float32),
        "blk_fc0_w": s * jax.random.normal(ks[2], (5, two_h, hidden_dim), jnp.float32),
        "blk_fc0_b": s * jax.random.normal(ks[3], (5, 1, hidden_dim), jnp.float32),
        "blk_fc1_w": s * jax.random.normal(ks[4], (5, hidden_dim, hidden_dim), jnp.float32),
        "blk_fc1_b": s * jax.random.normal(ks[5], (5, 1, hidden_dim), jnp.float32),
        "blk_sc_w": s * jax.random.normal(ks[6], (5, two_h, hidden_dim), jnp.float32),
        "fc_c_w": s * jax.random.normal(ks[7], (hidden_dim, c_dim), jnp.float32),
        "fc_c_b": s * jax.random.normal(ks[8], (1, c_dim), jnp.float32),
    }


def resnet_pointnet_ref(p, params):
    """Pure-jnp reference mirroring the PyTorch forward (with the same bf16
    matmul-operand casting the kernel uses, f32 accumulation/elementwise)."""
    relu = lambda v: jnp.maximum(v, 0.0)
    mm = lambda x, w: jnp.dot(x.astype(jnp.bfloat16), w.astype(jnp.bfloat16),
                              preferred_element_type=jnp.float32)

    def resblock(i, x):
        net = mm(relu(x), params["blk_fc0_w"][i]) + params["blk_fc0_b"][i]
        dx = mm(relu(net), params["blk_fc1_w"][i]) + params["blk_fc1_b"][i]
        x_s = mm(x, params["blk_sc_w"][i])
        return x_s + dx

    net = mm(p, params["fc_pos_w"]) + params["fc_pos_b"]
    net = resblock(0, net)
    for i in range(1, 5):
        pooled = jnp.max(net, axis=1, keepdims=True)
        pooled = jnp.broadcast_to(pooled, net.shape)
        net = jnp.concatenate([net, pooled], axis=-1)
        net = resblock(i, net)
    net = jnp.max(net, axis=1)
    return mm(relu(net), params["fc_c_w"]) + params["fc_c_b"]


if __name__ == "__main__":
    key = jax.random.PRNGKey(0)
    k_p, k_w = jax.random.split(key)

    B, T, dim = 4, 64, 3
    hidden_dim, c_dim = 32, 64

    p = jax.random.normal(k_p, (B, T, dim), jnp.float32)
    params = init_params(k_w, dim=dim, hidden_dim=hidden_dim, c_dim=c_dim)

    out = jax.block_until_ready(resnet_pointnet(p, params))
    ref = resnet_pointnet_ref(p, params)

    assert out.shape == (B, c_dim), out.shape
    assert jnp.allclose(out, ref, atol=1e-2, rtol=1e-2), (
        "mismatch vs jnp reference, max abs diff = "
        + str(float(jnp.max(jnp.abs(out - ref)))))
    print("KERNEL_OK")
</pallas_src>

<mosaic_0001>
module attributes {stable_mosaic.version = 11 : i64} {
  func.func @resnet_pointnet_kernel(%arg0: i32, %arg1: memref<8x64x8xf32, #tpu.memory_space<vmem>>, %arg2: memref<8x64xbf16, #tpu.memory_space<vmem>>, %arg3: memref<1x64xf32, #tpu.memory_space<vmem>>, %arg4: memref<5x64x32xbf16, #tpu.memory_space<vmem>>, %arg5: memref<5x1x32xf32, #tpu.memory_space<vmem>>, %arg6: memref<5x32x32xbf16, #tpu.memory_space<vmem>>, %arg7: memref<5x1x32xf32, #tpu.memory_space<vmem>>, %arg8: memref<5x64x32xbf16, #tpu.memory_space<vmem>>, %arg9: memref<32x128xbf16, #tpu.memory_space<vmem>>, %arg10: memref<1x128xf32, #tpu.memory_space<vmem>>, %arg11: memref<8x128xf32, #tpu.memory_space<vmem>>) attributes {dimension_semantics = [#tpu.dimension_semantics<parallel>], iteration_bounds = array<i64: 1>, scalar_prefetch = 0 : i64, scratch_operands = 0 : i64, tpu.core_type = #tpu.core_type<tc>, window_params = [{transform_indices = @transform_0, window_bounds = array<i64: 8, 64, 8>}, {pipeline_mode = #tpu.pipeline_mode<synchronous>, transform_indices = @transform_1, window_bounds = array<i64: 8, 64>}, {pipeline_mode = #tpu.pipeline_mode<synchronous>, transform_indices = @transform_2, window_bounds = array<i64: 1, 64>}, {pipeline_mode = #tpu.pipeline_mode<synchronous>, transform_indices = @transform_3, window_bounds = array<i64: 5, 64, 32>}, {pipeline_mode = #tpu.pipeline_mode<synchronous>, transform_indices = @transform_4, window_bounds = array<i64: 5, 1, 32>}, {pipeline_mode = #tpu.pipeline_mode<synchronous>, transform_indices = @transform_5, window_bounds = array<i64: 5, 32, 32>}, {pipeline_mode = #tpu.pipeline_mode<synchronous>, transform_indices = @transform_6, window_bounds = array<i64: 5, 1, 32>}, {pipeline_mode = #tpu.pipeline_mode<synchronous>, transform_indices = @transform_7, window_bounds = array<i64: 5, 64, 32>}, {pipeline_mode = #tpu.pipeline_mode<synchronous>, transform_indices = @transform_8, window_bounds = array<i64: 32, 128>}, {pipeline_mode = #tpu.pipeline_mode<synchronous>, transform_indices = @transform_9, window_bounds = array<i64: 1, 128>}, {transform_indices = @transform_10, window_bounds = array<i64: 8, 128>}]} {
    %c0 = arith.constant 0 : index
    %c0_0 = arith.constant 0 : index
    %c0_1 = arith.constant 0 : index
    %0 = vector.load %arg1[%c0, %c0_0, %c0_1] : memref<8x64x8xf32, #tpu.memory_space<vmem>>, vector<8x64x8xf32>
    %1 = vector.shape_cast %0 : vector<8x64x8xf32> to vector<512x8xf32>
    %c0_2 = arith.constant 0 : index
    %c0_3 = arith.constant 0 : index
    %2 = vector.load %arg2[%c0_2, %c0_3] : memref<8x64xbf16, #tpu.memory_space<vmem>>, vector<8x64xbf16>
    %3 = arith.truncf %1 : vector<512x8xf32> to vector<512x8xbf16>
    %cst = arith.constant dense<0.000000e+00> : vector<512x64xf32>
    %4 = tpu.matmul %3, %2, %cst {dimension_numbers = #tpu.dot_dimension_numbers<[1], [0], [0], [1], [0, 0, 1, 1], [], []>} : vector<512x8xbf16>, vector<8x64xbf16>, vector<512x64xf32> -> vector<512x64xf32>
    %c0_4 = arith.constant 0 : index
    %c0_5 = arith.constant 0 : index
    %5 = vector.load %arg3[%c0_4, %c0_5] : memref<1x64xf32, #tpu.memory_space<vmem>>, vector<1x64xf32>
    %6 = vector.broadcast %5 : vector<1x64xf32> to vector<512x64xf32>
    %7 = arith.addf %4, %6 : vector<512x64xf32>
    %cst_6 = arith.constant 0.000000e+00 : f32
    %8 = vector.broadcast %cst_6 : f32 to vector<512x64xf32>
    %9 = arith.maximumf %7, %8 : vector<512x64xf32>
    %c0_7 = arith.constant 0 : index
    %c0_8 = arith.constant 0 : index
    %c0_9 = arith.constant 0 : index
    %10 = vector.load %arg4[%c0_7, %c0_8, %c0_9] : memref<5x64x32xbf16, #tpu.memory_space<vmem>>, vector<1x64x32xbf16>
    %11 = vector.shape_cast %10 : vector<1x64x32xbf16> to vector<64x32xbf16>
    %12 = arith.truncf %9 : vector<512x64xf32> to vector<512x64xbf16>
    %cst_10 = arith.constant dense<0.000000e+00> : vector<512x32xf32>
    %13 = tpu.matmul %12, %11, %cst_10 {dimension_numbers = #tpu.dot_dimension_numbers<[1], [0], [0], [1], [0, 0, 1, 1], [], []>} : vector<512x64xbf16>, vector<64x32xbf16>, vector<512x32xf32> -> vector<512x32xf32>
    %c0_11 = arith.constant 0 : index
    %c0_12 = arith.constant 0 : index
    %c0_13 = arith.constant 0 : index
    %14 = vector.load %arg5[%c0_11, %c0_12, %c0_13] : memref<5x1x32xf32, #tpu.memory_space<vmem>>, vector<1x1x32xf32>
    %15 = vector.shape_cast %14 : vector<1x1x32xf32> to vector<1x32xf32>
    %16 = vector.broadcast %15 : vector<1x32xf32> to vector<512x32xf32>
    %17 = arith.addf %13, %16 : vector<512x32xf32>
    %cst_14 = arith.constant 0.000000e+00 : f32
    %18 = vector.broadcast %cst_14 : f32 to vector<512x32xf32>
    %19 = arith.maximumf %17, %18 : vector<512x32xf32>
    %c0_15 = arith.constant 0 : index
    %c0_16 = arith.constant 0 : index
    %c0_17 = arith.constant 0 : index
    %20 = vector.load %arg6[%c0_15, %c0_16, %c0_17] : memref<5x32x32xbf16, #tpu.memory_space<vmem>>, vector<1x32x32xbf16>
    %21 = vector.shape_cast %20 : vector<1x32x32xbf16> to vector<32x32xbf16>
    %22 = arith.truncf %19 : vector<512x32xf32> to vector<512x32xbf16>
    %cst_18 = arith.constant dense<0.000000e+00> : vector<512x32xf32>
    %23 = tpu.matmul %22, %21, %cst_18 {dimension_numbers = #tpu.dot_dimension_numbers<[1], [0], [0], [1], [0, 0, 1, 1], [], []>} : vector<512x32xbf16>, vector<32x32xbf16>, vector<512x32xf32> -> vector<512x32xf32>
    %c0_19 = arith.constant 0 : index
    %c0_20 = arith.constant 0 : index
    %c0_21 = arith.constant 0 : index
    %24 = vector.load %arg7[%c0_19, %c0_20, %c0_21] : memref<5x1x32xf32, #tpu.memory_space<vmem>>, vector<1x1x32xf32>
    %25 = vector.shape_cast %24 : vector<1x1x32xf32> to vector<1x32xf32>
    %26 = vector.broadcast %25 : vector<1x32xf32> to vector<512x32xf32>
    %27 = arith.addf %23, %26 : vector<512x32xf32>
    %c0_22 = arith.constant 0 : index
    %c0_23 = arith.constant 0 : index
    %c0_24 = arith.constant 0 : index
    %28 = vector.load %arg8[%c0_22, %c0_23, %c0_24] : memref<5x64x32xbf16, #tpu.memory_space<vmem>>, vector<1x64x32xbf16>
    %29 = vector.shape_cast %28 : vector<1x64x32xbf16> to vector<64x32xbf16>
    %30 = arith.truncf %7 : vector<512x64xf32> to vector<512x64xbf16>
    %cst_25 = arith.constant dense<0.000000e+00> : vector<512x32xf32>
    %31 = tpu.matmul %30, %29, %cst_25 {dimension_numbers = #tpu.dot_dimension_numbers<[1], [0], [0], [1], [0, 0, 1, 1], [], []>} : vector<512x64xbf16>, vector<64x32xbf16>, vector<512x32xf32> -> vector<512x32xf32>
    %32 = arith.addf %31, %27 : vector<512x32xf32>
    %33 = vector.shape_cast %32 : vector<512x32xf32> to vector<8x64x32xf32>
    %cst_26 = arith.constant dense<0xFF800000> : vector<8x32xf32>
    %34 = vector.multi_reduction <maximumf>, %33, %cst_26 [1] : vector<8x64x32xf32> to vector<8x32xf32>
    %35 = vector.shape_cast %33 : vector<8x64x32xf32> to vector<512x32xf32>
    %c1 = arith.constant 1 : index
    %c0_27 = arith.constant 0 : index
    %c0_28 = arith.constant 0 : index
    %36 = vector.load %arg4[%c1, %c0_27, %c0_28] : memref<5x64x32xbf16, #tpu.memory_space<vmem>>, vector<1x32x32xbf16>
    %37 = vector.shape_cast %36 : vector<1x32x32xbf16> to vector<32x32xbf16>
    %c1_29 = arith.constant 1 : index
    %c32 = arith.constant 32 : index
    %c0_30 = arith.constant 0 : index
    %38 = vector.load %arg4[%c1_29, %c32, %c0_30] : memref<5x64x32xbf16, #tpu.memory_space<vmem>>, vector<1x32x32xbf16>
    %39 = vector.shape_cast %38 : vector<1x32x32xbf16> to vector<32x32xbf16>
    %c1_31 = arith.constant 1 : index
    %c0_32 = arith.constant 0 : index
    %c0_33 = arith.constant 0 : index
    %40 = vector.load %arg8[%c1_31, %c0_32, %c0_33] : memref<5x64x32xbf16, #tpu.memory_space<vmem>>, vector<1x32x32xbf16>
    %41 = vector.shape_cast %40 : vector<1x32x32xbf16> to vector<32x32xbf16>
    %c1_34 = arith.constant 1 : index
    %c32_35 = arith.constant 32 : index
    %c0_36 = arith.constant 0 : index
    %42 = vector.load %arg8[%c1_34, %c32_35, %c0_36] : memref<5x64x32xbf16, #tpu.memory_space<vmem>>, vector<1x32x32xbf16>
    %43 = vector.shape_cast %42 : vector<1x32x32xbf16> to vector<32x32xbf16>
    %cst_37 = arith.constant 0.000000e+00 : f32
    %44 = vector.broadcast %cst_37 : f32 to vector<512x32xf32>
    %45 = arith.maximumf %35, %44 : vector<512x32xf32>
    %46 = arith.truncf %45 : vector<512x32xf32> to vector<512x32xbf16>
    %cst_38 = arith.constant dense<0.000000e+00> : vector<512x32xf32>
    %47 = tpu.matmul %46, %37, %cst_38 {dimension_numbers = #tpu.dot_dimension_numbers<[1], [0], [0], [1], [0, 0, 1, 1], [], []>} : vector<512x32xbf16>, vector<32x32xbf16>, vector<512x32xf32> -> vector<512x32xf32>
    %48 = vector.shape_cast %47 : vector<512x32xf32> to vector<8x64x32xf32>
    %cst_39 = arith.constant 0.000000e+00 : f32
    %49 = vector.broadcast %cst_39 : f32 to vector<8x32xf32>
    %50 = arith.maximumf %34, %49 : vector<8x32xf32>
    %51 = arith.truncf %50 : vector<8x32xf32> to vector<8x32xbf16>
    %cst_40 = arith.constant dense<0.000000e+00> : vector<8x32xf32>
    %52 = tpu.matmul %51, %39, %cst_40 {dimension_numbers = #tpu.dot_dimension_numbers<[1], [0], [0], [1], [0, 0, 1, 1], [], []>} : vector<8x32xbf16>, vector<32x32xbf16>, vector<8x32xf32> -> vector<8x32xf32>
    %c1_41 = arith.constant 1 : index
    %c0_42 = arith.constant 0 : index
    %c0_43 = arith.constant 0 : index
    %53 = vector.load %arg5[%c1_41, %c0_42, %c0_43] : memref<5x1x32xf32, #tpu.memory_space<vmem>>, vector<1x1x32xf32>
    %54 = vector.shape_cast %53 : vector<1x1x32xf32> to vector<1x32xf32>
    %55 = vector.broadcast %54 : vector<1x32xf32> to vector<8x32xf32>
    %56 = arith.addf %52, %55 : vector<8x32xf32>
    %57 = vector.shape_cast %56 : vector<8x32xf32> to vector<8x1x32xf32>
    %58 = vector.broadcast %57 : vector<8x1x32xf32> to vector<8x64x32xf32>
    %59 = arith.addf %48, %58 : vector<8x64x32xf32>
    %60 = vector.shape_cast %59 : vector<8x64x32xf32> to vector<512x32xf32>
    %cst_44 = arith.constant 0.000000e+00 : f32
    %61 = vector.broadcast %cst_44 : f32 to vector<512x32xf32>
    %62 = arith.maximumf %60, %61 : vector<512x32xf32>
    %c1_45 = arith.constant 1 : index
    %c0_46 = arith.constant 0 : index
    %c0_47 = arith.constant 0 : index
    %63 = vector.load %arg6[%c1_45, %c0_46, %c0_47] : memref<5x32x32xbf16, #tpu.memory_space<vmem>>, vector<1x32x32xbf16>
    %64 = vector.shape_cast %63 : vector<1x32x32xbf16> to vector<32x32xbf16>
    %65 = arith.truncf %62 : vector<512x32xf32> to vector<512x32xbf16>
    %cst_48 = arith.constant dense<0.000000e+00> : vector<512x32xf32>
    %66 = tpu.matmul %65, %64, %cst_48 {dimension_numbers = #tpu.dot_dimension_numbers<[1], [0], [0], [1], [0, 0, 1, 1], [], []>} : vector<512x32xbf16>, vector<32x32xbf16>, vector<512x32xf32> -> vector<512x32xf32>
    %c1_49 = arith.constant 1 : index
    %c0_50 = arith.constant 0 : index
    %c0_51 = arith.constant 0 : index
    %67 = vector.load %arg7[%c1_49, %c0_50, %c0_51] : memref<5x1x32xf32, #tpu.memory_space<vmem>>, vector<1x1x32xf32>
    %68 = vector.shape_cast %67 : vector<1x1x32xf32> to vector<1x32xf32>
    %69 = vector.broadcast %68 : vector<1x32xf32> to vector<512x32xf32>
    %70 = arith.addf %66, %69 : vector<512x32xf32>
    %71 = arith.truncf %35 : vector<512x32xf32> to vector<512x32xbf16>
    %cst_52 = arith.constant dense<0.000000e+00> : vector<512x32xf32>
    %72 = tpu.matmul %71, %41, %cst_52 {dimension_numbers = #tpu.dot_dimension_numbers<[1], [0], [0], [1], [0, 0, 1, 1], [], []>} : vector<512x32xbf16>, vector<32x32xbf16>, vector<512x32xf32> -> vector<512x32xf32>
    %73 = vector.shape_cast %72 : vector<512x32xf32> to vector<8x64x32xf32>
    %74 = arith.truncf %34 : vector<8x32xf32> to vector<8x32xbf16>
    %cst_53 = arith.constant dense<0.000000e+00> : vector<8x32xf32>
    %75 = tpu.matmul %74, %43, %cst_53 {dimension_numbers = #tpu.dot_dimension_numbers<[1], [0], [0], [1], [0, 0, 1, 1], [], []>} : vector<8x32xbf16>, vector<32x32xbf16>, vector<8x32xf32> -> vector<8x32xf32>
    %76 = vector.shape_cast %75 : vector<8x32xf32> to vector<8x1x32xf32>
    %77 = vector.broadcast %76 : vector<8x1x32xf32> to vector<8x64x32xf32>
    %78 = arith.addf %73, %77 : vector<8x64x32xf32>
    %79 = vector.shape_cast %70 : vector<512x32xf32> to vector<8x64x32xf32>
    %80 = arith.addf %78, %79 : vector<8x64x32xf32>
    %cst_54 = arith.constant dense<0xFF800000> : vector<8x32xf32>
    %81 = vector.multi_reduction <maximumf>, %80, %cst_54 [1] : vector<8x64x32xf32> to vector<8x32xf32>
    %82 = vector.shape_cast %80 : vector<8x64x32xf32> to vector<512x32xf32>
    %c2 = arith.constant 2 : index
    %c0_55 = arith.constant 0 : index
    %c0_56 = arith.constant 0 : index
    %83 = vector.load %arg4[%c2, %c0_55, %c0_56] : memref<5x64x32xbf16, #tpu.memory_space<vmem>>, vector<1x32x32xbf16>
    %84 = vector.shape_cast %83 : vector<1x32x32xbf16> to vector<32x32xbf16>
    %c2_57 = arith.constant 2 : index
    %c32_58 = arith.constant 32 : index
    %c0_59 = arith.constant 0 : index
    %85 = vector.load %arg4[%c2_57, %c32_58, %c0_59] : memref<5x64x32xbf16, #tpu.memory_space<vmem>>, vector<1x32x32xbf16>
    %86 = vector.shape_cast %85 : vector<1x32x32xbf16> to vector<32x32xbf16>
    %c2_60 = arith.constant 2 : index
    %c0_61 = arith.constant 0 : index
    %c0_62 = arith.constant 0 : index
    %87 = vector.load %arg8[%c2_60, %c0_61, %c0_62] : memref<5x64x32xbf16, #tpu.memory_space<vmem>>, vector<1x32x32xbf16>
    %88 = vector.shape_cast %87 : vector<1x32x32xbf16> to vector<32x32xbf16>
    %c2_63 = arith.constant 2 : index
    %c32_64 = arith.constant 32 : index
    %c0_65 = arith.constant 0 : index
    %89 = vector.load %arg8[%c2_63, %c32_64, %c0_65] : memref<5x64x32xbf16, #tpu.memory_space<vmem>>, vector<1x32x32xbf16>
    %90 = vector.shape_cast %89 : vector<1x32x32xbf16> to vector<32x32xbf16>
    %cst_66 = arith.constant 0.000000e+00 : f32
    %91 = vector.broadcast %cst_66 : f32 to vector<512x32xf32>
    %92 = arith.maximumf %82, %91 : vector<512x32xf32>
    %93 = arith.truncf %92 : vector<512x32xf32> to vector<512x32xbf16>
    %cst_67 = arith.constant dense<0.000000e+00> : vector<512x32xf32>
    %94 = tpu.matmul %93, %84, %cst_67 {dimension_numbers = #tpu.dot_dimension_numbers<[1], [0], [0], [1], [0, 0, 1, 1], [], []>} : vector<512x32xbf16>, vector<32x32xbf16>, vector<512x32xf32> -> vector<512x32xf32>
    %95 = vector.shape_cast %94 : vector<512x32xf32> to vector<8x64x32xf32>
    %cst_68 = arith.constant 0.000000e+00 : f32
    %96 = vector.broadcast %cst_68 : f32 to vector<8x32xf32>
    %97 = arith.maximumf %81, %96 : vector<8x32xf32>
    %98 = arith.truncf %97 : vector<8x32xf32> to vector<8x32xbf16>
    %cst_69 = arith.constant dense<0.000000e+00> : vector<8x32xf32>
    %99 = tpu.matmul %98, %86, %cst_69 {dimension_numbers = #tpu.dot_dimension_numbers<[1], [0], [0], [1], [0, 0, 1, 1], [], []>} : vector<8x32xbf16>, vector<32x32xbf16>, vector<8x32xf32> -> vector<8x32xf32>
    %c2_70 = arith.constant 2 : index
    %c0_71 = arith.constant 0 : index
    %c0_72 = arith.constant 0 : index
    %100 = vector.load %arg5[%c2_70, %c0_71, %c0_72] : memref<5x1x32xf32, #tpu.memory_space<vmem>>, vector<1x1x32xf32>
    %101 = vector.shape_cast %100 : vector<1x1x32xf32> to vector<1x32xf32>
    %102 = vector.broadcast %101 : vector<1x32xf32> to vector<8x32xf32>
    %103 = arith.addf %99, %102 : vector<8x32xf32>
    %104 = vector.shape_cast %103 : vector<8x32xf32> to vector<8x1x32xf32>
    %105 = vector.broadcast %104 : vector<8x1x32xf32> to vector<8x64x32xf32>
    %106 = arith.addf %95, %105 : vector<8x64x32xf32>
    %107 = vector.shape_cast %106 : vector<8x64x32xf32> to vector<512x32xf32>
    %cst_73 = arith.constant 0.000000e+00 : f32
    %108 = vector.broadcast %cst_73 : f32 to vector<512x32xf32>
    %109 = arith.maximumf %107, %108 : vector<512x32xf32>
    %c2_74 = arith.constant 2 : index
    %c0_75 = arith.constant 0 : index
    %c0_76 = arith.constant 0 : index
    %110 = vector.load %arg6[%c2_74, %c0_75, %c0_76] : memref<5x32x32xbf16, #tpu.memory_space<vmem>>, vector<1x32x32xbf16>
    %111 = vector.shape_cast %110 : vector<1x32x32xbf16> to vector<32x32xbf16>
    %112 = arith.truncf %109 : vector<512x32xf32> to vector<512x32xbf16>
    %cst_77 = arith.constant dense<0.000000e+00> : vector<512x32xf32>
    %113 = tpu.matmul %112, %111, %cst_77 {dimension_numbers = #tpu.dot_dimension_numbers<[1], [0], [0], [1], [0, 0, 1, 1], [], []>} : vector<512x32xbf16>, vector<32x32xbf16>, vector<512x32xf32> -> vector<512x32xf32>
    %c2_78 = arith.constant 2 : index
    %c0_79 = arith.constant 0 : index
    %c0_80 = arith.constant 0 : index
    %114 = vector.load %arg7[%c2_78, %c0_79, %c0_80] : memref<5x1x32xf32, #tpu.memory_space<vmem>>, vector<1x1x32xf32>
    %115 = vector.shape_cast %114 : vector<1x1x32xf32> to vector<1x32xf32>
    %116 = vector.broadcast %115 : vector<1x32xf32> to vector<512x32xf32>
    %117 = arith.addf %113, %116 : vector<512x32xf32>
    %118 = arith.truncf %82 : vector<512x32xf32> to vector<512x32xbf16>
    %cst_81 = arith.constant dense<0.000000e+00> : vector<512x32xf32>
    %119 = tpu.matmul %118, %88, %cst_81 {dimension_numbers = #tpu.dot_dimension_numbers<[1], [0], [0], [1], [0, 0, 1, 1], [], []>} : vector<512x32xbf16>, vector<32x32xbf16>, vector<512x32xf32> -> vector<512x32xf32>
    %120 = vector.shape_cast %119 : vector<512x32xf32> to vector<8x64x32xf32>
    %121 = arith.truncf %81 : vector<8x32xf32> to vector<8x32xbf16>
    %cst_82 = arith.constant dense<0.000000e+00> : vector<8x32xf32>
    %122 = tpu.matmul %121, %90, %cst_82 {dimension_numbers = #tpu.dot_dimension_numbers<[1], [0], [0], [1], [0, 0, 1, 1], [], []>} : vector<8x32xbf16>, vector<32x32xbf16>, vector<8x32xf32> -> vector<8x32xf32>
    %123 = vector.shape_cast %122 : vector<8x32xf32> to vector<8x1x32xf32>
    %124 = vector.broadcast %123 : vector<8x1x32xf32> to vector<8x64x32xf32>
    %125 = arith.addf %120, %124 : vector<8x64x32xf32>
    %126 = vector.shape_cast %117 : vector<512x32xf32> to vector<8x64x32xf32>
    %127 = arith.addf %125, %126 : vector<8x64x32xf32>
    %cst_83 = arith.constant dense<0xFF800000> : vector<8x32xf32>
    %128 = vector.multi_reduction <maximumf>, %127, %cst_83 [1] : vector<8x64x32xf32> to vector<8x32xf32>
    %129 = vector.shape_cast %127 : vector<8x64x32xf32> to vector<512x32xf32>
    %c3 = arith.constant 3 : index
    %c0_84 = arith.constant 0 : index
    %c0_85 = arith.constant 0 : index
    %130 = vector.load %arg4[%c3, %c0_84, %c0_85] : memref<5x64x32xbf16, #tpu.memory_space<vmem>>, vector<1x32x32xbf16>
    %131 = vector.shape_cast %130 : vector<1x32x32xbf16> to vector<32x32xbf16>
    %c3_86 = arith.constant 3 : index
    %c32_87 = arith.constant 32 : index
    %c0_88 = arith.constant 0 : index
    %132 = vector.load %arg4[%c3_86, %c32_87, %c0_88] : memref<5x64x32xbf16, #tpu.memory_space<vmem>>, vector<1x32x32xbf16>
    %133 = vector.shape_cast %132 : vector<1x32x32xbf16> to vector<32x32xbf16>
    %c3_89 = arith.constant 3 : index
    %c0_90 = arith.constant 0 : index
    %c0_91 = arith.constant 0 : index
    %134 = vector.load %arg8[%c3_89, %c0_90, %c0_91] : memref<5x64x32xbf16, #tpu.memory_space<vmem>>, vector<1x32x32xbf16>
    %135 = vector.shape_cast %134 : vector<1x32x32xbf16> to vector<32x32xbf16>
    %c3_92 = arith.constant 3 : index
    %c32_93 = arith.constant 32 : index
    %c0_94 = arith.constant 0 : index
    %136 = vector.load %arg8[%c3_92, %c32_93, %c0_94] : memref<5x64x32xbf16, #tpu.memory_space<vmem>>, vector<1x32x32xbf16>
    %137 = vector.shape_cast %136 : vector<1x32x32xbf16> to vector<32x32xbf16>
    %cst_95 = arith.constant 0.000000e+00 : f32
    %138 = vector.broadcast %cst_95 : f32 to vector<512x32xf32>
    %139 = arith.maximumf %129, %138 : vector<512x32xf32>
    %140 = arith.truncf %139 : vector<512x32xf32> to vector<512x32xbf16>
    %cst_96 = arith.constant dense<0.000000e+00> : vector<512x32xf32>
    %141 = tpu.matmul %140, %131, %cst_96 {dimension_numbers = #tpu.dot_dimension_numbers<[1], [0], [0], [1], [0, 0, 1, 1], [], []>} : vector<512x32xbf16>, vector<32x32xbf16>, vector<512x32xf32> -> vector<512x32xf32>
    %142 = vector.shape_cast %141 : vector<512x32xf32> to vector<8x64x32xf32>
    %cst_97 = arith.constant 0.000000e+00 : f32
    %143 = vector.broadcast %cst_97 : f32 to vector<8x32xf32>
    %144 = arith.maximumf %128, %143 : vector<8x32xf32>
    %145 = arith.truncf %144 : vector<8x32xf32> to vector<8x32xbf16>
    %cst_98 = arith.constant dense<0.000000e+00> : vector<8x32xf32>
    %146 = tpu.matmul %145, %133, %cst_98 {dimension_numbers = #tpu.dot_dimension_numbers<[1], [0], [0], [1], [0, 0, 1, 1], [], []>} : vector<8x32xbf16>, vector<32x32xbf16>, vector<8x32xf32> -> vector<8x32xf32>
    %c3_99 = arith.constant 3 : index
    %c0_100 = arith.constant 0 : index
    %c0_101 = arith.constant 0 : index
    %147 = vector.load %arg5[%c3_99, %c0_100, %c0_101] : memref<5x1x32xf32, #tpu.memory_space<vmem>>, vector<1x1x32xf32>
    %148 = vector.shape_cast %147 : vector<1x1x32xf32> to vector<1x32xf32>
    %149 = vector.broadcast %148 : vector<1x32xf32> to vector<8x32xf32>
    %150 = arith.addf %146, %149 : vector<8x32xf32>
    %151 = vector.shape_cast %150 : vector<8x32xf32> to vector<8x1x32xf32>
    %152 = vector.broadcast %151 : vector<8x1x32xf32> to vector<8x64x32xf32>
    %153 = arith.addf %142, %152 : vector<8x64x32xf32>
    %154 = vector.shape_cast %153 : vector<8x64x32xf32> to vector<512x32xf32>
    %cst_102 = arith.constant 0.000000e+00 : f32
    %155 = vector.broadcast %cst_102 : f32 to vector<512x32xf32>
    %156 = arith.maximumf %154, %155 : vector<512x32xf32>
    %c3_103 = arith.constant 3 : index
    %c0_104 = arith.constant 0 : index
    %c0_105 = arith.constant 0 : index
    %157 = vector.load %arg6[%c3_103, %c0_104, %c0_105] : memref<5x32x32xbf16, #tpu.memory_space<vmem>>, vector<1x32x32xbf16>
    %158 = vector.shape_cast %157 : vector<1x32x32xbf16> to vector<32x32xbf16>
    %159 = arith.truncf %156 : vector<512x32xf32> to vector<512x32xbf16>
    %cst_106 = arith.constant dense<0.000000e+00> : vector<512x32xf32>
    %160 = tpu.matmul %159, %158, %cst_106 {dimension_numbers = #tpu.dot_dimension_numbers<[1], [0], [0], [1], [0, 0, 1, 1], [], []>} : vector<512x32xbf16>, vector<32x32xbf16>, vector<512x32xf32> -> vector<512x32xf32>
    %c3_107 = arith.constant 3 : index
    %c0_108 = arith.constant 0 : index
    %c0_109 = arith.constant 0 : index
    %161 = vector.load %arg7[%c3_107, %c0_108, %c0_109] : memref<5x1x32xf32, #tpu.memory_space<vmem>>, vector<1x1x32xf32>
    %162 = vector.shape_cast %161 : vector<1x1x32xf32> to vector<1x32xf32>
    %163 = vector.broadcast %162 : vector<1x32xf32> to vector<512x32xf32>
    %164 = arith.addf %160, %163 : vector<512x32xf32>
    %165 = arith.truncf %129 : vector<512x32xf32> to vector<512x32xbf16>
    %cst_110 = arith.constant dense<0.000000e+00> : vector<512x32xf32>
    %166 = tpu.matmul %165, %135, %cst_110 {dimension_numbers = #tpu.dot_dimension_numbers<[1], [0], [0], [1], [0, 0, 1, 1], [], []>} : vector<512x32xbf16>, vector<32x32xbf16>, vector<512x32xf32> -> vector<512x32xf32>
    %167 = vector.shape_cast %166 : vector<512x32xf32> to vector<8x64x32xf32>
    %168 = arith.truncf %128 : vector<8x32xf32> to vector<8x32xbf16>
    %cst_111 = arith.constant dense<0.000000e+00> : vector<8x32xf32>
    %169 = tpu.matmul %168, %137, %cst_111 {dimension_numbers = #tpu.dot_dimension_numbers<[1], [0], [0], [1], [0, 0, 1, 1], [], []>} : vector<8x32xbf16>, vector<32x32xbf16>, vector<8x32xf32> -> vector<8x32xf32>
    %170 = vector.shape_cast %169 : vector<8x32xf32> to vector<8x1x32xf32>
    %171 = vector.broadcast %170 : vector<8x1x32xf32> to vector<8x64x32xf32>
    %172 = arith.addf %167, %171 : vector<8x64x32xf32>
    %173 = vector.shape_cast %164 : vector<512x32xf32> to vector<8x64x32xf32>
    %174 = arith.addf %172, %173 : vector<8x64x32xf32>
    %cst_112 = arith.constant dense<0xFF800000> : vector<8x32xf32>
    %175 = vector.multi_reduction <maximumf>, %174, %cst_112 [1] : vector<8x64x32xf32> to vector<8x32xf32>
    %176 = vector.shape_cast %174 : vector<8x64x32xf32> to vector<512x32xf32>
    %c4 = arith.constant 4 : index
    %c0_113 = arith.constant 0 : index
    %c0_114 = arith.constant 0 : index
    %177 = vector.load %arg4[%c4, %c0_113, %c0_114] : memref<5x64x32xbf16, #tpu.memory_space<vmem>>, vector<1x32x32xbf16>
    %178 = vector.shape_cast %177 : vector<1x32x32xbf16> to vector<32x32xbf16>
    %c4_115 = arith.constant 4 : index
    %c32_116 = arith.constant 32 : index
    %c0_117 = arith.constant 0 : index
    %179 = vector.load %arg4[%c4_115, %c32_116, %c0_117] : memref<5x64x32xbf16, #tpu.memory_space<vmem>>, vector<1x32x32xbf16>
    %180 = vector.shape_cast %179 : vector<1x32x32xbf16> to vector<32x32xbf16>
    %c4_118 = arith.constant 4 : index
    %c0_119 = arith.constant 0 : index
    %c0_120 = arith.constant 0 : index
    %181 = vector.load %arg8[%c4_118, %c0_119, %c0_120] : memref<5x64x32xbf16, #tpu.memory_space<vmem>>, vector<1x32x32xbf16>
    %182 = vector.shape_cast %181 : vector<1x32x32xbf16> to vector<32x32xbf16>
    %c4_121 = arith.constant 4 : index
    %c32_122 = arith.constant 32 : index
    %c0_123 = arith.constant 0 : index
    %183 = vector.load %arg8[%c4_121, %c32_122, %c0_123] : memref<5x64x32xbf16, #tpu.memory_space<vmem>>, vector<1x32x32xbf16>
    %184 = vector.shape_cast %183 : vector<1x32x32xbf16> to vector<32x32xbf16>
    %cst_124 = arith.constant 0.000000e+00 : f32
    %185 = vector.broadcast %cst_124 : f32 to vector<512x32xf32>
    %186 = arith.maximumf %176, %185 : vector<512x32xf32>
    %187 = arith.truncf %186 : vector<512x32xf32> to vector<512x32xbf16>
    %cst_125 = arith.constant dense<0.000000e+00> : vector<512x32xf32>
    %188 = tpu.matmul %187, %178, %cst_125 {dimension_numbers = #tpu.dot_dimension_numbers<[1], [0], [0], [1], [0, 0, 1, 1], [], []>} : vector<512x32xbf16>, vector<32x32xbf16>, vector<512x32xf32> -> vector<512x32xf32>
    %189 = vector.shape_cast %188 : vector<512x32xf32> to vector<8x64x32xf32>
    %cst_126 = arith.constant 0.000000e+00 : f32
    %190 = vector.broadcast %cst_126 : f32 to vector<8x32xf32>
    %191 = arith.maximumf %175, %190 : vector<8x32xf32>
    %192 = arith.truncf %191 : vector<8x32xf32> to vector<8x32xbf16>
    %cst_127 = arith.constant dense<0.000000e+00> : vector<8x32xf32>
    %193 = tpu.matmul %192, %180, %cst_127 {dimension_numbers = #tpu.dot_dimension_numbers<[1], [0], [0], [1], [0, 0, 1, 1], [], []>} : vector<8x32xbf16>, vector<32x32xbf16>, vector<8x32xf32> -> vector<8x32xf32>
    %c4_128 = arith.constant 4 : index
    %c0_129 = arith.constant 0 : index
    %c0_130 = arith.constant 0 : index
    %194 = vector.load %arg5[%c4_128, %c0_129, %c0_130] : memref<5x1x32xf32, #tpu.memory_space<vmem>>, vector<1x1x32xf32>
    %195 = vector.shape_cast %194 : vector<1x1x32xf32> to vector<1x32xf32>
    %196 = vector.broadcast %195 : vector<1x32xf32> to vector<8x32xf32>
    %197 = arith.addf %193, %196 : vector<8x32xf32>
    %198 = vector.shape_cast %197 : vector<8x32xf32> to vector<8x1x32xf32>
    %199 = vector.broadcast %198 : vector<8x1x32xf32> to vector<8x64x32xf32>
    %200 = arith.addf %189, %199 : vector<8x64x32xf32>
    %201 = vector.shape_cast %200 : vector<8x64x32xf32> to vector<512x32xf32>
    %cst_131 = arith.constant 0.000000e+00 : f32
    %202 = vector.broadcast %cst_131 : f32 to vector<512x32xf32>
    %203 = arith.maximumf %201, %202 : vector<512x32xf32>
    %c4_132 = arith.constant 4 : index
    %c0_133 = arith.constant 0 : index
    %c0_134 = arith.constant 0 : index
    %204 = vector.load %arg6[%c4_132, %c0_133, %c0_134] : memref<5x32x32xbf16, #tpu.memory_space<vmem>>, vector<1x32x32xbf16>
    %205 = vector.shape_cast %204 : vector<1x32x32xbf16> to vector<32x32xbf16>
    %206 = arith.truncf %203 : vector<512x32xf32> to vector<512x32xbf16>
    %cst_135 = arith.constant dense<0.000000e+00> : vector<512x32xf32>
    %207 = tpu.matmul %206, %205, %cst_135 {dimension_numbers = #tpu.dot_dimension_numbers<[1], [0], [0], [1], [0, 0, 1, 1], [], []>} : vector<512x32xbf16>, vector<32x32xbf16>, vector<512x32xf32> -> vector<512x32xf32>
    %c4_136 = arith.constant 4 : index
    %c0_137 = arith.constant 0 : index
    %c0_138 = arith.constant 0 : index
    %208 = vector.load %arg7[%c4_136, %c0_137, %c0_138] : memref<5x1x32xf32, #tpu.memory_space<vmem>>, vector<1x1x32xf32>
    %209 = vector.shape_cast %208 : vector<1x1x32xf32> to vector<1x32xf32>
    %210 = vector.broadcast %209 : vector<1x32xf32> to vector<512x32xf32>
    %211 = arith.addf %207, %210 : vector<512x32xf32>
    %212 = arith.truncf %176 : vector<512x32xf32> to vector<512x32xbf16>
    %cst_139 = arith.constant dense<0.000000e+00> : vector<512x32xf32>
    %213 = tpu.matmul %212, %182, %cst_139 {dimension_numbers = #tpu.dot_dimension_numbers<[1], [0], [0], [1], [0, 0, 1, 1], [], []>} : vector<512x32xbf16>, vector<32x32xbf16>, vector<512x32xf32> -> vector<512x32xf32>
    %214 = vector.shape_cast %213 : vector<512x32xf32> to vector<8x64x32xf32>
    %215 = arith.truncf %175 : vector<8x32xf32> to vector<8x32xbf16>
    %cst_140 = arith.constant dense<0.000000e+00> : vector<8x32xf32>
    %216 = tpu.matmul %215, %184, %cst_140 {dimension_numbers = #tpu.dot_dimension_numbers<[1], [0], [0], [1], [0, 0, 1, 1], [], []>} : vector<8x32xbf16>, vector<32x32xbf16>, vector<8x32xf32> -> vector<8x32xf32>
    %217 = vector.shape_cast %216 : vector<8x32xf32> to vector<8x1x32xf32>
    %218 = vector.broadcast %217 : vector<8x1x32xf32> to vector<8x64x32xf32>
    %219 = arith.addf %214, %218 : vector<8x64x32xf32>
    %220 = vector.shape_cast %211 : vector<512x32xf32> to vector<8x64x32xf32>
    %221 = arith.addf %219, %220 : vector<8x64x32xf32>
    %cst_141 = arith.constant dense<0xFF800000> : vector<8x32xf32>
    %222 = vector.multi_reduction <maximumf>, %221, %cst_141 [1] : vector<8x64x32xf32> to vector<8x32xf32>
    %cst_142 = arith.constant 0.000000e+00 : f32
    %223 = vector.broadcast %cst_142 : f32 to vector<8x32xf32>
    %224 = arith.maximumf %222, %223 : vector<8x32xf32>
    %c0_143 = arith.constant 0 : index
    %c0_144 = arith.constant 0 : index
    %225 = vector.load %arg9[%c0_143, %c0_144] : memref<32x128xbf16, #tpu.memory_space<vmem>>, vector<32x128xbf16>
    %226 = arith.truncf %224 : vector<8x32xf32> to vector<8x32xbf16>
    %cst_145 = arith.constant dense<0.000000e+00> : vector<8x128xf32>
    %227 = tpu.matmul %226, %225, %cst_145 {dimension_numbers = #tpu.dot_dimension_numbers<[1], [0], [0], [1], [0, 0, 1, 1], [], []>} : vector<8x32xbf16>, vector<32x128xbf16>, vector<8x128xf32> -> vector<8x128xf32>
    %c0_146 = arith.constant 0 : index
    %c0_147 = arith.constant 0 : index
    %228 = vector.load %arg10[%c0_146, %c0_147] : memref<1x128xf32, #tpu.memory_space<vmem>>, vector<1x128xf32>
    %229 = vector.broadcast %228 : vector<1x128xf32> to vector<8x128xf32>
    %230 = arith.addf %227, %229 : vector<8x128xf32>
    %c0_148 = arith.constant 0 : index
    %c0_149 = arith.constant 0 : index
    %231 = vector.load %arg11[%c0_148, %c0_149] : memref<8x128xf32, #tpu.memory_space<vmem>>, vector<8x128xf32>
    tpu.vector_store %arg11[%c0_148, %c0_149], %230 {strides = array<i32>} : memref<8x128xf32, #tpu.memory_space<vmem>>, vector<8x128xf32>,
    return
  }
  func.func @transform_0(%arg0: i32) -> (i32, i32, i32) {
    %c0_i32 = arith.constant 0 : i32
    %c0_i32_0 = arith.constant 0 : i32
    %c0_i32_1 = arith.constant 0 : i32
    return %arg0, %c0_i32, %c0_i32_0 : i32, i32, i32
  }
  func.func @transform_1(%arg0: i32) -> (i32, i32) {
    %c0_i32 = arith.constant 0 : i32
    %c0_i32_0 = arith.constant 0 : i32
    %c0_i32_1 = arith.constant 0 : i32
    return %c0_i32, %c0_i32_0 : i32, i32
  }
  func.func @transform_2(%arg0: i32) -> (i32, i32) {
    %c0_i32 = arith.constant 0 : i32
    %c0_i32_0 = arith.constant 0 : i32
    %c0_i32_1 = arith.constant 0 : i32
    return %c0_i32, %c0_i32_0 : i32, i32
  }
  func.func @transform_3(%arg0: i32) -> (i32, i32, i32) {
    %c0_i32 = arith.constant 0 : i32
    %c0_i32_0 = arith.constant 0 : i32
    %c0_i32_1 = arith.constant 0 : i32
    %c0_i32_2 = arith.constant 0 : i32
    return %c0_i32, %c0_i32_0, %c0_i32_1 : i32, i32, i32
  }
  func.func @transform_4(%arg0: i32) -> (i32, i32, i32) {
    %c0_i32 = arith.constant 0 : i32
    %c0_i32_0 = arith.constant 0 : i32
    %c0_i32_1 = arith.constant 0 : i32
    %c0_i32_2 = arith.constant 0 : i32
    return %c0_i32, %c0_i32_0, %c0_i32_1 : i32, i32, i32
  }
  func.func @transform_5(%arg0: i32) -> (i32, i32, i32) {
    %c0_i32 = arith.constant 0 : i32
    %c0_i32_0 = arith.constant 0 : i32
    %c0_i32_1 = arith.constant 0 : i32
    %c0_i32_2 = arith.constant 0 : i32
    return %c0_i32, %c0_i32_0, %c0_i32_1 : i32, i32, i32
  }
  func.func @transform_6(%arg0: i32) -> (i32, i32, i32) {
    %c0_i32 = arith.constant 0 : i32
    %c0_i32_0 = arith.constant 0 : i32
    %c0_i32_1 = arith.constant 0 : i32
    %c0_i32_2 = arith.constant 0 : i32
    return %c0_i32, %c0_i32_0, %c0_i32_1 : i32, i32, i32
  }
  func.func @transform_7(%arg0: i32) -> (i32, i32, i32) {
    %c0_i32 = arith.constant 0 : i32
    %c0_i32_0 = arith.constant 0 : i32
    %c0_i32_1 = arith.constant 0 : i32
    %c0_i32_2 = arith.constant 0 : i32
    return %c0_i32, %c0_i32_0, %c0_i32_1 : i32, i32, i32
  }
  func.func @transform_8(%arg0: i32) -> (i32, i32) {
    %c0_i32 = arith.constant 0 : i32
    %c0_i32_0 = arith.constant 0 : i32
    %c0_i32_1 = arith.constant 0 : i32
    return %c0_i32, %c0_i32_0 : i32, i32
  }
  func.func @transform_9(%arg0: i32) -> (i32, i32) {
    %c0_i32 = arith.constant 0 : i32
    %c0_i32_0 = arith.constant 0 : i32
    %c0_i32_1 = arith.constant 0 : i32
    return %c0_i32, %c0_i32_0 : i32, i32
  }
  func.func @transform_10(%arg0: i32) -> (i32, i32) {
    %c0_i32 = arith.constant 0 : i32
    %c0_i32_0 = arith.constant 0 : i32
    return %arg0, %c0_i32 : i32, i32
  }
}

</mosaic_0001>

<bundles_post_ra>
// kernel: tpu_custom_call.1
= control target key start
LH: loop header
LB: loop body
LE: loop exit
PB: predicated region body
PF: predicated region fallthrough
CT: control target
= control target key end

     0   :  { %vm238_vm0 = vcmask 1043456   ;;  %vm141_vm1 = vcmask 64512   ;;  %s19903_s0 = inlined_call_operand.vmem [shape: f32[8,64,8], index: 0, kind: input, shape index: {}]   ;;  %s19904_s1 = inlined_call_operand.vmem [shape: bf16[8,64], index: 1, kind: input, shape index: {}]   ;;  %s19905_s2 = inlined_call_operand.vmem [shape: f32[1,64], index: 2, kind: input, shape index: {}]   ;;  %s19906_s3 = inlined_call_operand.vmem [shape: bf16[5,64,32], index: 3, kind: input, shape index: {}]   ;;  %s19907_s4 = inlined_call_operand.vmem [shape: f32[5,1,32], index: 4, kind: input, shape index: {}]   ;;  %s19908_s5 = inlined_call_operand.vmem [shape: bf16[5,32,32], index: 5, kind: input, shape index: {}]   ;;  %s19909_s6 = inlined_call_operand.vmem [shape: f32[5,1,32], index: 6, kind: input, shape index: {}]   ;;  %s19910_s7 = inlined_call_operand.vmem [shape: bf16[5,64,32], index: 7, kind: input, shape index: {}]   ;;  %s19911_s8 = inlined_call_operand.vmem [shape: bf16[32,128], index: 8, kind: input, shape index: {}]   ;;  %s19912_s9 = inlined_call_operand.vmem [shape: f32[1,128], index: 9, kind: input, shape index: {}]   ;;  %s19913_s10 = inlined_call_operand.hbm [shape: f32[8,128], index: 10, kind: output, shape index: {}]  }
   0x1   :  { %v101_v0 = vld [vmem:[%s19904_s1] sm:$0xf]  ;;  %v38_v2 = vld [vmem:[%s19903_s0 + $0x8] sm:$0xff]  ;;  %v39_v5 = vld [vmem:[%s19903_s0 + $0x10] sm:$0xff] }
   0x2   :  { %v37_v1 = vld [vmem:[%s19903_s0] sm:$0xff]  ;;  %14315 = vmatprep.subr.msk.bf16.mxu1 %vm238_vm0, %v101_v0  ;;  %v240_v3 = vsel %vm238_vm0, %v101_v0, 0  ;;  %v40_v6 = vld [vmem:[%s19903_s0 + $0x18] sm:$0xff]  ;;  %v42_v9 = vld [vmem:[%s19903_s0 + $0x28] sm:$0xff] }
   0x3   :  { %v102_v4 = vpack.c.bf16 %v38_v2, %v37_v1  ;;  %v41_v7 = vld [vmem:[%s19903_s0 + $0x20] sm:$0xff]  ;;  %12254 = vmatpush3.bf16.msra.mxu1 %v240_v3  ;;  %v103_v8 = vpack.c.bf16 %v40_v6, %v39_v5  ;;  %v43_v11 = vld [vmem:[%s19903_s0 + $0x30] sm:$0xff]  ;;  %v44_v12 = vld [vmem:[%s19903_s0 + $0x38] sm:$0xff] }
   0x4   :  { %v104_v10 = vpack.c.bf16 %v42_v9, %v41_v7  ;;  %v45_v13 = vld [vmem:[%s19903_s0 + $0x40] sm:$0xff]  ;;  %v46_v14 = vld [vmem:[%s19903_s0 + $0x48] sm:$0xff]  ;;  %v105_v15 = vpack.c.bf16 %v44_v12, %v43_v11  ;;  %v47_v17 = vld [vmem:[%s19903_s0 + $0x50] sm:$0xff] }
   0x5   :  { %12255 = vmatprep.mubr.msk.bf16.mxu1 %vm141_vm1, %v102_v4  ;;  %v106_v16 = vpack.c.bf16 %v46_v14, %v45_v13  ;;  %v48_v18 = vld [vmem:[%s19903_s0 + $0x58] sm:$0xff]  ;;  %v49_v19 = vld [vmem:[%s19903_s0 + $0x60] sm:$0xff]  ;;  %v50_v20 = vld [vmem:[%s19903_s0 + $0x68] sm:$0xff] }
   0x6   :  { %12256 = vmatmul.mubr.msk.bf16.vlgmr.msra.gmra.mrb[0].mxu1 %vm141_vm1, %v103_v8  ;;  %v107_v21 = vpack.c.bf16 %v48_v18, %v47_v17  ;;  %v14320_v22 = vld [vmem:[%s19906_s3] sm:$0xff]   ;;  %v108_v23 = vpack.c.bf16 %v50_v20, %v49_v19  ;;  %v51_v24 = vld [vmem:[%s19903_s0 + $0x70] sm:$0xff]  ;;  %v52_v25 = vld [vmem:[%s19903_s0 + $0x78] sm:$0xff] }
   0x7   :  { %12259 = vmatprep.mubr.msk.bf16.mxu1 %vm141_vm1, %v104_v10  ;;  %12319 = vmatprep.subr.bf16.mxu1 %v14320_v22  ;;  %v53_v26 = vld [vmem:[%s19903_s0 + $0x80] sm:$0xff]  ;;  %v54_v27 = vld [vmem:[%s19903_s0 + $0x88] sm:$0xff]  ;;  %v14322_v29 = vld [vmem:[%s19906_s3 + $0x10] sm:$0xff]   ;;  %v109_v30 = vpack.c.bf16 %v52_v25, %v51_v24 }
   0x8   :  { %12320 = vmatpush3.bf16.msra.mxu1 %v14320_v22  ;;  %v14321_v28 = vld [vmem:[%s19906_s3 + $0x8] sm:$0xff]   ;;  %v14323_v31 = vld [vmem:[%s19906_s3 + $0x18] sm:$0xff]   ;;  %v110_v32 = vpack.c.bf16 %v54_v27, %v53_v26  ;;  %v55_v33 = vld [vmem:[%s19903_s0 + $0x90] sm:$0xff] }
   0x9   :  { %12321 = vmatprep.subr.bf16.mxu1 %v14321_v28  ;;  %v56_v34 = vld [vmem:[%s19903_s0 + $0x98] sm:$0xff]  ;;  %v57_v35 = vld [vmem:[%s19903_s0 + $0xa0] sm:$0xff]  ;;  %v58_v36 = vld [vmem:[%s19903_s0 + $0xa8] sm:$0xff] }
   0xa   :  { %v111_v37 = vpack.c.bf16 %v56_v34, %v55_v33  ;;  %v112_v38 = vpack.c.bf16 %v58_v36, %v57_v35  ;;  %v59_v39 = vld [vmem:[%s19903_s0 + $0xb0] sm:$0xff]  ;;  %v60_v40 = vld [vmem:[%s19903_s0 + $0xb8] sm:$0xff]  ;;  %v61_v41 = vld [vmem:[%s19903_s0 + $0xc0] sm:$0xff] }
   0xb   :  { %v62_v42 = vld [vmem:[%s19903_s0 + $0xc8] sm:$0xff]  ;;  %v113_v43 = vpack.c.bf16 %v60_v40, %v59_v39  ;;  %v63_v45 = vld [vmem:[%s19903_s0 + $0xd0] sm:$0xff]  ;;  %v64_v46 = vld [vmem:[%s19903_s0 + $0xd8] sm:$0xff] }
   0xc   :  { %12322 = vmatpush3.bf16.msra.mxu1 %v14321_v28  ;;  %v114_v44 = vpack.c.bf16 %v62_v42, %v61_v41  ;;  %v65_v47 = vld [vmem:[%s19903_s0 + $0xe0] sm:$0xff]  ;;  %v66_v48 = vld [vmem:[%s19903_s0 + $0xe8] sm:$0xff]  ;;  %v115_v49 = vpack.c.bf16 %v64_v46, %v63_v45  ;;  %v67_v51 = vld [vmem:[%s19903_s0 + $0xf0] sm:$0xff] }
   0xd   :  { %12323 = vmatprep.subr.bf16.mxu1 %v14322_v29  ;;  %v116_v50 = vpack.c.bf16 %v66_v48, %v65_v47  ;;  %v68_v52 = vld [vmem:[%s19903_s0 + $0xf8] sm:$0xff]  ;;  %v69_v53 = vld [vmem:[%s19903_s0 + $0x100] sm:$0xff]  ;;  %v70_v54 = vld [vmem:[%s19903_s0 + $0x108] sm:$0xff] }
   0xe   :  { %12260 = vmatmul.mubr.msk.bf16.gmra.mrb[4].mxu1 %vm141_vm1, %v105_v15  ;;  %v117_v55 = vpack.c.bf16 %v68_v52, %v67_v51 }
   0xf   :  { %12263 = vmatprep.mubr.msk.bf16.mxu1 %vm141_vm1, %v106_v16 }
  0x10   :  { %12324 = vmatpush3.bf16.msra.mxu1 %v14322_v29 }
  0x11   :  { %12325 = vmatprep.subr.bf16.mxu1 %v14323_v31 }
  0x14   :  { %12326 = vmatpush3.bf16.msra.mxu1 %v14323_v31 }
  0x16   :  { %12264 = vmatmul.mubr.msk.bf16.gmra.mrb[8].mxu1 %vm141_vm1, %v107_v21 }
  0x17   :  { %12267 = vmatprep.mubr.msk.bf16.mxu1 %vm141_vm1, %v108_v23 }
  0x1e   :  { %12268 = vmatmul.mubr.msk.bf16.gmra.mrb[12].mxu1 %vm141_vm1, %v109_v30 }
  0x1f   :  { %12271 = vmatprep.mubr.msk.bf16.mxu1 %vm141_vm1, %v110_v32 }
  0x26   :  { %12272 = vmatmul.mubr.msk.bf16.gmra.mrb[16].mxu1 %vm141_vm1, %v111_v37 }
  0x27   :  { %12275 = vmatprep.mubr.msk.bf16.mxu1 %vm141_vm1, %v112_v38 }
  0x2e   :  { %12276 = vmatmul.mubr.msk.bf16.gmra.mrb[20].mxu1 %vm141_vm1, %v113_v43 }
  0x2f   :  { %12279 = vmatprep.mubr.msk.bf16.mxu1 %vm141_vm1, %v114_v44 }
  0x36   :  { %12280 = vmatmul.mubr.msk.bf16.gmra.mrb[24].mxu1 %vm141_vm1, %v115_v49 }
  0x37   :  { %12283 = vmatprep.mubr.msk.bf16.mxu1 %vm141_vm1, %v116_v50 }
  0x38   :  { %15 = vsyncpa [#allocation3], 0  ;;  %v118_v56 = vpack.c.bf16 %v70_v54, %v69_v53  ;;  %v71_v57 = vld [vmem:[%s19903_s0 + $0x110] sm:$0xff]  ;;  %v72_v58 = vld [vmem:[%s19903_s0 + $0x118] sm:$0xff]  ;;  %vm666_vm2 = vcmask 523264   ;;  %vm1171_vm3 = vcmask 261120  }
  0x39   :  { %v73_v59 = vld [vmem:[%s19903_s0 + $0x120] sm:$0xff]  ;;  %v74_v60 = vld [vmem:[%s19903_s0 + $0x128] sm:$0xff]  ;;  %v119_v61 = vpack.c.bf16 %v72_v58, %v71_v57  ;;  %v75_v63 = vld [vmem:[%s19903_s0 + $0x130] sm:$0xff]  ;;  %vm14400_vm4 = vmmov 0   ;;  %vm2725_vm5 = vcmask 1041409   ;;  %vm2727_vm6 = vcmask 1042434  }
  0x3a   :  { %v120_v62 = vpack.c.bf16 %v74_v60, %v73_v59  ;;  %v76_v0 = vld [vmem:[%s19903_s0 + $0x138] sm:$0xff]  ;;  %v77_v1 = vld [vmem:[%s19903_s0 + $0x140] sm:$0xff]  ;;  %v78_v2 = vld [vmem:[%s19903_s0 + $0x148] sm:$0xff]  ;;  %vm2729_vm7 = vcmask 1043459   ;;  %vm2731_vm8 = vcmask 1044484   ;;  %vm2733_vm9 = vcmask 1045509  }
  0x3b   :  { %v121_v3 = vpack.c.bf16 %v76_v0, %v75_v63  ;;  %v122_v4 = vpack.c.bf16 %v78_v2, %v77_v1  ;;  %v79_v5 = vld [vmem:[%s19903_s0 + $0x150] sm:$0xff]  ;;  %v80_v6 = vld [vmem:[%s19903_s0 + $0x158] sm:$0xff]  ;;  %v81_v7 = vld [vmem:[%s19903_s0 + $0x160] sm:$0xff]  ;;  %vm2735_vm10 = vcmask 1046534   ;;  %vm2737_vm11 = vcmask 1047559   ;;  %s14402_s27 = smov [#allocation2]  }
  0x3c   :  { %v82_v8 = vld [vmem:[%s19903_s0 + $0x168] sm:$0xff]  ;;  %v123_v9 = vpack.c.bf16 %v80_v6, %v79_v5  ;;  %v83_v11 = vld [vmem:[%s19903_s0 + $0x170] sm:$0xff]  ;;  %v84_v12 = vld [vmem:[%s19903_s0 + $0x178] sm:$0xff]  ;;  %s10998_s28 = sshll.u32 %s14402_s27, 4  ;;  %s10999_s28 = int_to_ptr.vmem [resolvable:$true] %s10998_s28 }
  0x3d   :  { %v124_v10 = vpack.c.bf16 %v82_v8, %v81_v7  ;;  %v85_v13 = vld [vmem:[%s19903_s0 + $0x180] sm:$0xff]  ;;  %v86_v14 = vld [vmem:[%s19903_s0 + $0x188] sm:$0xff]  ;;  %v125_v15 = vpack.c.bf16 %v84_v12, %v83_v11  ;;  %v87_v17 = vld [vmem:[%s19903_s0 + $0x190] sm:$0xff]  ;;  %s14375_s29 = scalar_lea.vmem %s10999_s28, 128  ;;  %p14380_p1 = scmp.lt.s32.totalorder %s10999_s28, %s10999_s28 }
  0x3e   :  { %12284 = vmatmul.mubr.msk.bf16.gmra.mrb[28].mxu1 %vm141_vm1, %v117_v55  ;;  %v126_v16 = vpack.c.bf16 %v86_v14, %v85_v13  ;;  %v88_v18 = vld [vmem:[%s19903_s0 + $0x198] sm:$0xff]  ;;  %v89_v19 = vld [vmem:[%s19903_s0 + $0x1a0] sm:$0xff]  ;;  %v90_v20 = vld [vmem:[%s19903_s0 + $0x1a8] sm:$0xff]  ;;  %p14376_p0 = scmp.ne.s32.totalorder %s10999_s28, %s14375_s29  ;;  %p14381_p2 = scmp.lt.s32.totalorder %s14375_s29, %s14375_s29 }
  0x3f   :  { %12287 = vmatprep.mubr.msk.bf16.mxu1 %vm141_vm1, %v118_v56  ;;  %v127_v21 = vpack.c.bf16 %v88_v18, %v87_v17  ;;  %v128_v22 = vpack.c.bf16 %v90_v20, %v89_v19  ;;  %v91_v23 = vld [vmem:[%s19903_s0 + $0x1b0] sm:$0xff]  ;;  %v92_v24 = vld [vmem:[%s19903_s0 + $0x1b8] sm:$0xff]  ;;  %v93_v25 = vld [vmem:[%s19903_s0 + $0x1c0] sm:$0xff] }
  0x40   :  { %v94_v26 = vld [vmem:[%s19903_s0 + $0x1c8] sm:$0xff]  ;;  %v129_v27 = vpack.c.bf16 %v92_v24, %v91_v23  ;;  %v95_v29 = vld [vmem:[%s19903_s0 + $0x1d0] sm:$0xff]  ;;  %v96_v30 = vld [vmem:[%s19903_s0 + $0x1d8] sm:$0xff]  ;;  %p14382_p3 = por %p14381_p2, %p14380_p1 }
  0x41   :  { %v130_v28 = vpack.c.bf16 %v94_v26, %v93_v25  ;;  %v97_v31 = vld [vmem:[%s19903_s0 + $0x1e0] sm:$0xff]  ;;  %v98_v32 = vld [vmem:[%s19903_s0 + $0x1e8] sm:$0xff]  ;;  %v131_v33 = vpack.c.bf16 %v96_v30, %v95_v29  ;;  %v99_v35 = vld [vmem:[%s19903_s0 + $0x1f0] sm:$0xff] }
  0x42   :  { %v132_v34 = vpack.c.bf16 %v98_v32, %v97_v31  ;;  %v100_v36 = vld [vmem:[%s19903_s0 + $0x1f8] sm:$0xff]  ;;  %v14700_v38 = vld [vmem:[%s19905_s2] ss:$0 sm:$0xff]  ;;  %p14383_p4 = pnand %p14382_p3, %p14376_p0 }
  0x43   :  { %v133_v37 = vpack.c.bf16 %v100_v36, %v99_v35 }
  0x46   :  { %12288 = vmatmul.mubr.msk.bf16.gmra.mrb[32].mxu1 %vm141_vm1, %v119_v61 }
  0x47   :  { %12291 = vmatprep.mubr.msk.bf16.mxu1 %vm141_vm1, %v120_v62 }
  0x4e   :  { %12292 = vmatmul.mubr.msk.bf16.gmra.mrb[36].mxu1 %vm141_vm1, %v121_v3 }
  0x4f   :  { %12295 = vmatprep.mubr.msk.bf16.mxu1 %vm141_vm1, %v122_v4 }
  0x56   :  { %12296 = vmatmul.mubr.msk.bf16.gmra.mrb[40].mxu1 %vm141_vm1, %v123_v9 }
  0x57   :  { %12299 = vmatprep.mubr.msk.bf16.mxu1 %vm141_vm1, %v124_v10 }
  0x5e   :  { %12300 = vmatmul.mubr.msk.bf16.gmra.mrb[44].mxu1 %vm141_vm1, %v125_v15 }
  0x5f   :  { %12303 = vmatprep.mubr.msk.bf16.mxu1 %vm141_vm1, %v126_v16 }
  0x66   :  { %12304 = vmatmul.mubr.msk.bf16.gmra.mrb[48].mxu1 %vm141_vm1, %v127_v21 }
  0x67   :  { %12307 = vmatprep.mubr.msk.bf16.mxu1 %vm141_vm1, %v128_v22 }
  0x6e   :  { %12308 = vmatmul.mubr.msk.bf16.gmra.mrb[52].mxu1 %vm141_vm1, %v129_v27 }
  0x6f   :  { %12311 = vmatprep.mubr.msk.bf16.mxu1 %vm141_vm1, %v130_v28 }
  0x76   :  { %12312 = vmatmul.mubr.msk.bf16.gmra.mrb[56].mxu1 %vm141_vm1, %v131_v33 }
  0x77   :  { %12315 = vmatprep.mubr.msk.bf16.mxu1 %vm141_vm1, %v132_v34 }
  0x7e   :  { %12316 = vmatmul.mubr.msk.bf16.gmra.mrb[60].mxu1 %vm141_vm1, %v133_v37 }
  0xd9   :  { %v12257_v39 = vpop.f32.mrb[0].mxu1 }
  0xda   :  { %v14703_v40 = vadd.f32 %v12257_v39, %v14700_v38  ;;  %v276_v41 = vpop.f32.mrb[1].mxu1 }
  0xdb   :  { %v14706_v42 = vadd.f32 %v14700_v38, %v276_v41  ;;  %v12258_v43 = vpop.f32.mrb[2].mxu1 }
  0xdc   :  { %v14709_v44 = vadd.f32 %v12258_v43, %v14700_v38  ;;  %v279_v45 = vpop.f32.mrb[3].mxu1  ;;  %v533_v47 = vmax.f32 %v14703_v40, 0.0 }
  0xdd   :  { %v14712_v46 = vadd.f32 %v14700_v38, %v279_v45  ;;  %v531_v50 = vmax.f32 %v14706_v42, 0.0 }
  0xde   :  { %v534_v48 = vmax.f32 %v14709_v44, 0.0 }
  0xdf   :  { %v532_v51 = vmax.f32 %v14712_v46, 0.0 }
  0xe0   :  { %v604_v53 = vpack.c.bf16 %v534_v48, %v533_v47 }
  0xe1   :  { %v12261_v54 = vpop.f32.mrb[4].mxu1  ;;  %v603_v55 = vpack.c.bf16 %v532_v51, %v531_v50 }
  0xe2   :  { %v14723_v56 = vadd.f32 %v12261_v54, %v14700_v38  ;;  %v292_v57 = vpop.f32.mrb[5].mxu1 }
  0xe3   :  { %v14726_v58 = vadd.f32 %v14700_v38, %v292_v57  ;;  %v12262_v59 = vpop.f32.mrb[6].mxu1  ;;  %12327 = vmatprep.mubr.msk.bf16.mxu1 %vm666_vm2, %v603_v55 }
  0xe4   :  { %v14730_v60 = vadd.f32 %v12262_v59, %v14700_v38  ;;  %v295_v61 = vpop.f32.mrb[7].mxu1  ;;  %12328 = vmatmul.mubr.msk.bf16.vlgmr.msra.gmra.mrb[64].mxu1 %vm666_vm2, %v604_v53  ;;  %v537_v63 = vmax.f32 %v14723_v56, 0.0 }
  0xe5   :  { %v14734_v62 = vadd.f32 %v14700_v38, %v295_v61  ;;  %v535_v2 = vmax.f32 %v14726_v58, 0.0 }
  0xe6   :  { %v538_v0 = vmax.f32 %v14730_v60, 0.0 }
  0xe7   :  { %v536_v3 = vmax.f32 %v14734_v62, 0.0 }
  0xe8   :  { %v606_v5 = vpack.c.bf16 %v538_v0, %v537_v63 }
  0xe9   :  { %v12265_v6 = vpop.f32.mrb[8].mxu1  ;;  %v605_v7 = vpack.c.bf16 %v536_v3, %v535_v2 }
  0xea   :  { %v14745_v8 = vadd.f32 %v12265_v6, %v14700_v38  ;;  %v308_v9 = vpop.f32.mrb[9].mxu1 }
  0xeb   :  { %v14748_v10 = vadd.f32 %v14700_v38, %v308_v9  ;;  %v12266_v11 = vpop.f32.mrb[10].mxu1  ;;  %12331 = vmatprep.mubr.msk.bf16.mxu1 %vm666_vm2, %v605_v7 }
  0xec   :  { %v14752_v12 = vadd.f32 %v12266_v11, %v14700_v38  ;;  %v311_v13 = vpop.f32.mrb[11].mxu1  ;;  %12332 = vmatmul.mubr.msk.bf16.gmra.mrb[68].mxu1 %vm666_vm2, %v606_v5  ;;  %v541_v15 = vmax.f32 %v14745_v8, 0.0 }
  0xed   :  { %v14756_v14 = vadd.f32 %v14700_v38, %v311_v13  ;;  %v539_v18 = vmax.f32 %v14748_v10, 0.0 }
  0xee   :  { %v542_v16 = vmax.f32 %v14752_v12, 0.0 }
  0xef   :  { %v540_v19 = vmax.f32 %v14756_v14, 0.0 }
  0xf0   :  { %v608_v21 = vpack.c.bf16 %v542_v16, %v541_v15 }
  0xf1   :  { %v12269_v22 = vpop.f32.mrb[12].mxu1  ;;  %v607_v23 = vpack.c.bf16 %v540_v19, %v539_v18 }
  0xf2   :  { %v14767_v24 = vadd.f32 %v12269_v22, %v14700_v38  ;;  %v324_v25 = vpop.f32.mrb[13].mxu1 }
  0xf3   :  { %v14770_v26 = vadd.f32 %v14700_v38, %v324_v25  ;;  %v12270_v27 = vpop.f32.mrb[14].mxu1  ;;  %12335 = vmatprep.mubr.msk.bf16.mxu1 %vm666_vm2, %v607_v23 }
  0xf4   :  { %v14774_v28 = vadd.f32 %v12270_v27, %v14700_v38  ;;  %v327_v29 = vpop.f32.mrb[15].mxu1  ;;  %12336 = vmatmul.mubr.msk.bf16.gmra.mrb[72].mxu1 %vm666_vm2, %v608_v21  ;;  %v545_v31 = vmax.f32 %v14767_v24, 0.0 }
  0xf5   :  { %v14778_v30 = vadd.f32 %v14700_v38, %v327_v29  ;;  %v543_v34 = vmax.f32 %v14770_v26, 0.0 }
  0xf6   :  { %v546_v32 = vmax.f32 %v14774_v28, 0.0 }
  0xf7   :  { %v544_v35 = vmax.f32 %v14778_v30, 0.0 }
  0xf8   :  { %v610_v37 = vpack.c.bf16 %v546_v32, %v545_v31 }
  0xf9   :  { %v12273_v39 = vpop.f32.mrb[16].mxu1  ;;  %v609_v41 = vpack.c.bf16 %v544_v35, %v543_v34 }
  0xfa   :  { %v14789_v43 = vadd.f32 %v12273_v39, %v14700_v38  ;;  %v340_v45 = vpop.f32.mrb[17].mxu1 }
  0xfb   :  { %v14792_v47 = vadd.f32 %v14700_v38, %v340_v45  ;;  %v12274_v48 = vpop.f32.mrb[18].mxu1  ;;  %12339 = vmatprep.mubr.msk.bf16.mxu1 %vm666_vm2, %v609_v41 }
  0xfc   :  { %v14796_v50 = vadd.f32 %v12274_v48, %v14700_v38  ;;  %v343_v51 = vpop.f32.mrb[19].mxu1  ;;  %12340 = vmatmul.mubr.msk.bf16.gmra.mrb[76].mxu1 %vm666_vm2, %v610_v37  ;;  %v549_v54 = vmax.f32 %v14789_v43, 0.0 }
  0xfd   :  { %v14800_v53 = vadd.f32 %v14700_v38, %v343_v51  ;;  %v547_v59 = vmax.f32 %v14792_v47, 0.0 }
  0xfe   :  { %v550_v55 = vmax.f32 %v14796_v50, 0.0 }
  0xff   :  { %v548_v61 = vmax.f32 %v14800_v53, 0.0 }
 0x100   :  { %v612_v0 = vpack.c.bf16 %v550_v55, %v549_v54 }
 0x101   :  { %v12277_v2 = vpop.f32.mrb[20].mxu1  ;;  %v611_v3 = vpack.c.bf16 %v548_v61, %v547_v59 }
 0x102   :  { %v14811_v5 = vadd.f32 %v12277_v2, %v14700_v38  ;;  %v356_v6 = vpop.f32.mrb[21].mxu1 }
 0x103   :  { %v14814_v7 = vadd.f32 %v14700_v38, %v356_v6  ;;  %v12278_v9 = vpop.f32.mrb[22].mxu1  ;;  %12343 = vmatprep.mubr.msk.bf16.mxu1 %vm666_vm2, %v611_v3 }
 0x104   :  { %v14818_v11 = vadd.f32 %v12278_v9, %v14700_v38  ;;  %v359_v13 = vpop.f32.mrb[23].mxu1  ;;  %12344 = vmatmul.mubr.msk.bf16.gmra.mrb[80].mxu1 %vm666_vm2, %v612_v0  ;;  %v553_v16 = vmax.f32 %v14811_v5, 0.0 }
 0x105   :  { %v14822_v15 = vadd.f32 %v14700_v38, %v359_v13  ;;  %v551_v21 = vmax.f32 %v14814_v7, 0.0 }
 0x106   :  { %v554_v18 = vmax.f32 %v14818_v11, 0.0 }
 0x107   :  { %v552_v22 = vmax.f32 %v14822_v15, 0.0 }
 0x108   :  { %v614_v25 = vpack.c.bf16 %v554_v18, %v553_v16 }
 0x109   :  { %v12281_v27 = vpop.f32.mrb[24].mxu1  ;;  %v613_v29 = vpack.c.bf16 %v552_v22, %v551_v21 }
 0x10a   :  { %v14833_v31 = vadd.f32 %v12281_v27, %v14700_v38  ;;  %v372_v32 = vpop.f32.mrb[25].mxu1 }
 0x10b   :  { %v14836_v34 = vadd.f32 %v14700_v38, %v372_v32  ;;  %v12282_v35 = vpop.f32.mrb[26].mxu1  ;;  %12347 = vmatprep.mubr.msk.bf16.mxu1 %vm666_vm2, %v613_v29 }
 0x10c   :  { %v14840_v37 = vadd.f32 %v12282_v35, %v14700_v38  ;;  %v375_v39 = vpop.f32.mrb[27].mxu1  ;;  %12348 = vmatmul.mubr.msk.bf16.gmra.mrb[84].mxu1 %vm666_vm2, %v614_v25  ;;  %v557_v45 = vmax.f32 %v14833_v31, 0.0 }
 0x10d   :  { %v14844_v41 = vadd.f32 %v14700_v38, %v375_v39  ;;  %v555_v54 = vmax.f32 %v14836_v34, 0.0 }
 0x10e   :  { %v558_v48 = vmax.f32 %v14840_v37, 0.0 }
 0x10f   :  { %v556_v55 = vmax.f32 %v14844_v41, 0.0 }
 0x110   :  { %v616_v61 = vpack.c.bf16 %v558_v48, %v557_v45 }
 0x111   :  { %v12285_v0 = vpop.f32.mrb[28].mxu1  ;;  %v615_v2 = vpack.c.bf16 %v556_v55, %v555_v54 }
 0x112   :  { %v14855_v3 = vadd.f32 %v12285_v0, %v14700_v38  ;;  %v388_v6 = vpop.f32.mrb[29].mxu1 }
 0x113   :  { %v14858_v9 = vadd.f32 %v14700_v38, %v388_v6  ;;  %v12286_v13 = vpop.f32.mrb[30].mxu1  ;;  %12351 = vmatprep.mubr.msk.bf16.mxu1 %vm666_vm2, %v615_v2 }
 0x114   :  { %v14862_v16 = vadd.f32 %v12286_v13, %v14700_v38  ;;  %v391_v18 = vpop.f32.mrb[31].mxu1  ;;  %12352 = vmatmul.mubr.msk.bf16.gmra.mrb[88].mxu1 %vm666_vm2, %v616_v61  ;;  %v561_v22 = vmax.f32 %v14855_v3, 0.0 }
 0x115   :  { %v14866_v21 = vadd.f32 %v14700_v38, %v391_v18  ;;  %v559_v29 = vmax.f32 %v14858_v9, 0.0 }
 0x116   :  { %v562_v25 = vmax.f32 %v14862_v16, 0.0 }
 0x117   :  { %v560_v32 = vmax.f32 %v14866_v21, 0.0 }
 0x118   :  { %v618_v39 = vpack.c.bf16 %v562_v25, %v561_v22 }
 0x119   :  { %v12289_v45 = vpop.f32.mrb[32].mxu1  ;;  %v617_v48 = vpack.c.bf16 %v560_v32, %v559_v29 }
 0x11a   :  { %v14877_v54 = vadd.f32 %v12289_v45, %v14700_v38  ;;  %v404_v55 = vpop.f32.mrb[33].mxu1 }
 0x11b   :  { %v14880_v61 = vadd.f32 %v14700_v38, %v404_v55  ;;  %v12290_v0 = vpop.f32.mrb[34].mxu1  ;;  %12355 = vmatprep.mubr.msk.bf16.mxu1 %vm666_vm2, %v617_v48 }
 0x11c   :  { %v14884_v2 = vadd.f32 %v12290_v0, %v14700_v38  ;;  %v407_v6 = vpop.f32.mrb[35].mxu1  ;;  %12356 = vmatmul.mubr.msk.bf16.gmra.mrb[92].mxu1 %vm666_vm2, %v618_v39  ;;  %v565_v18 = vmax.f32 %v14877_v54, 0.0 }
 0x11d   :  { %v14888_v13 = vadd.f32 %v14700_v38, %v407_v6  ;;  %v563_v29 = vmax.f32 %v14880_v61, 0.0 }
 0x11e   :  { %v566_v22 = vmax.f32 %v14884_v2, 0.0 }
 0x11f   :  { %v564_v32 = vmax.f32 %v14888_v13, 0.0 }
 0x120   :  { %v620_v48 = vpack.c.bf16 %v566_v22, %v565_v18 }
 0x121   :  { %v12293_v55 = vpop.f32.mrb[36].mxu1  ;;  %v619_v39 = vpack.c.bf16 %v564_v32, %v563_v29 }
 0x122   :  { %v14899_v0 = vadd.f32 %v12293_v55, %v14700_v38  ;;  %v420_v6 = vpop.f32.mrb[37].mxu1 }
 0x123   :  { %v14902_v27 = vadd.f32 %v14700_v38, %v420_v6  ;;  %v12294_v35 = vpop.f32.mrb[38].mxu1  ;;  %12359 = vmatprep.mubr.msk.bf16.mxu1 %vm666_vm2, %v619_v39 }
 0x124   :  { %v14906_v25 = vadd.f32 %v12294_v35, %v14700_v38  ;;  %v423_v51 = vpop.f32.mrb[39].mxu1  ;;  %12360 = vmatmul.mubr.msk.bf16.gmra.mrb[96].mxu1 %vm666_vm2, %v620_v48  ;;  %v569_v22 = vmax.f32 %v14899_v0, 0.0 }
 0x125   :  { %v14910_v18 = vadd.f32 %v14700_v38, %v423_v51  ;;  %v567_v55 = vmax.f32 %v14902_v27, 0.0 }
 0x126   :  { %v570_v29 = vmax.f32 %v14906_v25, 0.0 }
 0x127   :  { %v568_v39 = vmax.f32 %v14910_v18, 0.0 }
 0x128   :  { %v622_v6 = vpack.c.bf16 %v570_v29, %v569_v22 }
 0x129   :  { %v12297_v45 = vpop.f32.mrb[40].mxu1  ;;  %v621_v48 = vpack.c.bf16 %v568_v39, %v567_v55 }
 0x12a   :  { %v14921_v51 = vadd.f32 %v12297_v45, %v14700_v38  ;;  %v436_v59 = vpop.f32.mrb[41].mxu1 }
 0x12b   :  { %v14924_v19 = vadd.f32 %v14700_v38, %v436_v59  ;;  %v12298_v23 = vpop.f32.mrb[42].mxu1  ;;  %12363 = vmatprep.mubr.msk.bf16.mxu1 %vm666_vm2, %v621_v48 }
 0x12c   :  { %v14928_v32 = vadd.f32 %v12298_v23, %v14700_v38  ;;  %v439_v57 = vpop.f32.mrb[43].mxu1  ;;  %12364 = vmatmul.mubr.msk.bf16.gmra.mrb[100].mxu1 %vm666_vm2, %v622_v6  ;;  %v573_v29 = vmax.f32 %v14921_v51, 0.0 }
 0x12d   :  { %v14932_v22 = vadd.f32 %v14700_v38, %v439_v57  ;;  %v571_v55 = vmax.f32 %v14924_v19, 0.0 }
 0x12e   :  { %v574_v45 = vmax.f32 %v14928_v32, 0.0 }
 0x12f   :  { %v572_v39 = vmax.f32 %v14932_v22, 0.0 }
 0x130   :  { %v624_v48 = vpack.c.bf16 %v574_v45, %v573_v29 }
 0x131   :  { %v12301_v35 = vpop.f32.mrb[44].mxu1  ;;  %v623_v6 = vpack.c.bf16 %v572_v39, %v571_v55 }
 0x132   :  { %v14943_v57 = vadd.f32 %v12301_v35, %v14700_v38  ;;  %v452_v63 = vpop.f32.mrb[45].mxu1 }
 0x133   :  { %v14946_v33 = vadd.f32 %v14700_v38, %v452_v63  ;;  %v12302_v36 = vpop.f32.mrb[46].mxu1  ;;  %12367 = vmatprep.mubr.msk.bf16.mxu1 %vm666_vm2, %v623_v6 }
 0x134   :  { %20218 = vst [vmem:[#allocation5_spill] sm:$0xff] %v14943_v57  ;;  %v14950_v59 = vadd.f32 %v12302_v36, %v14700_v38  ;;  %v455_v17 = vpop.f32.mrb[47].mxu1  ;;  %12368 = vmatmul.mubr.msk.bf16.gmra.mrb[104].mxu1 %vm666_vm2, %v624_v48  ;;  %v577_v45 = vmax.f32 %v14943_v57, 0.0 }
 0x135   :  { %20219 = vst [vmem:[#allocation6_spill] sm:$0xff] %v14946_v33  ;;  %v14954_v29 = vadd.f32 %v14700_v38, %v455_v17  ;;  %v575_v55 = vmax.f32 %v14946_v33, 0.0  ;;  %v14324_v17 = vld [vmem:[%s19908_s5] sm:$0xff]  }
 0x136   :  { %20220 = vst [vmem:[#allocation7_spill] sm:$0xff] %v14950_v59  ;;  %v578_v35 = vmax.f32 %v14950_v59, 0.0  ;;  %12391 = vmatprep.subr.bf16.mxu0 %v14324_v17 }
 0x137   :  { %20221 = vst [vmem:[#allocation8_spill] sm:$0xff] %v14954_v29  ;;  %v576_v39 = vmax.f32 %v14954_v29, 0.0  ;;  %12392 = vmatpush3.bf16.msra.mxu0 %v14324_v17 }
 0x138   :  { %v626_v6 = vpack.c.bf16 %v578_v35, %v577_v45 }
 0x139   :  { %v12305_v48 = vpop.f32.mrb[48].mxu1  ;;  %v625_v23 = vpack.c.bf16 %v576_v39, %v575_v55  ;;  %v14325_v55 = vld [vmem:[%s19908_s5 + $0x8] sm:$0xff]  }
 0x13a   :  { %v14968_v20 = vadd.f32 %v12305_v48, %v14700_v38  ;;  %v468_v1 = vpop.f32.mrb[49].mxu1  ;;  %12393 = vmatprep.subr.bf16.mxu0 %v14325_v55 }
 0x13b   :  { %v14971_v63 = vadd.f32 %v14700_v38, %v468_v1  ;;  %v12306_v4 = vpop.f32.mrb[50].mxu1  ;;  %12371 = vmatprep.mubr.msk.bf16.mxu1 %vm666_vm2, %v625_v23  ;;  %12394 = vmatpush3.bf16.msra.mxu0 %v14325_v55 }
 0x13c   :  { %20222 = vst [vmem:[#allocation9_spill] sm:$0xff] %v14968_v20  ;;  %v14975_v45 = vadd.f32 %v12306_v4, %v14700_v38  ;;  %v471_v35 = vpop.f32.mrb[51].mxu1  ;;  %12372 = vmatmul.mubr.msk.bf16.gmra.mrb[108].mxu1 %vm666_vm2, %v626_v6  ;;  %v581_v1 = vmax.f32 %v14968_v20, 0.0 }
 0x13d   :  { %20223 = vst [vmem:[#allocation10_spill] sm:$0xff] %v14971_v63  ;;  %v14982_v39 = vadd.f32 %v14700_v38, %v471_v35  ;;  %v579_v4 = vmax.f32 %v14971_v63, 0.0 }
 0x13e   :  { %20224 = vst [vmem:[#allocation11_spill] sm:$0xff] %v14975_v45  ;;  %v582_v48 = vmax.f32 %v14975_v45, 0.0 }
 0x13f   :  { %20225 = vst [vmem:[#allocation12_spill] sm:$0xff] %v14982_v39  ;;  %v580_v17 = vmax.f32 %v14982_v39, 0.0 }
 0x140   :  { %v628_v36 = vpack.c.bf16 %v582_v48, %v581_v1  ;;  %v15013_v48 = vld [vmem:[%s19910_s7] sm:$0xff]  }
 0x141   :  { %v12309_v49 = vpop.f32.mrb[52].mxu1  ;;  %v627_v35 = vpack.c.bf16 %v580_v17, %v579_v4  ;;  %12459 = vmatprep.subr.bf16.mxu0 %v15013_v48 }
 0x142   :  { %v14993_v52 = vadd.f32 %v12309_v49, %v14700_v38  ;;  %v484_v57 = vpop.f32.mrb[53].mxu1 }
 0x143   :  { %v14996_v59 = vadd.f32 %v14700_v38, %v484_v57  ;;  %v12310_v23 = vpop.f32.mrb[54].mxu1  ;;  %12375 = vmatprep.mubr.msk.bf16.mxu1 %vm666_vm2, %v627_v35 }
 0x144   :  { %20226 = vst [vmem:[#allocation13_spill] sm:$0xff] %v14993_v52  ;;  %v15000_v20 = vadd.f32 %v12310_v23, %v14700_v38  ;;  %v487_v45 = vpop.f32.mrb[55].mxu1  ;;  %12376 = vmatmul.mubr.msk.bf16.gmra.mrb[112].mxu1 %vm666_vm2, %v628_v36  ;;  %v585_v1 = vmax.f32 %v14993_v52, 0.0 }
 0x145   :  { %20227 = vst [vmem:[#allocation14_spill] sm:$0xff] %v14996_v59  ;;  %v15004_v55 = vadd.f32 %v14700_v38, %v487_v45  ;;  %v583_v23 = vmax.f32 %v14996_v59, 0.0 }
 0x146   :  { %20228 = vst [vmem:[#allocation15_spill] sm:$0xff] %v15000_v20  ;;  %v586_v49 = vmax.f32 %v15000_v20, 0.0 }
 0x147   :  { %20229 = vst [vmem:[#allocation16_spill] sm:$0xff] %v15004_v55  ;;  %v584_v4 = vmax.f32 %v15004_v55, 0.0 }
 0x148   :  { %v630_v45 = vpack.c.bf16 %v586_v49, %v585_v1 }
 0x149   :  { %v12313_v17 = vpop.f32.mrb[56].mxu1  ;;  %v629_v35 = vpack.c.bf16 %v584_v4, %v583_v23 }
 0x14a   :  { %v15021_v6 = vadd.f32 %v12313_v17, %v14700_v38  ;;  %v500_v57 = vpop.f32.mrb[57].mxu1 }
 0x14b   :  { %v15024_v52 = vadd.f32 %v14700_v38, %v500_v57  ;;  %v12314_v20 = vpop.f32.mrb[58].mxu1  ;;  %12379 = vmatprep.mubr.msk.bf16.mxu1 %vm666_vm2, %v629_v35 }
 0x14c   :  { %20230 = vst [vmem:[#allocation17_spill] sm:$0xff] %v15021_v6  ;;  %v15028_v63 = vadd.f32 %v12314_v20, %v14700_v38  ;;  %v503_v39 = vpop.f32.mrb[59].mxu1  ;;  %12380 = vmatmul.mubr.msk.bf16.gmra.mrb[116].mxu1 %vm666_vm2, %v630_v45  ;;  %v589_v49 = vmax.f32 %v15021_v6, 0.0 }
 0x14d   :  { %20231 = vst [vmem:[#allocation18_spill] sm:$0xff] %v15024_v52  ;;  %v15032_v1 = vadd.f32 %v14700_v38, %v503_v39  ;;  %v587_v4 = vmax.f32 %v15024_v52, 0.0 }
 0x14e   :  { %20232 = vst [vmem:[#allocation19_spill] sm:$0xff] %v15028_v63  ;;  %v590_v23 = vmax.f32 %v15028_v63, 0.0 }
 0x14f   :  { %20233 = vst [vmem:[#allocation20_spill] sm:$0xff] %v15032_v1  ;;  %v588_v17 = vmax.f32 %v15032_v1, 0.0 }
 0x150   :  { %v632_v35 = vpack.c.bf16 %v590_v23, %v589_v49 }
 0x151   :  { %v12317_v36 = vpop.f32.mrb[60].mxu1  ;;  %v631_v45 = vpack.c.bf16 %v588_v17, %v587_v4 }
 0x152   :  { %v15043_v39 = vadd.f32 %v12317_v36, %v14700_v38  ;;  %v516_v59 = vpop.f32.mrb[61].mxu1 }
 0x153   :  { %v15046_v55 = vadd.f32 %v14700_v38, %v516_v59  ;;  %v12318_v33 = vpop.f32.mrb[62].mxu1  ;;  %12383 = vmatprep.mubr.msk.bf16.mxu1 %vm666_vm2, %v631_v45 }
 0x154   :  { %20234 = vst [vmem:[#allocation21_spill] sm:$0xff] %v15043_v39  ;;  %v15050_v57 = vadd.f32 %v12318_v33, %v14700_v38  ;;  %v519_v6 = vpop.f32.mrb[63].mxu1  ;;  %12384 = vmatmul.mubr.msk.bf16.gmra.mrb[120].mxu1 %vm666_vm2, %v632_v35  ;;  %v593_v23 = vmax.f32 %v15043_v39, 0.0 }
 0x155   :  { %20235 = vst [vmem:[#allocation22_spill] sm:$0xff] %v15046_v55  ;;  %v15054_v49 = vadd.f32 %v14700_v38, %v519_v6  ;;  %v591_v4 = vmax.f32 %v15046_v55, 0.0  ;;  %v15069_v38 = vld [vmem:[%s19907_s4] ss:$0 sm:$0xff] }
 0x156   :  { %20236 = vst [vmem:[#allocation23_spill] sm:$0xff] %v15050_v57  ;;  %v594_v36 = vmax.f32 %v15050_v57, 0.0 }
 0x157   :  { %20237 = vst [vmem:[#allocation24_spill] sm:$0xff] %v15054_v49  ;;  %v592_v17 = vmax.f32 %v15054_v49, 0.0 }
 0x158   :  { %v634_v45 = vpack.c.bf16 %v594_v36, %v593_v23 }
 0x159   :  { %v633_v20 = vpack.c.bf16 %v592_v17, %v591_v4 }
 0x15b   :  { %12387 = vmatprep.mubr.msk.bf16.mxu1 %vm666_vm2, %v633_v20 }
 0x15c   :  { %12388 = vmatmul.mubr.msk.bf16.gmra.mrb[124].mxu1 %vm666_vm2, %v634_v45 }
 0x1b7   :  { %v12329_v6 = vpop.f32.mrb[64].mxu1 }
 0x1b8   :  { %v806_v35 = vadd.f32 %v12329_v6, %v15069_v38  ;;  %v797_v59 = vpop.f32.mrb[65].mxu1 }
 0x1b9   :  { %v798_v39 = vadd.f32 %v15069_v38, %v797_v59  ;;  %v12330_v57 = vpop.f32.mrb[66].mxu1  ;;  %v14327_v59 = vld [vmem:[%s19910_s7 + $0x8] sm:$0xff]  }
 0x1ba   :  { %v809_v33 = vadd.f32 %v12330_v57, %v15069_v38  ;;  %v800_v23 = vpop.f32.mrb[67].mxu1  ;;  %v1054_v20 = vmax.f32 %v806_v35, 0.0 }
 0x1bb   :  { %v801_v36 = vadd.f32 %v15069_v38, %v800_v23  ;;  %v1052_v17 = vmax.f32 %v798_v39, 0.0 }
 0x1bc   :  { %v1055_v4 = vmax.f32 %v809_v33, 0.0 }
 0x1bd   :  { %v1053_v45 = vmax.f32 %v801_v36, 0.0  ;;  %v14328_v36 = vld [vmem:[%s19910_s7 + $0x10] sm:$0xff]  }
 0x1be   :  { %v1121_v55 = vpack.c.bf16 %v1055_v4, %v1054_v20 }
 0x1bf   :  { %v12333_v49 = vpop.f32.mrb[68].mxu1  ;;  %v1120_v63 = vpack.c.bf16 %v1053_v45, %v1052_v17 }
 0x1c0   :  { %v822_v52 = vadd.f32 %v12333_v49, %v15069_v38  ;;  %v813_v6 = vpop.f32.mrb[69].mxu1 }
 0x1c1   :  { %v814_v57 = vadd.f32 %v15069_v38, %v813_v6  ;;  %v12334_v1 = vpop.f32.mrb[70].mxu1  ;;  %12395 = vmatprep.mubr.msk.bf16.mxu0 %vm1171_vm3, %v1120_v63 }
 0x1c2   :  { %v825_v33 = vadd.f32 %v12334_v1, %v15069_v38  ;;  %v816_v39 = vpop.f32.mrb[71].mxu1  ;;  %12396 = vmatmul.mubr.msk.bf16.vlgmr.msra.gmra.mrb[0].mxu0 %vm1171_vm3, %v1121_v55  ;;  %v1058_v49 = vmax.f32 %v822_v52, 0.0  ;;  %v14329_v52 = vld [vmem:[%s19910_s7 + $0x18] sm:$0xff]  }
 0x1c3   :  { %v817_v35 = vadd.f32 %v15069_v38, %v816_v39  ;;  %12460 = vmatpush3.bf16.msra.mxu0 %v15013_v48  ;;  %v1056_v20 = vmax.f32 %v814_v57, 0.0 }
 0x1c4   :  { %v1059_v23 = vmax.f32 %v825_v33, 0.0  ;;  %12461 = vmatprep.subr.bf16.mxu0 %v14327_v59 }
 0x1c5   :  { %v1057_v4 = vmax.f32 %v817_v35, 0.0 }
 0x1c6   :  { %v1123_v17 = vpack.c.bf16 %v1059_v23, %v1058_v49 }
 0x1c7   :  { %v1122_v63 = vpack.c.bf16 %v1057_v4, %v1056_v20  ;;  %v12337_v45 = vpop.f32.mrb[72].mxu1  ;;  %12462 = vmatpush3.bf16.msra.mxu0 %v14327_v59 }
 0x1c8   :  { %v838_v1 = vadd.f32 %v12337_v45, %v15069_v38  ;;  %v829_v55 = vpop.f32.mrb[73].mxu1  ;;  %12463 = vmatprep.subr.bf16.mxu0 %v14328_v36 }
 0x1c9   :  { %v830_v48 = vadd.f32 %v15069_v38, %v829_v55  ;;  %v12338_v6 = vpop.f32.mrb[74].mxu1  ;;  %12399 = vmatprep.mubr.msk.bf16.mxu0 %vm1171_vm3, %v1122_v63 }
 0x1ca   :  { %v841_v57 = vadd.f32 %v12338_v6, %v15069_v38  ;;  %v832_v33 = vpop.f32.mrb[75].mxu1  ;;  %12400 = vmatmul.mubr.msk.bf16.gmra.mrb[4].mxu0 %vm1171_vm3, %v1123_v17  ;;  %v1062_v39 = vmax.f32 %v838_v1, 0.0 }
 0x1cb   :  { %v833_v59 = vadd.f32 %v15069_v38, %v832_v33  ;;  %12464 = vmatpush3.bf16.msra.mxu0 %v14328_v36  ;;  %v1060_v49 = vmax.f32 %v830_v48, 0.0 }
 0x1cc   :  { %v1063_v35 = vmax.f32 %v841_v57, 0.0  ;;  %12465 = vmatprep.subr.bf16.mxu0 %v14329_v52 }
 0x1cd   :  { %v1061_v23 = vmax.f32 %v833_v59, 0.0 }
 0x1ce   :  { %v1125_v20 = vpack.c.bf16 %v1063_v35, %v1062_v39 }
 0x1cf   :  { %v1124_v4 = vpack.c.bf16 %v1061_v23, %v1060_v49  ;;  %v12341_v45 = vpop.f32.mrb[76].mxu1  ;;  %12466 = vmatpush3.bf16.msra.mxu0 %v14329_v52 }
 0x1d0   :  { %v854_v55 = vadd.f32 %v12341_v45, %v15069_v38  ;;  %v845_v63 = vpop.f32.mrb[77].mxu1 }
 0x1d1   :  { %v846_v6 = vadd.f32 %v15069_v38, %v845_v63  ;;  %v12342_v29 = vpop.f32.mrb[78].mxu1  ;;  %12403 = vmatprep.mubr.msk.bf16.mxu0 %vm1171_vm3, %v1124_v4 }
 0x1d2   :  { %v857_v17 = vadd.f32 %v12342_v29, %v15069_v38  ;;  %v848_v36 = vpop.f32.mrb[79].mxu1  ;;  %12404 = vmatmul.mubr.msk.bf16.gmra.mrb[8].mxu0 %vm1171_vm3, %v1125_v20  ;;  %v1066_v48 = vmax.f32 %v854_v55, 0.0 }
 0x1d3   :  { %v849_v1 = vadd.f32 %v15069_v38, %v848_v36  ;;  %v1064_v33 = vmax.f32 %v846_v6, 0.0 }
 0x1d4   :  { %v1067_v57 = vmax.f32 %v857_v17, 0.0 }
 0x1d5   :  { %v1065_v59 = vmax.f32 %v849_v1, 0.0 }
 0x1d6   :  { %v1127_v52 = vpack.c.bf16 %v1067_v57, %v1066_v48 }
 0x1d7   :  { %v12345_v39 = vpop.f32.mrb[80].mxu1  ;;  %v1126_v35 = vpack.c.bf16 %v1065_v59, %v1064_v33 }
 0x1d8   :  { %v870_v49 = vadd.f32 %v12345_v39, %v15069_v38  ;;  %v861_v23 = vpop.f32.mrb[81].mxu1 }
 0x1d9   :  { %v862_v45 = vadd.f32 %v15069_v38, %v861_v23  ;;  %v12346_v4 = vpop.f32.mrb[82].mxu1  ;;  %12407 = vmatprep.mubr.msk.bf16.mxu0 %vm1171_vm3, %v1126_v35 }
 0x1da   :  { %v873_v29 = vadd.f32 %v12346_v4, %v15069_v38  ;;  %v864_v20 = vpop.f32.mrb[83].mxu1  ;;  %12408 = vmatmul.mubr.msk.bf16.gmra.mrb[12].mxu0 %vm1171_vm3, %v1127_v52  ;;  %v1070_v63 = vmax.f32 %v870_v49, 0.0 }
 0x1db   :  { %v865_v55 = vadd.f32 %v15069_v38, %v864_v20  ;;  %v1068_v17 = vmax.f32 %v862_v45, 0.0 }
 0x1dc   :  { %v1071_v6 = vmax.f32 %v873_v29, 0.0 }
 0x1dd   :  { %v1069_v36 = vmax.f32 %v865_v55, 0.0 }
 0x1de   :  { %v1129_v1 = vpack.c.bf16 %v1071_v6, %v1070_v63 }
 0x1df   :  { %v12349_v48 = vpop.f32.mrb[84].mxu1  ;;  %v1128_v57 = vpack.c.bf16 %v1069_v36, %v1068_v17 }
 0x1e0   :  { %v886_v33 = vadd.f32 %v12349_v48, %v15069_v38  ;;  %v877_v59 = vpop.f32.mrb[85].mxu1 }
 0x1e1   :  { %v878_v39 = vadd.f32 %v15069_v38, %v877_v59  ;;  %v12350_v35 = vpop.f32.mrb[86].mxu1  ;;  %12411 = vmatprep.mubr.msk.bf16.mxu0 %vm1171_vm3, %v1128_v57 }
 0x1e2   :  { %v889_v23 = vadd.f32 %v12350_v35, %v15069_v38  ;;  %v880_v52 = vpop.f32.mrb[87].mxu1  ;;  %12412 = vmatmul.mubr.msk.bf16.gmra.mrb[16].mxu0 %vm1171_vm3, %v1129_v1  ;;  %v1074_v45 = vmax.f32 %v886_v33, 0.0 }
 0x1e3   :  { %v881_v49 = vadd.f32 %v15069_v38, %v880_v52  ;;  %v1072_v29 = vmax.f32 %v878_v39, 0.0 }
 0x1e4   :  { %v1075_v4 = vmax.f32 %v889_v23, 0.0 }
 0x1e5   :  { %v1073_v20 = vmax.f32 %v881_v49, 0.0 }
 0x1e6   :  { %v1131_v55 = vpack.c.bf16 %v1075_v4, %v1074_v45 }
 0x1e7   :  { %v12353_v63 = vpop.f32.mrb[88].mxu1  ;;  %v1130_v6 = vpack.c.bf16 %v1073_v20, %v1072_v29 }
 0x1e8   :  { %v902_v17 = vadd.f32 %v12353_v63, %v15069_v38  ;;  %v893_v36 = vpop.f32.mrb[89].mxu1 }
 0x1e9   :  { %v894_v48 = vadd.f32 %v15069_v38, %v893_v36  ;;  %v12354_v57 = vpop.f32.mrb[90].mxu1  ;;  %12415 = vmatprep.mubr.msk.bf16.mxu0 %vm1171_vm3, %v1130_v6 }
 0x1ea   :  { %v905_v59 = vadd.f32 %v12354_v57, %v15069_v38  ;;  %v896_v1 = vpop.f32.mrb[91].mxu1  ;;  %12416 = vmatmul.mubr.msk.bf16.gmra.mrb[20].mxu0 %vm1171_vm3, %v1131_v55  ;;  %v1078_v39 = vmax.f32 %v902_v17, 0.0 }
 0x1eb   :  { %v897_v33 = vadd.f32 %v15069_v38, %v896_v1  ;;  %v1076_v23 = vmax.f32 %v894_v48, 0.0 }
 0x1ec   :  { %v1079_v35 = vmax.f32 %v905_v59, 0.0 }
 0x1ed   :  { %v1077_v52 = vmax.f32 %v897_v33, 0.0 }
 0x1ee   :  { %v1133_v49 = vpack.c.bf16 %v1079_v35, %v1078_v39 }
 0x1ef   :  { %v12357_v45 = vpop.f32.mrb[92].mxu1  ;;  %v1132_v4 = vpack.c.bf16 %v1077_v52, %v1076_v23 }
 0x1f0   :  { %v918_v29 = vadd.f32 %v12357_v45, %v15069_v38  ;;  %v909_v20 = vpop.f32.mrb[93].mxu1 }
 0x1f1   :  { %v910_v63 = vadd.f32 %v15069_v38, %v909_v20  ;;  %v12358_v6 = vpop.f32.mrb[94].mxu1  ;;  %12419 = vmatprep.mubr.msk.bf16.mxu0 %vm1171_vm3, %v1132_v4 }
 0x1f2   :  { %v921_v36 = vadd.f32 %v12358_v6, %v15069_v38  ;;  %v912_v55 = vpop.f32.mrb[95].mxu1  ;;  %12420 = vmatmul.mubr.msk.bf16.gmra.mrb[24].mxu0 %vm1171_vm3, %v1133_v49  ;;  %v1082_v48 = vmax.f32 %v918_v29, 0.0 }
 0x1f3   :  { %v913_v17 = vadd.f32 %v15069_v38, %v912_v55  ;;  %v1080_v59 = vmax.f32 %v910_v63, 0.0 }
 0x1f4   :  { %v1083_v57 = vmax.f32 %v921_v36, 0.0 }
 0x1f5   :  { %v1081_v1 = vmax.f32 %v913_v17, 0.0 }
 0x1f6   :  { %v1135_v33 = vpack.c.bf16 %v1083_v57, %v1082_v48 }
 0x1f7   :  { %v12361_v39 = vpop.f32.mrb[96].mxu1  ;;  %v1134_v35 = vpack.c.bf16 %v1081_v1, %v1080_v59 }
 0x1f8   :  { %v934_v23 = vadd.f32 %v12361_v39, %v15069_v38  ;;  %v925_v52 = vpop.f32.mrb[97].mxu1 }
 0x1f9   :  { %v926_v45 = vadd.f32 %v15069_v38, %v925_v52  ;;  %v12362_v4 = vpop.f32.mrb[98].mxu1  ;;  %12423 = vmatprep.mubr.msk.bf16.mxu0 %vm1171_vm3, %v1134_v35 }
 0x1fa   :  { %v937_v20 = vadd.f32 %v12362_v4, %v15069_v38  ;;  %v928_v49 = vpop.f32.mrb[99].mxu1  ;;  %12424 = vmatmul.mubr.msk.bf16.gmra.mrb[28].mxu0 %vm1171_vm3, %v1135_v33  ;;  %v1086_v63 = vmax.f32 %v934_v23, 0.0 }
 0x1fb   :  { %v929_v29 = vadd.f32 %v15069_v38, %v928_v49  ;;  %v1084_v36 = vmax.f32 %v926_v45, 0.0 }
 0x1fc   :  { %v1087_v6 = vmax.f32 %v937_v20, 0.0 }
 0x1fd   :  { %v1085_v55 = vmax.f32 %v929_v29, 0.0 }
 0x1fe   :  { %v1137_v17 = vpack.c.bf16 %v1087_v6, %v1086_v63 }
 0x1ff   :  { %v12365_v48 = vpop.f32.mrb[100].mxu1  ;;  %v1136_v57 = vpack.c.bf16 %v1085_v55, %v1084_v36 }
 0x200   :  { %v950_v59 = vadd.f32 %v12365_v48, %v15069_v38  ;;  %v941_v1 = vpop.f32.mrb[101].mxu1 }
 0x201   :  { %v942_v39 = vadd.f32 %v15069_v38, %v941_v1  ;;  %v12366_v35 = vpop.f32.mrb[102].mxu1  ;;  %12427 = vmatprep.mubr.msk.bf16.mxu0 %vm1171_vm3, %v1136_v57 }
 0x202   :  { %v953_v52 = vadd.f32 %v12366_v35, %v15069_v38  ;;  %v944_v33 = vpop.f32.mrb[103].mxu1  ;;  %12428 = vmatmul.mubr.msk.bf16.gmra.mrb[32].mxu0 %vm1171_vm3, %v1137_v17  ;;  %v1090_v45 = vmax.f32 %v950_v59, 0.0 }
 0x203   :  { %v945_v23 = vadd.f32 %v15069_v38, %v944_v33  ;;  %v1088_v20 = vmax.f32 %v942_v39, 0.0 }
 0x204   :  { %v1091_v4 = vmax.f32 %v953_v52, 0.0 }
 0x205   :  { %v1089_v49 = vmax.f32 %v945_v23, 0.0 }
 0x206   :  { %v1139_v29 = vpack.c.bf16 %v1091_v4, %v1090_v45 }
 0x207   :  { %v12369_v63 = vpop.f32.mrb[104].mxu1  ;;  %v1138_v6 = vpack.c.bf16 %v1089_v49, %v1088_v20 }
 0x208   :  { %v966_v36 = vadd.f32 %v12369_v63, %v15069_v38  ;;  %v957_v55 = vpop.f32.mrb[105].mxu1 }
 0x209   :  { %v958_v48 = vadd.f32 %v15069_v38, %v957_v55  ;;  %v12370_v57 = vpop.f32.mrb[106].mxu1  ;;  %12431 = vmatprep.mubr.msk.bf16.mxu0 %vm1171_vm3, %v1138_v6 }
 0x20a   :  { %v969_v1 = vadd.f32 %v12370_v57, %v15069_v38  ;;  %v960_v17 = vpop.f32.mrb[107].mxu1  ;;  %12432 = vmatmul.mubr.msk.bf16.gmra.mrb[36].mxu0 %vm1171_vm3, %v1139_v29  ;;  %v1094_v39 = vmax.f32 %v966_v36, 0.0 }
 0x20b   :  { %v961_v59 = vadd.f32 %v15069_v38, %v960_v17  ;;  %v1092_v52 = vmax.f32 %v958_v48, 0.0 }
 0x20c   :  { %v1095_v35 = vmax.f32 %v969_v1, 0.0 }
 0x20d   :  { %v1093_v33 = vmax.f32 %v961_v59, 0.0 }
 0x20e   :  { %v1141_v23 = vpack.c.bf16 %v1095_v35, %v1094_v39 }
 0x20f   :  { %v12373_v45 = vpop.f32.mrb[108].mxu1  ;;  %v1140_v4 = vpack.c.bf16 %v1093_v33, %v1092_v52 }
 0x210   :  { %v982_v20 = vadd.f32 %v12373_v45, %v15069_v38  ;;  %v973_v49 = vpop.f32.mrb[109].mxu1 }
 0x211   :  { %v974_v63 = vadd.f32 %v15069_v38, %v973_v49  ;;  %v12374_v6 = vpop.f32.mrb[110].mxu1  ;;  %12435 = vmatprep.mubr.msk.bf16.mxu0 %vm1171_vm3, %v1140_v4 }
 0x212   :  { %v985_v55 = vadd.f32 %v12374_v6, %v15069_v38  ;;  %v976_v29 = vpop.f32.mrb[111].mxu1  ;;  %12436 = vmatmul.mubr.msk.bf16.gmra.mrb[40].mxu0 %vm1171_vm3, %v1141_v23  ;;  %v1098_v48 = vmax.f32 %v982_v20, 0.0 }
 0x213   :  { %v977_v36 = vadd.f32 %v15069_v38, %v976_v29  ;;  %v1096_v1 = vmax.f32 %v974_v63, 0.0 }
 0x214   :  { %v1099_v57 = vmax.f32 %v985_v55, 0.0 }
 0x215   :  { %v1097_v17 = vmax.f32 %v977_v36, 0.0 }
 0x216   :  { %v1143_v59 = vpack.c.bf16 %v1099_v57, %v1098_v48 }
 0x217   :  { %v12377_v39 = vpop.f32.mrb[112].mxu1  ;;  %v1142_v35 = vpack.c.bf16 %v1097_v17, %v1096_v1 }
 0x218   :  { %v998_v52 = vadd.f32 %v12377_v39, %v15069_v38  ;;  %v989_v33 = vpop.f32.mrb[113].mxu1 }
 0x219   :  { %v990_v45 = vadd.f32 %v15069_v38, %v989_v33  ;;  %v12378_v4 = vpop.f32.mrb[114].mxu1  ;;  %12439 = vmatprep.mubr.msk.bf16.mxu0 %vm1171_vm3, %v1142_v35 }
 0x21a   :  { %v1001_v49 = vadd.f32 %v12378_v4, %v15069_v38  ;;  %v992_v23 = vpop.f32.mrb[115].mxu1  ;;  %12440 = vmatmul.mubr.msk.bf16.gmra.mrb[44].mxu0 %vm1171_vm3, %v1143_v59  ;;  %v1102_v63 = vmax.f32 %v998_v52, 0.0 }
 0x21b   :  { %v993_v20 = vadd.f32 %v15069_v38, %v992_v23  ;;  %v1100_v55 = vmax.f32 %v990_v45, 0.0 }
 0x21c   :  { %v1103_v6 = vmax.f32 %v1001_v49, 0.0 }
 0x21d   :  { %v1101_v29 = vmax.f32 %v993_v20, 0.0 }
 0x21e   :  { %v1145_v36 = vpack.c.bf16 %v1103_v6, %v1102_v63 }
 0x21f   :  { %v12381_v48 = vpop.f32.mrb[116].mxu1  ;;  %v1144_v57 = vpack.c.bf16 %v1101_v29, %v1100_v55 }
 0x220   :  { %v1014_v1 = vadd.f32 %v12381_v48, %v15069_v38  ;;  %v1005_v17 = vpop.f32.mrb[117].mxu1 }
 0x221   :  { %v1006_v39 = vadd.f32 %v15069_v38, %v1005_v17  ;;  %v12382_v35 = vpop.f32.mrb[118].mxu1  ;;  %12443 = vmatprep.mubr.msk.bf16.mxu0 %vm1171_vm3, %v1144_v57 }
 0x222   :  { %v1017_v33 = vadd.f32 %v12382_v35, %v15069_v38  ;;  %v1008_v59 = vpop.f32.mrb[119].mxu1  ;;  %12444 = vmatmul.mubr.msk.bf16.gmra.mrb[48].mxu0 %vm1171_vm3, %v1145_v36  ;;  %v1106_v45 = vmax.f32 %v1014_v1, 0.0 }
 0x223   :  { %v1009_v52 = vadd.f32 %v15069_v38, %v1008_v59  ;;  %v1104_v49 = vmax.f32 %v1006_v39, 0.0  ;;  %v14330_v39 = vld [vmem:[%s19906_s3 + $0x20] sm:$0xff]  }
 0x224   :  { %v1107_v4 = vmax.f32 %v1017_v33, 0.0  ;;  %12531 = vmatprep.subr.bf16.mxu1 %v14330_v39 }
 0x225   :  { %v1105_v23 = vmax.f32 %v1009_v52, 0.0  ;;  %12532 = vmatpush3.bf16.msra.mxu1 %v14330_v39 }
 0x226   :  { %v1147_v20 = vpack.c.bf16 %v1107_v4, %v1106_v45 }
 0x227   :  { %v12385_v63 = vpop.f32.mrb[120].mxu1  ;;  %v1146_v6 = vpack.c.bf16 %v1105_v23, %v1104_v49 }
 0x228   :  { %v1030_v55 = vadd.f32 %v12385_v63, %v15069_v38  ;;  %v1021_v29 = vpop.f32.mrb[121].mxu1 }
 0x229   :  { %v1022_v48 = vadd.f32 %v15069_v38, %v1021_v29  ;;  %v12386_v57 = vpop.f32.mrb[122].mxu1  ;;  %12447 = vmatprep.mubr.msk.bf16.mxu0 %vm1171_vm3, %v1146_v6 }
 0x22a   :  { %v1033_v17 = vadd.f32 %v12386_v57, %v15069_v38  ;;  %v1024_v36 = vpop.f32.mrb[123].mxu1  ;;  %12448 = vmatmul.mubr.msk.bf16.gmra.mrb[52].mxu0 %vm1171_vm3, %v1147_v20  ;;  %v1110_v35 = vmax.f32 %v1030_v55, 0.0 }
 0x22b   :  { %v1025_v1 = vadd.f32 %v15069_v38, %v1024_v36  ;;  %v1108_v59 = vmax.f32 %v1022_v48, 0.0 }
 0x22c   :  { %v1111_v33 = vmax.f32 %v1033_v17, 0.0 }
 0x22d   :  { %v1109_v52 = vmax.f32 %v1025_v1, 0.0 }
 0x22e   :  { %v1149_v45 = vpack.c.bf16 %v1111_v33, %v1110_v35  ;;  %v14331_v33 = vld [vmem:[%s19906_s3 + $0x28] sm:$0xff]  }
 0x22f   :  { %v12389_v4 = vpop.f32.mrb[124].mxu1  ;;  %v1148_v49 = vpack.c.bf16 %v1109_v52, %v1108_v59  ;;  %v20238_v59 = vpack.c.bf16 %v14712_v46, %v14706_v42  ;;  %12533 = vmatprep.subr.bf16.mxu1 %v14331_v33  ;;  %v20240_v52 = vpack.c.bf16 %v14734_v62, %v14726_v58  ;;  %v20242_v42 = vpack.c.bf16 %v14756_v14, %v14748_v10 }
 0x230   :  { %v1046_v23 = vadd.f32 %v12389_v4, %v15069_v38  ;;  %v1037_v63 = vpop.f32.mrb[125].mxu1  ;;  %12534 = vmatpush3.bf16.msra.mxu1 %v14331_v33  ;;  %v20245_v46 = vpack.c.bf16 %v14774_v28, %v14767_v24  ;;  %v20247_v58 = vpack.c.bf16 %v14796_v50, %v14789_v43  ;;  %v20249_v62 = vpack.c.bf16 %v14818_v11, %v14811_v5  ;;  %v20260_v50 = vld [vmem:[#allocation8_spill] sm:$0xff]  ;;  %v20264_v11 = vld [vmem:[#allocation5_spill] sm:$0xff] }
 0x231   :  { %v1038_v20 = vadd.f32 %v15069_v38, %v1037_v63  ;;  %v12390_v6 = vpop.f32.mrb[126].mxu1  ;;  %12451 = vmatprep.mubr.msk.bf16.mxu0 %vm1171_vm3, %v1148_v49  ;;  %v20251_v10 = vpack.c.bf16 %v14840_v37, %v14833_v31  ;;  %v20253_v14 = vpack.c.bf16 %v14862_v16, %v14855_v3  ;;  %v20254_v24 = vpack.c.bf16 %v14888_v13, %v14880_v61  ;;  %v20266_v31 = vld [vmem:[#allocation12_spill] sm:$0xff]  ;;  %v20269_v37 = vld [vmem:[#allocation11_spill] sm:$0xff]  ;;  %v20273_v16 = vld [vmem:[#allocation14_spill] sm:$0xff] }
 0x232   :  { %v1049_v29 = vadd.f32 %v12390_v6, %v15069_v38  ;;  %v1040_v57 = vpop.f32.mrb[127].mxu1  ;;  %12452 = vmatmul.mubr.msk.bf16.gmra.mrb[56].mxu0 %vm1171_vm3, %v1149_v45  ;;  %v1114_v48 = vmax.f32 %v1046_v23, 0.0  ;;  %v20241_v45 = vpack.c.bf16 %v14730_v60, %v14723_v56  ;;  %v20246_v56 = vpack.c.bf16 %v14800_v53, %v14792_v47  ;;  %v20261_v53 = vld [vmem:[#allocation6_spill] sm:$0xff]  ;;  %v20287_v49 = vld [vmem:[#allocation23_spill] sm:$0xff]  ;;  %v20288_v23 = vld [vmem:[#allocation21_spill] sm:$0xff] }
 0x233   :  { %v1041_v55 = vadd.f32 %v15069_v38, %v1040_v57  ;;  %v1112_v36 = vmax.f32 %v1038_v20, 0.0  ;;  %v20239_v38 = vpack.c.bf16 %v14709_v44, %v14703_v40  ;;  %v20243_v40 = vpack.c.bf16 %v14752_v12, %v14745_v8  ;;  %v20279_v13 = vld [vmem:[#allocation18_spill] sm:$0xff]  ;;  %v15316_v6 = vld [vmem:[%s19909_s6] ss:$0 sm:$0xff] }
 0x234   :  { %v1115_v17 = vmax.f32 %v1049_v29, 0.0  ;;  %v20244_v44 = vpack.c.bf16 %v14778_v30, %v14770_v26  ;;  %v20248_v60 = vpack.c.bf16 %v14822_v15, %v14814_v7  ;;  %v20250_v8 = vpack.c.bf16 %v14844_v41, %v14836_v34  ;;  %v20263_v7 = vld [vmem:[#allocation7_spill] sm:$0xff]  ;;  %v20267_v34 = vld [vmem:[#allocation10_spill] sm:$0xff]  ;;  %v20270_v41 = vld [vmem:[#allocation9_spill] sm:$0xff] }
 0x235   :  { %v1113_v1 = vmax.f32 %v1041_v55, 0.0  ;;  %v20252_v12 = vpack.c.bf16 %v14866_v21, %v14858_v9  ;;  %v20255_v26 = vpack.c.bf16 %v14884_v2, %v14877_v54  ;;  %v20256_v28 = vpack.c.bf16 %v14910_v18, %v14902_v27  ;;  %v20272_v9 = vld [vmem:[#allocation16_spill] sm:$0xff]  ;;  %v20275_v27 = vld [vmem:[#allocation15_spill] sm:$0xff]  ;;  %v20276_v54 = vld [vmem:[#allocation13_spill] sm:$0xff] }
 0x236   :  { %v1151_v39 = vpack.c.bf16 %v1115_v17, %v1114_v48  ;;  %v20257_v30 = vpack.c.bf16 %v14906_v25, %v14899_v0  ;;  %v20258_v43 = vpack.c.bf16 %v14932_v22, %v14924_v19  ;;  %v20259_v47 = vpack.c.bf16 %v14928_v32, %v14921_v51  ;;  %v20278_v2 = vld [vmem:[#allocation20_spill] sm:$0xff]  ;;  %v20281_v0 = vld [vmem:[#allocation19_spill] sm:$0xff]  ;;  %v20282_v18 = vld [vmem:[#allocation17_spill] sm:$0xff] }
 0x237   :  { %v1150_v35 = vpack.c.bf16 %v1113_v1, %v1112_v36  ;;  %v20262_v5 = vpack.c.bf16 %v20260_v50, %v20261_v53  ;;  %v20265_v15 = vpack.c.bf16 %v20263_v7, %v20264_v11  ;;  %v20268_v19 = vpack.c.bf16 %v20266_v31, %v20267_v34  ;;  %v20284_v51 = vld [vmem:[#allocation24_spill] sm:$0xff]  ;;  %v20285_v22 = vld [vmem:[#allocation22_spill] sm:$0xff]  ;;  %v14333_v53 = vld [vmem:[%s19906_s3 + $0x38] sm:$0xff]  }
 0x238   :  { %v20271_v3 = vpack.c.bf16 %v20269_v37, %v20270_v41  ;;  %v20274_v21 = vpack.c.bf16 %v20272_v9, %v20273_v16  ;;  %v20277_v61 = vpack.c.bf16 %v20275_v27, %v20276_v54  ;;  %v20280_v25 = vpack.c.bf16 %v20278_v2, %v20279_v13  ;;  %v14334_v9 = vld [vmem:[%s19910_s7 + $0x30] sm:$0xff]   ;;  %v14335_v13 = vld [vmem:[%s19910_s7 + $0x38] sm:$0xff]  }
 0x239   :  { %12455 = vmatprep.mubr.msk.bf16.mxu0 %vm1171_vm3, %v1150_v35  ;;  %v20283_v32 = vpack.c.bf16 %v20281_v0, %v20282_v18  ;;  %v20286_v4 = vpack.c.bf16 %v20284_v51, %v20285_v22  ;;  %v20289_v63 = vpack.c.bf16 %v20287_v49, %v20288_v23  ;;  %v19934_v20 = vmov 0.0  }
 0x23a   :  { %12456 = vmatmul.mubr.msk.bf16.gmra.mrb[60].mxu0 %vm1171_vm3, %v1151_v39  ;;  %12599 = vmatprep.subr.bf16.mxu1 %v19934_v20 }
 0x23b   :  { %12467 = vmatprep.mubr.msk.bf16.mxu0 %vm666_vm2, %v20238_v59  ;;  %12743 = vmatprep.subr.bf16.mxu0 %v19934_v20 }
 0x242   :  { %12468 = vmatmul.mubr.msk.bf16.vlgmr.msra.gmra.mrb[0].mxu0 %vm666_vm2, %v20239_v38 }
 0x243   :  { %12471 = vmatprep.mubr.msk.bf16.mxu0 %vm666_vm2, %v20240_v52  ;;  %12744 = vmatpush3.bf16.msra.mxu0 %v14334_v9 }
 0x244   :  { %12745 = vmatprep.subr.bf16.mxu0 %v19934_v20 }
 0x247   :  { %12746 = vmatpush3.bf16.msra.mxu0 %v14335_v13 }
 0x24a   :  { %12472 = vmatmul.mubr.msk.bf16.gmra.mrb[4].mxu0 %vm666_vm2, %v20241_v45 }
 0x24b   :  { %12475 = vmatprep.mubr.msk.bf16.mxu0 %vm666_vm2, %v20242_v42 }
 0x252   :  { %12476 = vmatmul.mubr.msk.bf16.gmra.mrb[8].mxu0 %vm666_vm2, %v20243_v40 }
 0x253   :  { %12479 = vmatprep.mubr.msk.bf16.mxu0 %vm666_vm2, %v20244_v44 }
 0x25a   :  { %12480 = vmatmul.mubr.msk.bf16.gmra.mrb[12].mxu0 %vm666_vm2, %v20245_v46 }
 0x25b   :  { %12483 = vmatprep.mubr.msk.bf16.mxu0 %vm666_vm2, %v20246_v56 }
 0x262   :  { %12484 = vmatmul.mubr.msk.bf16.gmra.mrb[16].mxu0 %vm666_vm2, %v20247_v58 }
 0x263   :  { %12487 = vmatprep.mubr.msk.bf16.mxu0 %vm666_vm2, %v20248_v60 }
 0x26a   :  { %12488 = vmatmul.mubr.msk.bf16.gmra.mrb[20].mxu0 %vm666_vm2, %v20249_v62  ;;  %v14332_v62 = vld [vmem:[%s19906_s3 + $0x30] sm:$0xff]  }
 0x26b   :  { %12491 = vmatprep.mubr.msk.bf16.mxu0 %vm666_vm2, %v20250_v8 }
 0x272   :  { %12492 = vmatmul.mubr.msk.bf16.gmra.mrb[24].mxu0 %vm666_vm2, %v20251_v10 }
 0x273   :  { %12495 = vmatprep.mubr.msk.bf16.mxu0 %vm666_vm2, %v20252_v12 }
 0x27a   :  { %12496 = vmatmul.mubr.msk.bf16.gmra.mrb[28].mxu0 %vm666_vm2, %v20253_v14 }
 0x27b   :  { %12499 = vmatprep.mubr.msk.bf16.mxu0 %vm666_vm2, %v20254_v24 }
 0x282   :  { %12500 = vmatmul.mubr.msk.bf16.gmra.mrb[32].mxu0 %vm666_vm2, %v20255_v26 }
 0x283   :  { %12503 = vmatprep.mubr.msk.bf16.mxu0 %vm666_vm2, %v20256_v28 }
 0x28a   :  { %12504 = vmatmul.mubr.msk.bf16.gmra.mrb[36].mxu0 %vm666_vm2, %v20257_v30 }
 0x28b   :  { %12507 = vmatprep.mubr.msk.bf16.mxu0 %vm666_vm2, %v20258_v43 }
 0x292   :  { %12508 = vmatmul.mubr.msk.bf16.gmra.mrb[40].mxu0 %vm666_vm2, %v20259_v47 }
 0x293   :  { %12511 = vmatprep.mubr.msk.bf16.mxu0 %vm666_vm2, %v20262_v5 }
 0x29a   :  { %12512 = vmatmul.mubr.msk.bf16.gmra.mrb[44].mxu0 %vm666_vm2, %v20265_v15 }
 0x29b   :  { %12515 = vmatprep.mubr.msk.bf16.mxu0 %vm666_vm2, %v20268_v19 }
 0x2a2   :  { %12516 = vmatmul.mubr.msk.bf16.gmra.mrb[48].mxu0 %vm666_vm2, %v20271_v3 }
 0x2a3   :  { %12519 = vmatprep.mubr.msk.bf16.mxu0 %vm666_vm2, %v20274_v21 }
 0x2aa   :  { %12520 = vmatmul.mubr.msk.bf16.gmra.mrb[52].mxu0 %vm666_vm2, %v20277_v61 }
 0x2ab   :  { %12523 = vmatprep.mubr.msk.bf16.mxu0 %vm666_vm2, %v20280_v25 }
 0x2b2   :  { %12524 = vmatmul.mubr.msk.bf16.gmra.mrb[56].mxu0 %vm666_vm2, %v20283_v32 }
 0x2b3   :  { %12527 = vmatprep.mubr.msk.bf16.mxu0 %vm666_vm2, %v20286_v4 }
 0x2ba   :  { %12528 = vmatmul.mubr.msk.bf16.gmra.mrb[60].mxu0 %vm666_vm2, %v20289_v63 }
 0x2bb   :  { %12747 = vmatprep.mubr.msk.bf16.mxu0 %vm14400_vm4, %v19934_v20 }
 0x315   :  { %v12469_v29 = vpop.f32.mrb[0].mxu0 }
 0x316   :  { %v15319_v57 = vadd.f32 %v12469_v29, %v15316_v6  ;;  %v1751_v55 = vpop.f32.mrb[1].mxu0 }
 0x317   :  { %v15322_v48 = vadd.f32 %v15316_v6, %v1751_v55  ;;  %v12470_v17 = vpop.f32.mrb[2].mxu0 }
 0x318   :  { %20290 = vst [vmem:[#allocation8_spill] sm:$0xff] %v15319_v57  ;;  %v15325_v36 = vadd.f32 %v12470_v17, %v15316_v6  ;;  %v1754_v1 = vpop.f32.mrb[3].mxu0  ;;  %v2194_v35 = vmax.f32 %v15319_v57, 0.0  ;;  %v2009_v56 = vsel %vm1171_vm3, %v15319_v57, -inf }
 0x319   :  { %20291 = vst [vmem:[#allocation6_spill] sm:$0xff] %v15322_v48  ;;  %v15328_v39 = vadd.f32 %v15316_v6, %v1754_v1  ;;  %v2006_v33 = vsel %vm1171_vm3, %v15322_v48, -inf  ;;  %v2192_v52 = vmax.f32 %v15322_v48, 0.0 }
 0x31a   :  { %20292 = vst [vmem:[#allocation7_spill] sm:$0xff] %v15325_v36  ;;  %v2195_v59 = vmax.f32 %v15325_v36, 0.0  ;;  %v2011_v14 = vsel %vm1171_vm3, %v15325_v36, -inf }
 0x31b   :  { %20293 = vst [vmem:[#allocation5_spill] sm:$0xff] %v15328_v39  ;;  %v2007_v45 = vsel %vm1171_vm3, %v15328_v39, -inf  ;;  %v2193_v42 = vmax.f32 %v15328_v39, 0.0 }
 0x31c   :  { %v2257_v44 = vpack.c.bf16 %v2195_v59, %v2194_v35  ;;  %v2008_v46 = vmax.f32 %v2006_v33, %v2007_v45 }
 0x31d   :  { %v12473_v58 = vpop.f32.mrb[4].mxu0  ;;  %v2256_v60 = vpack.c.bf16 %v2193_v42, %v2192_v52 }
 0x31e   :  { %v2010_v8 = vmax.f32 %v2008_v46, %v2009_v56  ;;  %v15348_v10 = vadd.f32 %v12473_v58, %v15316_v6  ;;  %v1767_v12 = vpop.f32.mrb[5].mxu0 }
 0x31f   :  { %v15353_v24 = vadd.f32 %v15316_v6, %v1767_v12  ;;  %v12474_v26 = vpop.f32.mrb[6].mxu0  ;;  %12535 = vmatprep.mubr.msk.bf16.mxu1 %vm1171_vm3, %v2256_v60 }
 0x320   :  { %20294 = vst [vmem:[#allocation12_spill] sm:$0xff] %v15348_v10  ;;  %v2012_v28 = vmax.f32 %v2010_v8, %v2011_v14  ;;  %v15357_v30 = vadd.f32 %v12474_v26, %v15316_v6  ;;  %v1770_v43 = vpop.f32.mrb[7].mxu0  ;;  %12536 = vmatmul.mubr.msk.bf16.vlgmr.msra.gmra.mrb[128].mxu1 %vm1171_vm3, %v2257_v44  ;;  %v2198_v5 = vmax.f32 %v15348_v10, 0.0  ;;  %v2017_v16 = vsel %vm1171_vm3, %v15348_v10, -inf }
 0x321   :  { %20295 = vst [vmem:[#allocation10_spill] sm:$0xff] %v15353_v24  ;;  %v2013_v47 = vsel %vm1171_vm3, %v15353_v24, -inf  ;;  %v15363_v50 = vadd.f32 %v15316_v6, %v1770_v43  ;;  %12600 = vmatpush3.bf16.msra.mxu1 %v14332_v62  ;;  %v2196_v31 = vmax.f32 %v15353_v24, 0.0 }
 0x322   :  { %20296 = vst [vmem:[#allocation11_spill] sm:$0xff] %v15357_v30  ;;  %v2014_v7 = vmax.f32 %v2012_v28, %v2013_v47  ;;  %v2199_v11 = vmax.f32 %v15357_v30, 0.0  ;;  %12601 = vmatprep.subr.bf16.mxu1 %v19934_v20  ;;  %v2019_v25 = vsel %vm1171_vm3, %v15357_v30, -inf }
 0x323   :  { %20297 = vst [vmem:[#allocation9_spill] sm:$0xff] %v15363_v50  ;;  %v2015_v34 = vsel %vm1171_vm3, %v15363_v50, -inf  ;;  %v2197_v19 = vmax.f32 %v15363_v50, 0.0 }
 0x324   :  { %v2016_v41 = vmax.f32 %v2014_v7, %v2015_v34  ;;  %v2259_v3 = vpack.c.bf16 %v2199_v11, %v2198_v5 }
 0x325   :  { %v12477_v21 = vpop.f32.mrb[8].mxu0  ;;  %v2258_v27 = vpack.c.bf16 %v2197_v19, %v2196_v31  ;;  %12602 = vmatpush3.bf16.msra.mxu1 %v14333_v53 }
 0x326   :  { %v2018_v54 = vmax.f32 %v2016_v41, %v2017_v16  ;;  %v15387_v61 = vadd.f32 %v12477_v21, %v15316_v6  ;;  %v1783_v2 = vpop.f32.mrb[9].mxu0 }
 0x327   :  { %v15395_v0 = vadd.f32 %v15316_v6, %v1783_v2  ;;  %v12478_v18 = vpop.f32.mrb[10].mxu0  ;;  %12539 = vmatprep.mubr.msk.bf16.mxu1 %vm1171_vm3, %v2258_v27 }
 0x328   :  { %20298 = vst [vmem:[#allocation16_spill] sm:$0xff] %v15387_v61  ;;  %v2020_v32 = vmax.f32 %v2018_v54, %v2019_v25  ;;  %v15400_v51 = vadd.f32 %v12478_v18, %v15316_v6  ;;  %v1786_v22 = vpop.f32.mrb[11].mxu0  ;;  %12540 = vmatmul.mubr.msk.bf16.gmra.mrb[132].mxu1 %vm1171_vm3, %v2259_v3  ;;  %v2202_v4 = vmax.f32 %v15387_v61, 0.0  ;;  %v2030_v42 = vsel %vm1171_vm3, %v15387_v61, -inf }
 0x329   :  { %20299 = vst [vmem:[#allocation14_spill] sm:$0xff] %v15395_v0  ;;  %v15405_v49 = vadd.f32 %v15316_v6, %v1786_v22  ;;  %v2027_v63 = vsel %vm1171_vm3, %v15395_v0, -inf  ;;  %v2200_v17 = vmax.f32 %v15395_v0, 0.0 }
 0x32a   :  { %20300 = vst [vmem:[#allocation15_spill] sm:$0xff] %v15400_v51  ;;  %v2021_v23 = vrot.slane %v2020_v32, 4  ;;  %v2203_v29 = vmax.f32 %v15400_v51, 0.0  ;;  %v2032_v62 = vsel %vm1171_vm3, %v15400_v51, -inf }
 0x32b   :  { %20301 = vst [vmem:[#allocation13_spill] sm:$0xff] %v15405_v49  ;;  %v2028_v1 = vsel %vm1171_vm3, %v15405_v49, -inf  ;;  %v2201_v35 = vmax.f32 %v15405_v49, 0.0 }
 0x32c   :  { %v2029_v59 = vmax.f32 %v2027_v63, %v2028_v1  ;;  %v2261_v52 = vpack.c.bf16 %v2203_v29, %v2202_v4  ;;  %v2022_v45 = vmax.f32 %v2020_v32, %v2021_v23 }
 0x32d   :  { %v12481_v44 = vpop.f32.mrb[12].mxu0  ;;  %v2260_v46 = vpack.c.bf16 %v2201_v35, %v2200_v17 }
 0x32e   :  { %v2031_v56 = vmax.f32 %v2029_v59, %v2030_v42  ;;  %v15421_v58 = vadd.f32 %v12481_v44, %v15316_v6  ;;  %v1799_v60 = vpop.f32.mrb[13].mxu0  ;;  %v2023_v28 = vrot.slane %v2022_v45, 2 }
 0x32f   :  { %v15426_v8 = vadd.f32 %v15316_v6, %v1799_v60  ;;  %v12482_v12 = vpop.f32.mrb[14].mxu0  ;;  %12543 = vmatprep.mubr.msk.bf16.mxu1 %vm1171_vm3, %v2260_v46 }
 0x330   :  { %20302 = vst [vmem:[#allocation20_spill] sm:$0xff] %v15421_v58  ;;  %v2033_v14 = vmax.f32 %v2031_v56, %v2032_v62  ;;  %v1802_v26 = vpop.f32.mrb[15].mxu0  ;;  %12544 = vmatmul.mubr.msk.bf16.gmra.mrb[136].mxu1 %vm1171_vm3, %v2261_v52  ;;  %v15433_v47 = vadd.f32 %v12482_v12, %v15316_v6  ;;  %v2206_v5 = vmax.f32 %v15421_v58, 0.0  ;;  %v2024_v16 = vmax.f32 %v2022_v45, %v2023_v28 }
 0x331   :  { %20303 = vst [vmem:[#allocation18_spill] sm:$0xff] %v15426_v8  ;;  %v2034_v43 = vsel %vm1171_vm3, %v15426_v8, -inf  ;;  %v15436_v53 = vadd.f32 %v15316_v6, %v1802_v26  ;;  %v2204_v11 = vmax.f32 %v15426_v8, 0.0  ;;  %v2038_v21 = vsel %vm1171_vm3, %v15421_v58, -inf }
 0x332   :  { %20304 = vst [vmem:[#allocation19_spill] sm:$0xff] %v15433_v47  ;;  %v2035_v7 = vmax.f32 %v2033_v14, %v2034_v43  ;;  %v2207_v31 = vmax.f32 %v15433_v47, 0.0  ;;  %v2040_v18 = vsel %vm1171_vm3, %v15433_v47, -inf  ;;  %v2025_v29 = vrot.slane %v2024_v16, 1 }
 0x333   :  { %20305 = vst [vmem:[#allocation17_spill] sm:$0xff] %v15436_v53  ;;  %v2036_v34 = vsel %vm1171_vm3, %v15436_v53, -inf  ;;  %v2205_v19 = vmax.f32 %v15436_v53, 0.0 }
 0x334   :  { %v2037_v41 = vmax.f32 %v2035_v7, %v2036_v34  ;;  %v2263_v2 = vpack.c.bf16 %v2207_v31, %v2206_v5  ;;  %v2026_v14 = vmax.f32 %v2024_v16, %v2025_v29 }
 0x335   :  { %v12485_v27 = vpop.f32.mrb[16].mxu0  ;;  %v2262_v54 = vpack.c.bf16 %v2205_v19, %v2204_v11 }
 0x336   :  { %v2039_v13 = vmax.f32 %v2037_v41, %v2038_v21  ;;  %v1815_v25 = vpop.f32.mrb[17].mxu0  ;;  %v15453_v32 = vadd.f32 %v12485_v27, %v15316_v6 }
 0x337   :  { %v15456_v22 = vadd.f32 %v15316_v6, %v1815_v25  ;;  %v12486_v4 = vpop.f32.mrb[18].mxu0  ;;  %12547 = vmatprep.mubr.msk.bf16.mxu1 %vm1171_vm3, %v2262_v54 }
 0x338   :  { %20306 = vst [vmem:[#allocation24_spill] sm:$0xff] %v15453_v32  ;;  %v2041_v23 = vmax.f32 %v2039_v13, %v2040_v18  ;;  %v1818_v63 = vpop.f32.mrb[19].mxu0  ;;  %12548 = vmatmul.mubr.msk.bf16.gmra.mrb[140].mxu1 %vm1171_vm3, %v2263_v2  ;;  %v15461_v17 = vadd.f32 %v12486_v4, %v15316_v6  ;;  %v2210_v44 = vmax.f32 %v15453_v32, 0.0  ;;  %v2051_v26 = vsel %vm1171_vm3, %v15453_v32, -inf }
 0x339   :  { %20307 = vst [vmem:[#allocation22_spill] sm:$0xff] %v15456_v22  ;;  %v15464_v1 = vadd.f32 %v15316_v6, %v1818_v63  ;;  %v2048_v59 = vsel %vm1171_vm3, %v15456_v22, -inf  ;;  %v2208_v52 = vmax.f32 %v15456_v22, 0.0  ;;  %v2685_v13 = vmax.f32 %v2026_v14, 0.0 }
 0x33a   :  { %20308 = vst [vmem:[#allocation23_spill] sm:$0xff] %v15461_v17  ;;  %v2042_v35 = vrot.slane %v2041_v23, 4  ;;  %v2211_v46 = vmax.f32 %v15461_v17, 0.0  ;;  %v2053_v19 = vsel %vm1171_vm3, %v15461_v17, -inf }
 0x33b   :  { %20309 = vst [vmem:[#allocation21_spill] sm:$0xff] %v15464_v1  ;;  %v2049_v45 = vsel %vm1171_vm3, %v15464_v1, -inf  ;;  %v2209_v42 = vmax.f32 %v15464_v1, 0.0 }
 0x33c   :  { %v2043_v56 = vmax.f32 %v2041_v23, %v2042_v35  ;;  %v2050_v60 = vmax.f32 %v2048_v59, %v2049_v45  ;;  %v2265_v5 = vpack.c.bf16 %v2211_v46, %v2210_v44  ;;  %v3884_v44 = vpack.c.bf16 %v2026_v14, %v2026_v14 }
 0x33d   :  { %v12489_v28 = vpop.f32.mrb[20].mxu0  ;;  %v2264_v43 = vpack.c.bf16 %v2209_v42, %v2208_v52 }
 0x33e   :  { %v2044_v7 = vrot.slane %v2043_v56, 2  ;;  %v2052_v11 = vmax.f32 %v2050_v60, %v2051_v26  ;;  %v15481_v31 = vadd.f32 %v12489_v28, %v15316_v6  ;;  %v1831_v34 = vpop.f32.mrb[21].mxu0  ;;  %v2693_v26 = vpack.c.bf16 %v2685_v13, %v2685_v13 }
 0x33f   :  { %v15486_v41 = vadd.f32 %v15316_v6, %v1831_v34  ;;  %v12490_v21 = vpop.f32.mrb[22].mxu0  ;;  %12551 = vmatprep.mubr.msk.bf16.mxu1 %vm1171_vm3, %v2264_v43 }
 0x340   :  { %20310 = vst [vmem:[#allocation25_spill] sm:$0xff] %v15481_v31  ;;  %v2045_v16 = vmax.f32 %v2043_v56, %v2044_v7  ;;  %v2054_v27 = vmax.f32 %v2052_v11, %v2053_v19  ;;  %v15490_v54 = vadd.f32 %v12490_v21, %v15316_v6  ;;  %v1834_v2 = vpop.f32.mrb[23].mxu0  ;;  %12552 = vmatmul.mubr.msk.bf16.gmra.mrb[144].mxu1 %vm1171_vm3, %v2265_v5  ;;  %v2214_v29 = vmax.f32 %v15481_v31, 0.0 }
 0x341   :  { %20311 = vst [vmem:[#allocation26_spill] sm:$0xff] %v15486_v41  ;;  %v2055_v25 = vsel %vm1171_vm3, %v15486_v41, -inf  ;;  %v15496_v18 = vadd.f32 %v15316_v6, %v1834_v2  ;;  %v2212_v4 = vmax.f32 %v15486_v41, 0.0  ;;  %v2059_v28 = vsel %vm1171_vm3, %v15481_v31, -inf }
 0x342   :  { %20312 = vst [vmem:[#allocation27_spill] sm:$0xff] %v15490_v54  ;;  %v2046_v23 = vrot.slane %v2045_v16, 1  ;;  %v2056_v63 = vmax.f32 %v2054_v27, %v2055_v25  ;;  %v2215_v35 = vmax.f32 %v15490_v54, 0.0  ;;  %v2061_v21 = vsel %vm1171_vm3, %v15490_v54, -inf }
 0x343   :  { %20313 = vst [vmem:[#allocation28_spill] sm:$0xff] %v15496_v18  ;;  %v2057_v59 = vsel %vm1171_vm3, %v15496_v18, -inf  ;;  %v2213_v52 = vmax.f32 %v15496_v18, 0.0  ;;  %v3900_v2 = vunpack.c.l.b16 %v3884_v44 }
 0x344   :  { %v2047_v46 = vmax.f32 %v2045_v16, %v2046_v23  ;;  %v2058_v56 = vmax.f32 %v2056_v63, %v2057_v59  ;;  %v2267_v60 = vpack.c.bf16 %v2215_v35, %v2214_v29  ;;  %v2717_v63 = vunpack.c.l.b16 %v2693_v26 }
 0x345   :  { %v12493_v43 = vpop.f32.mrb[24].mxu0  ;;  %v2266_v5 = vpack.c.bf16 %v2213_v52, %v2212_v4 }
 0x346   :  { %v2686_v7 = vmax.f32 %v2047_v46, 0.0  ;;  %v3885_v11 = vpack.c.bf16 %v2047_v46, %v2047_v46  ;;  %v2060_v34 = vmax.f32 %v2058_v56, %v2059_v28  ;;  %v1847_v19 = vpop.f32.mrb[25].mxu0  ;;  %v15513_v27 = vadd.f32 %v12493_v43, %v15316_v6 }
 0x347   :  { %v15516_v14 = vadd.f32 %v15316_v6, %v1847_v19  ;;  %v12494_v16 = vpop.f32.mrb[26].mxu0  ;;  %12555 = vmatprep.mubr.msk.bf16.mxu1 %vm1171_vm3, %v2266_v5 }
 0x348   :  { %20314 = vst [vmem:[#allocation29_spill] sm:$0xff] %v15513_v27  ;;  %v2694_v13 = vpack.c.bf16 %v2686_v7, %v2686_v7  ;;  %v3901_v25 = vunpack.c.l.b16 %v3885_v11  ;;  %v2062_v4 = vmax.f32 %v2060_v34, %v2061_v21  ;;  %v1850_v23 = vpop.f32.mrb[27].mxu0  ;;  %12556 = vmatmul.mubr.msk.bf16.gmra.mrb[148].mxu1 %vm1171_vm3, %v2267_v60  ;;  %v15523_v35 = vadd.f32 %v12494_v16, %v15316_v6 }
 0x349   :  { %20315 = vst [vmem:[#allocation30_spill] sm:$0xff] %v15516_v14  ;;  %v2069_v29 = vsel %vm1171_vm3, %v15516_v14, -inf  ;;  %v15526_v59 = vadd.f32 %v15316_v6, %v1850_v23  ;;  %v2216_v56 = vmax.f32 %v15516_v14, 0.0  ;;  %v2218_v28 = vmax.f32 %v15513_v27, 0.0 }
 0x34a   :  { %20316 = vst [vmem:[#allocation31_spill] sm:$0xff] %v15523_v35  ;;  %v2718_v52 = vunpack.c.l.b16 %v2694_v13  ;;  %v15529_v46 = vsel %vm2725_vm5, %v3901_v25, %v3900_v2  ;;  %v2063_v44 = vrot.slane %v2062_v4, 4  ;;  %v2219_v43 = vmax.f32 %v15523_v35, 0.0 }
 0x34b   :  { %20317 = vst [vmem:[#allocation32_spill] sm:$0xff] %v15526_v59  ;;  %v2070_v60 = vsel %vm1171_vm3, %v15526_v59, -inf  ;;  %v2217_v26 = vmax.f32 %v15526_v59, 0.0  ;;  %v2072_v19 = vsel %vm1171_vm3, %v15513_v27, -inf }
 0x34c   :  { %v15538_v5 = vsel %vm2725_vm5, %v2718_v52, %v2717_v63  ;;  %v2064_v7 = vmax.f32 %v2062_v4, %v2063_v44  ;;  %v2071_v11 = vmax.f32 %v2069_v29, %v2070_v60  ;;  %v2269_v2 = vpack.c.bf16 %v2219_v43, %v2218_v28 }
 0x34d   :  { %v12497_v21 = vpop.f32.mrb[28].mxu0  ;;  %v2268_v16 = vpack.c.bf16 %v2217_v26, %v2216_v56  ;;  %v2074_v4 = vsel %vm1171_vm3, %v15523_v35, -inf }
 0x34e   :  { %v2065_v25 = vrot.slane %v2064_v7, 2  ;;  %v2073_v23 = vmax.f32 %v2071_v11, %v2072_v19  ;;  %v15547_v42 = vadd.f32 %v12497_v21, %v15316_v6  ;;  %v1863_v63 = vpop.f32.mrb[29].mxu0 }
 0x34f   :  { %v15552_v29 = vadd.f32 %v15316_v6, %v1863_v63  ;;  %v12498_v52 = vpop.f32.mrb[30].mxu0  ;;  %12559 = vmatprep.mubr.msk.bf16.mxu1 %vm1171_vm3, %v2268_v16 }
 0x350   :  { %20318 = vst [vmem:[#allocation33_spill] sm:$0xff] %v15547_v42  ;;  %v2066_v44 = vmax.f32 %v2064_v7, %v2065_v25  ;;  %v2075_v56 = vmax.f32 %v2073_v23, %v2074_v4  ;;  %v15556_v60 = vadd.f32 %v12498_v52, %v15316_v6  ;;  %v1866_v26 = vpop.f32.mrb[31].mxu0  ;;  %12560 = vmatmul.mubr.msk.bf16.gmra.mrb[152].mxu1 %vm1171_vm3, %v2269_v2  ;;  %v2222_v16 = vmax.f32 %v15547_v42, 0.0 }
 0x351   :  { %20319 = vst [vmem:[#allocation34_spill] sm:$0xff] %v15552_v29  ;;  %v2076_v28 = vsel %vm1171_vm3, %v15552_v29, -inf  ;;  %v15562_v43 = vadd.f32 %v15316_v6, %v1866_v26  ;;  %v2220_v11 = vmax.f32 %v15552_v29, 0.0 }
 0x352   :  { %20320 = vst [vmem:[#allocation35_spill] sm:$0xff] %v15556_v60  ;;  %v2067_v19 = vrot.slane %v2066_v44, 1  ;;  %v2077_v21 = vmax.f32 %v2075_v56, %v2076_v28  ;;  %v2223_v7 = vmax.f32 %v15556_v60, 0.0  ;;  %v2080_v56 = vsel %vm1171_vm3, %v15547_v42, -inf }
 0x353   :  { %20321 = vst [vmem:[#allocation36_spill] sm:$0xff] %v15562_v43  ;;  %v2078_v25 = vsel %vm1171_vm3, %v15562_v43, -inf  ;;  %v2221_v23 = vmax.f32 %v15562_v43, 0.0  ;;  %v2082_v9 = vsel %vm1171_vm3, %v15556_v60, -inf }
 0x354   :  { %v2068_v4 = vmax.f32 %v2066_v44, %v2067_v19  ;;  %v2079_v52 = vmax.f32 %v2077_v21, %v2078_v25  ;;  %v2271_v26 = vpack.c.bf16 %v2223_v7, %v2222_v16 }
 0x355   :  { %v12501_v28 = vpop.f32.mrb[32].mxu0  ;;  %v2270_v13 = vpack.c.bf16 %v2221_v23, %v2220_v11 }
 0x356   :  { %v2687_v34 = vmax.f32 %v2068_v4, 0.0  ;;  %v3886_v45 = vpack.c.bf16 %v2068_v4, %v2068_v4  ;;  %v2081_v12 = vmax.f32 %v2079_v52, %v2080_v56  ;;  %v1879_v62 = vpop.f32.mrb[33].mxu0  ;;  %v15579_v2 = vadd.f32 %v12501_v28, %v15316_v6 }
 0x357   :  { %v15582_v44 = vadd.f32 %v15316_v6, %v1879_v62  ;;  %v12502_v19 = vpop.f32.mrb[34].mxu0  ;;  %12563 = vmatprep.mubr.msk.bf16.mxu1 %vm1171_vm3, %v2270_v13 }
 0x358   :  { %20322 = vst [vmem:[#allocation37_spill] sm:$0xff] %v15579_v2  ;;  %v2695_v21 = vpack.c.bf16 %v2687_v34, %v2687_v34  ;;  %v3902_v16 = vunpack.c.l.b16 %v3886_v45  ;;  %v2083_v11 = vmax.f32 %v2081_v12, %v2082_v9  ;;  %v1882_v7 = vpop.f32.mrb[35].mxu0  ;;  %12564 = vmatmul.mubr.msk.bf16.gmra.mrb[156].mxu1 %vm1171_vm3, %v2271_v26  ;;  %v15589_v23 = vadd.f32 %v12502_v19, %v15316_v6 }
 0x359   :  { %20323 = vst [vmem:[#allocation38_spill] sm:$0xff] %v15582_v44  ;;  %v2090_v25 = vsel %vm1171_vm3, %v15582_v44, -inf  ;;  %v15592_v4 = vadd.f32 %v15316_v6, %v1882_v7  ;;  %v2224_v9 = vmax.f32 %v15582_v44, 0.0  ;;  %v2226_v13 = vmax.f32 %v15579_v2, 0.0 }
 0x35a   :  { %20324 = vst [vmem:[#allocation39_spill] sm:$0xff] %v15589_v23  ;;  %v2719_v62 = vunpack.c.l.b16 %v2695_v21  ;;  %v15596_v52 = vsel %vm2727_vm6, %v3902_v16, %v15529_v46  ;;  %v2084_v34 = vrot.slane %v2083_v11, 4  ;;  %v2227_v26 = vmax.f32 %v15589_v23, 0.0 }
 0x35b   :  { %20325 = vst [vmem:[#allocation40_spill] sm:$0xff] %v15592_v4  ;;  %v2091_v12 = vsel %vm1171_vm3, %v15592_v4, -inf  ;;  %v2225_v45 = vmax.f32 %v15592_v4, 0.0  ;;  %v2093_v21 = vsel %vm1171_vm3, %v15579_v2, -inf }
 0x35c   :  { %v15606_v56 = vsel %vm2727_vm6, %v2719_v62, %v15538_v5  ;;  %v2085_v28 = vmax.f32 %v2083_v11, %v2084_v34  ;;  %v2092_v19 = vmax.f32 %v2090_v25, %v2091_v12  ;;  %v2273_v63 = vpack.c.bf16 %v2227_v26, %v2226_v13 }
 0x35d   :  { %v12505_v16 = vpop.f32.mrb[36].mxu0  ;;  %v2272_v7 = vpack.c.bf16 %v2225_v45, %v2224_v9  ;;  %v2095_v11 = vsel %vm1171_vm3, %v15589_v23, -inf }
 0x35e   :  { %v2086_v55 = vrot.slane %v2085_v28, 2  ;;  %v2094_v33 = vmax.f32 %v2092_v19, %v2093_v21  ;;  %v15615_v15 = vadd.f32 %v12505_v16, %v15316_v6  ;;  %v1895_v5 = vpop.f32.mrb[37].mxu0 }
 0x35f   :  { %v15620_v25 = vadd.f32 %v15316_v6, %v1895_v5  ;;  %v12506_v62 = vpop.f32.mrb[38].mxu0  ;;  %12567 = vmatprep.mubr.msk.bf16.mxu1 %vm1171_vm3, %v2272_v7 }
 0x360   :  { %20326 = vst [vmem:[#allocation41_spill] sm:$0xff] %v15615_v15  ;;  %v2087_v34 = vmax.f32 %v2085_v28, %v2086_v55  ;;  %v2096_v9 = vmax.f32 %v2094_v33, %v2095_v11  ;;  %v15624_v12 = vadd.f32 %v12506_v62, %v15316_v6  ;;  %v1898_v45 = vpop.f32.mrb[39].mxu0  ;;  %12568 = vmatmul.mubr.msk.bf16.gmra.mrb[160].mxu1 %vm1171_vm3, %v2273_v63  ;;  %v2230_v7 = vmax.f32 %v15615_v15, 0.0 }
 0x361   :  { %20327 = vst [vmem:[#allocation42_spill] sm:$0xff] %v15620_v25  ;;  %v2097_v13 = vsel %vm1171_vm3, %v15620_v25, -inf  ;;  %v15630_v26 = vadd.f32 %v15316_v6, %v1898_v45  ;;  %v2228_v19 = vmax.f32 %v15620_v25, 0.0 }
 0x362   :  { %20328 = vst [vmem:[#allocation43_spill] sm:$0xff] %v15624_v12  ;;  %v2088_v21 = vrot.slane %v2087_v34, 1  ;;  %v2098_v16 = vmax.f32 %v2096_v9, %v2097_v13  ;;  %v2231_v55 = vmax.f32 %v15624_v12, 0.0  ;;  %v2101_v9 = vsel %vm1171_vm3, %v15615_v15, -inf }
 0x363   :  { %20329 = vst [vmem:[#allocation44_spill] sm:$0xff] %v15630_v26  ;;  %v2099_v33 = vsel %vm1171_vm3, %v15630_v26, -inf  ;;  %v2229_v28 = vmax.f32 %v15630_v26, 0.0  ;;  %v2103_v20 = vsel %vm1171_vm3, %v15624_v12, -inf }
 0x364   :  { %v2089_v11 = vmax.f32 %v2087_v34, %v2088_v21  ;;  %v2100_v62 = vmax.f32 %v2098_v16, %v2099_v33  ;;  %v2275_v45 = vpack.c.bf16 %v2231_v55, %v2230_v7 }
 0x365   :  { %v12509_v13 = vpop.f32.mrb[40].mxu0  ;;  %v2274_v3 = vpack.c.bf16 %v2229_v28, %v2228_v19 }
 0x366   :  { %v2688_v46 = vmax.f32 %v2089_v11, 0.0  ;;  %v3887_v37 = vpack.c.bf16 %v2089_v11, %v2089_v11  ;;  %v2102_v38 = vmax.f32 %v2100_v62, %v2101_v9  ;;  %v1911_v40 = vpop.f32.mrb[41].mxu0  ;;  %v15647_v63 = vadd.f32 %v12509_v13, %v15316_v6 }
 0x367   :  { %v15650_v5 = vadd.f32 %v15316_v6, %v1911_v40  ;;  %v12510_v34 = vpop.f32.mrb[42].mxu0  ;;  %12571 = vmatprep.mubr.msk.bf16.mxu1 %vm1171_vm3, %v2274_v3 }
 0x368   :  { %20330 = vst [vmem:[#allocation45_spill] sm:$0xff] %v15647_v63  ;;  %v2696_v21 = vpack.c.bf16 %v2688_v46, %v2688_v46  ;;  %v3903_v16 = vunpack.c.l.b16 %v3887_v37  ;;  %v2104_v19 = vmax.f32 %v2102_v38, %v2103_v20  ;;  %v1914_v7 = vpop.f32.mrb[43].mxu0  ;;  %12572 = vmatmul.mubr.msk.bf16.gmra.mrb[164].mxu1 %vm1171_vm3, %v2275_v45  ;;  %v15657_v33 = vadd.f32 %v12510_v34, %v15316_v6 }
 0x369   :  { %20331 = vst [vmem:[#allocation46_spill] sm:$0xff] %v15650_v5  ;;  %v2111_v55 = vsel %vm1171_vm3, %v15650_v5, -inf  ;;  %v15660_v28 = vadd.f32 %v15316_v6, %v1914_v7  ;;  %v2232_v3 = vmax.f32 %v15650_v5, 0.0  ;;  %v2234_v46 = vmax.f32 %v15647_v63, 0.0 }
 0x36a   :  { %20332 = vst [vmem:[#allocation47_spill] sm:$0xff] %v15657_v33  ;;  %v2720_v40 = vunpack.c.l.b16 %v2696_v21  ;;  %v2105_v11 = vrot.slane %v2104_v19, 4  ;;  %v15665_v37 = vsel %vm2729_vm7, %v3903_v16, %v15596_v52  ;;  %v2235_v62 = vmax.f32 %v15657_v33, 0.0 }
 0x36b   :  { %20333 = vst [vmem:[#allocation48_spill] sm:$0xff] %v15660_v28  ;;  %v2112_v20 = vsel %vm1171_vm3, %v15660_v28, -inf  ;;  %v2233_v38 = vmax.f32 %v15660_v28, 0.0  ;;  %v2114_v52 = vsel %vm1171_vm3, %v15647_v63, -inf }
 0x36c   :  { %v2106_v45 = vmax.f32 %v2104_v19, %v2105_v11  ;;  %v2113_v9 = vmax.f32 %v2111_v55, %v2112_v20  ;;  %v15674_v13 = vsel %vm2729_vm7, %v2720_v40, %v15606_v56  ;;  %v2277_v7 = vpack.c.bf16 %v2235_v62, %v2234_v46 }
 0x36d   :  { %v12513_v21 = vpop.f32.mrb[44].mxu0  ;;  %v2276_v16 = vpack.c.bf16 %v2233_v38, %v2232_v3  ;;  %v2116_v56 = vsel %vm1171_vm3, %v15657_v33, -inf }
 0x36e   :  { %v2107_v12 = vrot.slane %v2106_v45, 2  ;;  %v2115_v25 = vmax.f32 %v2113_v9, %v2114_v52  ;;  %v15683_v19 = vadd.f32 %v12513_v21, %v15316_v6  ;;  %v1927_v55 = vpop.f32.mrb[45].mxu0 }
 0x36f   :  { %v15688_v40 = vadd.f32 %v15316_v6, %v1927_v55  ;;  %v12514_v11 = vpop.f32.mrb[46].mxu0  ;;  %12575 = vmatprep.mubr.msk.bf16.mxu1 %vm1171_vm3, %v2276_v16 }
 0x370   :  { %20334 = vst [vmem:[#allocation49_spill] sm:$0xff] %v15683_v19  ;;  %v2108_v3 = vmax.f32 %v2106_v45, %v2107_v12  ;;  %v2117_v20 = vmax.f32 %v2115_v25, %v2116_v56  ;;  %v15692_v38 = vadd.f32 %v12514_v11, %v15316_v6  ;;  %v1930_v46 = vpop.f32.mrb[47].mxu0  ;;  %12576 = vmatmul.mubr.msk.bf16.gmra.mrb[168].mxu1 %vm1171_vm3, %v2277_v7  ;;  %v2238_v16 = vmax.f32 %v15683_v19, 0.0 }
 0x371   :  { %20335 = vst [vmem:[#allocation50_spill] sm:$0xff] %v15688_v40  ;;  %v2118_v62 = vsel %vm1171_vm3, %v15688_v40, -inf  ;;  %v15698_v9 = vadd.f32 %v15316_v6, %v1930_v46  ;;  %v2236_v52 = vmax.f32 %v15688_v40, 0.0 }
 0x372   :  { %20336 = vst [vmem:[#allocation51_spill] sm:$0xff] %v15692_v38  ;;  %v2109_v21 = vrot.slane %v2108_v3, 1  ;;  %v2119_v55 = vmax.f32 %v2117_v20, %v2118_v62  ;;  %v2239_v25 = vmax.f32 %v15692_v38, 0.0  ;;  %v2122_v20 = vsel %vm1171_vm3, %v15683_v19, -inf }
 0x373   :  { %20337 = vst [vmem:[#allocation52_spill] sm:$0xff] %v15698_v9  ;;  %v2120_v12 = vsel %vm1171_vm3, %v15698_v9, -inf  ;;  %v2237_v45 = vmax.f32 %v15698_v9, 0.0  ;;  %v2124_v26 = vsel %vm1171_vm3, %v15692_v38, -inf }
 0x374   :  { %v2110_v11 = vmax.f32 %v2108_v3, %v2109_v21  ;;  %v2121_v46 = vmax.f32 %v2119_v55, %v2120_v12  ;;  %v2279_v15 = vpack.c.bf16 %v2239_v25, %v2238_v16 }
 0x375   :  { %v12517_v62 = vpop.f32.mrb[48].mxu0  ;;  %v2278_v34 = vpack.c.bf16 %v2237_v45, %v2236_v52 }
 0x376   :  { %v2689_v63 = vmax.f32 %v2110_v11, 0.0  ;;  %v3888_v33 = vpack.c.bf16 %v2110_v11, %v2110_v11  ;;  %v2123_v5 = vmax.f32 %v2121_v46, %v2122_v20  ;;  %v1943_v28 = vpop.f32.mrb[49].mxu0  ;;  %v15715_v7 = vadd.f32 %v12517_v62, %v15316_v6 }
 0x377   :  { %v15718_v56 = vadd.f32 %v15316_v6, %v1943_v28  ;;  %v12518_v3 = vpop.f32.mrb[50].mxu0  ;;  %12579 = vmatprep.mubr.msk.bf16.mxu1 %vm1171_vm3, %v2278_v34 }
 0x378   :  { %20338 = vst [vmem:[#allocation53_spill] sm:$0xff] %v15715_v7  ;;  %v2697_v21 = vpack.c.bf16 %v2689_v63, %v2689_v63  ;;  %v3904_v55 = vunpack.c.l.b16 %v3888_v33  ;;  %v2125_v52 = vmax.f32 %v2123_v5, %v2124_v26  ;;  %v1946_v16 = vpop.f32.mrb[51].mxu0  ;;  %12580 = vmatmul.mubr.msk.bf16.gmra.mrb[172].mxu1 %vm1171_vm3, %v2279_v15  ;;  %v15725_v12 = vadd.f32 %v12518_v3, %v15316_v6 }
 0x379   :  { %20339 = vst [vmem:[#allocation54_spill] sm:$0xff] %v15718_v56  ;;  %v2132_v25 = vsel %vm1171_vm3, %v15718_v56, -inf  ;;  %v15728_v45 = vadd.f32 %v15316_v6, %v1946_v16  ;;  %v2240_v34 = vmax.f32 %v15718_v56, 0.0  ;;  %v2242_v5 = vmax.f32 %v15715_v7, 0.0 }
 0x37a   :  { %20340 = vst [vmem:[#allocation55_spill] sm:$0xff] %v15725_v12  ;;  %v2721_v28 = vunpack.c.l.b16 %v2697_v21  ;;  %v2126_v11 = vrot.slane %v2125_v52, 4  ;;  %v15733_v63 = vsel %vm2731_vm8, %v3904_v55, %v15665_v37  ;;  %v2243_v33 = vmax.f32 %v15725_v12, 0.0 }
 0x37b   :  { %20341 = vst [vmem:[#allocation56_spill] sm:$0xff] %v15728_v45  ;;  %v2133_v15 = vsel %vm1171_vm3, %v15728_v45, -inf  ;;  %v2241_v26 = vmax.f32 %v15728_v45, 0.0  ;;  %v2135_v37 = vsel %vm1171_vm3, %v15715_v7, -inf }
 0x37c   :  { %v2127_v46 = vmax.f32 %v2125_v52, %v2126_v11  ;;  %v2134_v20 = vmax.f32 %v2132_v25, %v2133_v15  ;;  %v15742_v62 = vsel %vm2731_vm8, %v2721_v28, %v15674_v13  ;;  %v2281_v16 = vpack.c.bf16 %v2243_v33, %v2242_v5 }
 0x37d   :  { %v12521_v21 = vpop.f32.mrb[52].mxu0  ;;  %v2280_v55 = vpack.c.bf16 %v2241_v26, %v2240_v34  ;;  %v2137_v13 = vsel %vm1171_vm3, %v15725_v12, -inf }
 0x37e   :  { %v2128_v38 = vrot.slane %v2127_v46, 2  ;;  %v2136_v40 = vmax.f32 %v2134_v20, %v2135_v37  ;;  %v15751_v52 = vadd.f32 %v12521_v21, %v15316_v6  ;;  %v1959_v25 = vpop.f32.mrb[53].mxu0 }
 0x37f   :  { %v15756_v28 = vadd.f32 %v15316_v6, %v1959_v25  ;;  %v12522_v11 = vpop.f32.mrb[54].mxu0  ;;  %12583 = vmatprep.mubr.msk.bf16.mxu1 %vm1171_vm3, %v2280_v55 }
 0x380   :  { %20342 = vst [vmem:[#allocation57_spill] sm:$0xff] %v15751_v52  ;;  %v2129_v34 = vmax.f32 %v2127_v46, %v2128_v38  ;;  %v2138_v15 = vmax.f32 %v2136_v40, %v2137_v13  ;;  %v15760_v26 = vadd.f32 %v12522_v11, %v15316_v6  ;;  %v1962_v5 = vpop.f32.mrb[55].mxu0  ;;  %12584 = vmatmul.mubr.msk.bf16.gmra.mrb[176].mxu1 %vm1171_vm3, %v2281_v16  ;;  %v2246_v55 = vmax.f32 %v15751_v52, 0.0 }
 0x381   :  { %20343 = vst [vmem:[#allocation58_spill] sm:$0xff] %v15756_v28  ;;  %v2139_v33 = vsel %vm1171_vm3, %v15756_v28, -inf  ;;  %v15766_v20 = vadd.f32 %v15316_v6, %v1962_v5  ;;  %v2244_v37 = vmax.f32 %v15756_v28, 0.0 }
 0x382   :  { %20344 = vst [vmem:[#allocation59_spill] sm:$0xff] %v15760_v26  ;;  %v2130_v21 = vrot.slane %v2129_v34, 1  ;;  %v2140_v25 = vmax.f32 %v2138_v15, %v2139_v33  ;;  %v2247_v40 = vmax.f32 %v15760_v26, 0.0  ;;  %v2143_v15 = vsel %vm1171_vm3, %v15751_v52, -inf }
 0x383   :  { %20345 = vst [vmem:[#allocation60_spill] sm:$0xff] %v15766_v20  ;;  %v2141_v38 = vsel %vm1171_vm3, %v15766_v20, -inf  ;;  %v2245_v46 = vmax.f32 %v15766_v20, 0.0  ;;  %v2145_v9 = vsel %vm1171_vm3, %v15760_v26, -inf }
 0x384   :  { %v2131_v11 = vmax.f32 %v2129_v34, %v2130_v21  ;;  %v2142_v5 = vmax.f32 %v2140_v25, %v2141_v38  ;;  %v2283_v19 = vpack.c.bf16 %v2247_v40, %v2246_v55 }
 0x385   :  { %v12525_v33 = vpop.f32.mrb[56].mxu0  ;;  %v2282_v3 = vpack.c.bf16 %v2245_v46, %v2244_v37 }
 0x386   :  { %v2690_v7 = vmax.f32 %v2131_v11, 0.0  ;;  %v3889_v12 = vpack.c.bf16 %v2131_v11, %v2131_v11  ;;  %v2144_v56 = vmax.f32 %v2142_v5, %v2143_v15  ;;  %v1975_v45 = vpop.f32.mrb[57].mxu0  ;;  %v15783_v16 = vadd.f32 %v12525_v33, %v15316_v6 }
 0x387   :  { %v15786_v13 = vadd.f32 %v15316_v6, %v1975_v45  ;;  %v12526_v34 = vpop.f32.mrb[58].mxu0  ;;  %12587 = vmatprep.mubr.msk.bf16.mxu1 %vm1171_vm3, %v2282_v3 }
 0x388   :  { %20346 = vst [vmem:[#allocation61_spill] sm:$0xff] %v15783_v16  ;;  %v2698_v21 = vpack.c.bf16 %v2690_v7, %v2690_v7  ;;  %v3905_v25 = vunpack.c.l.b16 %v3889_v12  ;;  %v2146_v37 = vmax.f32 %v2144_v56, %v2145_v9  ;;  %v1978_v55 = vpop.f32.mrb[59].mxu0  ;;  %12588 = vmatmul.mubr.msk.bf16.gmra.mrb[180].mxu1 %vm1171_vm3, %v2283_v19  ;;  %v15793_v38 = vadd.f32 %v12526_v34, %v15316_v6 }
 0x389   :  { %20347 = vst [vmem:[#allocation62_spill] sm:$0xff] %v15786_v13  ;;  %v2153_v40 = vsel %vm1171_vm3, %v15786_v13, -inf  ;;  %v15796_v46 = vadd.f32 %v15316_v6, %v1978_v55  ;;  %v2248_v3 = vmax.f32 %v15786_v13, 0.0  ;;  %v2250_v56 = vmax.f32 %v15783_v16, 0.0 }
 0x38a   :  { %20348 = vst [vmem:[#allocation63_spill] sm:$0xff] %v15793_v38  ;;  %v2722_v45 = vunpack.c.l.b16 %v2698_v21  ;;  %v2147_v11 = vrot.slane %v2146_v37, 4  ;;  %v3912_v7 = vsel %vm2733_vm9, %v3905_v25, %v15733_v63  ;;  %v2251_v12 = vmax.f32 %v15793_v38, 0.0 }
 0x38b   :  { %20349 = vst [vmem:[#allocation64_spill] sm:$0xff] %v15796_v46  ;;  %v2154_v9 = vsel %vm1171_vm3, %v15796_v46, -inf  ;;  %v2249_v19 = vmax.f32 %v15796_v46, 0.0  ;;  %v2156_v63 = vsel %vm1171_vm3, %v15783_v16, -inf }
 0x38c   :  { %v2148_v5 = vmax.f32 %v2146_v37, %v2147_v11  ;;  %v2155_v15 = vmax.f32 %v2153_v40, %v2154_v9  ;;  %v2734_v33 = vsel %vm2733_vm9, %v2722_v45, %v15742_v62  ;;  %v2285_v55 = vpack.c.bf16 %v2251_v12, %v2250_v56 }
 0x38d   :  { %v12529_v21 = vpop.f32.mrb[60].mxu0  ;;  %v2284_v25 = vpack.c.bf16 %v2249_v19, %v2248_v3  ;;  %v2158_v62 = vsel %vm1171_vm3, %v15793_v38, -inf }
 0x38e   :  { %v2149_v26 = vrot.slane %v2148_v5, 2  ;;  %v2157_v28 = vmax.f32 %v2155_v15, %v2156_v63  ;;  %v15815_v37 = vadd.f32 %v12529_v21, %v15316_v6  ;;  %v1991_v40 = vpop.f32.mrb[61].mxu0 }
 0x38f   :  { %v15820_v45 = vadd.f32 %v15316_v6, %v1991_v40  ;;  %v12530_v11 = vpop.f32.mrb[62].mxu0  ;;  %12591 = vmatprep.mubr.msk.bf16.mxu1 %vm1171_vm3, %v2284_v25 }
 0x390   :  { %20350 = vst [vmem:[#allocation65_spill] sm:$0xff] %v15815_v37  ;;  %v2150_v3 = vmax.f32 %v2148_v5, %v2149_v26  ;;  %v2159_v9 = vmax.f32 %v2157_v28, %v2158_v62  ;;  %v15824_v19 = vadd.f32 %v12530_v11, %v15316_v6  ;;  %v1994_v56 = vpop.f32.mrb[63].mxu0  ;;  %12592 = vmatmul.mubr.msk.bf16.gmra.mrb[184].mxu1 %vm1171_vm3, %v2285_v55  ;;  %v2254_v28 = vmax.f32 %v15815_v37, 0.0 }
 0x391   :  { %20351 = vst [vmem:[#allocation66_spill] sm:$0xff] %v15820_v45  ;;  %v2160_v12 = vsel %vm1171_vm3, %v15820_v45, -inf  ;;  %v15830_v15 = vadd.f32 %v15316_v6, %v1994_v56  ;;  %v2252_v63 = vmax.f32 %v15820_v45, 0.0  ;;  %v15903_v6 = vld [vmem:[%s19910_s7 + $0x20] sm:$0xff]  }
 0x392   :  { %20352 = vst [vmem:[#allocation67_spill] sm:$0xff] %v15824_v19  ;;  %v2151_v21 = vrot.slane %v2150_v3, 1  ;;  %v2161_v40 = vmax.f32 %v2159_v9, %v2160_v12  ;;  %v2255_v55 = vmax.f32 %v15824_v19, 0.0  ;;  %v2164_v9 = vsel %vm1171_vm3, %v15815_v37, -inf }
 0x393   :  { %20353 = vst [vmem:[#allocation68_spill] sm:$0xff] %v15830_v15  ;;  %v2162_v5 = vsel %vm1171_vm3, %v15830_v15, -inf  ;;  %v2253_v25 = vmax.f32 %v15830_v15, 0.0  ;;  %v2166_v16 = vsel %vm1171_vm3, %v15824_v19, -inf }
 0x394   :  { %v2152_v62 = vmax.f32 %v2150_v3, %v2151_v21  ;;  %v2163_v11 = vmax.f32 %v2161_v40, %v2162_v5  ;;  %v2287_v12 = vpack.c.bf16 %v2255_v55, %v2254_v28  ;;  %v20354_v3 = vmov 0.0  }
 0x395   :  { %v2286_v56 = vpack.c.bf16 %v2253_v25, %v2252_v63 }
 0x396   :  { %v2691_v26 = vmax.f32 %v2152_v62, 0.0  ;;  %v3890_v52 = vpack.c.bf16 %v2152_v62, %v2152_v62  ;;  %v2165_v34 = vmax.f32 %v2163_v11, %v2164_v9 }
 0x397   :  { %12595 = vmatprep.mubr.msk.bf16.mxu1 %vm1171_vm3, %v2286_v56 }
 0x398   :  { %v2699_v38 = vpack.c.bf16 %v2691_v26, %v2691_v26  ;;  %v3906_v13 = vunpack.c.l.b16 %v3890_v52  ;;  %v2167_v46 = vmax.f32 %v2165_v34, %v2166_v16  ;;  %12596 = vmatmul.mubr.msk.bf16.gmra.mrb[188].mxu1 %vm1171_vm3, %v2287_v12 }
 0x399   :  { %12603 = vmatprep.mubr.msk.bf16.mxu1 %vm14400_vm4, %v20354_v3 }
 0x39a   :  { %v2723_v21 = vunpack.c.l.b16 %v2699_v38  ;;  %v2168_v63 = vrot.slane %v2167_v46, 4  ;;  %v3913_v40 = vsel %vm2735_vm10, %v3906_v13, %v3912_v7 }
 0x39c   :  { %v2169_v28 = vmax.f32 %v2167_v46, %v2168_v63  ;;  %v2736_v5 = vsel %vm2735_vm10, %v2723_v21, %v2734_v33 }
 0x39e   :  { %v2170_v25 = vrot.slane %v2169_v28, 2 }
 0x3a0   :  { %v2171_v55 = vmax.f32 %v2169_v28, %v2170_v25 }
 0x3a2   :  { %v2172_v62 = vrot.slane %v2171_v55, 1 }
 0x3a4   :  { %v2173_v11 = vmax.f32 %v2171_v55, %v2172_v62 }
 0x3a6   :  { %v3891_v9 = vpack.c.bf16 %v2173_v11, %v2173_v11  ;;  %v2692_v26 = vmax.f32 %v2173_v11, 0.0 }
 0x3a8   :  { %v3907_v52 = vunpack.c.l.b16 %v3891_v9  ;;  %v2700_v16 = vpack.c.bf16 %v2692_v26, %v2692_v26 }
 0x3aa   :  { %v3914_v34 = vsel %vm2737_vm11, %v3907_v52, %v3913_v40  ;;  %v2724_v56 = vunpack.c.l.b16 %v2700_v16  ;;  %v14336_v52 = vld [vmem:[%s19908_s5 + $0x10] sm:$0xff]  }
 0x3ab   :  { %v3915_v12 = vpack.c.b16 %v3914_v34, %v3914_v34  ;;  %12607 = vmatprep.subr.bf16.mxu1 %v14336_v52 }
 0x3ac   :  { %v2738_v38 = vsel %vm2737_vm11, %v2724_v56, %v2736_v5  ;;  %v14337_v56 = vld [vmem:[%s19908_s5 + $0x18] sm:$0xff]  }
 0x3ad   :  { %12748 = vmatmul.mubr.msk.bf16.vlgmr.msra.gmra.mrb[64].mxu0 %vm1171_vm3, %v3915_v12  ;;  %v2739_v13 = vpack.c.b16 %v2738_v38, %v2738_v38 }
 0x3af   :  { %12604 = vmatmul.mubr.msk.bf16.vlgmr.msra.gmra.mrb[192].mxu1 %vm1171_vm3, %v2739_v13 }
 0x3b0   :  { %12608 = vmatpush3.bf16.msra.mxu1 %v14336_v52 }
 0x3b1   :  { %12609 = vmatprep.subr.bf16.mxu1 %v14337_v56 }
 0x3b4   :  { %12610 = vmatpush3.bf16.msra.mxu1 %v14337_v56 }
 0x3b5   :  { %12675 = vmatprep.subr.bf16.mxu1 %v15903_v6 }
 0x3f3   :  { %v15856_v46 = vpop.f32.mrb[128].mxu1 }
 0x3f4   :  { %v15858_v7 = vpop.f32.mrb[129].mxu1 }
 0x3f5   :  { %v15860_v33 = vpop.f32.mrb[130].mxu1 }
 0x3f6   :  { %v15862_v21 = vpop.f32.mrb[131].mxu1 }
 0x3fb   :  { %v15864_v63 = vpop.f32.mrb[132].mxu1 }
 0x3fc   :  { %v15866_v40 = vpop.f32.mrb[133].mxu1 }
 0x3fd   :  { %v15868_v28 = vpop.f32.mrb[134].mxu1 }
 0x3fe   :  { %v15870_v5 = vpop.f32.mrb[135].mxu1 }
 0x403   :  { %v15872_v25 = vpop.f32.mrb[136].mxu1 }
 0x404   :  { %v15874_v55 = vpop.f32.mrb[137].mxu1 }
 0x405   :  { %v15876_v62 = vpop.f32.mrb[138].mxu1 }
 0x406   :  { %v15878_v11 = vpop.f32.mrb[139].mxu1 }
 0x40b   :  { %v15880_v9 = vpop.f32.mrb[140].mxu1 }
 0x40c   :  { %v15882_v26 = vpop.f32.mrb[141].mxu1 }
 0x40d   :  { %v15887_v16 = vpop.f32.mrb[142].mxu1 }
 0x40e   :  { %v15889_v34 = vpop.f32.mrb[143].mxu1 }
 0x413   :  { %v15894_v12 = vpop.f32.mrb[144].mxu1 }
 0x414   :  { %v15896_v38 = vpop.f32.mrb[145].mxu1 }
 0x415   :  { %v15898_v13 = vpop.f32.mrb[146].mxu1 }
 0x416   :  { %v15905_v37 = vpop.f32.mrb[147].mxu1 }
 0x41b   :  { %v15908_v52 = vpop.f32.mrb[148].mxu1 }
 0x41c   :  { %v15910_v19 = vpop.f32.mrb[149].mxu1 }
 0x41d   :  { %v15912_v45 = vpop.f32.mrb[150].mxu1 }
 0x41e   :  { %v15914_v56 = vpop.f32.mrb[151].mxu1 }
 0x423   :  { %v15916_v15 = vpop.f32.mrb[152].mxu1 }
 0x424   :  { %v15918_v20 = vpop.f32.mrb[153].mxu1 }
 0x425   :  { %v15920_v2 = vpop.f32.mrb[154].mxu1 }
 0x426   :  { %v15922_v23 = vpop.f32.mrb[155].mxu1 }
 0x42b   :  { %v15924_v44 = vpop.f32.mrb[156].mxu1 }
 0x42c   :  { %v15926_v4 = vpop.f32.mrb[157].mxu1 }
 0x42d   :  { %v15928_v42 = vpop.f32.mrb[158].mxu1 }
 0x42e   :  { %v15930_v60 = vpop.f32.mrb[159].mxu1 }
 0x433   :  { %v15932_v29 = vpop.f32.mrb[160].mxu1 }
 0x434   :  { %v15934_v43 = vpop.f32.mrb[161].mxu1 }
 0x435   :  { %v15936_v27 = vpop.f32.mrb[162].mxu1 }
 0x436   :  { %v15938_v35 = vpop.f32.mrb[163].mxu1 }
 0x43b   :  { %v15940_v14 = vpop.f32.mrb[164].mxu1 }
 0x43c   :  { %v15942_v59 = vpop.f32.mrb[165].mxu1 }
 0x43d   :  { %v15944_v31 = vpop.f32.mrb[166].mxu1 }
 0x43e   :  { %v15946_v54 = vpop.f32.mrb[167].mxu1 }
 0x443   :  { %v15948_v41 = vpop.f32.mrb[168].mxu1 }
 0x444   :  { %20355 = vst [vmem:[#allocation69_spill] sm:$0xff] %v15948_v41  ;;  %v15950_v18 = vpop.f32.mrb[169].mxu1 }
 0x445   :  { %v15952_v32 = vpop.f32.mrb[170].mxu1 }
 0x446   :  { %20356 = vst [vmem:[#allocation70_spill] sm:$0xff] %v15952_v32  ;;  %v15954_v17 = vpop.f32.mrb[171].mxu1 }
 0x447   :  { %20357 = vst [vmem:[#allocation71_spill] sm:$0xff] %v15954_v17 }
 0x44b   :  { %v15956_v22 = vpop.f32.mrb[172].mxu1 }
 0x44c   :  { %20358 = vst [vmem:[#allocation72_spill] sm:$0xff] %v15956_v22  ;;  %v15958_v1 = vpop.f32.mrb[173].mxu1 }
 0x44d   :  { %20359 = vst [vmem:[#allocation73_spill] sm:$0xff] %v15958_v1  ;;  %v15960_v58 = vpop.f32.mrb[174].mxu1 }
 0x44e   :  { %20360 = vst [vmem:[#allocation74_spill] sm:$0xff] %v15960_v58  ;;  %v15962_v47 = vpop.f32.mrb[175].mxu1 }
 0x44f   :  { %20361 = vst [vmem:[#allocation75_spill] sm:$0xff] %v15962_v47 }
 0x453   :  { %v15964_v8 = vpop.f32.mrb[176].mxu1 }
 0x454   :  { %20362 = vst [vmem:[#allocation76_spill] sm:$0xff] %v15964_v8  ;;  %v15966_v53 = vpop.f32.mrb[177].mxu1  ;;  %v2800_v8 = vlaneseq }
 0x455   :  { %20363 = vst [vmem:[#allocation77_spill] sm:$0xff] %v15966_v53  ;;  %v15968_v61 = vpop.f32.mrb[178].mxu1 }
 0x456   :  { %20364 = vst [vmem:[#allocation78_spill] sm:$0xff] %v15968_v61  ;;  %v15970_v51 = vpop.f32.mrb[179].mxu1 }
 0x457   :  { %20365 = vst [vmem:[#allocation79_spill] sm:$0xff] %v15970_v51  ;;  %v2801_v51 = vshrl.u32 %v2800_v8, 7 }
 0x45b   :  { %v15972_v0 = vpop.f32.mrb[180].mxu1 }
 0x45c   :  { %20366 = vst [vmem:[#allocation80_spill] sm:$0xff] %v15972_v0  ;;  %v15974_v49 = vpop.f32.mrb[181].mxu1 }
 0x45d   :  { %20367 = vst [vmem:[#allocation81_spill] sm:$0xff] %v15974_v49  ;;  %v15976_v10 = vpop.f32.mrb[182].mxu1  ;;  %v14401_v49 = vmov 1966171168  }
 0x45e   :  { %20368 = vst [vmem:[#allocation82_spill] sm:$0xff] %v15976_v10  ;;  %v15978_v30 = vpop.f32.mrb[183].mxu1  ;;  %v2798_v10 = vunpack.c.l.s4 %v14401_v49 }
 0x45f   :  { %20369 = vst [vmem:[#allocation83_spill] sm:$0xff] %v15978_v30 }
 0x460   :  { %v2799_v30 = vunpack.c.0.s8 %v2798_v10 }
 0x463   :  { %v15980_v24 = vpop.f32.mrb[184].mxu1 }
 0x464   :  { %20370 = vst [vmem:[#allocation84_spill] sm:$0xff] %v15980_v24  ;;  %v15982_v50 = vpop.f32.mrb[185].mxu1 }
 0x465   :  { %20371 = vst [vmem:[#allocation85_spill] sm:$0xff] %v15982_v50  ;;  %v15984_v57 = vpop.f32.mrb[186].mxu1 }
 0x466   :  { %20372 = vst [vmem:[#allocation86_spill] sm:$0xff] %v15984_v57  ;;  %v15986_v36 = vpop.f32.mrb[187].mxu1  ;;  %v11198_v57 = vld [vmem:[%s19907_s4 + $0x1] ss:$0 sm:$0xff] }
 0x467   :  { %20373 = vst [vmem:[#allocation87_spill] sm:$0xff] %v15986_v36 }
 0x46b   :  { %v15988_v48 = vpop.f32.mrb[188].mxu1 }
 0x46c   :  { %20374 = vst [vmem:[#allocation88_spill] sm:$0xff] %v15988_v48  ;;  %v15990_v39 = vpop.f32.mrb[189].mxu1 }
 0x46d   :  { %20375 = vst [vmem:[#allocation89_spill] sm:$0xff] %v15990_v39  ;;  %v15992_v61 = vpop.f32.mrb[190].mxu1 }
 0x46e   :  { %20376 = vst [vmem:[#allocation90_spill] sm:$0xff] %v15992_v61  ;;  %v15994_v0 = vpop.f32.mrb[191].mxu1  ;;  %v16001_v61 = vsub.s32 %v2799_v30, %v2801_v51 }
 0x46f   :  { %20377 = vst [vmem:[#allocation91_spill] sm:$0xff] %v15994_v0 }
 0x470   :  { %20379 = vst [vmem:[#allocation93_spill] sm:$0xff] %v16001_v61 }
 0x480   :  { %v15996_v24 = vpop.f32.mrb[64].mxu0 }
 0x481   :  { %20378 = vst [vmem:[#allocation92_spill] sm:$0xff] %v15996_v24  ;;  %v12749_v36 = vpop.f32.mrb[65].mxu0 }
 0x482   :  { %v2789_v50 = vpop.f32.mrb[192].mxu1  ;;  %v3968_v48 = vpop.f32.mrb[66].mxu0 }
 0x483   :  { %v2790_v53 = vadd.f32 %v11198_v57, %v2789_v50  ;;  %v12605_v39 = vpop.f32.mrb[193].mxu1  ;;  %v12750_v58 = vpop.f32.mrb[67].mxu0  ;;  %v16008_v57 = vsub.s32 0, %v2801_v51 }
 0x484   :  { %v2792_v0 = vpop.f32.mrb[194].mxu1 }
 0x485   :  { %v12606_v22 = vpop.f32.mrb[195].mxu1  ;;  %v2796_v49 = vcombine.high %v2790_v53, %v2790_v53  ;;  %v2803_v10 = vrot.slane %v2790_v53, %v16001_v61  ;;  %20380 = vst [vmem:[#allocation94_spill] sm:$0xff] %v16008_v57 }
 0x487   :  { %v2810_v8 = vrot.slane %v2796_v49, %v16001_v61  ;;  %v2811_v24 = vcombine.high %v2803_v10, %v2803_v10  ;;  %v2819_v1 = vrot.slane %v2803_v10, %v16001_v61 }
 0x489   :  { %v2812_v47 = vcombine.high %v2810_v8, %v2810_v8  ;;  %v2826_v36 = vrot.slane %v2810_v8, %v16001_v61  ;;  %v2833_v48 = vrot.slane %v2811_v24, %v16001_v61  ;;  %v2841_v30 = vcombine.high %v2819_v1, %v2819_v1 }
 0x48a   :  { %v2848_v58 = vrot.slane %v2819_v1, %v16008_v57 }
 0x48b   :  { %v2840_v39 = vrot.slane %v2812_v47, %v16001_v61  ;;  %v2842_v50 = vcombine.high %v2826_v36, %v2826_v36  ;;  %v2843_v0 = vcombine.high %v2833_v48, %v2833_v48  ;;  %v2852_v53 = vrot.slane %v2833_v48, %v16008_v57 }
 0x48c   :  { %v16014_v22 = vrot.slane %v2826_v36, %v16008_v57  ;;  %v16017_v10 = vrot.slane %v2841_v30, %v16008_v57  ;;  %v2885_v1 = vadd.f32 %v2848_v58, %v15858_v7  ;;  %v2886_v8 = vadd.f32 %v2848_v58, %v15862_v21 }
 0x48d   :  { %v2844_v49 = vcombine.high %v2840_v39, %v2840_v39  ;;  %v16020_v24 = vrot.slane %v2843_v0, %v16008_v57  ;;  %v16023_v51 = vrot.slane %v2840_v39, %v16008_v57  ;;  %v16026_v47 = vrot.slane %v2842_v50, %v16008_v57 }
 0x48e   :  { %v2887_v36 = vadd.f32 %v15856_v46, %v2848_v58  ;;  %v2888_v30 = vadd.f32 %v15860_v33, %v2848_v58  ;;  %v2889_v0 = vadd.f32 %v2848_v58, %v15866_v40  ;;  %v2890_v61 = vadd.f32 %v2848_v58, %v15870_v5 }
 0x48f   :  { %20381 = vst [vmem:[#allocation95_spill] sm:$0xff] %v16023_v51  ;;  %20382 = vst [vmem:[#allocation96_spill] sm:$0xff] %v16026_v47  ;;  %v16032_v48 = vrot.slane %v2844_v49, %v16008_v57  ;;  %v2949_v39 = vmax.f32 %v2885_v1, 0.0  ;;  %v2950_v32 = vmax.f32 %v2886_v8, 0.0  ;;  %v2891_v50 = vadd.f32 %v15864_v63, %v2848_v58  ;;  %v14339_v63 = vld [vmem:[%s19910_s7 + $0x28] sm:$0xff]  }
 0x490   :  { %v2951_v41 = vmax.f32 %v2887_v36, 0.0  ;;  %v2952_v47 = vmax.f32 %v2888_v30, 0.0  ;;  %v2953_v7 = vmax.f32 %v2889_v0, 0.0  ;;  %v2954_v17 = vmax.f32 %v2890_v61, 0.0 }
 0x491   :  { %20383 = vst [vmem:[#allocation97_spill] sm:$0xff] %v16032_v48  ;;  %v2892_v21 = vadd.f32 %v15868_v28, %v2848_v58  ;;  %v3018_v46 = vpack.c.bf16 %v2950_v32, %v2949_v39  ;;  %v2955_v51 = vmax.f32 %v2891_v50, 0.0  ;;  %v2893_v49 = vadd.f32 %v2852_v53, %v15874_v55 }
 0x492   :  { %v2894_v33 = vadd.f32 %v2852_v53, %v15878_v11  ;;  %v3019_v57 = vpack.c.bf16 %v2952_v47, %v2951_v41  ;;  %v3020_v40 = vpack.c.bf16 %v2954_v17, %v2953_v7  ;;  %v2895_v5 = vadd.f32 %v15872_v25, %v2852_v53 }
 0x493   :  { %v2956_v48 = vmax.f32 %v2892_v21, 0.0  ;;  %12611 = vmatprep.mubr.msk.bf16.mxu1 %vm1171_vm3, %v3018_v46  ;;  %v2957_v61 = vmax.f32 %v2893_v49, 0.0  ;;  %v2896_v32 = vadd.f32 %v15876_v62, %v2852_v53  ;;  %v2897_v28 = vadd.f32 %v2852_v53, %v15882_v26 }
 0x494   :  { %v2958_v1 = vmax.f32 %v2894_v33, 0.0  ;;  %12612 = vmatmul.mubr.msk.bf16.vlgmr.msra.gmra.mrb[196].mxu1 %vm1171_vm3, %v3019_v57  ;;  %v2959_v41 = vmax.f32 %v2895_v5, 0.0  ;;  %v2898_v17 = vadd.f32 %v2852_v53, %v15889_v34  ;;  %v2899_v25 = vadd.f32 %v15880_v9, %v2852_v53 }
 0x495   :  { %v3021_v55 = vpack.c.bf16 %v2956_v48, %v2955_v51  ;;  %12676 = vmatpush3.bf16.msra.mxu1 %v15903_v6  ;;  %12615 = vmatprep.mubr.msk.bf16.mxu1 %vm1171_vm3, %v3020_v40  ;;  %v2960_v58 = vmax.f32 %v2896_v32, 0.0  ;;  %v2961_v47 = vmax.f32 %v2897_v28, 0.0  ;;  %v2900_v8 = vadd.f32 %v15887_v16, %v2852_v53 }
 0x496   :  { %v3022_v11 = vpack.c.bf16 %v2958_v1, %v2957_v61  ;;  %v2962_v62 = vmax.f32 %v2898_v17, 0.0  ;;  %v2963_v36 = vmax.f32 %v2899_v25, 0.0  ;;  %v2901_v26 = vadd.f32 %v16017_v10, %v15896_v38  ;;  %12677 = vmatprep.subr.bf16.mxu1 %v14339_v63 }
 0x497   :  { %v2902_v57 = vadd.f32 %v16017_v10, %v15905_v37  ;;  %v3023_v34 = vpack.c.bf16 %v2960_v58, %v2959_v41  ;;  %v2964_v9 = vmax.f32 %v2900_v8, 0.0  ;;  %v2903_v6 = vadd.f32 %v15894_v12, %v16017_v10 }
 0x498   :  { %v2904_v51 = vadd.f32 %v15898_v13, %v16017_v10  ;;  %v3024_v48 = vpack.c.bf16 %v2962_v62, %v2961_v47  ;;  %v2965_v30 = vmax.f32 %v2901_v26, 0.0  ;;  %v2905_v53 = vadd.f32 %v16017_v10, %v15910_v19 }
 0x499   :  { %v2966_v16 = vmax.f32 %v2902_v57, 0.0  ;;  %v16064_v0 = vpack.c.bf16 %v2964_v9, %v2963_v36  ;;  %v2967_v38 = vmax.f32 %v2903_v6, 0.0  ;;  %v2906_v37 = vadd.f32 %v16017_v10, %v15914_v56  ;;  %12678 = vmatpush3.bf16.msra.mxu1 %v14339_v63  ;;  %v20384_v9 = vld [vmem:[#allocation95_spill] sm:$0xff] }
 0x49a   :  { %v2968_v39 = vmax.f32 %v2904_v51, 0.0  ;;  %v2969_v12 = vmax.f32 %v2905_v53, 0.0  ;;  %v2907_v13 = vadd.f32 %v15908_v52, %v16017_v10  ;;  %v2908_v7 = vadd.f32 %v15912_v45, %v16017_v10  ;;  %12963 = vmatprep.subr.bf16.mxu1 %v20354_v3 }
 0x49b   :  { %v16068_v50 = vpack.c.bf16 %v2966_v16, %v2965_v30  ;;  %v2970_v21 = vmax.f32 %v2906_v37, 0.0  ;;  %v2909_v46 = vadd.f32 %v16020_v24, %v15918_v20  ;;  %v2910_v56 = vadd.f32 %v16020_v24, %v15922_v23  ;;  %v20386_v16 = vld [vmem:[#allocation69_spill] sm:$0xff] }
 0x49c   :  { %v16075_v19 = vpack.c.bf16 %v2968_v39, %v2967_v38  ;;  %12616 = vmatmul.mubr.msk.bf16.gmra.mrb[200].mxu1 %vm1171_vm3, %v3021_v55  ;;  %v2971_v49 = vmax.f32 %v2907_v13, 0.0  ;;  %v2972_v33 = vmax.f32 %v2908_v7, 0.0  ;;  %v2911_v52 = vadd.f32 %v15916_v15, %v16020_v24  ;;  %v20388_v39 = vld [vmem:[#allocation73_spill] sm:$0xff]  ;;  %v20389_v7 = vld [vmem:[#allocation75_spill] sm:$0xff] }
 0x49d   :  { %v2912_v45 = vadd.f32 %v15920_v2, %v16020_v24  ;;  %12619 = vmatprep.mubr.msk.bf16.mxu1 %vm1171_vm3, %v3022_v11  ;;  %v16087_v10 = vpack.c.bf16 %v2970_v21, %v2969_v12  ;;  %v2973_v40 = vmax.f32 %v2909_v46, 0.0  ;;  %v2974_v5 = vmax.f32 %v2910_v56, 0.0 }
 0x49e   :  { %v2913_v20 = vadd.f32 %v16020_v24, %v15926_v4  ;;  %v16091_v23 = vpack.c.bf16 %v2972_v33, %v2971_v49  ;;  %v2975_v63 = vmax.f32 %v2911_v52, 0.0  ;;  %v2914_v1 = vadd.f32 %v16020_v24, %v15930_v60  ;;  %v20390_v49 = vld [vmem:[#allocation72_spill] sm:$0xff]  ;;  %v20391_v52 = vld [vmem:[#allocation74_spill] sm:$0xff] }
 0x49f   :  { %v2976_v61 = vmax.f32 %v2912_v45, 0.0  ;;  %v16095_v15 = vpack.c.bf16 %v2974_v5, %v2973_v40  ;;  %v2915_v2 = vadd.f32 %v15924_v44, %v16020_v24  ;;  %v2916_v28 = vadd.f32 %v15928_v42, %v16020_v24 }
 0x4a0   :  { %v2977_v32 = vmax.f32 %v2913_v20, 0.0  ;;  %v2978_v41 = vmax.f32 %v2914_v1, 0.0  ;;  %v2917_v4 = vadd.f32 %v16014_v22, %v15934_v43  ;;  %v2918_v17 = vadd.f32 %v16014_v22, %v15938_v35  ;;  %v20392_v20 = vld [vmem:[#allocation77_spill] sm:$0xff]  ;;  %v20394_v1 = vld [vmem:[#allocation79_spill] sm:$0xff] }
 0x4a1   :  { %v16101_v55 = vpack.c.bf16 %v2976_v61, %v2975_v63  ;;  %v2979_v25 = vmax.f32 %v2915_v2, 0.0  ;;  %v2980_v60 = vmax.f32 %v2916_v28, 0.0  ;;  %v2919_v11 = vadd.f32 %v15932_v29, %v16014_v22  ;;  %v20393_v63 = vld [vmem:[#allocation96_spill] sm:$0xff] }
 0x4a2   :  { %v2920_v44 = vadd.f32 %v15936_v27, %v16014_v22  ;;  %v16111_v58 = vpack.c.bf16 %v2978_v41, %v2977_v32  ;;  %v2981_v42 = vmax.f32 %v2917_v4, 0.0  ;;  %v2982_v24 = vmax.f32 %v2918_v17, 0.0  ;;  %v20395_v41 = vld [vmem:[#allocation76_spill] sm:$0xff]  ;;  %v20396_v17 = vld [vmem:[#allocation78_spill] sm:$0xff] }
 0x4a3   :  { %v2921_v47 = vadd.f32 %v16014_v22, %v15942_v59  ;;  %v16115_v8 = vpack.c.bf16 %v2980_v60, %v2979_v25  ;;  %v2983_v43 = vmax.f32 %v2919_v11, 0.0  ;;  %v2922_v35 = vadd.f32 %v16014_v22, %v15946_v54  ;;  %v20385_v54 = vld [vmem:[#allocation71_spill] sm:$0xff] }
 0x4a4   :  { %v2984_v62 = vmax.f32 %v2920_v44, 0.0  ;;  %12620 = vmatmul.mubr.msk.bf16.gmra.mrb[204].mxu1 %vm1171_vm3, %v3023_v34  ;;  %v16120_v29 = vpack.c.bf16 %v2982_v24, %v2981_v42  ;;  %v2923_v27 = vadd.f32 %v15940_v14, %v16014_v22  ;;  %v2924_v26 = vadd.f32 %v15944_v31, %v16014_v22  ;;  %v20387_v14 = vld [vmem:[#allocation70_spill] sm:$0xff]  ;;  %v20397_v42 = vld [vmem:[#allocation81_spill] sm:$0xff] }
 0x4a5   :  { %v2985_v36 = vmax.f32 %v2921_v47, 0.0  ;;  %12623 = vmatprep.mubr.msk.bf16.mxu1 %vm1171_vm3, %v3024_v48  ;;  %v2986_v57 = vmax.f32 %v2922_v35, 0.0  ;;  %v2925_v6 = vadd.f32 %v20384_v9, %v15950_v18  ;;  %v2926_v34 = vadd.f32 %v20384_v9, %v20385_v54  ;;  %v20398_v35 = vld [vmem:[#allocation83_spill] sm:$0xff] }
 0x4a6   :  { %v16127_v59 = vpack.c.bf16 %v2984_v62, %v2983_v43  ;;  %v2987_v51 = vmax.f32 %v2923_v27, 0.0  ;;  %v2988_v30 = vmax.f32 %v2924_v26, 0.0  ;;  %v2927_v53 = vadd.f32 %v20386_v16, %v20384_v9 }
 0x4a7   :  { %v2928_v38 = vadd.f32 %v20387_v14, %v20384_v9  ;;  %v16137_v31 = vpack.c.bf16 %v2986_v57, %v2985_v36  ;;  %v2989_v22 = vmax.f32 %v2925_v6, 0.0  ;;  %v2990_v48 = vmax.f32 %v2926_v34, 0.0  ;;  %v20399_v57 = vld [vmem:[#allocation80_spill] sm:$0xff] }
 0x4a8   :  { %v2929_v37 = vadd.f32 %v20384_v9, %v20388_v39  ;;  %v16141_v12 = vpack.c.bf16 %v2988_v30, %v2987_v51  ;;  %v2991_v18 = vmax.f32 %v2927_v53, 0.0  ;;  %v2930_v21 = vadd.f32 %v20384_v9, %v20389_v7  ;;  %v20401_v51 = vld [vmem:[#allocation85_spill] sm:$0xff]  ;;  %v20405_v39 = vld [vmem:[#allocation86_spill] sm:$0xff] }
 0x4a9   :  { %v2992_v13 = vmax.f32 %v2928_v38, 0.0  ;;  %v16145_v46 = vpack.c.bf16 %v2990_v48, %v2989_v22  ;;  %v2931_v33 = vadd.f32 %v20390_v49, %v20384_v9  ;;  %v2932_v45 = vadd.f32 %v20391_v52, %v20384_v9  ;;  %v20400_v9 = vld [vmem:[#allocation82_spill] sm:$0xff]  ;;  %v20402_v30 = vld [vmem:[#allocation97_spill] sm:$0xff]  ;;  %v20404_v22 = vld [vmem:[#allocation84_spill] sm:$0xff] }
 0x4aa   :  { %v2993_v56 = vmax.f32 %v2929_v37, 0.0  ;;  %v2994_v5 = vmax.f32 %v2930_v21, 0.0  ;;  %v2933_v61 = vadd.f32 %v20393_v63, %v20392_v20  ;;  %v2934_v32 = vadd.f32 %v20393_v63, %v20394_v1  ;;  %v20406_v21 = vld [vmem:[#allocation89_spill] sm:$0xff] }
 0x4ab   :  { %v3039_v40 = vpack.c.bf16 %v2992_v13, %v2991_v18  ;;  %v2995_v2 = vmax.f32 %v2931_v33, 0.0  ;;  %v2996_v28 = vmax.f32 %v2932_v45, 0.0  ;;  %v2935_v4 = vadd.f32 %v20395_v41, %v20393_v63  ;;  %v20407_v45 = vld [vmem:[#allocation91_spill] sm:$0xff] }
 0x4ac   :  { %v2936_v25 = vadd.f32 %v20396_v17, %v20393_v63  ;;  %12624 = vmatmul.mubr.msk.bf16.gmra.mrb[208].mxu1 %vm1171_vm3, %v16064_v0  ;;  %v3040_v60 = vpack.c.bf16 %v2994_v5, %v2993_v56  ;;  %v2997_v11 = vmax.f32 %v2933_v61, 0.0  ;;  %v2998_v44 = vmax.f32 %v2934_v32, 0.0  ;;  %v20408_v61 = vld [vmem:[#allocation88_spill] sm:$0xff]  ;;  %v20409_v32 = vld [vmem:[#allocation90_spill] sm:$0xff] }
 0x4ad   :  { %v2937_v24 = vadd.f32 %v20393_v63, %v20397_v42  ;;  %12627 = vmatprep.mubr.msk.bf16.mxu1 %vm1171_vm3, %v16068_v50  ;;  %v3041_v47 = vpack.c.bf16 %v2996_v28, %v2995_v2  ;;  %v2999_v43 = vmax.f32 %v2935_v4, 0.0  ;;  %v2938_v36 = vadd.f32 %v20393_v63, %v20398_v35  ;;  %v20403_v50 = vld [vmem:[#allocation87_spill] sm:$0xff] }
 0x4ae   :  { %v3000_v62 = vmax.f32 %v2936_v25, 0.0  ;;  %v3042_v27 = vpack.c.bf16 %v2998_v44, %v2997_v11  ;;  %v2939_v0 = vadd.f32 %v20399_v57, %v20393_v63  ;;  %v2940_v6 = vadd.f32 %v20400_v9, %v20393_v63  ;;  %v20425_v42 = vld [vmem:[#allocation15_spill] sm:$0xff]  ;;  %v20434_v57 = vld [vmem:[#allocation21_spill] sm:$0xff] }
 0x4af   :  { %v3001_v26 = vmax.f32 %v2937_v24, 0.0  ;;  %v3002_v34 = vmax.f32 %v2938_v36, 0.0  ;;  %v2941_v16 = vadd.f32 %v20402_v30, %v20401_v51  ;;  %v2942_v53 = vadd.f32 %v20402_v30, %v20403_v50  ;;  %v20426_v24 = vld [vmem:[#allocation16_spill] sm:$0xff]  ;;  %v20431_v36 = vld [vmem:[#allocation19_spill] sm:$0xff] }
 0x4b0   :  { %v3043_v54 = vpack.c.bf16 %v3000_v62, %v2999_v43  ;;  %v3003_v14 = vmax.f32 %v2939_v0, 0.0  ;;  %v3004_v38 = vmax.f32 %v2940_v6, 0.0  ;;  %v2943_v48 = vadd.f32 %v20404_v22, %v20402_v30  ;;  %v20428_v43 = vld [vmem:[#allocation17_spill] sm:$0xff]  ;;  %v20429_v62 = vld [vmem:[#allocation18_spill] sm:$0xff]  ;;  %v20437_v6 = vld [vmem:[#allocation23_spill] sm:$0xff] }
 0x4b1   :  { %v2944_v37 = vadd.f32 %v20405_v39, %v20402_v30  ;;  %v3044_v18 = vpack.c.bf16 %v3002_v34, %v3001_v26  ;;  %v3005_v13 = vmax.f32 %v2941_v16, 0.0  ;;  %v3006_v7 = vmax.f32 %v2942_v53, 0.0  ;;  %v20435_v0 = vld [vmem:[#allocation22_spill] sm:$0xff]  ;;  %v20440_v51 = vld [vmem:[#allocation28_spill] sm:$0xff]  ;;  %v20443_v50 = vld [vmem:[#allocation27_spill] sm:$0xff] }
 0x4b2   :  { %v2945_v56 = vadd.f32 %v20402_v30, %v20406_v21  ;;  %v3045_v49 = vpack.c.bf16 %v3004_v38, %v3003_v14  ;;  %v3007_v33 = vmax.f32 %v2943_v48, 0.0  ;;  %v2946_v5 = vadd.f32 %v20402_v30, %v20407_v45  ;;  %v20444_v53 = vld [vmem:[#allocation25_spill] sm:$0xff]  ;;  %v20446_v38 = vld [vmem:[#allocation32_spill] sm:$0xff]  ;;  %v20447_v22 = vld [vmem:[#allocation30_spill] sm:$0xff] }
 0x4b3   :  { %v3008_v52 = vmax.f32 %v2944_v37, 0.0  ;;  %v3046_v20 = vpack.c.bf16 %v3006_v7, %v3005_v13  ;;  %v2947_v1 = vadd.f32 %v20408_v61, %v20402_v30  ;;  %v2948_v2 = vadd.f32 %v20409_v32, %v20402_v30  ;;  %v20441_v30 = vld [vmem:[#allocation26_spill] sm:$0xff]  ;;  %v20449_v39 = vld [vmem:[#allocation31_spill] sm:$0xff]  ;;  %v20450_v37 = vld [vmem:[#allocation29_spill] sm:$0xff] }
 0x4b4   :  { %v3009_v63 = vmax.f32 %v2945_v56, 0.0  ;;  %12628 = vmatmul.mubr.msk.bf16.gmra.mrb[212].mxu1 %vm1171_vm3, %v16075_v19  ;;  %v3010_v41 = vmax.f32 %v2946_v5, 0.0  ;;  %v20410_v19 = vld [vmem:[#allocation5_spill] sm:$0xff]  ;;  %v20430_v35 = vpack.c.bf16 %v20428_v43, %v20429_v62  ;;  %v20436_v9 = vpack.c.bf16 %v20434_v57, %v20435_v0  ;;  %v20452_v13 = vld [vmem:[#allocation36_spill] sm:$0xff]  ;;  %v20453_v7 = vld [vmem:[#allocation34_spill] sm:$0xff] }
 0x4b5   :  { %v3047_v28 = vpack.c.bf16 %v3008_v52, %v3007_v33  ;;  %12631 = vmatprep.mubr.msk.bf16.mxu1 %vm1171_vm3, %v16087_v10  ;;  %v3011_v4 = vmax.f32 %v2947_v1, 0.0  ;;  %v3012_v17 = vmax.f32 %v2948_v2, 0.0  ;;  %v20411_v10 = vld [vmem:[#allocation6_spill] sm:$0xff]  ;;  %v20442_v16 = vpack.c.bf16 %v20440_v51, %v20441_v30  ;;  %v20455_v56 = vld [vmem:[#allocation35_spill] sm:$0xff]  ;;  %v20458_v52 = vld [vmem:[#allocation40_spill] sm:$0xff] }
 0x4b6   :  { %v3048_v25 = vpack.c.bf16 %v3010_v41, %v3009_v63  ;;  %v20445_v14 = vpack.c.bf16 %v20443_v50, %v20444_v53  ;;  %v20448_v48 = vpack.c.bf16 %v20446_v38, %v20447_v22  ;;  %v20454_v21 = vpack.c.bf16 %v20452_v13, %v20453_v7  ;;  %v20459_v45 = vld [vmem:[#allocation38_spill] sm:$0xff]  ;;  %v20462_v63 = vld [vmem:[#allocation37_spill] sm:$0xff]  ;;  %v20464_v1 = vld [vmem:[#allocation44_spill] sm:$0xff] }
 0x4b7   :  { %v3049_v11 = vpack.c.bf16 %v3012_v17, %v3011_v4  ;;  %v20460_v5 = vpack.c.bf16 %v20458_v52, %v20459_v45  ;;  %v20465_v32 = vld [vmem:[#allocation42_spill] sm:$0xff]  ;;  %v20468_v41 = vld [vmem:[#allocation41_spill] sm:$0xff]  ;;  %v20470_v17 = vld [vmem:[#allocation48_spill] sm:$0xff] }
 0x4b8   :  { %v20466_v2 = vpack.c.bf16 %v20464_v1, %v20465_v32  ;;  %v14341_v62 = vld [vmem:[%s19906_s3 + $0x48] sm:$0xff]   ;;  %v20495_v57 = vld [vmem:[#allocation62_spill] sm:$0xff]  ;;  %v20507_v38 = vld [vmem:[#allocation92_spill] sm:$0xff] }
 0x4b9   :  { %v20501_v51 = vld [vmem:[#allocation66_spill] sm:$0xff]  ;;  %v20504_v50 = vld [vmem:[#allocation65_spill] sm:$0xff] }
 0x4bc   :  { %12632 = vmatmul.mubr.msk.bf16.gmra.mrb[216].mxu1 %vm1171_vm3, %v16091_v23  ;;  %v20412_v23 = vpack.c.bf16 %v20410_v19, %v20411_v10  ;;  %v20473_v19 = vld [vmem:[#allocation47_spill] sm:$0xff]  ;;  %v20474_v10 = vld [vmem:[#allocation45_spill] sm:$0xff] }
 0x4bd   :  { %12635 = vmatprep.mubr.msk.bf16.mxu1 %vm1171_vm3, %v16095_v15  ;;  %v20413_v15 = vld [vmem:[#allocation7_spill] sm:$0xff] }
 0x4c4   :  { %12636 = vmatmul.mubr.msk.bf16.gmra.mrb[220].mxu1 %vm1171_vm3, %v16101_v55  ;;  %v20414_v55 = vld [vmem:[#allocation8_spill] sm:$0xff] }
 0x4c5   :  { %12639 = vmatprep.mubr.msk.bf16.mxu1 %vm1171_vm3, %v16111_v58  ;;  %v20415_v58 = vpack.c.bf16 %v20413_v15, %v20414_v55  ;;  %v20476_v15 = vld [vmem:[#allocation52_spill] sm:$0xff]  ;;  %v20477_v55 = vld [vmem:[#allocation50_spill] sm:$0xff] }
 0x4cc   :  { %12640 = vmatmul.mubr.msk.bf16.gmra.mrb[224].mxu1 %vm1171_vm3, %v16115_v8  ;;  %v20416_v8 = vld [vmem:[#allocation9_spill] sm:$0xff] }
 0x4cd   :  { %12643 = vmatprep.mubr.msk.bf16.mxu1 %vm1171_vm3, %v16120_v29  ;;  %v20417_v29 = vld [vmem:[#allocation10_spill] sm:$0xff] }
 0x4d4   :  { %12644 = vmatmul.mubr.msk.bf16.gmra.mrb[228].mxu1 %vm1171_vm3, %v16127_v59  ;;  %v20418_v59 = vpack.c.bf16 %v20416_v8, %v20417_v29  ;;  %v20479_v8 = vld [vmem:[#allocation51_spill] sm:$0xff]  ;;  %v20480_v29 = vld [vmem:[#allocation49_spill] sm:$0xff] }
 0x4d5   :  { %12647 = vmatprep.mubr.msk.bf16.mxu1 %vm1171_vm3, %v16137_v31  ;;  %v20419_v31 = vld [vmem:[#allocation11_spill] sm:$0xff] }
 0x4dc   :  { %12648 = vmatmul.mubr.msk.bf16.gmra.mrb[232].mxu1 %vm1171_vm3, %v16141_v12  ;;  %v20420_v12 = vld [vmem:[#allocation12_spill] sm:$0xff] }
 0x4dd   :  { %12651 = vmatprep.mubr.msk.bf16.mxu1 %vm1171_vm3, %v16145_v46  ;;  %v20421_v46 = vpack.c.bf16 %v20419_v31, %v20420_v12  ;;  %v20482_v31 = vld [vmem:[#allocation56_spill] sm:$0xff]  ;;  %v20483_v12 = vld [vmem:[#allocation54_spill] sm:$0xff] }
 0x4e4   :  { %12652 = vmatmul.mubr.msk.bf16.gmra.mrb[236].mxu1 %vm1171_vm3, %v3039_v40  ;;  %v20422_v40 = vld [vmem:[#allocation13_spill] sm:$0xff] }
 0x4e5   :  { %12655 = vmatprep.mubr.msk.bf16.mxu1 %vm1171_vm3, %v3040_v60  ;;  %v20423_v60 = vld [vmem:[#allocation14_spill] sm:$0xff] }
 0x4e6   :  { %v20424_v44 = vpack.c.bf16 %v20422_v40, %v20423_v60  ;;  %v14340_v40 = vld [vmem:[%s19906_s3 + $0x40] sm:$0xff]   ;;  %v20485_v60 = vld [vmem:[#allocation55_spill] sm:$0xff] }
 0x4e7   :  { %12751 = vmatprep.subr.bf16.mxu0 %v14340_v40 }
 0x4e8   :  { %12752 = vmatpush3.bf16.msra.mxu0 %v14340_v40 }
 0x4e9   :  { %12753 = vmatprep.subr.bf16.mxu0 %v14341_v62 }
 0x4ec   :  { %12656 = vmatmul.mubr.msk.bf16.gmra.mrb[240].mxu1 %vm1171_vm3, %v3041_v47  ;;  %v20427_v47 = vpack.c.bf16 %v20425_v42, %v20426_v24  ;;  %v20488_v24 = vld [vmem:[#allocation60_spill] sm:$0xff]  ;;  %12754 = vmatpush3.bf16.msra.mxu0 %v14341_v62 }
 0x4ed   :  { %12659 = vmatprep.mubr.msk.bf16.mxu1 %vm1171_vm3, %v3042_v27  ;;  %v20432_v27 = vld [vmem:[#allocation20_spill] sm:$0xff]  ;;  %12819 = vmatprep.subr.bf16.mxu0 %v20354_v3 }
 0x4ee   :  { %v20433_v26 = vpack.c.bf16 %v20431_v36, %v20432_v27  ;;  %v20492_v36 = vld [vmem:[#allocation57_spill] sm:$0xff] }
 0x4f4   :  { %12660 = vmatmul.mubr.msk.bf16.gmra.mrb[244].mxu1 %vm1171_vm3, %v3043_v54  ;;  %v20438_v54 = vld [vmem:[#allocation24_spill] sm:$0xff] }
 0x4f5   :  { %12663 = vmatprep.mubr.msk.bf16.mxu1 %vm1171_vm3, %v3044_v18  ;;  %v20439_v34 = vpack.c.bf16 %v20437_v6, %v20438_v54  ;;  %v20451_v18 = vpack.c.bf16 %v20449_v39, %v20450_v37  ;;  %v20498_v6 = vld [vmem:[#allocation61_spill] sm:$0xff]  ;;  %v16367_v39 = vld [vmem:[%s19909_s6 + $0x1] ss:$0 sm:$0xff] }
 0x4fc   :  { %12664 = vmatmul.mubr.msk.bf16.gmra.mrb[248].mxu1 %vm1171_vm3, %v3045_v49  ;;  %v20456_v49 = vld [vmem:[#allocation33_spill] sm:$0xff] }
 0x4fd   :  { %12667 = vmatprep.mubr.msk.bf16.mxu1 %vm1171_vm3, %v3046_v20  ;;  %v20457_v33 = vpack.c.bf16 %v20455_v56, %v20456_v49  ;;  %v20461_v20 = vld [vmem:[#allocation39_spill] sm:$0xff] }
 0x4fe   :  { %v20463_v61 = vpack.c.bf16 %v20461_v20, %v20462_v63 }
 0x504   :  { %12668 = vmatmul.mubr.msk.bf16.gmra.mrb[252].mxu1 %vm1171_vm3, %v3047_v28  ;;  %v20467_v28 = vld [vmem:[#allocation43_spill] sm:$0xff] }
 0x505   :  { %12671 = vmatprep.mubr.msk.bf16.mxu1 %vm1171_vm3, %v3048_v25  ;;  %v20469_v4 = vpack.c.bf16 %v20467_v28, %v20468_v41  ;;  %v20471_v25 = vld [vmem:[#allocation46_spill] sm:$0xff] }
 0x50c   :  { %12672 = vmatmul.mubr.msk.bf16.gmra.mrb[0].mxu1 %vm1171_vm3, %v3049_v11  ;;  %v20472_v11 = vpack.c.bf16 %v20470_v17, %v20471_v25 }
 0x50d   :  { %12679 = vmatprep.mubr.msk.bf16.mxu1 %vm1171_vm3, %v20412_v23  ;;  %v20475_v23 = vpack.c.bf16 %v20473_v19, %v20474_v10 }
 0x514   :  { %12680 = vmatmul.mubr.msk.bf16.vlgmr.msra.gmra.mrb[196].mxu1 %vm1171_vm3, %v20415_v58  ;;  %v20478_v58 = vpack.c.bf16 %v20476_v15, %v20477_v55 }
 0x515   :  { %12683 = vmatprep.mubr.msk.bf16.mxu1 %vm1171_vm3, %v20418_v59  ;;  %v20481_v59 = vpack.c.bf16 %v20479_v8, %v20480_v29 }
 0x51c   :  { %12684 = vmatmul.mubr.msk.bf16.gmra.mrb[200].mxu1 %vm1171_vm3, %v20421_v46  ;;  %v20484_v46 = vpack.c.bf16 %v20482_v31, %v20483_v12  ;;  %v14342_v31 = vld [vmem:[%s19906_s3 + $0x50] sm:$0xff]  }
 0x51d   :  { %12687 = vmatprep.mubr.msk.bf16.mxu1 %vm1171_vm3, %v20424_v44  ;;  %v20486_v44 = vld [vmem:[#allocation53_spill] sm:$0xff] }
 0x51e   :  { %v20487_v42 = vpack.c.bf16 %v20485_v60, %v20486_v44 }
 0x524   :  { %12688 = vmatmul.mubr.msk.bf16.gmra.mrb[204].mxu1 %vm1171_vm3, %v20427_v47  ;;  %v20489_v47 = vld [vmem:[#allocation58_spill] sm:$0xff] }
 0x525   :  { %12691 = vmatprep.mubr.msk.bf16.mxu1 %vm1171_vm3, %v20430_v35  ;;  %v20490_v43 = vpack.c.bf16 %v20488_v24, %v20489_v47  ;;  %v20491_v35 = vld [vmem:[#allocation59_spill] sm:$0xff] }
 0x526   :  { %v20493_v27 = vpack.c.bf16 %v20491_v35, %v20492_v36 }
 0x52c   :  { %12692 = vmatmul.mubr.msk.bf16.gmra.mrb[208].mxu1 %vm1171_vm3, %v20433_v26  ;;  %v20494_v26 = vld [vmem:[#allocation64_spill] sm:$0xff] }
 0x52d   :  { %12695 = vmatprep.mubr.msk.bf16.mxu1 %vm1171_vm3, %v20436_v9  ;;  %v20496_v0 = vpack.c.bf16 %v20494_v26, %v20495_v57  ;;  %v20497_v9 = vld [vmem:[#allocation63_spill] sm:$0xff] }
 0x52e   :  { %v20499_v54 = vpack.c.bf16 %v20497_v9, %v20498_v6 }
 0x534   :  { %12696 = vmatmul.mubr.msk.bf16.gmra.mrb[212].mxu1 %vm1171_vm3, %v20439_v34  ;;  %v20500_v34 = vld [vmem:[#allocation68_spill] sm:$0xff] }
 0x535   :  { %12699 = vmatprep.mubr.msk.bf16.mxu1 %vm1171_vm3, %v20442_v16  ;;  %v20502_v30 = vpack.c.bf16 %v20500_v34, %v20501_v51  ;;  %v20503_v16 = vld [vmem:[#allocation67_spill] sm:$0xff] }
 0x536   :  { %v20505_v53 = vpack.c.bf16 %v20503_v16, %v20504_v50 }
 0x53c   :  { %12700 = vmatmul.mubr.msk.bf16.gmra.mrb[216].mxu1 %vm1171_vm3, %v20445_v14  ;;  %v20506_v14 = vld [vmem:[#allocation93_spill] sm:$0xff] }
 0x53d   :  { %12703 = vmatprep.mubr.msk.bf16.mxu1 %vm1171_vm3, %v20448_v48  ;;  %v3979_v22 = vrot.slane %v20507_v38, %v20506_v14 }
 0x53f   :  { %v16362_v48 = vrot.slane %v3979_v22, %v20506_v14  ;;  %v3987_v19 = vcombine.high %v3979_v22, %v3979_v22 }
 0x541   :  { %v16412_v47 = vrot.slane %v3987_v19, %v20506_v14 }
 0x544   :  { %12704 = vmatmul.mubr.msk.bf16.gmra.mrb[220].mxu1 %vm1171_vm3, %v20451_v18  ;;  %v20508_v18 = vld [vmem:[#allocation94_spill] sm:$0xff] }
 0x545   :  { %12707 = vmatprep.mubr.msk.bf16.mxu1 %vm1171_vm3, %v20454_v21  ;;  %v4024_v13 = vrot.slane %v16362_v48, %v20508_v18  ;;  %v4028_v16 = vrot.slane %v16412_v47, %v20508_v18 }
 0x54c   :  { %12708 = vmatmul.mubr.msk.bf16.gmra.mrb[224].mxu1 %vm1171_vm3, %v20457_v33 }
 0x54d   :  { %12711 = vmatprep.mubr.msk.bf16.mxu1 %vm1171_vm3, %v20460_v5 }
 0x554   :  { %12712 = vmatmul.mubr.msk.bf16.gmra.mrb[228].mxu1 %vm1171_vm3, %v20463_v61 }
 0x555   :  { %12715 = vmatprep.mubr.msk.bf16.mxu1 %vm1171_vm3, %v20466_v2 }
 0x55c   :  { %12716 = vmatmul.mubr.msk.bf16.gmra.mrb[232].mxu1 %vm1171_vm3, %v20469_v4 }
 0x55d   :  { %12719 = vmatprep.mubr.msk.bf16.mxu1 %vm1171_vm3, %v20472_v11 }
 0x564   :  { %12720 = vmatmul.mubr.msk.bf16.gmra.mrb[236].mxu1 %vm1171_vm3, %v20475_v23 }
 0x565   :  { %12723 = vmatprep.mubr.msk.bf16.mxu1 %vm1171_vm3, %v20478_v58 }
 0x56c   :  { %12724 = vmatmul.mubr.msk.bf16.gmra.mrb[240].mxu1 %vm1171_vm3, %v20481_v59 }
 0x56d   :  { %12727 = vmatprep.mubr.msk.bf16.mxu1 %vm1171_vm3, %v20484_v46 }
 0x574   :  { %12728 = vmatmul.mubr.msk.bf16.gmra.mrb[244].mxu1 %vm1171_vm3, %v20487_v42 }
 0x575   :  { %12731 = vmatprep.mubr.msk.bf16.mxu1 %vm1171_vm3, %v20490_v43 }
 0x57c   :  { %12732 = vmatmul.mubr.msk.bf16.gmra.mrb[248].mxu1 %vm1171_vm3, %v20493_v27  ;;  %v14343_v27 = vld [vmem:[%s19906_s3 + $0x58] sm:$0xff]  }
 0x57d   :  { %12735 = vmatprep.mubr.msk.bf16.mxu1 %vm1171_vm3, %v20496_v0 }
 0x584   :  { %12736 = vmatmul.mubr.msk.bf16.gmra.mrb[252].mxu1 %vm1171_vm3, %v20499_v54 }
 0x585   :  { %12739 = vmatprep.mubr.msk.bf16.mxu1 %vm1171_vm3, %v20502_v30 }
 0x58c   :  { %12740 = vmatmul.mubr.msk.bf16.gmra.mrb[0].mxu1 %vm1171_vm3, %v20505_v53 }
 0x58d   :  { %12967 = vmatprep.mubr.msk.bf16.mxu1 %vm14400_vm4, %v20354_v3 }
 0x5e7   :  { %v12681_v37 = vpop.f32.mrb[196].mxu1 }
 0x5e8   :  { %v13483_v7 = vadd.f32 %v12681_v37, %v16367_v39  ;;  %v3629_v21 = vpop.f32.mrb[197].mxu1 }
 0x5e9   :  { %v13485_v56 = vadd.f32 %v16367_v39, %v3629_v21  ;;  %v12682_v49 = vpop.f32.mrb[198].mxu1 }
 0x5ea   :  { %v16373_v33 = vadd.f32 %v13483_v7, %v4024_v13  ;;  %v13487_v52 = vadd.f32 %v12682_v49, %v16367_v39  ;;  %v3632_v45 = vpop.f32.mrb[199].mxu1 }
 0x5eb   :  { %v16376_v5 = vadd.f32 %v13485_v56, %v4024_v13  ;;  %v13489_v20 = vadd.f32 %v16367_v39, %v3632_v45 }
 0x5ec   :  { %20509 = vst [vmem:[#allocation95_spill] sm:$0xff] %v16373_v33  ;;  %v16379_v63 = vadd.f32 %v13487_v52, %v4024_v13  ;;  %v4377_v1 = vmax.f32 %v16373_v33, 0.0  ;;  %v4192_v58 = vsel %vm1171_vm3, %v16373_v33, -inf }
 0x5ed   :  { %20510 = vst [vmem:[#allocation71_spill] sm:$0xff] %v16376_v5  ;;  %v16381_v61 = vadd.f32 %v13489_v20, %v4024_v13  ;;  %v4189_v32 = vsel %vm1171_vm3, %v16376_v5, -inf  ;;  %v4375_v41 = vmax.f32 %v16376_v5, 0.0 }
 0x5ee   :  { %20511 = vst [vmem:[#allocation69_spill] sm:$0xff] %v16379_v63  ;;  %v4378_v2 = vmax.f32 %v16379_v63, 0.0  ;;  %v4194_v44 = vsel %vm1171_vm3, %v16379_v63, -inf }
 0x5ef   :  { %20512 = vst [vmem:[#allocation70_spill] sm:$0xff] %v16381_v61  ;;  %v4190_v4 = vsel %vm1171_vm3, %v16381_v61, -inf  ;;  %v4376_v17 = vmax.f32 %v16381_v61, 0.0  ;;  %v12685_v11 = vpop.f32.mrb[200].mxu1 }
 0x5f0   :  { %v4440_v10 = vpack.c.bf16 %v4378_v2, %v4377_v1  ;;  %v4191_v23 = vmax.f32 %v4189_v32, %v4190_v4  ;;  %v13491_v15 = vadd.f32 %v12685_v11, %v16367_v39  ;;  %v3645_v55 = vpop.f32.mrb[201].mxu1 }
 0x5f1   :  { %v13493_v8 = vadd.f32 %v16367_v39, %v3645_v55  ;;  %v12686_v29 = vpop.f32.mrb[202].mxu1  ;;  %v4439_v59 = vpack.c.bf16 %v4376_v17, %v4375_v41 }
 0x5f2   :  { %v4193_v12 = vmax.f32 %v4191_v23, %v4192_v58  ;;  %v16402_v46 = vadd.f32 %v13491_v15, %v4024_v13  ;;  %v13495_v40 = vadd.f32 %v12686_v29, %v16367_v39  ;;  %v3648_v60 = vpop.f32.mrb[203].mxu1 }
 0x5f3   :  { %v16407_v42 = vadd.f32 %v13493_v8, %v4024_v13  ;;  %v13497_v24 = vadd.f32 %v16367_v39, %v3648_v60  ;;  %12755 = vmatprep.mubr.msk.bf16.mxu0 %vm1171_vm3, %v4439_v59 }
 0x5f4   :  { %20513 = vst [vmem:[#allocation73_spill] sm:$0xff] %v16402_v46  ;;  %v4195_v43 = vmax.f32 %v4193_v12, %v4194_v44  ;;  %v16414_v62 = vadd.f32 %v13495_v40, %v4024_v13  ;;  %12756 = vmatmul.mubr.msk.bf16.vlgmr.msra.gmra.mrb[68].mxu0 %vm1171_vm3, %v4440_v10  ;;  %v4381_v26 = vmax.f32 %v16402_v46, 0.0 }
 0x5f5   :  { %20514 = vst [vmem:[#allocation75_spill] sm:$0xff] %v16407_v42  ;;  %v4196_v35 = vsel %vm1171_vm3, %v16407_v42, -inf  ;;  %v16419_v36 = vadd.f32 %v13497_v24, %v4024_v13  ;;  %12820 = vmatpush3.bf16.msra.mxu0 %v14342_v31  ;;  %v4379_v6 = vmax.f32 %v16407_v42, 0.0  ;;  %v4200_v13 = vsel %vm1171_vm3, %v16402_v46, -inf }
 0x5f6   :  { %20515 = vst [vmem:[#allocation72_spill] sm:$0xff] %v16414_v62  ;;  %v4197_v57 = vmax.f32 %v4195_v43, %v4196_v35  ;;  %v4382_v0 = vmax.f32 %v16414_v62, 0.0  ;;  %12821 = vmatprep.subr.bf16.mxu0 %v20354_v3  ;;  %v4202_v1 = vsel %vm1171_vm3, %v16414_v62, -inf  ;;  %v4017_v24 = vcombine.high %v16362_v48, %v16362_v48 }
 0x5f7   :  { %20516 = vst [vmem:[#allocation74_spill] sm:$0xff] %v16419_v36  ;;  %v4198_v54 = vsel %vm1171_vm3, %v16419_v36, -inf  ;;  %v4380_v34 = vmax.f32 %v16419_v36, 0.0  ;;  %v12689_v30 = vpop.f32.mrb[204].mxu1 }
 0x5f8   :  { %v4199_v50 = vmax.f32 %v4197_v57, %v4198_v54  ;;  %v13499_v53 = vadd.f32 %v12689_v30, %v16367_v39  ;;  %v3661_v22 = vpop.f32.mrb[205].mxu1  ;;  %v4442_v37 = vpack.c.bf16 %v4382_v0, %v4381_v26  ;;  %v14344_v57 = vld [vmem:[%s19910_s7 + $0x50] sm:$0xff]  }
 0x5f9   :  { %v13501_v7 = vadd.f32 %v16367_v39, %v3661_v22  ;;  %v12690_v21 = vpop.f32.mrb[206].mxu1  ;;  %v4441_v56 = vpack.c.bf16 %v4380_v34, %v4379_v6  ;;  %12822 = vmatpush3.bf16.msra.mxu0 %v14343_v27  ;;  %12964 = vmatpush3.bf16.msra.mxu1 %v14344_v57  ;;  %v14345_v22 = vld [vmem:[%s19910_s7 + $0x58] sm:$0xff]  }
 0x5fa   :  { %v4201_v49 = vmax.f32 %v4199_v50, %v4200_v13  ;;  %v16441_v52 = vadd.f32 %v13499_v53, %v4028_v16  ;;  %v13503_v45 = vadd.f32 %v12690_v21, %v16367_v39  ;;  %v3664_v20 = vpop.f32.mrb[207].mxu1  ;;  %12965 = vmatprep.subr.bf16.mxu1 %v20354_v3 }
 0x5fb   :  { %v16446_v32 = vadd.f32 %v13501_v7, %v4028_v16  ;;  %v13505_v2 = vadd.f32 %v16367_v39, %v3664_v20  ;;  %12759 = vmatprep.mubr.msk.bf16.mxu0 %vm1171_vm3, %v4441_v56 }
 0x5fc   :  { %20517 = vst [vmem:[#allocation77_spill] sm:$0xff] %v16441_v52  ;;  %v4203_v41 = vmax.f32 %v4201_v49, %v4202_v1  ;;  %v16450_v4 = vadd.f32 %v13503_v45, %v4028_v16  ;;  %12760 = vmatmul.mubr.msk.bf16.gmra.mrb[72].mxu0 %vm1171_vm3, %v4442_v37  ;;  %v4385_v17 = vmax.f32 %v16441_v52, 0.0  ;;  %v4213_v43 = vsel %vm1171_vm3, %v16441_v52, -inf }
 0x5fd   :  { %20518 = vst [vmem:[#allocation96_spill] sm:$0xff] %v16446_v32  ;;  %v16454_v11 = vadd.f32 %v13505_v2, %v4028_v16  ;;  %v4210_v10 = vsel %vm1171_vm3, %v16446_v32, -inf  ;;  %v4383_v55 = vmax.f32 %v16446_v32, 0.0  ;;  %v16497_v49 = vrot.slane %v4017_v24, %v20508_v18  ;;  %12966 = vmatpush3.bf16.msra.mxu1 %v14345_v22 }
 0x5fe   :  { %20519 = vst [vmem:[#allocation79_spill] sm:$0xff] %v16450_v4  ;;  %v4204_v19 = vrot.slane %v4203_v41, 4  ;;  %v4386_v23 = vmax.f32 %v16450_v4, 0.0  ;;  %v4215_v48 = vsel %vm1171_vm3, %v16450_v4, -inf }
 0x5ff   :  { %20520 = vst [vmem:[#allocation76_spill] sm:$0xff] %v16454_v11  ;;  %v4211_v58 = vsel %vm1171_vm3, %v16454_v11, -inf  ;;  %v4384_v8 = vmax.f32 %v16454_v11, 0.0  ;;  %v12693_v59 = vpop.f32.mrb[208].mxu1 }
 0x600   :  { %v4205_v31 = vmax.f32 %v4203_v41, %v4204_v19  ;;  %v4212_v12 = vmax.f32 %v4210_v10, %v4211_v58  ;;  %v13507_v40 = vadd.f32 %v12693_v59, %v16367_v39  ;;  %v3677_v60 = vpop.f32.mrb[209].mxu1  ;;  %v4444_v44 = vpack.c.bf16 %v4386_v23, %v4385_v17 }
 0x601   :  { %v13509_v35 = vadd.f32 %v16367_v39, %v3677_v60  ;;  %v12694_v27 = vpop.f32.mrb[210].mxu1  ;;  %v4443_v26 = vpack.c.bf16 %v4384_v8, %v4383_v55 }
 0x602   :  { %v4206_v0 = vrot.slane %v4205_v31, 2  ;;  %v4214_v6 = vmax.f32 %v4212_v12, %v4213_v43  ;;  %v16476_v54 = vadd.f32 %v13507_v40, %v4028_v16  ;;  %v13511_v34 = vadd.f32 %v12694_v27, %v16367_v39  ;;  %v3680_v30 = vpop.f32.mrb[211].mxu1 }
 0x603   :  { %v16481_v50 = vadd.f32 %v13509_v35, %v4028_v16  ;;  %v13513_v53 = vadd.f32 %v16367_v39, %v3680_v30  ;;  %12763 = vmatprep.mubr.msk.bf16.mxu0 %vm1171_vm3, %v4443_v26  ;;  %v3972_v30 = vcombine.high %v20507_v38, %v20507_v38 }
 0x604   :  { %20521 = vst [vmem:[#allocation78_spill] sm:$0xff] %v16476_v54  ;;  %v4207_v37 = vmax.f32 %v4205_v31, %v4206_v0  ;;  %v4216_v13 = vmax.f32 %v4214_v6, %v4215_v48  ;;  %12764 = vmatmul.mubr.msk.bf16.gmra.mrb[76].mxu0 %vm1171_vm3, %v4444_v44  ;;  %v16492_v21 = vadd.f32 %v13511_v34, %v4028_v16  ;;  %v4389_v1 = vmax.f32 %v16476_v54, 0.0 }
 0x605   :  { %20522 = vst [vmem:[#allocation81_spill] sm:$0xff] %v16481_v50  ;;  %v4217_v7 = vsel %vm1171_vm3, %v16481_v50, -inf  ;;  %v16494_v56 = vadd.f32 %v13513_v53, %v4028_v16  ;;  %v4221_v16 = vsel %vm1171_vm3, %v16476_v54, -inf  ;;  %v4387_v8 = vmax.f32 %v16481_v50, 0.0 }
 0x606   :  { %20523 = vst [vmem:[#allocation83_spill] sm:$0xff] %v16492_v21  ;;  %v4208_v45 = vrot.slane %v4207_v37, 1  ;;  %v4218_v20 = vmax.f32 %v4216_v13, %v4217_v7  ;;  %v4390_v2 = vmax.f32 %v16492_v21, 0.0  ;;  %v4223_v44 = vsel %vm1171_vm3, %v16492_v21, -inf }
 0x607   :  { %20524 = vst [vmem:[#allocation80_spill] sm:$0xff] %v16494_v56  ;;  %v4219_v17 = vsel %vm1171_vm3, %v16494_v56, -inf  ;;  %v12697_v19 = vpop.f32.mrb[212].mxu1  ;;  %v4388_v23 = vmax.f32 %v16494_v56, 0.0  ;;  %v4019_v48 = vcombine.high %v16412_v47, %v16412_v47 }
 0x608   :  { %v4220_v10 = vmax.f32 %v4218_v20, %v4219_v17  ;;  %v3693_v58 = vpop.f32.mrb[213].mxu1  ;;  %v13515_v59 = vadd.f32 %v12697_v19, %v16367_v39  ;;  %v4446_v40 = vpack.c.bf16 %v4390_v2, %v4389_v1  ;;  %v4209_v60 = vmax.f32 %v4207_v37, %v4208_v45 }
 0x609   :  { %v13517_v31 = vadd.f32 %v16367_v39, %v3693_v58  ;;  %v12698_v12 = vpop.f32.mrb[214].mxu1  ;;  %v4445_v0 = vpack.c.bf16 %v4388_v23, %v4387_v8 }
 0x60a   :  { %v4222_v24 = vmax.f32 %v4220_v10, %v4221_v16  ;;  %v13519_v43 = vadd.f32 %v12698_v12, %v16367_v39  ;;  %v3696_v35 = vpop.f32.mrb[215].mxu1  ;;  %v16517_v27 = vadd.f32 %v13515_v59, %v16497_v49  ;;  %v4868_v53 = vmax.f32 %v4209_v60, 0.0 }
 0x60b   :  { %v16520_v26 = vadd.f32 %v13517_v31, %v16497_v49  ;;  %v13521_v57 = vadd.f32 %v16367_v39, %v3696_v35  ;;  %12767 = vmatprep.mubr.msk.bf16.mxu0 %vm1171_vm3, %v4445_v0  ;;  %v6060_v7 = vpack.c.bf16 %v4209_v60, %v4209_v60 }
 0x60c   :  { %20525 = vst [vmem:[#allocation82_spill] sm:$0xff] %v16517_v27  ;;  %v4224_v6 = vmax.f32 %v4222_v24, %v4223_v44  ;;  %v16524_v34 = vadd.f32 %v13519_v43, %v16497_v49  ;;  %v4393_v37 = vmax.f32 %v16517_v27, 0.0  ;;  %12768 = vmatmul.mubr.msk.bf16.gmra.mrb[80].mxu0 %vm1171_vm3, %v4446_v40  ;;  %v4234_v43 = vsel %vm1171_vm3, %v16517_v27, -inf }
 0x60d   :  { %20526 = vst [vmem:[#allocation85_spill] sm:$0xff] %v16520_v26  ;;  %v4231_v45 = vsel %vm1171_vm3, %v16520_v26, -inf  ;;  %v16539_v1 = vadd.f32 %v13521_v57, %v16497_v49  ;;  %v4391_v17 = vmax.f32 %v16520_v26, 0.0 }
 0x60e   :  { %20527 = vst [vmem:[#allocation97_spill] sm:$0xff] %v16524_v34  ;;  %v4225_v22 = vrot.slane %v4224_v6, 4  ;;  %v4394_v13 = vmax.f32 %v16524_v34, 0.0 }
 0x60f   :  { %20528 = vst [vmem:[#allocation87_spill] sm:$0xff] %v16539_v1  ;;  %v12701_v47 = vpop.f32.mrb[216].mxu1  ;;  %v4232_v23 = vsel %vm1171_vm3, %v16539_v1, -inf  ;;  %v4392_v58 = vmax.f32 %v16539_v1, 0.0 }
 0x610   :  { %v4226_v2 = vmax.f32 %v4224_v6, %v4225_v22  ;;  %v13523_v19 = vadd.f32 %v12701_v47, %v16367_v39  ;;  %v3709_v16 = vpop.f32.mrb[217].mxu1  ;;  %v4448_v10 = vpack.c.bf16 %v4394_v13, %v4393_v37  ;;  %v4233_v40 = vmax.f32 %v4231_v45, %v4232_v23 }
 0x611   :  { %v13525_v59 = vadd.f32 %v16367_v39, %v3709_v16  ;;  %v12702_v31 = vpop.f32.mrb[218].mxu1  ;;  %v4447_v0 = vpack.c.bf16 %v4392_v58, %v4391_v17  ;;  %v16560_v6 = vrot.slane %v4019_v48, %v20508_v18  ;;  %v4876_v22 = vpack.c.bf16 %v4868_v53, %v4868_v53 }
 0x612   :  { %v4227_v12 = vrot.slane %v4226_v2, 2  ;;  %v16550_v60 = vadd.f32 %v13523_v19, %v16497_v49  ;;  %v13527_v44 = vadd.f32 %v12702_v31, %v16367_v39  ;;  %v3712_v24 = vpop.f32.mrb[219].mxu1  ;;  %v4235_v13 = vmax.f32 %v4233_v40, %v4234_v43 }
 0x613   :  { %v16556_v35 = vadd.f32 %v13525_v59, %v16497_v49  ;;  %v13529_v57 = vadd.f32 %v16367_v39, %v3712_v24  ;;  %v4236_v45 = vsel %vm1171_vm3, %v16524_v34, -inf  ;;  %12771 = vmatprep.mubr.msk.bf16.mxu0 %vm1171_vm3, %v4447_v0  ;;  %v6076_v17 = vunpack.c.l.b16 %v6060_v7 }
 0x614   :  { %20529 = vst [vmem:[#allocation84_spill] sm:$0xff] %v16550_v60  ;;  %v4228_v37 = vmax.f32 %v4226_v2, %v4227_v12  ;;  %v16567_v19 = vadd.f32 %v13527_v44, %v16497_v49  ;;  %v4242_v53 = vsel %vm1171_vm3, %v16550_v60, -inf  ;;  %v4237_v2 = vmax.f32 %v4235_v13, %v4236_v45  ;;  %12772 = vmatmul.mubr.msk.bf16.gmra.mrb[84].mxu0 %vm1171_vm3, %v4448_v10 }
 0x615   :  { %20530 = vst [vmem:[#allocation86_spill] sm:$0xff] %v16556_v35  ;;  %v4238_v47 = vsel %vm1171_vm3, %v16556_v35, -inf  ;;  %v16570_v16 = vadd.f32 %v13529_v57, %v16497_v49  ;;  %v4397_v23 = vmax.f32 %v16550_v60, 0.0  ;;  %v4395_v10 = vmax.f32 %v16556_v35, 0.0 }
 0x616   :  { %20531 = vst [vmem:[#allocation89_spill] sm:$0xff] %v16567_v19  ;;  %v4229_v48 = vrot.slane %v4228_v37, 1  ;;  %v4398_v58 = vmax.f32 %v16567_v19, 0.0  ;;  %v4239_v7 = vmax.f32 %v4237_v2, %v4238_v47 }
 0x617   :  { %20532 = vst [vmem:[#allocation91_spill] sm:$0xff] %v16570_v16  ;;  %v4240_v49 = vsel %vm1171_vm3, %v16570_v16, -inf  ;;  %v12705_v31 = vpop.f32.mrb[220].mxu1  ;;  %v4396_v40 = vmax.f32 %v16570_v16, 0.0 }
 0x618   :  { %v4230_v12 = vmax.f32 %v4228_v37, %v4229_v48  ;;  %v3725_v24 = vpop.f32.mrb[221].mxu1  ;;  %v13531_v43 = vadd.f32 %v12705_v31, %v16367_v39  ;;  %v4450_v13 = vpack.c.bf16 %v4398_v58, %v4397_v23  ;;  %v4241_v20 = vmax.f32 %v4239_v7, %v4240_v49 }
 0x619   :  { %v13533_v57 = vadd.f32 %v16367_v39, %v3725_v24  ;;  %v12706_v0 = vpop.f32.mrb[222].mxu1  ;;  %v4449_v8 = vpack.c.bf16 %v4396_v40, %v4395_v10  ;;  %v16603_v58 = vrot.slane %v3972_v30, %v20506_v14  ;;  %v4900_v49 = vunpack.c.l.b16 %v4876_v22 }
 0x61a   :  { %v4869_v45 = vmax.f32 %v4230_v12, 0.0  ;;  %v6061_v59 = vpack.c.bf16 %v4230_v12, %v4230_v12  ;;  %v13535_v37 = vadd.f32 %v12706_v0, %v16367_v39  ;;  %v3728_v47 = vpop.f32.mrb[223].mxu1  ;;  %v16590_v48 = vadd.f32 %v13531_v43, %v16560_v6 }
 0x61b   :  { %v16593_v2 = vadd.f32 %v13533_v57, %v16560_v6  ;;  %v13537_v44 = vadd.f32 %v16367_v39, %v3728_v47  ;;  %v4243_v24 = vmax.f32 %v4241_v20, %v4242_v53  ;;  %v4244_v12 = vsel %vm1171_vm3, %v16567_v19, -inf  ;;  %12775 = vmatprep.mubr.msk.bf16.mxu0 %vm1171_vm3, %v4449_v8 }
 0x61c   :  { %20533 = vst [vmem:[#allocation88_spill] sm:$0xff] %v16590_v48  ;;  %v4877_v31 = vpack.c.bf16 %v4869_v45, %v4869_v45  ;;  %v6077_v41 = vunpack.c.l.b16 %v6061_v59  ;;  %v16597_v23 = vadd.f32 %v13535_v37, %v16560_v6  ;;  %v4255_v7 = vsel %vm1171_vm3, %v16590_v48, -inf  ;;  %12776 = vmatmul.mubr.msk.bf16.gmra.mrb[88].mxu0 %vm1171_vm3, %v4450_v13 }
 0x61d   :  { %20534 = vst [vmem:[#allocation90_spill] sm:$0xff] %v16593_v2  ;;  %v4245_v53 = vmax.f32 %v4243_v24, %v4244_v12  ;;  %v4401_v40 = vmax.f32 %v16590_v48, 0.0  ;;  %v4252_v38 = vsel %vm1171_vm3, %v16593_v2, -inf  ;;  %v16621_v10 = vadd.f32 %v13537_v44, %v16560_v6 }
 0x61e   :  { %20535 = vst [vmem:[#allocation5_spill] sm:$0xff] %v16597_v23  ;;  %v4901_v59 = vunpack.c.l.b16 %v4877_v31  ;;  %v16611_v20 = vsel %vm2725_vm5, %v6077_v41, %v6076_v17  ;;  %v4402_v30 = vmax.f32 %v16597_v23, 0.0  ;;  %v4399_v43 = vmax.f32 %v16593_v2, 0.0 }
 0x61f   :  { %20536 = vst [vmem:[#allocation6_spill] sm:$0xff] %v16621_v10  ;;  %v12709_v8 = vpop.f32.mrb[224].mxu1  ;;  %v4246_v17 = vrot.slane %v4245_v53, 4  ;;  %v4253_v13 = vsel %vm1171_vm3, %v16621_v10, -inf  ;;  %v4400_v45 = vmax.f32 %v16621_v10, 0.0  ;;  %v16644_v37 = vrot.slane %v16603_v58, %v20506_v14 }
 0x620   :  { %v16624_v41 = vsel %vm2725_vm5, %v4901_v59, %v4900_v49  ;;  %v13539_v57 = vadd.f32 %v12709_v8, %v16367_v39  ;;  %v3741_v0 = vpop.f32.mrb[225].mxu1  ;;  %v4254_v24 = vmax.f32 %v4252_v38, %v4253_v13  ;;  %v4452_v15 = vpack.c.bf16 %v4402_v30, %v4401_v40 }
 0x621   :  { %v13541_v44 = vadd.f32 %v16367_v39, %v3741_v0  ;;  %v12710_v47 = vpop.f32.mrb[226].mxu1  ;;  %v4247_v31 = vmax.f32 %v4245_v53, %v4246_v17  ;;  %v4451_v55 = vpack.c.bf16 %v4400_v45, %v4399_v43  ;;  %v4257_v38 = vsel %vm1171_vm3, %v16597_v23, -inf }
 0x622   :  { %v16635_v49 = vadd.f32 %v13539_v57, %v16560_v6  ;;  %v13543_v12 = vadd.f32 %v12710_v47, %v16367_v39  ;;  %v3744_v59 = vpop.f32.mrb[227].mxu1  ;;  %v4256_v53 = vmax.f32 %v4254_v24, %v4255_v7 }
 0x623   :  { %v16639_v8 = vadd.f32 %v13541_v44, %v16560_v6  ;;  %v13545_v22 = vadd.f32 %v16367_v39, %v3744_v59  ;;  %v4248_v0 = vrot.slane %v4247_v31, 2  ;;  %12779 = vmatprep.mubr.msk.bf16.mxu0 %vm1171_vm3, %v4451_v55 }
 0x624   :  { %20537 = vst [vmem:[#allocation7_spill] sm:$0xff] %v16635_v49  ;;  %v16651_v57 = vadd.f32 %v13543_v12, %v16560_v6  ;;  %v4405_v30 = vmax.f32 %v16635_v49, 0.0  ;;  %v4258_v43 = vmax.f32 %v4256_v53, %v4257_v38  ;;  %12780 = vmatmul.mubr.msk.bf16.gmra.mrb[92].mxu0 %vm1171_vm3, %v4452_v15  ;;  %v4040_v15 = vrot.slane %v16644_v37, %v20508_v18 }
 0x625   :  { %20538 = vst [vmem:[#allocation8_spill] sm:$0xff] %v16639_v8  ;;  %v4259_v17 = vsel %vm1171_vm3, %v16639_v8, -inf  ;;  %v16654_v13 = vadd.f32 %v13545_v22, %v16560_v6  ;;  %v4249_v40 = vmax.f32 %v4247_v31, %v4248_v0  ;;  %v4403_v7 = vmax.f32 %v16639_v8, 0.0 }
 0x626   :  { %20539 = vst [vmem:[#allocation9_spill] sm:$0xff] %v16651_v57  ;;  %v4406_v45 = vmax.f32 %v16651_v57, 0.0  ;;  %v4260_v24 = vmax.f32 %v4258_v43, %v4259_v17  ;;  %v4263_v51 = vsel %vm1171_vm3, %v16635_v49, -inf }
 0x627   :  { %20540 = vst [vmem:[#allocation10_spill] sm:$0xff] %v16654_v13  ;;  %v4261_v47 = vsel %vm1171_vm3, %v16654_v13, -inf  ;;  %v12713_v6 = vpop.f32.mrb[228].mxu1  ;;  %v4250_v22 = vrot.slane %v4249_v40, 1  ;;  %v4404_v55 = vmax.f32 %v16654_v13, 0.0 }
 0x628   :  { %v3757_v12 = vpop.f32.mrb[229].mxu1  ;;  %v13547_v59 = vadd.f32 %v12713_v6, %v16367_v39  ;;  %v4454_v38 = vpack.c.bf16 %v4406_v45, %v4405_v30  ;;  %v4262_v29 = vmax.f32 %v4260_v24, %v4261_v47  ;;  %v4265_v30 = vsel %vm1171_vm3, %v16651_v57, -inf }
 0x629   :  { %v13549_v0 = vadd.f32 %v16367_v39, %v3757_v12  ;;  %v12714_v53 = vpop.f32.mrb[230].mxu1  ;;  %v4251_v44 = vmax.f32 %v4249_v40, %v4250_v22  ;;  %v4453_v43 = vpack.c.bf16 %v4404_v55, %v4403_v7  ;;  %v3988_v40 = vcombine.high %v16603_v58, %v16603_v58 }
 0x62a   :  { %v13551_v9 = vadd.f32 %v12714_v53, %v16367_v39  ;;  %v3760_v17 = vpop.f32.mrb[231].mxu1  ;;  %v16675_v31 = vadd.f32 %v13547_v59, %v4040_v15  ;;  %v4264_v12 = vmax.f32 %v4262_v29, %v4263_v51 }
 0x62b   :  { %v16677_v28 = vadd.f32 %v13549_v0, %v4040_v15  ;;  %v13553_v25 = vadd.f32 %v16367_v39, %v3760_v17  ;;  %v4870_v6 = vmax.f32 %v4251_v44, 0.0  ;;  %v6062_v8 = vpack.c.bf16 %v4251_v44, %v4251_v44  ;;  %12783 = vmatprep.mubr.msk.bf16.mxu0 %vm1171_vm3, %v4453_v43 }
 0x62c   :  { %20541 = vst [vmem:[#allocation11_spill] sm:$0xff] %v16675_v31  ;;  %v16680_v13 = vadd.f32 %v13551_v9, %v4040_v15  ;;  %v4276_v7 = vsel %vm1171_vm3, %v16675_v31, -inf  ;;  %v4266_v22 = vmax.f32 %v4264_v12, %v4265_v30  ;;  %12784 = vmatmul.mubr.msk.bf16.gmra.mrb[96].mxu0 %vm1171_vm3, %v4454_v38  ;;  %v16720_v43 = vrot.slane %v3988_v40, %v20506_v14 }
 0x62d   :  { %20542 = vst [vmem:[#allocation12_spill] sm:$0xff] %v16677_v28  ;;  %v4878_v45 = vpack.c.bf16 %v4870_v6, %v4870_v6  ;;  %v6078_v47 = vunpack.c.l.b16 %v6062_v8  ;;  %v4273_v44 = vsel %vm1171_vm3, %v16677_v28, -inf  ;;  %v4407_v9 = vmax.f32 %v16677_v28, 0.0 }
 0x62e   :  { %20543 = vst [vmem:[#allocation13_spill] sm:$0xff] %v16680_v13  ;;  %v4410_v51 = vmax.f32 %v16680_v13, 0.0  ;;  %v16696_v58 = vadd.f32 %v13553_v25, %v4040_v15  ;;  %v4267_v59 = vrot.slane %v4266_v22, 4  ;;  %v4409_v28 = vmax.f32 %v16675_v31, 0.0 }
 0x62f   :  { %v12717_v24 = vpop.f32.mrb[232].mxu1  ;;  %v4902_v55 = vunpack.c.l.b16 %v4878_v45  ;;  %v16700_v8 = vsel %vm2727_vm6, %v6078_v47, %v16611_v20 }
 0x630   :  { %20544 = vst [vmem:[#allocation14_spill] sm:$0xff] %v16696_v58  ;;  %v13555_v0 = vadd.f32 %v12717_v24, %v16367_v39  ;;  %v3773_v53 = vpop.f32.mrb[233].mxu1  ;;  %v4274_v38 = vsel %vm1171_vm3, %v16696_v58, -inf  ;;  %v4408_v17 = vmax.f32 %v16696_v58, 0.0  ;;  %v4268_v20 = vmax.f32 %v4266_v22, %v4267_v59 }
 0x631   :  { %v13557_v25 = vadd.f32 %v16367_v39, %v3773_v53  ;;  %v12718_v6 = vpop.f32.mrb[234].mxu1  ;;  %v16711_v12 = vsel %vm2727_vm6, %v4902_v55, %v16624_v41  ;;  %v4275_v30 = vmax.f32 %v4273_v44, %v4274_v38  ;;  %v4278_v22 = vsel %vm1171_vm3, %v16680_v13, -inf }
 0x632   :  { %v16713_v45 = vadd.f32 %v13555_v0, %v4040_v15  ;;  %v3776_v47 = vpop.f32.mrb[235].mxu1  ;;  %v13559_v29 = vadd.f32 %v12718_v6, %v16367_v39  ;;  %v4455_v57 = vpack.c.bf16 %v4408_v17, %v4407_v9  ;;  %v4269_v53 = vrot.slane %v4268_v20, 2 }
 0x633   :  { %v16715_v24 = vadd.f32 %v13557_v25, %v4040_v15  ;;  %v13561_v49 = vadd.f32 %v16367_v39, %v3776_v47  ;;  %v4277_v41 = vmax.f32 %v4275_v30, %v4276_v7  ;;  %v4456_v38 = vpack.c.bf16 %v4410_v51, %v4409_v28 }
 0x634   :  { %20545 = vst [vmem:[#allocation15_spill] sm:$0xff] %v16713_v45  ;;  %v16727_v55 = vadd.f32 %v13559_v29, %v4040_v15  ;;  %12787 = vmatprep.mubr.msk.bf16.mxu0 %vm1171_vm3, %v4455_v57  ;;  %v4270_v9 = vmax.f32 %v4268_v20, %v4269_v53  ;;  %v4413_v40 = vmax.f32 %v16713_v45, 0.0  ;;  %v4044_v51 = vrot.slane %v16720_v43, %v20508_v18 }
 0x635   :  { %20546 = vst [vmem:[#allocation16_spill] sm:$0xff] %v16715_v24  ;;  %v4280_v44 = vsel %vm1171_vm3, %v16715_v24, -inf  ;;  %v16729_v59 = vadd.f32 %v13561_v49, %v4040_v15  ;;  %v4279_v0 = vmax.f32 %v4277_v41, %v4278_v22  ;;  %v4411_v17 = vmax.f32 %v16715_v24, 0.0  ;;  %12788 = vmatmul.mubr.msk.bf16.gmra.mrb[100].mxu0 %vm1171_vm3, %v4456_v38 }
 0x636   :  { %20547 = vst [vmem:[#allocation17_spill] sm:$0xff] %v16727_v55  ;;  %v4414_v7 = vmax.f32 %v16727_v55, 0.0  ;;  %v4271_v49 = vrot.slane %v4270_v9, 1  ;;  %v4284_v20 = vsel %vm1171_vm3, %v16713_v45, -inf }
 0x637   :  { %20548 = vst [vmem:[#allocation18_spill] sm:$0xff] %v16729_v59  ;;  %v4282_v29 = vsel %vm1171_vm3, %v16729_v59, -inf  ;;  %v12721_v6 = vpop.f32.mrb[236].mxu1  ;;  %v4281_v15 = vmax.f32 %v4279_v0, %v4280_v44  ;;  %v4412_v57 = vmax.f32 %v16729_v59, 0.0 }
 0x638   :  { %v3789_v28 = vpop.f32.mrb[237].mxu1  ;;  %v13563_v30 = vadd.f32 %v12721_v6, %v16367_v39  ;;  %v4458_v41 = vpack.c.bf16 %v4414_v7, %v4413_v40  ;;  %v4272_v22 = vmax.f32 %v4270_v9, %v4271_v49  ;;  %v4286_v9 = vsel %vm1171_vm3, %v16727_v55, -inf }
 0x639   :  { %v13565_v47 = vadd.f32 %v16367_v39, %v3789_v28  ;;  %v12722_v53 = vpop.f32.mrb[238].mxu1  ;;  %v4283_v25 = vmax.f32 %v4281_v15, %v4282_v29  ;;  %v4457_v31 = vpack.c.bf16 %v4412_v57, %v4411_v17 }
 0x63a   :  { %v13567_v44 = vadd.f32 %v12722_v53, %v16367_v39  ;;  %v3792_v0 = vpop.f32.mrb[239].mxu1  ;;  %v16750_v38 = vadd.f32 %v13563_v30, %v4044_v51  ;;  %v4871_v6 = vmax.f32 %v4272_v22, 0.0  ;;  %v6063_v13 = vpack.c.bf16 %v4272_v22, %v4272_v22 }
 0x63b   :  { %v16752_v24 = vadd.f32 %v13565_v47, %v4044_v51  ;;  %v13569_v59 = vadd.f32 %v16367_v39, %v3792_v0  ;;  %v4285_v28 = vmax.f32 %v4283_v25, %v4284_v20  ;;  %12791 = vmatprep.mubr.msk.bf16.mxu0 %vm1171_vm3, %v4457_v31 }
 0x63c   :  { %20549 = vst [vmem:[#allocation19_spill] sm:$0xff] %v16750_v38  ;;  %v16755_v58 = vadd.f32 %v13567_v44, %v4044_v51  ;;  %v4297_v40 = vsel %vm1171_vm3, %v16750_v38, -inf  ;;  %v4879_v17 = vpack.c.bf16 %v4871_v6, %v4871_v6  ;;  %v6079_v7 = vunpack.c.l.b16 %v6063_v13 }
 0x63d   :  { %20550 = vst [vmem:[#allocation20_spill] sm:$0xff] %v16752_v24  ;;  %v4287_v29 = vmax.f32 %v4285_v28, %v4286_v9  ;;  %v4294_v49 = vsel %vm1171_vm3, %v16752_v24, -inf  ;;  %v4415_v15 = vmax.f32 %v16752_v24, 0.0  ;;  %v16768_v31 = vadd.f32 %v13569_v59, %v4044_v51  ;;  %12792 = vmatmul.mubr.msk.bf16.gmra.mrb[104].mxu0 %vm1171_vm3, %v4458_v41 }
 0x63e   :  { %20551 = vst [vmem:[#allocation21_spill] sm:$0xff] %v16755_v58  ;;  %v4418_v25 = vmax.f32 %v16755_v58, 0.0  ;;  %v4903_v30 = vunpack.c.l.b16 %v4879_v17  ;;  %v16772_v47 = vsel %vm2729_vm7, %v6079_v7, %v16700_v8  ;;  %v4417_v24 = vmax.f32 %v16750_v38, 0.0 }
 0x63f   :  { %20552 = vst [vmem:[#allocation22_spill] sm:$0xff] %v16768_v31  ;;  %v12725_v20 = vpop.f32.mrb[240].mxu1  ;;  %v4288_v13 = vrot.slane %v4287_v29, 4  ;;  %v4295_v44 = vsel %vm1171_vm3, %v16768_v31, -inf  ;;  %v4416_v0 = vmax.f32 %v16768_v31, 0.0  ;;  %v4020_v31 = vcombine.high %v16720_v43, %v16720_v43 }
 0x640   :  { %v13571_v53 = vadd.f32 %v12725_v20, %v16367_v39  ;;  %v3805_v22 = vpop.f32.mrb[241].mxu1  ;;  %v16784_v8 = vsel %vm2729_vm7, %v4903_v30, %v16711_v12  ;;  %v4296_v41 = vmax.f32 %v4294_v49, %v4295_v44  ;;  %v4460_v44 = vpack.c.bf16 %v4418_v25, %v4417_v24 }
 0x641   :  { %v13573_v6 = vadd.f32 %v16367_v39, %v3805_v22  ;;  %v12726_v28 = vpop.f32.mrb[242].mxu1  ;;  %v4289_v9 = vmax.f32 %v4287_v29, %v4288_v13  ;;  %v4459_v55 = vpack.c.bf16 %v4416_v0, %v4415_v15  ;;  %v4018_v22 = vcombine.high %v16644_v37, %v16644_v37 }
 0x642   :  { %v16786_v17 = vadd.f32 %v13571_v53, %v4044_v51  ;;  %v3808_v7 = vpop.f32.mrb[243].mxu1  ;;  %v13575_v57 = vadd.f32 %v12726_v28, %v16367_v39  ;;  %v4298_v12 = vmax.f32 %v4296_v41, %v4297_v40  ;;  %v4299_v29 = vsel %vm1171_vm3, %v16755_v58, -inf }
 0x643   :  { %v16788_v20 = vadd.f32 %v13573_v6, %v4044_v51  ;;  %v13577_v45 = vadd.f32 %v16367_v39, %v3808_v7  ;;  %v4290_v59 = vrot.slane %v4289_v9, 2  ;;  %12795 = vmatprep.mubr.msk.bf16.mxu0 %vm1171_vm3, %v4459_v55  ;;  %v4048_v25 = vrot.slane %v4018_v22, %v20508_v18 }
 0x644   :  { %20553 = vst [vmem:[#allocation23_spill] sm:$0xff] %v16786_v17  ;;  %v16799_v30 = vadd.f32 %v13575_v57, %v4044_v51  ;;  %v4421_v53 = vmax.f32 %v16786_v17, 0.0  ;;  %v4300_v37 = vmax.f32 %v4298_v12, %v4299_v29 }
 0x645   :  { %20554 = vst [vmem:[#allocation24_spill] sm:$0xff] %v16788_v20  ;;  %v4301_v49 = vsel %vm1171_vm3, %v16788_v20, -inf  ;;  %v16801_v13 = vadd.f32 %v13577_v45, %v4044_v51  ;;  %v4291_v15 = vmax.f32 %v4289_v9, %v4290_v59  ;;  %v4419_v0 = vmax.f32 %v16788_v20, 0.0  ;;  %12796 = vmatmul.mubr.msk.bf16.gmra.mrb[108].mxu0 %vm1171_vm3, %v4460_v44 }
 0x646   :  { %20555 = vst [vmem:[#allocation28_spill] sm:$0xff] %v16799_v30  ;;  %v4422_v40 = vmax.f32 %v16799_v30, 0.0  ;;  %v4302_v51 = vmax.f32 %v4300_v37, %v4301_v49  ;;  %v4305_v59 = vsel %vm1171_vm3, %v16786_v17, -inf }
 0x647   :  { %20556 = vst [vmem:[#allocation26_spill] sm:$0xff] %v16801_v13  ;;  %v4303_v57 = vsel %vm1171_vm3, %v16801_v13, -inf  ;;  %v12729_v28 = vpop.f32.mrb[244].mxu1  ;;  %v4292_v45 = vrot.slane %v4291_v15, 1  ;;  %v4420_v55 = vmax.f32 %v16801_v13, 0.0 }
 0x648   :  { %v3821_v24 = vpop.f32.mrb[245].mxu1  ;;  %v13579_v9 = vadd.f32 %v12729_v28, %v16367_v39  ;;  %v4462_v12 = vpack.c.bf16 %v4422_v40, %v4421_v53  ;;  %v4304_v6 = vmax.f32 %v4302_v51, %v4303_v57 }
 0x649   :  { %v13581_v41 = vadd.f32 %v16367_v39, %v3821_v24  ;;  %v12730_v7 = vpop.f32.mrb[246].mxu1  ;;  %v4293_v29 = vmax.f32 %v4291_v15, %v4292_v45  ;;  %v4461_v38 = vpack.c.bf16 %v4420_v55, %v4419_v0  ;;  %v4307_v15 = vsel %vm1171_vm3, %v16799_v30, -inf }
 0x64a   :  { %v13583_v49 = vadd.f32 %v12730_v7, %v16367_v39  ;;  %v3824_v37 = vpop.f32.mrb[247].mxu1  ;;  %v16821_v20 = vadd.f32 %v13579_v9, %v4048_v25  ;;  %v4306_v24 = vmax.f32 %v4304_v6, %v4305_v59 }
 0x64b   :  { %v16823_v44 = vadd.f32 %v13581_v41, %v4048_v25  ;;  %v13585_v22 = vadd.f32 %v16367_v39, %v3824_v37  ;;  %v4872_v28 = vmax.f32 %v4293_v29, 0.0  ;;  %v6064_v13 = vpack.c.bf16 %v4293_v29, %v4293_v29  ;;  %12799 = vmatprep.mubr.msk.bf16.mxu0 %vm1171_vm3, %v4461_v38 }
 0x64c   :  { %20557 = vst [vmem:[#allocation27_spill] sm:$0xff] %v16821_v20  ;;  %v16826_v58 = vadd.f32 %v13583_v49, %v4048_v25  ;;  %v4318_v53 = vsel %vm1171_vm3, %v16821_v20, -inf  ;;  %v4425_v0 = vmax.f32 %v16821_v20, 0.0  ;;  %v4308_v45 = vmax.f32 %v4306_v24, %v4307_v15 }
 0x64d   :  { %20558 = vst [vmem:[#allocation25_spill] sm:$0xff] %v16823_v44  ;;  %v4880_v40 = vpack.c.bf16 %v4872_v28, %v4872_v28  ;;  %v6080_v57 = vunpack.c.l.b16 %v6064_v13  ;;  %v4315_v51 = vsel %vm1171_vm3, %v16823_v44, -inf  ;;  %v4423_v6 = vmax.f32 %v16823_v44, 0.0  ;;  %12800 = vmatmul.mubr.msk.bf16.gmra.mrb[112].mxu0 %vm1171_vm3, %v4462_v12 }
 0x64e   :  { %20559 = vst [vmem:[#allocation32_spill] sm:$0xff] %v16826_v58  ;;  %v4426_v55 = vmax.f32 %v16826_v58, 0.0  ;;  %v16840_v59 = vadd.f32 %v13585_v22, %v4048_v25  ;;  %v4309_v13 = vrot.slane %v4308_v45, 4 }
 0x64f   :  { %v12733_v9 = vpop.f32.mrb[248].mxu1  ;;  %v4904_v41 = vunpack.c.l.b16 %v4880_v40  ;;  %v16844_v7 = vsel %vm2731_vm8, %v6080_v57, %v16772_v47 }
 0x650   :  { %20560 = vst [vmem:[#allocation30_spill] sm:$0xff] %v16840_v59  ;;  %v13587_v29 = vadd.f32 %v12733_v9, %v16367_v39  ;;  %v3837_v49 = vpop.f32.mrb[249].mxu1  ;;  %v4316_v37 = vsel %vm1171_vm3, %v16840_v59, -inf  ;;  %v4424_v28 = vmax.f32 %v16840_v59, 0.0  ;;  %v4310_v40 = vmax.f32 %v4308_v45, %v4309_v13 }
 0x651   :  { %v13589_v24 = vadd.f32 %v16367_v39, %v3837_v49  ;;  %v12734_v15 = vpop.f32.mrb[250].mxu1  ;;  %v4317_v47 = vmax.f32 %v4315_v51, %v4316_v37  ;;  %v4464_v30 = vpack.c.bf16 %v4426_v55, %v4425_v0  ;;  %v4320_v45 = vsel %vm1171_vm3, %v16826_v58, -inf }
 0x652   :  { %v16854_v57 = vadd.f32 %v13587_v29, %v4048_v25  ;;  %v13591_v12 = vadd.f32 %v12734_v15, %v16367_v39  ;;  %v3840_v38 = vpop.f32.mrb[251].mxu1  ;;  %v4463_v17 = vpack.c.bf16 %v4424_v28, %v4423_v6  ;;  %v4311_v22 = vrot.slane %v4310_v40, 2 }
 0x653   :  { %v16857_v9 = vadd.f32 %v13589_v24, %v4048_v25  ;;  %v13593_v20 = vadd.f32 %v16367_v39, %v3840_v38  ;;  %v4319_v44 = vmax.f32 %v4317_v47, %v4318_v53  ;;  %v16874_v43 = vsel %vm2731_vm8, %v4904_v41, %v16784_v8 }
 0x654   :  { %20561 = vst [vmem:[#allocation31_spill] sm:$0xff] %v16854_v57  ;;  %v16866_v13 = vadd.f32 %v13591_v12, %v4048_v25  ;;  %12803 = vmatprep.mubr.msk.bf16.mxu0 %vm1171_vm3, %v4463_v17  ;;  %v4312_v38 = vmax.f32 %v4310_v40, %v4311_v22  ;;  %v4429_v0 = vmax.f32 %v16854_v57, 0.0  ;;  %v4052_v41 = vrot.slane %v4020_v31, %v20508_v18  ;;  %v14372_v31 = vld [vmem:[%s19909_s6 + $0x1] ss:$0 sm:$0xff] }
 0x655   :  { %20562 = vst [vmem:[#allocation29_spill] sm:$0xff] %v16857_v9  ;;  %v4322_v51 = vsel %vm1171_vm3, %v16857_v9, -inf  ;;  %v16868_v29 = vadd.f32 %v13593_v20, %v4048_v25  ;;  %v4321_v6 = vmax.f32 %v4319_v44, %v4320_v45  ;;  %v4427_v53 = vmax.f32 %v16857_v9, 0.0  ;;  %12804 = vmatmul.mubr.msk.bf16.gmra.mrb[116].mxu0 %vm1171_vm3, %v4464_v30 }
 0x656   :  { %20563 = vst [vmem:[#allocation36_spill] sm:$0xff] %v16866_v13  ;;  %v4430_v55 = vmax.f32 %v16866_v13, 0.0  ;;  %v4313_v17 = vrot.slane %v4312_v38, 1  ;;  %v4326_v49 = vsel %vm1171_vm3, %v16854_v57, -inf }
 0x657   :  { %20564 = vst [vmem:[#allocation34_spill] sm:$0xff] %v16868_v29  ;;  %v4324_v20 = vsel %vm1171_vm3, %v16868_v29, -inf  ;;  %v12737_v25 = vpop.f32.mrb[252].mxu1  ;;  %v4323_v37 = vmax.f32 %v4321_v6, %v4322_v51  ;;  %v4428_v28 = vmax.f32 %v16868_v29, 0.0 }
 0x658   :  { %v3853_v8 = vpop.f32.mrb[253].mxu1  ;;  %v13595_v22 = vadd.f32 %v12737_v25, %v16367_v39  ;;  %v4466_v40 = vpack.c.bf16 %v4430_v55, %v4429_v0  ;;  %v4314_v47 = vmax.f32 %v4312_v38, %v4313_v17 }
 0x659   :  { %v13597_v24 = vadd.f32 %v16367_v39, %v3853_v8  ;;  %v12738_v15 = vpop.f32.mrb[254].mxu1  ;;  %v4325_v12 = vmax.f32 %v4323_v37, %v4324_v20  ;;  %v4465_v6 = vpack.c.bf16 %v4428_v28, %v4427_v53 }
 0x65a   :  { %v13599_v45 = vadd.f32 %v12738_v15, %v16367_v39  ;;  %v3856_v51 = vpop.f32.mrb[255].mxu1  ;;  %v16892_v44 = vadd.f32 %v13595_v22, %v4052_v41  ;;  %v4873_v8 = vmax.f32 %v4314_v47, 0.0  ;;  %v6065_v0 = vpack.c.bf16 %v4314_v47, %v4314_v47 }
 0x65b   :  { %v16894_v30 = vadd.f32 %v13597_v24, %v4052_v41  ;;  %v13601_v25 = vadd.f32 %v14372_v31, %v3856_v51  ;;  %v4327_v38 = vmax.f32 %v4325_v12, %v4326_v49  ;;  %12807 = vmatprep.mubr.msk.bf16.mxu0 %vm1171_vm3, %v4465_v6  ;;  %v4328_v39 = vsel %vm1171_vm3, %v16866_v13, -inf }
 0x65c   :  { %20565 = vst [vmem:[#allocation35_spill] sm:$0xff] %v16892_v44  ;;  %v16899_v55 = vadd.f32 %v13599_v45, %v4052_v41  ;;  %v4339_v53 = vsel %vm1171_vm3, %v16892_v44, -inf  ;;  %v4433_v20 = vmax.f32 %v16892_v44, 0.0  ;;  %v4881_v17 = vpack.c.bf16 %v4873_v8, %v4873_v8 }
 0x65d   :  { %20566 = vst [vmem:[#allocation33_spill] sm:$0xff] %v16894_v30  ;;  %v6081_v37 = vunpack.c.l.b16 %v6065_v0  ;;  %v4329_v28 = vmax.f32 %v4327_v38, %v4328_v39  ;;  %v4336_v22 = vsel %vm1171_vm3, %v16894_v30, -inf  ;;  %v4431_v49 = vmax.f32 %v16894_v30, 0.0  ;;  %12808 = vmatmul.mubr.msk.bf16.gmra.mrb[120].mxu0 %vm1171_vm3, %v4466_v40 }
 0x65e   :  { %20567 = vst [vmem:[#allocation40_spill] sm:$0xff] %v16899_v55  ;;  %v4434_v24 = vmax.f32 %v16899_v55, 0.0  ;;  %v16913_v47 = vadd.f32 %v13601_v25, %v4052_v41  ;;  %v4905_v45 = vunpack.c.l.b16 %v4881_v17  ;;  %v4341_v48 = vsel %vm1171_vm3, %v16899_v55, -inf }
 0x65f   :  { %v12741_v12 = vpop.f32.mrb[0].mxu1  ;;  %v6088_v51 = vsel %vm2733_vm9, %v6081_v37, %v16844_v7  ;;  %v4330_v6 = vrot.slane %v4329_v28, 4 }
 0x660   :  { %20568 = vst [vmem:[#allocation38_spill] sm:$0xff] %v16913_v47  ;;  %v13603_v8 = vadd.f32 %v14372_v31, %v12741_v12  ;;  %v3869_v0 = vpop.f32.mrb[1].mxu1  ;;  %v4337_v38 = vsel %vm1171_vm3, %v16913_v47, -inf  ;;  %v4432_v39 = vmax.f32 %v16913_v47, 0.0  ;;  %v4468_v29 = vpack.c.bf16 %v4434_v24, %v4433_v20 }
 0x661   :  { %v13605_v25 = vadd.f32 %v14372_v31, %v3869_v0  ;;  %v12742_v44 = vpop.f32.mrb[2].mxu1  ;;  %v4331_v57 = vmax.f32 %v4329_v28, %v4330_v6  ;;  %v4338_v17 = vmax.f32 %v4336_v22, %v4337_v38  ;;  %v4912_v20 = vsel %vm2733_vm9, %v4905_v45, %v16874_v43 }
 0x662   :  { %v16923_v13 = vadd.f32 %v13603_v8, %v4052_v41  ;;  %v13607_v7 = vadd.f32 %v14372_v31, %v12742_v44  ;;  %v3872_v37 = vpop.f32.mrb[3].mxu1  ;;  %v4467_v12 = vpack.c.bf16 %v4432_v39, %v4431_v49 }
 0x663   :  { %v16925_v9 = vadd.f32 %v13605_v25, %v4052_v41  ;;  %v13609_v40 = vadd.f32 %v14372_v31, %v3872_v37  ;;  %v4332_v58 = vrot.slane %v4331_v57, 2  ;;  %v4340_v59 = vmax.f32 %v4338_v17, %v4339_v53 }
 0x664   :  { %20569 = vst [vmem:[#allocation39_spill] sm:$0xff] %v16923_v13  ;;  %v16931_v15 = vadd.f32 %v13607_v7, %v4052_v41  ;;  %12811 = vmatprep.mubr.msk.bf16.mxu0 %vm1171_vm3, %v4467_v12  ;;  %v4437_v22 = vmax.f32 %v16923_v13, 0.0  ;;  %v4347_v38 = vsel %vm1171_vm3, %v16923_v13, -inf }
 0x665   :  { %20570 = vst [vmem:[#allocation37_spill] sm:$0xff] %v16925_v9  ;;  %v4343_v0 = vsel %vm1171_vm3, %v16925_v9, -inf  ;;  %v16933_v28 = vadd.f32 %v13609_v40, %v4052_v41  ;;  %v4333_v44 = vmax.f32 %v4331_v57, %v4332_v58  ;;  %v4342_v31 = vmax.f32 %v4340_v59, %v4341_v48  ;;  %12812 = vmatmul.mubr.msk.bf16.gmra.mrb[124].mxu0 %vm1171_vm3, %v4468_v29 }
 0x666   :  { %20571 = vst [vmem:[#allocation44_spill] sm:$0xff] %v16931_v15  ;;  %v4435_v53 = vmax.f32 %v16925_v9, 0.0  ;;  %v4438_v49 = vmax.f32 %v16931_v15, 0.0  ;;  %v4349_v7 = vsel %vm1171_vm3, %v16931_v15, -inf }
 0x667   :  { %20572 = vst [vmem:[#allocation42_spill] sm:$0xff] %v16933_v28  ;;  %v4345_v41 = vsel %vm1171_vm3, %v16933_v28, -inf  ;;  %v4334_v6 = vrot.slane %v4333_v44, 1  ;;  %v4344_v8 = vmax.f32 %v4342_v31, %v4343_v0  ;;  %v4436_v58 = vmax.f32 %v16933_v28, 0.0 }
 0x668   :  { %v4470_v59 = vpack.c.bf16 %v4438_v49, %v4437_v22 }
 0x669   :  { %v4335_v57 = vmax.f32 %v4333_v44, %v4334_v6  ;;  %v4346_v43 = vmax.f32 %v4344_v8, %v4345_v41  ;;  %v4469_v45 = vpack.c.bf16 %v4436_v58, %v4435_v53 }
 0x66b   :  { %v4874_v39 = vmax.f32 %v4335_v57, 0.0  ;;  %v6066_v25 = vpack.c.bf16 %v4335_v57, %v4335_v57  ;;  %v4348_v17 = vmax.f32 %v4346_v43, %v4347_v38  ;;  %12815 = vmatprep.mubr.msk.bf16.mxu0 %vm1171_vm3, %v4469_v45 }
 0x66d   :  { %v4882_v37 = vpack.c.bf16 %v4874_v39, %v4874_v39  ;;  %v6082_v40 = vunpack.c.l.b16 %v6066_v25  ;;  %v4350_v12 = vmax.f32 %v4348_v17, %v4349_v7  ;;  %12816 = vmatmul.mubr.msk.bf16.gmra.mrb[128].mxu0 %vm1171_vm3, %v4470_v59 }
 0x66e   :  { %12823 = vmatprep.mubr.msk.bf16.mxu0 %vm14400_vm4, %v20354_v3 }
 0x66f   :  { %v4906_v0 = vunpack.c.l.b16 %v4882_v37  ;;  %v6089_v29 = vsel %vm2735_vm10, %v6082_v40, %v6088_v51  ;;  %v4351_v44 = vrot.slane %v4350_v12, 4 }
 0x671   :  { %v4352_v22 = vmax.f32 %v4350_v12, %v4351_v44  ;;  %v4913_v31 = vsel %vm2735_vm10, %v4906_v0, %v4912_v20 }
 0x673   :  { %v4353_v53 = vrot.slane %v4352_v22, 2 }
 0x675   :  { %v4354_v49 = vmax.f32 %v4352_v22, %v4353_v53 }
 0x677   :  { %v4355_v41 = vrot.slane %v4354_v49, 1 }
 0x679   :  { %v4356_v6 = vmax.f32 %v4354_v49, %v4355_v41 }
 0x67b   :  { %v4875_v8 = vmax.f32 %v4356_v6, 0.0  ;;  %v6067_v58 = vpack.c.bf16 %v4356_v6, %v4356_v6 }
 0x67d   :  { %v4883_v57 = vpack.c.bf16 %v4875_v8, %v4875_v8  ;;  %v6083_v43 = vunpack.c.l.b16 %v6067_v58  ;;  %v14346_v8 = vld [vmem:[%s19908_s5 + $0x20] sm:$0xff]   ;;  %v14347_v58 = vld [vmem:[%s19908_s5 + $0x28] sm:$0xff]  }
 0x67e   :  { %12827 = vmatprep.subr.bf16.mxu0 %v14346_v8 }
 0x67f   :  { %v4907_v45 = vunpack.c.l.b16 %v4883_v57  ;;  %v6090_v51 = vsel %vm2737_vm11, %v6083_v43, %v6089_v29 }
 0x680   :  { %v6091_v38 = vpack.c.b16 %v6090_v51, %v6090_v51  ;;  %v17010_v51 = vld [vmem:[%s19910_s7 + $0x40] sm:$0xff]  }
 0x681   :  { %v4914_v59 = vsel %vm2737_vm11, %v4907_v45, %v4913_v31 }
 0x682   :  { %12968 = vmatmul.mubr.msk.bf16.vlgmr.msra.gmra.mrb[4].mxu1 %vm1171_vm3, %v6091_v38  ;;  %v4915_v39 = vpack.c.b16 %v4914_v59, %v4914_v59 }
 0x684   :  { %12824 = vmatmul.mubr.msk.bf16.vlgmr.msra.gmra.mrb[132].mxu0 %vm1171_vm3, %v4915_v39 }
 0x685   :  { %12828 = vmatpush3.bf16.msra.mxu0 %v14346_v8 }
 0x686   :  { %12829 = vmatprep.subr.bf16.mxu0 %v14347_v58 }
 0x689   :  { %12830 = vmatpush3.bf16.msra.mxu0 %v14347_v58 }
 0x68a   :  { %12895 = vmatprep.subr.bf16.mxu0 %v17010_v51 }
 0x6c7   :  { %v16963_v20 = vpop.f32.mrb[68].mxu0 }
 0x6c8   :  { %v16965_v25 = vpop.f32.mrb[69].mxu0 }
 0x6c9   :  { %v16967_v17 = vpop.f32.mrb[70].mxu0 }
 0x6ca   :  { %v16969_v7 = vpop.f32.mrb[71].mxu0 }
 0x6cf   :  { %v16971_v37 = vpop.f32.mrb[72].mxu0 }
 0x6d0   :  { %v16973_v40 = vpop.f32.mrb[73].mxu0 }
 0x6d1   :  { %v16975_v12 = vpop.f32.mrb[74].mxu0 }
 0x6d2   :  { %v16977_v0 = vpop.f32.mrb[75].mxu0 }
 0x6d7   :  { %v16979_v29 = vpop.f32.mrb[76].mxu0 }
 0x6d8   :  { %v16981_v44 = vpop.f32.mrb[77].mxu0 }
 0x6d9   :  { %v16983_v22 = vpop.f32.mrb[78].mxu0 }
 0x6da   :  { %v16985_v31 = vpop.f32.mrb[79].mxu0 }
 0x6df   :  { %v16987_v53 = vpop.f32.mrb[80].mxu0 }
 0x6e0   :  { %v16989_v49 = vpop.f32.mrb[81].mxu0 }
 0x6e1   :  { %v16991_v41 = vpop.f32.mrb[82].mxu0 }
 0x6e2   :  { %v16993_v6 = vpop.f32.mrb[83].mxu0 }
 0x6e7   :  { %v17001_v57 = vpop.f32.mrb[84].mxu0 }
 0x6e8   :  { %v17003_v43 = vpop.f32.mrb[85].mxu0 }
 0x6e9   :  { %v17005_v45 = vpop.f32.mrb[86].mxu0 }
 0x6ea   :  { %v17012_v38 = vpop.f32.mrb[87].mxu0 }
 0x6ef   :  { %v17015_v59 = vpop.f32.mrb[88].mxu0 }
 0x6f0   :  { %v17017_v39 = vpop.f32.mrb[89].mxu0 }
 0x6f1   :  { %v17019_v8 = vpop.f32.mrb[90].mxu0 }
 0x6f2   :  { %v17021_v24 = vpop.f32.mrb[91].mxu0 }
 0x6f7   :  { %v17023_v48 = vpop.f32.mrb[92].mxu0 }
 0x6f8   :  { %v17025_v13 = vpop.f32.mrb[93].mxu0 }
 0x6f9   :  { %v17027_v15 = vpop.f32.mrb[94].mxu0 }
 0x6fa   :  { %v17029_v9 = vpop.f32.mrb[95].mxu0 }
 0x6ff   :  { %v17031_v28 = vpop.f32.mrb[96].mxu0 }
 0x700   :  { %v17033_v58 = vpop.f32.mrb[97].mxu0 }
 0x701   :  { %v17035_v55 = vpop.f32.mrb[98].mxu0 }
 0x702   :  { %v17037_v30 = vpop.f32.mrb[99].mxu0 }
 0x708   :  { %v17039_v47 = vpop.f32.mrb[100].mxu0 }
 0x709   :  { %v17041_v23 = vpop.f32.mrb[101].mxu0 }
 0x70a   :  { %v17043_v2 = vpop.f32.mrb[102].mxu0 }
 0x70b   :  { %v17045_v10 = vpop.f32.mrb[103].mxu0 }
 0x710   :  { %v17047_v60 = vpop.f32.mrb[104].mxu0 }
 0x711   :  { %v17049_v19 = vpop.f32.mrb[105].mxu0 }
 0x712   :  { %v17051_v35 = vpop.f32.mrb[106].mxu0 }
 0x713   :  { %v17053_v16 = vpop.f32.mrb[107].mxu0 }
 0x718   :  { %v17055_v27 = vpop.f32.mrb[108].mxu0 }
 0x719   :  { %20573 = vst [vmem:[#allocation43_spill] sm:$0xff] %v17055_v27  ;;  %v17057_v34 = vpop.f32.mrb[109].mxu0 }
 0x71a   :  { %v17059_v26 = vpop.f32.mrb[110].mxu0 }
 0x71b   :  { %20574 = vst [vmem:[#allocation41_spill] sm:$0xff] %v17059_v26  ;;  %v17061_v1 = vpop.f32.mrb[111].mxu0 }
 0x71c   :  { %20575 = vst [vmem:[#allocation48_spill] sm:$0xff] %v17061_v1 }
 0x720   :  { %v17063_v54 = vpop.f32.mrb[112].mxu0 }
 0x721   :  { %20576 = vst [vmem:[#allocation46_spill] sm:$0xff] %v17063_v54  ;;  %v17065_v21 = vpop.f32.mrb[113].mxu0 }
 0x722   :  { %20577 = vst [vmem:[#allocation47_spill] sm:$0xff] %v17065_v21  ;;  %v17067_v50 = vpop.f32.mrb[114].mxu0 }
 0x723   :  { %20578 = vst [vmem:[#allocation45_spill] sm:$0xff] %v17067_v50  ;;  %v17069_v56 = vpop.f32.mrb[115].mxu0 }
 0x724   :  { %20579 = vst [vmem:[#allocation52_spill] sm:$0xff] %v17069_v56 }
 0x728   :  { %v17071_v52 = vpop.f32.mrb[116].mxu0 }
 0x729   :  { %20580 = vst [vmem:[#allocation50_spill] sm:$0xff] %v17071_v52  ;;  %v17073_v4 = vpop.f32.mrb[117].mxu0 }
 0x72a   :  { %20581 = vst [vmem:[#allocation51_spill] sm:$0xff] %v17073_v4  ;;  %v17075_v32 = vpop.f32.mrb[118].mxu0 }
 0x72b   :  { %20582 = vst [vmem:[#allocation49_spill] sm:$0xff] %v17075_v32  ;;  %v17077_v11 = vpop.f32.mrb[119].mxu0 }
 0x72c   :  { %20583 = vst [vmem:[#allocation56_spill] sm:$0xff] %v17077_v11 }
 0x730   :  { %v17079_v46 = vpop.f32.mrb[120].mxu0 }
 0x731   :  { %20584 = vst [vmem:[#allocation54_spill] sm:$0xff] %v17079_v46  ;;  %v17081_v62 = vpop.f32.mrb[121].mxu0 }
 0x732   :  { %20585 = vst [vmem:[#allocation55_spill] sm:$0xff] %v17081_v62  ;;  %v17083_v42 = vpop.f32.mrb[122].mxu0 }
 0x733   :  { %20586 = vst [vmem:[#allocation53_spill] sm:$0xff] %v17083_v42  ;;  %v17085_v36 = vpop.f32.mrb[123].mxu0 }
 0x734   :  { %20587 = vst [vmem:[#allocation60_spill] sm:$0xff] %v17085_v36 }
 0x738   :  { %v17087_v33 = vpop.f32.mrb[124].mxu0 }
 0x739   :  { %20588 = vst [vmem:[#allocation58_spill] sm:$0xff] %v17087_v33  ;;  %v17089_v63 = vpop.f32.mrb[125].mxu0  ;;  %v11330_v33 = vld [vmem:[%s19907_s4 + $0x2] ss:$0 sm:$0xff] }
 0x73a   :  { %20589 = vst [vmem:[#allocation59_spill] sm:$0xff] %v17089_v63  ;;  %v17091_v5 = vpop.f32.mrb[126].mxu0 }
 0x73b   :  { %20590 = vst [vmem:[#allocation57_spill] sm:$0xff] %v17091_v5  ;;  %v17093_v61 = vpop.f32.mrb[127].mxu0 }
 0x73c   :  { %20591 = vst [vmem:[#allocation64_spill] sm:$0xff] %v17093_v61 }
 0x740   :  { %v17095_v52 = vpop.f32.mrb[128].mxu0 }
 0x741   :  { %20592 = vst [vmem:[#allocation62_spill] sm:$0xff] %v17095_v52  ;;  %v17097_v32 = vpop.f32.mrb[129].mxu0 }
 0x742   :  { %20593 = vst [vmem:[#allocation63_spill] sm:$0xff] %v17097_v32  ;;  %v17099_v11 = vpop.f32.mrb[130].mxu0 }
 0x743   :  { %20594 = vst [vmem:[#allocation61_spill] sm:$0xff] %v17099_v11  ;;  %v17101_v46 = vpop.f32.mrb[131].mxu0 }
 0x744   :  { %20595 = vst [vmem:[#allocation68_spill] sm:$0xff] %v17101_v46 }
 0x755   :  { %v17103_v62 = vpop.f32.mrb[4].mxu1 }
 0x756   :  { %20596 = vst [vmem:[#allocation66_spill] sm:$0xff] %v17103_v62  ;;  %v12969_v42 = vpop.f32.mrb[5].mxu1 }
 0x757   :  { %v4965_v63 = vpop.f32.mrb[132].mxu0  ;;  %v6144_v36 = vpop.f32.mrb[6].mxu1 }
 0x758   :  { %v4966_v5 = vadd.f32 %v11330_v33, %v4965_v63  ;;  %v12825_v4 = vpop.f32.mrb[133].mxu0  ;;  %v12970_v61 = vpop.f32.mrb[7].mxu1 }
 0x759   :  { %v4968_v50 = vpop.f32.mrb[134].mxu0 }
 0x75a   :  { %v12826_v52 = vpop.f32.mrb[135].mxu0  ;;  %v4972_v54 = vcombine.high %v4966_v5, %v4966_v5  ;;  %v4979_v32 = vrot.slane %v4966_v5, %v20506_v14 }
 0x75c   :  { %v4986_v11 = vrot.slane %v4972_v54, %v20506_v14  ;;  %v4987_v46 = vcombine.high %v4979_v32, %v4979_v32  ;;  %v4995_v62 = vrot.slane %v4979_v32, %v20506_v14 }
 0x75e   :  { %v4988_v56 = vcombine.high %v4986_v11, %v4986_v11  ;;  %v5002_v21 = vrot.slane %v4986_v11, %v20506_v14  ;;  %v5009_v42 = vrot.slane %v4987_v46, %v20506_v14  ;;  %v5017_v33 = vcombine.high %v4995_v62, %v4995_v62 }
 0x75f   :  { %v5024_v52 = vrot.slane %v4995_v62, %v20508_v18 }
 0x760   :  { %v5016_v36 = vrot.slane %v4988_v56, %v20506_v14  ;;  %v5018_v63 = vcombine.high %v5002_v21, %v5002_v21  ;;  %v5019_v61 = vcombine.high %v5009_v42, %v5009_v42  ;;  %v5028_v4 = vrot.slane %v5009_v42, %v20508_v18 }
 0x761   :  { %v17117_v5 = vrot.slane %v5002_v21, %v20508_v18  ;;  %v17120_v50 = vrot.slane %v5017_v33, %v20508_v18  ;;  %v5061_v62 = vadd.f32 %v5024_v52, %v16965_v25  ;;  %v5062_v56 = vadd.f32 %v5024_v52, %v16969_v7 }
 0x762   :  { %v5020_v54 = vcombine.high %v5016_v36, %v5016_v36  ;;  %v17123_v32 = vrot.slane %v5019_v61, %v20508_v18  ;;  %v17126_v46 = vrot.slane %v5016_v36, %v20508_v18  ;;  %v17129_v11 = vrot.slane %v5018_v63, %v20508_v18 }
 0x763   :  { %v5063_v21 = vadd.f32 %v16963_v20, %v5024_v52  ;;  %v5064_v33 = vadd.f32 %v16967_v17, %v5024_v52  ;;  %v5065_v61 = vadd.f32 %v5024_v52, %v16973_v40  ;;  %v5066_v14 = vadd.f32 %v5024_v52, %v16977_v0 }
 0x764   :  { %20597 = vst [vmem:[#allocation67_spill] sm:$0xff] %v17126_v46  ;;  %20598 = vst [vmem:[#allocation65_spill] sm:$0xff] %v17129_v11  ;;  %v17135_v42 = vrot.slane %v5020_v54, %v20508_v18  ;;  %v5125_v36 = vmax.f32 %v5061_v62, 0.0  ;;  %v5126_v26 = vmax.f32 %v5062_v56, 0.0  ;;  %v5067_v63 = vadd.f32 %v16971_v37, %v5024_v52  ;;  %v14349_v37 = vld [vmem:[%s19910_s7 + $0x48] sm:$0xff]  }
 0x765   :  { %v5127_v27 = vmax.f32 %v5063_v21, 0.0  ;;  %v5128_v11 = vmax.f32 %v5064_v33, 0.0  ;;  %v5129_v25 = vmax.f32 %v5065_v61, 0.0  ;;  %v5130_v1 = vmax.f32 %v5066_v14, 0.0 }
 0x766   :  { %20599 = vst [vmem:[#allocation92_spill] sm:$0xff] %v17135_v42  ;;  %v5068_v7 = vadd.f32 %v16975_v12, %v5024_v52  ;;  %v5194_v20 = vpack.c.bf16 %v5126_v26, %v5125_v36  ;;  %v5131_v46 = vmax.f32 %v5067_v63, 0.0  ;;  %v5069_v54 = vadd.f32 %v5028_v4, %v16981_v44 }
 0x767   :  { %v5070_v17 = vadd.f32 %v5028_v4, %v16985_v31  ;;  %v5195_v18 = vpack.c.bf16 %v5128_v11, %v5127_v27  ;;  %v5196_v40 = vpack.c.bf16 %v5130_v1, %v5129_v25  ;;  %v5071_v0 = vadd.f32 %v16979_v29, %v5028_v4 }
 0x768   :  { %v5132_v42 = vmax.f32 %v5068_v7, 0.0  ;;  %12831 = vmatprep.mubr.msk.bf16.mxu0 %vm1171_vm3, %v5194_v20  ;;  %v5133_v14 = vmax.f32 %v5069_v54, 0.0  ;;  %v5072_v26 = vadd.f32 %v16983_v22, %v5028_v4  ;;  %v5073_v12 = vadd.f32 %v5028_v4, %v16989_v49 }
 0x769   :  { %v5134_v62 = vmax.f32 %v5070_v17, 0.0  ;;  %12832 = vmatmul.mubr.msk.bf16.vlgmr.msra.gmra.mrb[136].mxu0 %vm1171_vm3, %v5195_v18  ;;  %v5135_v27 = vmax.f32 %v5071_v0, 0.0  ;;  %v5074_v1 = vadd.f32 %v5028_v4, %v16993_v6  ;;  %v5075_v29 = vadd.f32 %v16987_v53, %v5028_v4 }
 0x76a   :  { %v5197_v44 = vpack.c.bf16 %v5132_v42, %v5131_v46  ;;  %12896 = vmatpush3.bf16.msra.mxu0 %v17010_v51  ;;  %12835 = vmatprep.mubr.msk.bf16.mxu0 %vm1171_vm3, %v5196_v40  ;;  %v5136_v52 = vmax.f32 %v5072_v26, 0.0  ;;  %v5137_v11 = vmax.f32 %v5073_v12, 0.0  ;;  %v5076_v56 = vadd.f32 %v16991_v41, %v5028_v4 }
 0x76b   :  { %v5198_v31 = vpack.c.bf16 %v5134_v62, %v5133_v14  ;;  %v5138_v22 = vmax.f32 %v5074_v1, 0.0  ;;  %v5139_v21 = vmax.f32 %v5075_v29, 0.0  ;;  %v5077_v18 = vadd.f32 %v17120_v50, %v17003_v43  ;;  %12897 = vmatprep.subr.bf16.mxu0 %v14349_v37 }
 0x76c   :  { %v5078_v49 = vadd.f32 %v17120_v50, %v17012_v38  ;;  %v5199_v6 = vpack.c.bf16 %v5136_v52, %v5135_v27  ;;  %v5140_v53 = vmax.f32 %v5076_v56, 0.0  ;;  %v5079_v51 = vadd.f32 %v17001_v57, %v17120_v50 }
 0x76d   :  { %v5080_v46 = vadd.f32 %v17005_v45, %v17120_v50  ;;  %v5200_v42 = vpack.c.bf16 %v5138_v22, %v5137_v11  ;;  %v5141_v33 = vmax.f32 %v5077_v18, 0.0  ;;  %v5081_v4 = vadd.f32 %v17120_v50, %v17017_v39 }
 0x76e   :  { %v5142_v41 = vmax.f32 %v5078_v49, 0.0  ;;  %v17167_v61 = vpack.c.bf16 %v5140_v53, %v5139_v21  ;;  %v5143_v43 = vmax.f32 %v5079_v51, 0.0  ;;  %v5082_v38 = vadd.f32 %v17120_v50, %v17021_v24  ;;  %12898 = vmatpush3.bf16.msra.mxu0 %v14349_v37  ;;  %v20600_v53 = vld [vmem:[#allocation67_spill] sm:$0xff] }
 0x76f   :  { %v5144_v36 = vmax.f32 %v5080_v46, 0.0  ;;  %v5145_v57 = vmax.f32 %v5081_v4, 0.0  ;;  %v5083_v45 = vadd.f32 %v17015_v59, %v17120_v50  ;;  %v5084_v25 = vadd.f32 %v17019_v8, %v17120_v50  ;;  %13183 = vmatprep.subr.bf16.mxu0 %v20354_v3 }
 0x770   :  { %v17171_v63 = vpack.c.bf16 %v5142_v41, %v5141_v33  ;;  %v5146_v7 = vmax.f32 %v5082_v38, 0.0  ;;  %v5085_v20 = vadd.f32 %v17123_v32, %v17025_v13  ;;  %v5086_v24 = vadd.f32 %v17123_v32, %v17029_v9  ;;  %v20602_v41 = vld [vmem:[#allocation43_spill] sm:$0xff] }
 0x771   :  { %v17178_v39 = vpack.c.bf16 %v5144_v36, %v5143_v43  ;;  %12836 = vmatmul.mubr.msk.bf16.gmra.mrb[140].mxu0 %vm1171_vm3, %v5197_v44  ;;  %v5147_v54 = vmax.f32 %v5083_v45, 0.0  ;;  %v5148_v17 = vmax.f32 %v5084_v25, 0.0  ;;  %v5087_v59 = vadd.f32 %v17023_v48, %v17123_v32  ;;  %v20604_v36 = vld [vmem:[#allocation47_spill] sm:$0xff]  ;;  %v20605_v25 = vld [vmem:[#allocation52_spill] sm:$0xff] }
 0x772   :  { %v5088_v8 = vadd.f32 %v17027_v15, %v17123_v32  ;;  %12839 = vmatprep.mubr.msk.bf16.mxu0 %vm1171_vm3, %v5198_v31  ;;  %v17190_v50 = vpack.c.bf16 %v5146_v7, %v5145_v57  ;;  %v5149_v40 = vmax.f32 %v5085_v20, 0.0  ;;  %v5150_v0 = vmax.f32 %v5086_v24, 0.0 }
 0x773   :  { %v5089_v13 = vadd.f32 %v17123_v32, %v17033_v58  ;;  %v17194_v9 = vpack.c.bf16 %v5148_v17, %v5147_v54  ;;  %v5151_v37 = vmax.f32 %v5087_v59, 0.0  ;;  %v5090_v62 = vadd.f32 %v17123_v32, %v17037_v30  ;;  %v20606_v54 = vld [vmem:[#allocation46_spill] sm:$0xff]  ;;  %v20607_v59 = vld [vmem:[#allocation45_spill] sm:$0xff] }
 0x774   :  { %v5152_v14 = vmax.f32 %v5088_v8, 0.0  ;;  %v17198_v48 = vpack.c.bf16 %v5150_v0, %v5149_v40  ;;  %v5091_v15 = vadd.f32 %v17031_v28, %v17123_v32  ;;  %v5092_v12 = vadd.f32 %v17035_v55, %v17123_v32 }
 0x775   :  { %v5153_v26 = vmax.f32 %v5089_v13, 0.0  ;;  %v5154_v27 = vmax.f32 %v5090_v62, 0.0  ;;  %v5093_v58 = vadd.f32 %v17117_v5, %v17041_v23  ;;  %v5094_v1 = vadd.f32 %v17117_v5, %v17045_v10  ;;  %v20608_v13 = vld [vmem:[#allocation51_spill] sm:$0xff]  ;;  %v20610_v62 = vld [vmem:[#allocation56_spill] sm:$0xff] }
 0x776   :  { %v17204_v44 = vpack.c.bf16 %v5152_v14, %v5151_v37  ;;  %v5155_v29 = vmax.f32 %v5091_v15, 0.0  ;;  %v5156_v30 = vmax.f32 %v5092_v12, 0.0  ;;  %v5095_v31 = vadd.f32 %v17039_v47, %v17117_v5  ;;  %v20609_v37 = vld [vmem:[#allocation65_spill] sm:$0xff] }
 0x777   :  { %v5096_v28 = vadd.f32 %v17043_v2, %v17117_v5  ;;  %v17214_v52 = vpack.c.bf16 %v5154_v27, %v5153_v26  ;;  %v5157_v55 = vmax.f32 %v5093_v58, 0.0  ;;  %v5158_v32 = vmax.f32 %v5094_v1, 0.0  ;;  %v20611_v27 = vld [vmem:[#allocation50_spill] sm:$0xff]  ;;  %v20612_v1 = vld [vmem:[#allocation49_spill] sm:$0xff] }
 0x778   :  { %v5097_v11 = vadd.f32 %v17117_v5, %v17049_v19  ;;  %v17218_v56 = vpack.c.bf16 %v5156_v30, %v5155_v29  ;;  %v5159_v23 = vmax.f32 %v5095_v31, 0.0  ;;  %v5098_v10 = vadd.f32 %v17117_v5, %v17053_v16  ;;  %v20601_v16 = vld [vmem:[#allocation48_spill] sm:$0xff] }
 0x779   :  { %v5160_v22 = vmax.f32 %v5096_v28, 0.0  ;;  %12840 = vmatmul.mubr.msk.bf16.gmra.mrb[144].mxu0 %vm1171_vm3, %v5199_v6  ;;  %v17223_v47 = vpack.c.bf16 %v5158_v32, %v5157_v55  ;;  %v5099_v2 = vadd.f32 %v17047_v60, %v17117_v5  ;;  %v5100_v18 = vadd.f32 %v17051_v35, %v17117_v5  ;;  %v20603_v60 = vld [vmem:[#allocation41_spill] sm:$0xff]  ;;  %v20613_v55 = vld [vmem:[#allocation55_spill] sm:$0xff] }
 0x77a   :  { %v5161_v21 = vmax.f32 %v5097_v11, 0.0  ;;  %12843 = vmatprep.mubr.msk.bf16.mxu0 %vm1171_vm3, %v5200_v42  ;;  %v5162_v49 = vmax.f32 %v5098_v10, 0.0  ;;  %v5101_v51 = vadd.f32 %v20600_v53, %v17057_v34  ;;  %v5102_v6 = vadd.f32 %v20600_v53, %v20601_v16  ;;  %v20614_v10 = vld [vmem:[#allocation60_spill] sm:$0xff] }
 0x77b   :  { %v17230_v19 = vpack.c.bf16 %v5160_v22, %v5159_v23  ;;  %v5163_v46 = vmax.f32 %v5099_v2, 0.0  ;;  %v5164_v33 = vmax.f32 %v5100_v18, 0.0  ;;  %v5103_v4 = vadd.f32 %v20602_v41, %v20600_v53 }
 0x77c   :  { %v5104_v43 = vadd.f32 %v20603_v60, %v20600_v53  ;;  %v17240_v35 = vpack.c.bf16 %v5162_v49, %v5161_v21  ;;  %v5165_v5 = vmax.f32 %v5101_v51, 0.0  ;;  %v5166_v42 = vmax.f32 %v5102_v6, 0.0  ;;  %v20615_v49 = vld [vmem:[#allocation54_spill] sm:$0xff] }
 0x77d   :  { %v5105_v38 = vadd.f32 %v20600_v53, %v20604_v36  ;;  %v17244_v57 = vpack.c.bf16 %v5164_v33, %v5163_v46  ;;  %v5167_v34 = vmax.f32 %v5103_v4, 0.0  ;;  %v5106_v7 = vadd.f32 %v20600_v53, %v20605_v25  ;;  %v20617_v46 = vld [vmem:[#allocation59_spill] sm:$0xff]  ;;  %v20618_v33 = vld [vmem:[#allocation92_spill] sm:$0xff]  ;;  %v20621_v36 = vld [vmem:[#allocation57_spill] sm:$0xff] }
 0x77e   :  { %v5168_v45 = vmax.f32 %v5104_v43, 0.0  ;;  %v17248_v20 = vpack.c.bf16 %v5166_v42, %v5165_v5  ;;  %v5107_v17 = vadd.f32 %v20606_v54, %v20600_v53  ;;  %v5108_v8 = vadd.f32 %v20607_v59, %v20600_v53  ;;  %v20616_v53 = vld [vmem:[#allocation53_spill] sm:$0xff]  ;;  %v20620_v5 = vld [vmem:[#allocation58_spill] sm:$0xff] }
 0x77f   :  { %v5169_v24 = vmax.f32 %v5105_v38, 0.0  ;;  %v5170_v0 = vmax.f32 %v5106_v7, 0.0  ;;  %v5109_v14 = vadd.f32 %v20609_v37, %v20608_v13  ;;  %v5110_v26 = vadd.f32 %v20609_v37, %v20610_v62  ;;  %v20622_v7 = vld [vmem:[#allocation63_spill] sm:$0xff] }
 0x780   :  { %v5215_v40 = vpack.c.bf16 %v5168_v45, %v5167_v34  ;;  %v5171_v15 = vmax.f32 %v5107_v17, 0.0  ;;  %v5172_v12 = vmax.f32 %v5108_v8, 0.0  ;;  %v5111_v58 = vadd.f32 %v20611_v27, %v20609_v37  ;;  %v20623_v8 = vld [vmem:[#allocation68_spill] sm:$0xff] }
 0x781   :  { %v5112_v29 = vadd.f32 %v20612_v1, %v20609_v37  ;;  %12844 = vmatmul.mubr.msk.bf16.gmra.mrb[148].mxu0 %vm1171_vm3, %v17167_v61  ;;  %v5216_v30 = vpack.c.bf16 %v5170_v0, %v5169_v24  ;;  %v5173_v31 = vmax.f32 %v5109_v14, 0.0  ;;  %v5174_v28 = vmax.f32 %v5110_v26, 0.0  ;;  %v20624_v14 = vld [vmem:[#allocation62_spill] sm:$0xff]  ;;  %v20625_v26 = vld [vmem:[#allocation61_spill] sm:$0xff] }
 0x782   :  { %v5113_v32 = vadd.f32 %v20609_v37, %v20613_v55  ;;  %12847 = vmatprep.mubr.msk.bf16.mxu0 %vm1171_vm3, %v17171_v63  ;;  %v5217_v11 = vpack.c.bf16 %v5172_v12, %v5171_v15  ;;  %v5175_v23 = vmax.f32 %v5111_v58, 0.0  ;;  %v5114_v21 = vadd.f32 %v20609_v37, %v20614_v10  ;;  %v20619_v63 = vld [vmem:[#allocation64_spill] sm:$0xff]  ;;  %v20641_v55 = vld [vmem:[#allocation79_spill] sm:$0xff] }
 0x783   :  { %v5176_v22 = vmax.f32 %v5112_v29, 0.0  ;;  %v5218_v2 = vpack.c.bf16 %v5174_v28, %v5173_v31  ;;  %v5115_v61 = vadd.f32 %v20615_v49, %v20609_v37  ;;  %v5116_v51 = vadd.f32 %v20616_v53, %v20609_v37  ;;  %v20650_v49 = vld [vmem:[#allocation87_spill] sm:$0xff] }
 0x784   :  { %v5177_v18 = vmax.f32 %v5113_v32, 0.0  ;;  %v5178_v6 = vmax.f32 %v5114_v21, 0.0  ;;  %v5117_v41 = vadd.f32 %v20618_v33, %v20617_v46  ;;  %v5118_v4 = vadd.f32 %v20618_v33, %v20619_v63  ;;  %v20642_v32 = vld [vmem:[#allocation77_spill] sm:$0xff]  ;;  %v20647_v21 = vld [vmem:[#allocation83_spill] sm:$0xff] }
 0x785   :  { %v5219_v16 = vpack.c.bf16 %v5176_v22, %v5175_v23  ;;  %v5179_v60 = vmax.f32 %v5115_v61, 0.0  ;;  %v5180_v43 = vmax.f32 %v5116_v51, 0.0  ;;  %v5119_v42 = vadd.f32 %v20620_v5, %v20618_v33  ;;  %v20644_v23 = vld [vmem:[#allocation80_spill] sm:$0xff]  ;;  %v20645_v22 = vld [vmem:[#allocation81_spill] sm:$0xff]  ;;  %v20656_v46 = vld [vmem:[#allocation91_spill] sm:$0xff] }
 0x786   :  { %v5120_v38 = vadd.f32 %v20621_v36, %v20618_v33  ;;  %v5220_v34 = vpack.c.bf16 %v5178_v6, %v5177_v18  ;;  %v5181_v45 = vmax.f32 %v5117_v41, 0.0  ;;  %v5182_v25 = vmax.f32 %v5118_v4, 0.0  ;;  %v20651_v61 = vld [vmem:[#allocation85_spill] sm:$0xff]  ;;  %v20660_v4 = vld [vmem:[#allocation84_spill] sm:$0xff]  ;;  %v20663_v5 = vld [vmem:[#allocation90_spill] sm:$0xff] }
 0x787   :  { %v5121_v24 = vadd.f32 %v20618_v33, %v20622_v7  ;;  %v5221_v54 = vpack.c.bf16 %v5180_v43, %v5179_v60  ;;  %v5183_v17 = vmax.f32 %v5119_v42, 0.0  ;;  %v5122_v0 = vadd.f32 %v20618_v33, %v20623_v8  ;;  %v20653_v51 = vld [vmem:[#allocation97_spill] sm:$0xff]  ;;  %v20662_v43 = vld [vmem:[#allocation6_spill] sm:$0xff]  ;;  %v20675_v8 = vld [vmem:[#allocation12_spill] sm:$0xff] }
 0x788   :  { %v5184_v59 = vmax.f32 %v5120_v38, 0.0  ;;  %v5222_v13 = vpack.c.bf16 %v5182_v25, %v5181_v45  ;;  %v5123_v62 = vadd.f32 %v20624_v14, %v20618_v33  ;;  %v5124_v15 = vadd.f32 %v20625_v26, %v20618_v33  ;;  %v20657_v33 = vld [vmem:[#allocation86_spill] sm:$0xff]  ;;  %v20659_v63 = vld [vmem:[#allocation89_spill] sm:$0xff]  ;;  %v20666_v38 = vld [vmem:[#allocation88_spill] sm:$0xff] }
 0x789   :  { %v5185_v37 = vmax.f32 %v5121_v24, 0.0  ;;  %12848 = vmatmul.mubr.msk.bf16.gmra.mrb[152].mxu0 %vm1171_vm3, %v17178_v39  ;;  %v5186_v27 = vmax.f32 %v5122_v0, 0.0  ;;  %v20626_v39 = vld [vmem:[#allocation70_spill] sm:$0xff]  ;;  %v20646_v10 = vpack.c.bf16 %v20644_v23, %v20645_v22  ;;  %v20652_v53 = vpack.c.bf16 %v20650_v49, %v20651_v61  ;;  %v20665_v36 = vld [vmem:[#allocation5_spill] sm:$0xff]  ;;  %v20669_v25 = vld [vmem:[#allocation8_spill] sm:$0xff] }
 0x78a   :  { %v5223_v12 = vpack.c.bf16 %v5184_v59, %v5183_v17  ;;  %12851 = vmatprep.mubr.msk.bf16.mxu0 %vm1171_vm3, %v17190_v50  ;;  %v5187_v58 = vmax.f32 %v5123_v62, 0.0  ;;  %v5188_v1 = vmax.f32 %v5124_v15, 0.0  ;;  %v20627_v50 = vld [vmem:[#allocation71_spill] sm:$0xff]  ;;  %v20658_v41 = vpack.c.bf16 %v20656_v46, %v20657_v33  ;;  %v20668_v45 = vld [vmem:[#allocation10_spill] sm:$0xff]  ;;  %v20671_v24 = vld [vmem:[#allocation9_spill] sm:$0xff] }
 0x78b   :  { %v5224_v29 = vpack.c.bf16 %v5186_v27, %v5185_v37  ;;  %v20661_v60 = vpack.c.bf16 %v20659_v63, %v20660_v4  ;;  %v20664_v42 = vpack.c.bf16 %v20662_v43, %v20663_v5  ;;  %v20670_v7 = vpack.c.bf16 %v20668_v45, %v20669_v25  ;;  %v20674_v59 = vld [vmem:[#allocation14_spill] sm:$0xff]  ;;  %v20678_v37 = vld [vmem:[#allocation11_spill] sm:$0xff]  ;;  %v20681_v26 = vld [vmem:[#allocation16_spill] sm:$0xff] }
 0x78c   :  { %v5225_v31 = vpack.c.bf16 %v5188_v1, %v5187_v58  ;;  %v20676_v0 = vpack.c.bf16 %v20674_v59, %v20675_v8  ;;  %v20680_v62 = vld [vmem:[#allocation18_spill] sm:$0xff]  ;;  %v20684_v27 = vld [vmem:[#allocation15_spill] sm:$0xff]  ;;  %v14351_v22 = vld [vmem:[%s19906_s3 + $0x68] sm:$0xff]  }
 0x78d   :  { %v20682_v15 = vpack.c.bf16 %v20680_v62, %v20681_v26  ;;  %v20686_v1 = vld [vmem:[#allocation22_spill] sm:$0xff]  ;;  %v20711_v49 = vld [vmem:[#allocation33_spill] sm:$0xff]  ;;  %v20720_v63 = vld [vmem:[#allocation39_spill] sm:$0xff] }
 0x78e   :  { %v20717_v46 = vld [vmem:[#allocation37_spill] sm:$0xff]  ;;  %v20723_v43 = vld [vmem:[#allocation66_spill] sm:$0xff] }
 0x791   :  { %12852 = vmatmul.mubr.msk.bf16.gmra.mrb[156].mxu0 %vm1171_vm3, %v17194_v9  ;;  %v20628_v9 = vpack.c.bf16 %v20626_v39, %v20627_v50  ;;  %v20689_v39 = vld [vmem:[#allocation21_spill] sm:$0xff]  ;;  %v20690_v50 = vld [vmem:[#allocation19_spill] sm:$0xff] }
 0x792   :  { %12855 = vmatprep.mubr.msk.bf16.mxu0 %vm1171_vm3, %v17198_v48  ;;  %v20629_v48 = vld [vmem:[#allocation69_spill] sm:$0xff] }
 0x799   :  { %12856 = vmatmul.mubr.msk.bf16.gmra.mrb[160].mxu0 %vm1171_vm3, %v17204_v44  ;;  %v20630_v44 = vld [vmem:[#allocation95_spill] sm:$0xff] }
 0x79a   :  { %12859 = vmatprep.mubr.msk.bf16.mxu0 %vm1171_vm3, %v17214_v52  ;;  %v20631_v52 = vpack.c.bf16 %v20629_v48, %v20630_v44  ;;  %v20692_v48 = vld [vmem:[#allocation26_spill] sm:$0xff]  ;;  %v20693_v44 = vld [vmem:[#allocation24_spill] sm:$0xff] }
 0x7a1   :  { %12860 = vmatmul.mubr.msk.bf16.gmra.mrb[164].mxu0 %vm1171_vm3, %v17218_v56  ;;  %v20632_v56 = vld [vmem:[#allocation74_spill] sm:$0xff] }
 0x7a2   :  { %12863 = vmatprep.mubr.msk.bf16.mxu0 %vm1171_vm3, %v17223_v47  ;;  %v20633_v47 = vld [vmem:[#allocation75_spill] sm:$0xff] }
 0x7a9   :  { %12864 = vmatmul.mubr.msk.bf16.gmra.mrb[168].mxu0 %vm1171_vm3, %v17230_v19  ;;  %v20634_v19 = vpack.c.bf16 %v20632_v56, %v20633_v47  ;;  %v20695_v56 = vld [vmem:[#allocation28_spill] sm:$0xff]  ;;  %v20696_v47 = vld [vmem:[#allocation23_spill] sm:$0xff] }
 0x7aa   :  { %12867 = vmatprep.mubr.msk.bf16.mxu0 %vm1171_vm3, %v17240_v35  ;;  %v20635_v35 = vld [vmem:[#allocation72_spill] sm:$0xff] }
 0x7b1   :  { %12868 = vmatmul.mubr.msk.bf16.gmra.mrb[172].mxu0 %vm1171_vm3, %v17244_v57  ;;  %v20636_v57 = vld [vmem:[#allocation73_spill] sm:$0xff] }
 0x7b2   :  { %12871 = vmatprep.mubr.msk.bf16.mxu0 %vm1171_vm3, %v17248_v20  ;;  %v20637_v20 = vpack.c.bf16 %v20635_v35, %v20636_v57  ;;  %v20698_v35 = vld [vmem:[#allocation30_spill] sm:$0xff]  ;;  %v20699_v57 = vld [vmem:[#allocation25_spill] sm:$0xff] }
 0x7b9   :  { %12872 = vmatmul.mubr.msk.bf16.gmra.mrb[176].mxu0 %vm1171_vm3, %v5215_v40  ;;  %v20638_v40 = vld [vmem:[#allocation76_spill] sm:$0xff] }
 0x7ba   :  { %12875 = vmatprep.mubr.msk.bf16.mxu0 %vm1171_vm3, %v5216_v30  ;;  %v20639_v30 = vld [vmem:[#allocation96_spill] sm:$0xff] }
 0x7bb   :  { %v20640_v28 = vpack.c.bf16 %v20638_v40, %v20639_v30  ;;  %v14350_v40 = vld [vmem:[%s19906_s3 + $0x60] sm:$0xff]  }
 0x7bc   :  { %v20701_v30 = vld [vmem:[#allocation32_spill] sm:$0xff]  ;;  %12971 = vmatprep.subr.bf16.mxu1 %v14350_v40 }
 0x7bd   :  { %12972 = vmatpush3.bf16.msra.mxu1 %v14350_v40 }
 0x7be   :  { %12973 = vmatprep.subr.bf16.mxu1 %v14351_v22 }
 0x7c1   :  { %12876 = vmatmul.mubr.msk.bf16.gmra.mrb[180].mxu0 %vm1171_vm3, %v5217_v11  ;;  %v20643_v11 = vpack.c.bf16 %v20641_v55, %v20642_v32  ;;  %v20704_v32 = vld [vmem:[#allocation34_spill] sm:$0xff]  ;;  %12974 = vmatpush3.bf16.msra.mxu1 %v14351_v22 }
 0x7c2   :  { %12879 = vmatprep.mubr.msk.bf16.mxu0 %vm1171_vm3, %v5218_v2  ;;  %v20648_v2 = vld [vmem:[#allocation78_spill] sm:$0xff]  ;;  %13039 = vmatprep.subr.bf16.mxu1 %v20354_v3 }
 0x7c3   :  { %v20649_v18 = vpack.c.bf16 %v20647_v21, %v20648_v2  ;;  %v20708_v21 = vld [vmem:[#allocation31_spill] sm:$0xff] }
 0x7c9   :  { %12880 = vmatmul.mubr.msk.bf16.gmra.mrb[184].mxu0 %vm1171_vm3, %v5219_v16  ;;  %v20654_v16 = vld [vmem:[#allocation82_spill] sm:$0xff] }
 0x7ca   :  { %12883 = vmatprep.mubr.msk.bf16.mxu0 %vm1171_vm3, %v5220_v34  ;;  %v20655_v6 = vpack.c.bf16 %v20653_v51, %v20654_v16  ;;  %v20667_v34 = vpack.c.bf16 %v20665_v36, %v20666_v38  ;;  %v20714_v51 = vld [vmem:[#allocation35_spill] sm:$0xff]  ;;  %v17470_v36 = vld [vmem:[%s19909_s6 + $0x2] ss:$0 sm:$0xff] }
 0x7d1   :  { %12884 = vmatmul.mubr.msk.bf16.gmra.mrb[188].mxu0 %vm1171_vm3, %v5221_v54  ;;  %v20672_v54 = vld [vmem:[#allocation7_spill] sm:$0xff] }
 0x7d2   :  { %12887 = vmatprep.mubr.msk.bf16.mxu0 %vm1171_vm3, %v5222_v13  ;;  %v20673_v17 = vpack.c.bf16 %v20671_v24, %v20672_v54  ;;  %v20677_v13 = vld [vmem:[#allocation13_spill] sm:$0xff] }
 0x7d3   :  { %v20679_v14 = vpack.c.bf16 %v20677_v13, %v20678_v37 }
 0x7d9   :  { %12888 = vmatmul.mubr.msk.bf16.gmra.mrb[192].mxu0 %vm1171_vm3, %v5223_v12  ;;  %v20683_v12 = vld [vmem:[#allocation17_spill] sm:$0xff] }
 0x7da   :  { %12891 = vmatprep.mubr.msk.bf16.mxu0 %vm1171_vm3, %v5224_v29  ;;  %v20685_v58 = vpack.c.bf16 %v20683_v12, %v20684_v27  ;;  %v20687_v29 = vld [vmem:[#allocation20_spill] sm:$0xff] }
 0x7e1   :  { %12892 = vmatmul.mubr.msk.bf16.gmra.mrb[196].mxu0 %vm1171_vm3, %v5225_v31  ;;  %v20688_v31 = vpack.c.bf16 %v20686_v1, %v20687_v29 }
 0x7e2   :  { %12899 = vmatprep.mubr.msk.bf16.mxu0 %vm1171_vm3, %v20628_v9  ;;  %v20691_v9 = vpack.c.bf16 %v20689_v39, %v20690_v50 }
 0x7e9   :  { %12900 = vmatmul.mubr.msk.bf16.vlgmr.msra.gmra.mrb[136].mxu0 %vm1171_vm3, %v20631_v52  ;;  %v20694_v52 = vpack.c.bf16 %v20692_v48, %v20693_v44 }
 0x7ea   :  { %12903 = vmatprep.mubr.msk.bf16.mxu0 %vm1171_vm3, %v20634_v19  ;;  %v20697_v19 = vpack.c.bf16 %v20695_v56, %v20696_v47 }
 0x7f1   :  { %12904 = vmatmul.mubr.msk.bf16.gmra.mrb[140].mxu0 %vm1171_vm3, %v20637_v20  ;;  %v20700_v20 = vpack.c.bf16 %v20698_v35, %v20699_v57  ;;  %v14352_v35 = vld [vmem:[%s19906_s3 + $0x70] sm:$0xff]  }
 0x7f2   :  { %12907 = vmatprep.mubr.msk.bf16.mxu0 %vm1171_vm3, %v20640_v28  ;;  %v20702_v28 = vld [vmem:[#allocation27_spill] sm:$0xff] }
 0x7f3   :  { %v20703_v55 = vpack.c.bf16 %v20701_v30, %v20702_v28 }
 0x7f9   :  { %12908 = vmatmul.mubr.msk.bf16.gmra.mrb[144].mxu0 %vm1171_vm3, %v20643_v11  ;;  %v20705_v11 = vld [vmem:[#allocation29_spill] sm:$0xff] }
 0x7fa   :  { %12911 = vmatprep.mubr.msk.bf16.mxu0 %vm1171_vm3, %v20646_v10  ;;  %v20706_v23 = vpack.c.bf16 %v20704_v32, %v20705_v11  ;;  %v20707_v10 = vld [vmem:[#allocation36_spill] sm:$0xff] }
 0x7fb   :  { %v20709_v2 = vpack.c.bf16 %v20707_v10, %v20708_v21 }
 0x801   :  { %12912 = vmatmul.mubr.msk.bf16.gmra.mrb[148].mxu0 %vm1171_vm3, %v20649_v18  ;;  %v20710_v18 = vld [vmem:[#allocation38_spill] sm:$0xff] }
 0x802   :  { %12915 = vmatprep.mubr.msk.bf16.mxu0 %vm1171_vm3, %v20652_v53  ;;  %v20712_v61 = vpack.c.bf16 %v20710_v18, %v20711_v49  ;;  %v20713_v53 = vld [vmem:[#allocation40_spill] sm:$0xff] }
 0x803   :  { %v20715_v16 = vpack.c.bf16 %v20713_v53, %v20714_v51 }
 0x809   :  { %12916 = vmatmul.mubr.msk.bf16.gmra.mrb[152].mxu0 %vm1171_vm3, %v20655_v6  ;;  %v20716_v6 = vld [vmem:[#allocation42_spill] sm:$0xff] }
 0x80a   :  { %12919 = vmatprep.mubr.msk.bf16.mxu0 %vm1171_vm3, %v20658_v41  ;;  %v20718_v33 = vpack.c.bf16 %v20716_v6, %v20717_v46  ;;  %v20719_v41 = vld [vmem:[#allocation44_spill] sm:$0xff] }
 0x80b   :  { %v20721_v4 = vpack.c.bf16 %v20719_v41, %v20720_v63 }
 0x811   :  { %12920 = vmatmul.mubr.msk.bf16.gmra.mrb[156].mxu0 %vm1171_vm3, %v20661_v60  ;;  %v20722_v60 = vld [vmem:[#allocation93_spill] sm:$0xff] }
 0x812   :  { %12923 = vmatprep.mubr.msk.bf16.mxu0 %vm1171_vm3, %v20664_v42  ;;  %v6155_v5 = vrot.slane %v20723_v43, %v20722_v60 }
 0x814   :  { %v17465_v42 = vrot.slane %v6155_v5, %v20722_v60  ;;  %v6163_v39 = vcombine.high %v6155_v5, %v6155_v5 }
 0x816   :  { %v17515_v11 = vrot.slane %v6163_v39, %v20722_v60 }
 0x819   :  { %12924 = vmatmul.mubr.msk.bf16.gmra.mrb[160].mxu0 %vm1171_vm3, %v20667_v34  ;;  %v20724_v34 = vld [vmem:[#allocation94_spill] sm:$0xff] }
 0x81a   :  { %12927 = vmatprep.mubr.msk.bf16.mxu0 %vm1171_vm3, %v20670_v7  ;;  %v6200_v45 = vrot.slane %v17465_v42, %v20724_v34  ;;  %v6204_v41 = vrot.slane %v17515_v11, %v20724_v34 }
 0x821   :  { %12928 = vmatmul.mubr.msk.bf16.gmra.mrb[164].mxu0 %vm1171_vm3, %v20673_v17 }
 0x822   :  { %12931 = vmatprep.mubr.msk.bf16.mxu0 %vm1171_vm3, %v20676_v0 }
 0x829   :  { %12932 = vmatmul.mubr.msk.bf16.gmra.mrb[168].mxu0 %vm1171_vm3, %v20679_v14 }
 0x82a   :  { %12935 = vmatprep.mubr.msk.bf16.mxu0 %vm1171_vm3, %v20682_v15 }
 0x831   :  { %12936 = vmatmul.mubr.msk.bf16.gmra.mrb[172].mxu0 %vm1171_vm3, %v20685_v58 }
 0x832   :  { %12939 = vmatprep.mubr.msk.bf16.mxu0 %vm1171_vm3, %v20688_v31 }
 0x839   :  { %12940 = vmatmul.mubr.msk.bf16.gmra.mrb[176].mxu0 %vm1171_vm3, %v20691_v9 }
 0x83a   :  { %12943 = vmatprep.mubr.msk.bf16.mxu0 %vm1171_vm3, %v20694_v52 }
 0x841   :  { %12944 = vmatmul.mubr.msk.bf16.gmra.mrb[180].mxu0 %vm1171_vm3, %v20697_v19 }
 0x842   :  { %12947 = vmatprep.mubr.msk.bf16.mxu0 %vm1171_vm3, %v20700_v20 }
 0x849   :  { %12948 = vmatmul.mubr.msk.bf16.gmra.mrb[184].mxu0 %vm1171_vm3, %v20703_v55 }
 0x84a   :  { %12951 = vmatprep.mubr.msk.bf16.mxu0 %vm1171_vm3, %v20706_v23 }
 0x851   :  { %12952 = vmatmul.mubr.msk.bf16.gmra.mrb[188].mxu0 %vm1171_vm3, %v20709_v2  ;;  %v14353_v2 = vld [vmem:[%s19906_s3 + $0x78] sm:$0xff]  }
 0x852   :  { %12955 = vmatprep.mubr.msk.bf16.mxu0 %vm1171_vm3, %v20712_v61 }
 0x859   :  { %12956 = vmatmul.mubr.msk.bf16.gmra.mrb[192].mxu0 %vm1171_vm3, %v20715_v16 }
 0x85a   :  { %12959 = vmatprep.mubr.msk.bf16.mxu0 %vm1171_vm3, %v20718_v33 }
 0x861   :  { %12960 = vmatmul.mubr.msk.bf16.gmra.mrb[196].mxu0 %vm1171_vm3, %v20721_v4 }
 0x862   :  { %13187 = vmatprep.mubr.msk.bf16.mxu0 %vm14400_vm4, %v20354_v3 }
 0x8bc   :  { %v12901_v38 = vpop.f32.mrb[136].mxu0 }
 0x8bd   :  { %v13611_v25 = vadd.f32 %v12901_v38, %v17470_v36  ;;  %v5805_v7 = vpop.f32.mrb[137].mxu0 }
 0x8be   :  { %v13613_v24 = vadd.f32 %v17470_v36, %v5805_v7  ;;  %v12902_v54 = vpop.f32.mrb[138].mxu0 }
 0x8bf   :  { %v17476_v17 = vadd.f32 %v13611_v25, %v6200_v45  ;;  %v13615_v59 = vadd.f32 %v12902_v54, %v17470_v36  ;;  %v5808_v8 = vpop.f32.mrb[139].mxu0 }
 0x8c0   :  { %v17479_v0 = vadd.f32 %v13613_v24, %v6200_v45  ;;  %v13617_v13 = vadd.f32 %v17470_v36, %v5808_v8 }
 0x8c1   :  { %20725 = vst [vmem:[#allocation67_spill] sm:$0xff] %v17476_v17  ;;  %v17482_v37 = vadd.f32 %v13615_v59, %v6200_v45  ;;  %v6553_v62 = vmax.f32 %v17476_v17, 0.0  ;;  %v6368_v52 = vsel %vm1171_vm3, %v17476_v17, -inf }
 0x8c2   :  { %20726 = vst [vmem:[#allocation48_spill] sm:$0xff] %v17479_v0  ;;  %v17484_v14 = vadd.f32 %v13617_v13, %v6200_v45  ;;  %v6365_v26 = vsel %vm1171_vm3, %v17479_v0, -inf  ;;  %v6551_v27 = vmax.f32 %v17479_v0, 0.0 }
 0x8c3   :  { %20727 = vst [vmem:[#allocation43_spill] sm:$0xff] %v17482_v37  ;;  %v6554_v15 = vmax.f32 %v17482_v37, 0.0  ;;  %v6370_v28 = vsel %vm1171_vm3, %v17482_v37, -inf }
 0x8c4   :  { %20728 = vst [vmem:[#allocation41_spill] sm:$0xff] %v17484_v14  ;;  %v6366_v58 = vsel %vm1171_vm3, %v17484_v14, -inf  ;;  %v6552_v1 = vmax.f32 %v17484_v14, 0.0  ;;  %v12905_v31 = vpop.f32.mrb[140].mxu0 }
 0x8c5   :  { %v6616_v50 = vpack.c.bf16 %v6554_v15, %v6553_v62  ;;  %v6367_v9 = vmax.f32 %v6365_v26, %v6366_v58  ;;  %v13619_v48 = vadd.f32 %v12905_v31, %v17470_v36  ;;  %v5821_v44 = vpop.f32.mrb[141].mxu0 }
 0x8c6   :  { %v13621_v56 = vadd.f32 %v17470_v36, %v5821_v44  ;;  %v12906_v47 = vpop.f32.mrb[142].mxu0  ;;  %v6615_v19 = vpack.c.bf16 %v6552_v1, %v6551_v27 }
 0x8c7   :  { %v6369_v57 = vmax.f32 %v6367_v9, %v6368_v52  ;;  %v17505_v20 = vadd.f32 %v13619_v48, %v6200_v45  ;;  %v13623_v40 = vadd.f32 %v12906_v47, %v17470_v36  ;;  %v5824_v30 = vpop.f32.mrb[143].mxu0 }
 0x8c8   :  { %v17510_v55 = vadd.f32 %v13621_v56, %v6200_v45  ;;  %v13625_v32 = vadd.f32 %v17470_v36, %v5824_v30  ;;  %12975 = vmatprep.mubr.msk.bf16.mxu1 %vm1171_vm3, %v6615_v19 }
 0x8c9   :  { %20729 = vst [vmem:[#allocation47_spill] sm:$0xff] %v17505_v20  ;;  %v6371_v23 = vmax.f32 %v6369_v57, %v6370_v28  ;;  %v17517_v22 = vadd.f32 %v13623_v40, %v6200_v45  ;;  %12976 = vmatmul.mubr.msk.bf16.vlgmr.msra.gmra.mrb[8].mxu1 %vm1171_vm3, %v6616_v50  ;;  %v6557_v18 = vmax.f32 %v17505_v20, 0.0 }
 0x8ca   :  { %20730 = vst [vmem:[#allocation52_spill] sm:$0xff] %v17510_v55  ;;  %v6372_v10 = vsel %vm1171_vm3, %v17510_v55, -inf  ;;  %v17522_v21 = vadd.f32 %v13625_v32, %v6200_v45  ;;  %13040 = vmatpush3.bf16.msra.mxu1 %v14352_v35  ;;  %v6555_v51 = vmax.f32 %v17510_v55, 0.0  ;;  %v6376_v45 = vsel %vm1171_vm3, %v17505_v20, -inf }
 0x8cb   :  { %20731 = vst [vmem:[#allocation46_spill] sm:$0xff] %v17517_v22  ;;  %v6373_v49 = vmax.f32 %v6371_v23, %v6372_v10  ;;  %v6558_v61 = vmax.f32 %v17517_v22, 0.0  ;;  %13041 = vmatprep.subr.bf16.mxu1 %v20354_v3  ;;  %v6378_v62 = vsel %vm1171_vm3, %v17517_v22, -inf  ;;  %v6193_v32 = vcombine.high %v17465_v42, %v17465_v42 }
 0x8cc   :  { %20732 = vst [vmem:[#allocation45_spill] sm:$0xff] %v17522_v21  ;;  %v6374_v16 = vsel %vm1171_vm3, %v17522_v21, -inf  ;;  %v6556_v6 = vmax.f32 %v17522_v21, 0.0  ;;  %v12909_v33 = vpop.f32.mrb[144].mxu0 }
 0x8cd   :  { %v6618_v63 = vpack.c.bf16 %v6558_v61, %v6557_v18  ;;  %v6375_v4 = vmax.f32 %v6373_v49, %v6374_v16  ;;  %v13627_v5 = vadd.f32 %v12909_v33, %v17470_v36  ;;  %v5837_v38 = vpop.f32.mrb[145].mxu0  ;;  %v14354_v33 = vld [vmem:[%s19910_s7 + $0x70] sm:$0xff]  }
 0x8ce   :  { %v13629_v25 = vadd.f32 %v17470_v36, %v5837_v38  ;;  %v12910_v7 = vpop.f32.mrb[146].mxu0  ;;  %v6617_v24 = vpack.c.bf16 %v6556_v6, %v6555_v51  ;;  %13042 = vmatpush3.bf16.msra.mxu1 %v14353_v2  ;;  %13184 = vmatpush3.bf16.msra.mxu0 %v14354_v33 }
 0x8cf   :  { %v6377_v54 = vmax.f32 %v6375_v4, %v6376_v45  ;;  %v17544_v59 = vadd.f32 %v13627_v5, %v6204_v41  ;;  %v13631_v8 = vadd.f32 %v12910_v7, %v17470_v36  ;;  %v5840_v13 = vpop.f32.mrb[147].mxu0  ;;  %v14355_v45 = vld [vmem:[%s19910_s7 + $0x78] sm:$0xff]   ;;  %13185 = vmatprep.subr.bf16.mxu0 %v20354_v3 }
 0x8d0   :  { %v17549_v26 = vadd.f32 %v13629_v25, %v6204_v41  ;;  %v13633_v15 = vadd.f32 %v17470_v36, %v5840_v13  ;;  %12979 = vmatprep.mubr.msk.bf16.mxu1 %vm1171_vm3, %v6617_v24 }
 0x8d1   :  { %20733 = vst [vmem:[#allocation51_spill] sm:$0xff] %v17544_v59  ;;  %v6379_v27 = vmax.f32 %v6377_v54, %v6378_v62  ;;  %v17553_v58 = vadd.f32 %v13631_v8, %v6204_v41  ;;  %12980 = vmatmul.mubr.msk.bf16.gmra.mrb[12].mxu1 %vm1171_vm3, %v6618_v63  ;;  %v6561_v1 = vmax.f32 %v17544_v59, 0.0  ;;  %v6389_v23 = vsel %vm1171_vm3, %v17544_v59, -inf }
 0x8d2   :  { %20734 = vst [vmem:[#allocation65_spill] sm:$0xff] %v17549_v26  ;;  %v17557_v31 = vadd.f32 %v13633_v15, %v6204_v41  ;;  %v6386_v50 = vsel %vm1171_vm3, %v17549_v26, -inf  ;;  %v6559_v44 = vmax.f32 %v17549_v26, 0.0  ;;  %v6148_v54 = vcombine.high %v20723_v43, %v20723_v43  ;;  %13186 = vmatpush3.bf16.msra.mxu0 %v14355_v45 }
 0x8d3   :  { %20735 = vst [vmem:[#allocation56_spill] sm:$0xff] %v17553_v58  ;;  %v6380_v39 = vrot.slane %v6379_v27, 4  ;;  %v6562_v9 = vmax.f32 %v17553_v58, 0.0  ;;  %v6391_v42 = vsel %vm1171_vm3, %v17553_v58, -inf  ;;  %v17602_v8 = vrot.slane %v6193_v32, %v20724_v34 }
 0x8d4   :  { %20736 = vst [vmem:[#allocation50_spill] sm:$0xff] %v17557_v31  ;;  %v6387_v52 = vsel %vm1171_vm3, %v17557_v31, -inf  ;;  %v6560_v56 = vmax.f32 %v17557_v31, 0.0  ;;  %v12913_v19 = vpop.f32.mrb[148].mxu0  ;;  %v17632_v33 = vrot.slane %v6148_v54, %v20722_v60 }
 0x8d5   :  { %v6381_v35 = vmax.f32 %v6379_v27, %v6380_v39  ;;  %v6620_v57 = vpack.c.bf16 %v6562_v9, %v6561_v1  ;;  %v6388_v40 = vmax.f32 %v6386_v50, %v6387_v52  ;;  %v13635_v30 = vadd.f32 %v12913_v19, %v17470_v36  ;;  %v5853_v28 = vpop.f32.mrb[149].mxu0 }
 0x8d6   :  { %v13637_v10 = vadd.f32 %v17470_v36, %v5853_v28  ;;  %v12914_v2 = vpop.f32.mrb[150].mxu0  ;;  %v6619_v18 = vpack.c.bf16 %v6560_v56, %v6559_v44 }
 0x8d7   :  { %v6382_v49 = vrot.slane %v6381_v35, 2  ;;  %v6390_v61 = vmax.f32 %v6388_v40, %v6389_v23  ;;  %v17576_v51 = vadd.f32 %v13635_v30, %v6204_v41  ;;  %v13639_v16 = vadd.f32 %v12914_v2, %v17470_v36  ;;  %v5856_v6 = vpop.f32.mrb[151].mxu0 }
 0x8d8   :  { %v17584_v63 = vadd.f32 %v13637_v10, %v6204_v41  ;;  %v13641_v4 = vadd.f32 %v17470_v36, %v5856_v6  ;;  %12983 = vmatprep.mubr.msk.bf16.mxu1 %vm1171_vm3, %v6619_v18 }
 0x8d9   :  { %20737 = vst [vmem:[#allocation49_spill] sm:$0xff] %v17576_v51  ;;  %v6383_v5 = vmax.f32 %v6381_v35, %v6382_v49  ;;  %v6392_v38 = vmax.f32 %v6390_v61, %v6391_v42  ;;  %12984 = vmatmul.mubr.msk.bf16.gmra.mrb[16].mxu1 %vm1171_vm3, %v6620_v57  ;;  %v17594_v7 = vadd.f32 %v13639_v16, %v6204_v41  ;;  %v6565_v15 = vmax.f32 %v17576_v51, 0.0 }
 0x8da   :  { %20738 = vst [vmem:[#allocation55_spill] sm:$0xff] %v17584_v63  ;;  %v6393_v25 = vsel %vm1171_vm3, %v17584_v63, -inf  ;;  %v17596_v24 = vadd.f32 %v13641_v4, %v6204_v41  ;;  %v6397_v50 = vsel %vm1171_vm3, %v17576_v51, -inf  ;;  %v6563_v56 = vmax.f32 %v17584_v63, 0.0 }
 0x8db   :  { %20739 = vst [vmem:[#allocation60_spill] sm:$0xff] %v17594_v7  ;;  %v6384_v13 = vrot.slane %v6383_v5, 1  ;;  %v6394_v62 = vmax.f32 %v6392_v38, %v6393_v25  ;;  %v6566_v27 = vmax.f32 %v17594_v7, 0.0  ;;  %v6399_v28 = vsel %vm1171_vm3, %v17594_v7, -inf }
 0x8dc   :  { %20740 = vst [vmem:[#allocation54_spill] sm:$0xff] %v17596_v24  ;;  %v6395_v41 = vsel %vm1171_vm3, %v17596_v24, -inf  ;;  %v12917_v39 = vpop.f32.mrb[152].mxu0  ;;  %v6564_v9 = vmax.f32 %v17596_v24, 0.0  ;;  %v6195_v42 = vcombine.high %v17515_v11, %v17515_v11 }
 0x8dd   :  { %v6396_v43 = vmax.f32 %v6394_v62, %v6395_v41  ;;  %v5869_v52 = vpop.f32.mrb[153].mxu0  ;;  %v6622_v19 = vpack.c.bf16 %v6566_v27, %v6565_v15  ;;  %v13643_v35 = vadd.f32 %v12917_v39, %v17470_v36  ;;  %v6385_v30 = vmax.f32 %v6383_v5, %v6384_v13 }
 0x8de   :  { %v13645_v57 = vadd.f32 %v17470_v36, %v5869_v52  ;;  %v12918_v40 = vpop.f32.mrb[154].mxu0  ;;  %v6621_v61 = vpack.c.bf16 %v6564_v9, %v6563_v56 }
 0x8df   :  { %v6398_v32 = vmax.f32 %v6396_v43, %v6397_v50  ;;  %v13647_v23 = vadd.f32 %v12918_v40, %v17470_v36  ;;  %v5872_v10 = vpop.f32.mrb[155].mxu0  ;;  %v17622_v2 = vadd.f32 %v13643_v35, %v17602_v8  ;;  %v7044_v4 = vmax.f32 %v6385_v30, 0.0 }
 0x8e0   :  { %v17625_v18 = vadd.f32 %v13645_v57, %v17602_v8  ;;  %v13649_v49 = vadd.f32 %v17470_v36, %v5872_v10  ;;  %12987 = vmatprep.mubr.msk.bf16.mxu1 %vm1171_vm3, %v6621_v61  ;;  %v8236_v25 = vpack.c.bf16 %v6385_v30, %v6385_v30  ;;  %v17666_v61 = vrot.slane %v6195_v42, %v20724_v34 }
 0x8e1   :  { %20741 = vst [vmem:[#allocation53_spill] sm:$0xff] %v17622_v2  ;;  %v6400_v16 = vmax.f32 %v6398_v32, %v6399_v28  ;;  %v17629_v6 = vadd.f32 %v13647_v23, %v17602_v8  ;;  %v6569_v38 = vmax.f32 %v17622_v2, 0.0  ;;  %12988 = vmatmul.mubr.msk.bf16.gmra.mrb[20].mxu1 %vm1171_vm3, %v6622_v19  ;;  %v6410_v32 = vsel %vm1171_vm3, %v17622_v2, -inf }
 0x8e2   :  { %20742 = vst [vmem:[#allocation59_spill] sm:$0xff] %v17625_v18  ;;  %v6407_v13 = vsel %vm1171_vm3, %v17625_v18, -inf  ;;  %v17645_v62 = vadd.f32 %v13649_v49, %v17602_v8  ;;  %v6567_v27 = vmax.f32 %v17625_v18, 0.0 }
 0x8e3   :  { %20743 = vst [vmem:[#allocation92_spill] sm:$0xff] %v17629_v6  ;;  %v6401_v5 = vrot.slane %v6400_v16, 4  ;;  %v6570_v45 = vmax.f32 %v17629_v6, 0.0 }
 0x8e4   :  { %20744 = vst [vmem:[#allocation64_spill] sm:$0xff] %v17645_v62  ;;  %v12921_v11 = vpop.f32.mrb[156].mxu0  ;;  %v6408_v43 = vsel %vm1171_vm3, %v17645_v62, -inf  ;;  %v6568_v9 = vmax.f32 %v17645_v62, 0.0 }
 0x8e5   :  { %v6402_v15 = vmax.f32 %v6400_v16, %v6401_v5  ;;  %v6624_v41 = vpack.c.bf16 %v6570_v45, %v6569_v38  ;;  %v13651_v39 = vadd.f32 %v12921_v11, %v17470_v36  ;;  %v5885_v50 = vpop.f32.mrb[157].mxu0  ;;  %v6409_v57 = vmax.f32 %v6407_v13, %v6408_v43 }
 0x8e6   :  { %v13653_v56 = vadd.f32 %v17470_v36, %v5885_v50  ;;  %v12922_v19 = vpop.f32.mrb[158].mxu0  ;;  %v6623_v49 = vpack.c.bf16 %v6568_v9, %v6567_v27  ;;  %v7052_v16 = vpack.c.bf16 %v7044_v4, %v7044_v4  ;;  %v6412_v45 = vsel %vm1171_vm3, %v17629_v6, -inf }
 0x8e7   :  { %v6403_v35 = vrot.slane %v6402_v15, 2  ;;  %v17656_v40 = vadd.f32 %v13651_v39, %v17602_v8  ;;  %v13655_v30 = vadd.f32 %v12922_v19, %v17470_v36  ;;  %v5888_v28 = vpop.f32.mrb[159].mxu0  ;;  %v6411_v38 = vmax.f32 %v6409_v57, %v6410_v32 }
 0x8e8   :  { %v17662_v23 = vadd.f32 %v13653_v56, %v17602_v8  ;;  %v13657_v10 = vadd.f32 %v17470_v36, %v5888_v28  ;;  %12991 = vmatprep.mubr.msk.bf16.mxu1 %vm1171_vm3, %v6623_v49  ;;  %v8252_v27 = vunpack.c.l.b16 %v8236_v25 }
 0x8e9   :  { %20745 = vst [vmem:[#allocation58_spill] sm:$0xff] %v17656_v40  ;;  %v6404_v5 = vmax.f32 %v6402_v15, %v6403_v35  ;;  %v17673_v11 = vadd.f32 %v13655_v30, %v17602_v8  ;;  %v6418_v4 = vsel %vm1171_vm3, %v17656_v40, -inf  ;;  %v6413_v15 = vmax.f32 %v6411_v38, %v6412_v45  ;;  %12992 = vmatmul.mubr.msk.bf16.gmra.mrb[24].mxu1 %vm1171_vm3, %v6624_v41 }
 0x8ea   :  { %20746 = vst [vmem:[#allocation57_spill] sm:$0xff] %v17662_v23  ;;  %v6414_v13 = vsel %vm1171_vm3, %v17662_v23, -inf  ;;  %v17676_v39 = vadd.f32 %v13657_v10, %v17602_v8  ;;  %v6573_v50 = vmax.f32 %v17656_v40, 0.0  ;;  %v6571_v41 = vmax.f32 %v17662_v23, 0.0 }
 0x8eb   :  { %20747 = vst [vmem:[#allocation63_spill] sm:$0xff] %v17673_v11  ;;  %v6405_v42 = vrot.slane %v6404_v5, 1  ;;  %v6574_v43 = vmax.f32 %v17673_v11, 0.0  ;;  %v6415_v25 = vmax.f32 %v6413_v15, %v6414_v13 }
 0x8ec   :  { %20748 = vst [vmem:[#allocation68_spill] sm:$0xff] %v17676_v39  ;;  %v6416_v8 = vsel %vm1171_vm3, %v17676_v39, -inf  ;;  %v12925_v56 = vpop.f32.mrb[160].mxu0  ;;  %v6572_v35 = vmax.f32 %v17676_v39, 0.0 }
 0x8ed   :  { %v6406_v19 = vmax.f32 %v6404_v5, %v6405_v42  ;;  %v5901_v30 = vpop.f32.mrb[161].mxu0  ;;  %v6626_v28 = vpack.c.bf16 %v6574_v43, %v6573_v50  ;;  %v13659_v32 = vadd.f32 %v12925_v56, %v17470_v36  ;;  %v6417_v9 = vmax.f32 %v6415_v25, %v6416_v8 }
 0x8ee   :  { %v13661_v10 = vadd.f32 %v17470_v36, %v5901_v30  ;;  %v12926_v49 = vpop.f32.mrb[162].mxu0  ;;  %v6625_v50 = vpack.c.bf16 %v6572_v35, %v6571_v41  ;;  %v6164_v8 = vcombine.high %v17632_v33, %v17632_v33  ;;  %v7076_v25 = vunpack.c.l.b16 %v7052_v16 }
 0x8ef   :  { %v7045_v38 = vmax.f32 %v6406_v19, 0.0  ;;  %v8237_v45 = vpack.c.bf16 %v6406_v19, %v6406_v19  ;;  %v13663_v5 = vadd.f32 %v12926_v49, %v17470_v36  ;;  %v5904_v13 = vpop.f32.mrb[163].mxu0  ;;  %v17696_v42 = vadd.f32 %v13659_v32, %v17666_v61 }
 0x8f0   :  { %v17699_v15 = vadd.f32 %v13661_v10, %v17666_v61  ;;  %v13665_v57 = vadd.f32 %v17470_v36, %v5904_v13  ;;  %v6419_v54 = vmax.f32 %v6417_v9, %v6418_v4  ;;  %v17709_v19 = vrot.slane %v17632_v33, %v20722_v60  ;;  %12995 = vmatprep.mubr.msk.bf16.mxu1 %vm1171_vm3, %v6625_v50 }
 0x8f1   :  { %20749 = vst [vmem:[#allocation62_spill] sm:$0xff] %v17696_v42  ;;  %v7053_v43 = vpack.c.bf16 %v7045_v38, %v7045_v38  ;;  %v8253_v56 = vunpack.c.l.b16 %v8237_v45  ;;  %v17703_v30 = vadd.f32 %v13663_v5, %v17666_v61  ;;  %v6420_v32 = vsel %vm1171_vm3, %v17673_v11, -inf  ;;  %12996 = vmatmul.mubr.msk.bf16.gmra.mrb[28].mxu1 %vm1171_vm3, %v6626_v28 }
 0x8f2   :  { %20750 = vst [vmem:[#allocation61_spill] sm:$0xff] %v17699_v15  ;;  %v6421_v4 = vmax.f32 %v6419_v54, %v6420_v32  ;;  %v6577_v9 = vmax.f32 %v17696_v42, 0.0  ;;  %v6428_v10 = vsel %vm1171_vm3, %v17699_v15, -inf  ;;  %v17725_v49 = vadd.f32 %v13665_v57, %v17666_v61 }
 0x8f3   :  { %20751 = vst [vmem:[#allocation70_spill] sm:$0xff] %v17703_v30  ;;  %v7077_v35 = vunpack.c.l.b16 %v7053_v43  ;;  %v17715_v41 = vsel %vm2725_vm5, %v8253_v56, %v8252_v27  ;;  %v6578_v33 = vmax.f32 %v17703_v30, 0.0  ;;  %v6575_v45 = vmax.f32 %v17699_v15, 0.0 }
 0x8f4   :  { %20752 = vst [vmem:[#allocation71_spill] sm:$0xff] %v17725_v49  ;;  %v12929_v38 = vpop.f32.mrb[164].mxu0  ;;  %v6422_v54 = vrot.slane %v6421_v4, 4  ;;  %v6429_v50 = vsel %vm1171_vm3, %v17725_v49, -inf  ;;  %v6576_v43 = vmax.f32 %v17725_v49, 0.0 }
 0x8f5   :  { %v17728_v27 = vsel %vm2725_vm5, %v7077_v35, %v7076_v25  ;;  %v13667_v28 = vadd.f32 %v12929_v38, %v17470_v36  ;;  %v5917_v5 = vpop.f32.mrb[165].mxu0  ;;  %v6628_v13 = vpack.c.bf16 %v6578_v33, %v6577_v9  ;;  %v6430_v16 = vmax.f32 %v6428_v10, %v6429_v50 }
 0x8f6   :  { %v12930_v56 = vpop.f32.mrb[166].mxu0  ;;  %v6423_v32 = vmax.f32 %v6421_v4, %v6422_v54  ;;  %v13669_v35 = vadd.f32 %v17470_v36, %v5917_v5  ;;  %v6431_v9 = vsel %vm1171_vm3, %v17696_v42, -inf  ;;  %v6627_v1 = vpack.c.bf16 %v6576_v43, %v6575_v45 }
 0x8f7   :  { %v17738_v25 = vadd.f32 %v13667_v28, %v17666_v61  ;;  %v5920_v52 = vpop.f32.mrb[167].mxu0  ;;  %v13671_v33 = vadd.f32 %v12930_v56, %v17470_v36  ;;  %v6432_v48 = vmax.f32 %v6430_v16, %v6431_v9  ;;  %v6433_v4 = vsel %vm1171_vm3, %v17703_v30, -inf }
 0x8f8   :  { %v13673_v38 = vadd.f32 %v17470_v36, %v5920_v52  ;;  %v6424_v44 = vrot.slane %v6423_v32, 2  ;;  %v17748_v10 = vadd.f32 %v13669_v35, %v17666_v61  ;;  %12999 = vmatprep.mubr.msk.bf16.mxu1 %vm1171_vm3, %v6627_v1  ;;  %v17758_v5 = vrot.slane %v6164_v8, %v20722_v60 }
 0x8f9   :  { %20753 = vst [vmem:[#allocation69_spill] sm:$0xff] %v17738_v25  ;;  %v17751_v54 = vadd.f32 %v13671_v33, %v17666_v61  ;;  %v17762_v52 = vrot.slane %v17709_v19, %v20724_v34  ;;  %v6434_v45 = vmax.f32 %v6432_v48, %v6433_v4  ;;  %13000 = vmatmul.mubr.msk.bf16.gmra.mrb[32].mxu1 %vm1171_vm3, %v6628_v13  ;;  %v6581_v50 = vmax.f32 %v17738_v25, 0.0 }
 0x8fa   :  { %20754 = vst [vmem:[#allocation95_spill] sm:$0xff] %v17748_v10  ;;  %v17754_v28 = vadd.f32 %v13673_v38, %v17666_v61  ;;  %v6425_v16 = vmax.f32 %v6423_v32, %v6424_v44  ;;  %v6435_v43 = vsel %vm1171_vm3, %v17748_v10, -inf  ;;  %v6579_v61 = vmax.f32 %v17748_v10, 0.0 }
 0x8fb   :  { %20755 = vst [vmem:[#allocation74_spill] sm:$0xff] %v17751_v54  ;;  %v6582_v1 = vmax.f32 %v17751_v54, 0.0  ;;  %v6436_v35 = vmax.f32 %v6434_v45, %v6435_v43  ;;  %v6439_v53 = vsel %vm1171_vm3, %v17738_v25, -inf }
 0x8fc   :  { %20756 = vst [vmem:[#allocation75_spill] sm:$0xff] %v17754_v28  ;;  %v12933_v56 = vpop.f32.mrb[168].mxu0  ;;  %v6426_v8 = vrot.slane %v6425_v16, 1  ;;  %v6437_v48 = vsel %vm1171_vm3, %v17754_v28, -inf  ;;  %v6580_v32 = vmax.f32 %v17754_v28, 0.0 }
 0x8fd   :  { %v5933_v44 = vpop.f32.mrb[169].mxu0  ;;  %v6630_v13 = vpack.c.bf16 %v6582_v1, %v6581_v50  ;;  %v13675_v38 = vadd.f32 %v12933_v56, %v17470_v36  ;;  %v6438_v47 = vmax.f32 %v6436_v35, %v6437_v48 }
 0x8fe   :  { %v12934_v4 = vpop.f32.mrb[170].mxu0  ;;  %v6427_v57 = vmax.f32 %v6425_v16, %v6426_v8  ;;  %v13677_v45 = vadd.f32 %v17470_v36, %v5933_v44  ;;  %v6629_v46 = vpack.c.bf16 %v6580_v32, %v6579_v61  ;;  %v6441_v8 = vsel %vm1171_vm3, %v17751_v54, -inf }
 0x8ff   :  { %v13679_v43 = vadd.f32 %v12934_v4, %v17470_v36  ;;  %v5936_v9 = vpop.f32.mrb[171].mxu0  ;;  %v17783_v50 = vadd.f32 %v13675_v38, %v17762_v52  ;;  %v6440_v56 = vmax.f32 %v6438_v47, %v6439_v53 }
 0x900   :  { %v13681_v1 = vadd.f32 %v17470_v36, %v5936_v9  ;;  %v7046_v33 = vmax.f32 %v6427_v57, 0.0  ;;  %v8238_v12 = vpack.c.bf16 %v6427_v57, %v6427_v57  ;;  %v17787_v16 = vadd.f32 %v13677_v45, %v17762_v52  ;;  %13003 = vmatprep.mubr.msk.bf16.mxu1 %vm1171_vm3, %v6629_v46 }
 0x901   :  { %20757 = vst [vmem:[#allocation72_spill] sm:$0xff] %v17783_v50  ;;  %v6452_v35 = vsel %vm1171_vm3, %v17783_v50, -inf  ;;  %v17794_v48 = vadd.f32 %v13679_v43, %v17762_v52  ;;  %v6442_v53 = vmax.f32 %v6440_v56, %v6441_v8  ;;  %v6585_v47 = vmax.f32 %v17783_v50, 0.0  ;;  %13004 = vmatmul.mubr.msk.bf16.gmra.mrb[36].mxu1 %vm1171_vm3, %v6630_v13 }
 0x902   :  { %20758 = vst [vmem:[#allocation73_spill] sm:$0xff] %v17787_v16  ;;  %v17797_v44 = vadd.f32 %v13681_v1, %v17762_v52  ;;  %v7054_v61 = vpack.c.bf16 %v7046_v33, %v7046_v33  ;;  %v8254_v57 = vunpack.c.l.b16 %v8238_v12  ;;  %v6449_v9 = vsel %vm1171_vm3, %v17787_v16, -inf }
 0x903   :  { %20759 = vst [vmem:[#allocation76_spill] sm:$0xff] %v17794_v48  ;;  %v6583_v32 = vmax.f32 %v17787_v16, 0.0  ;;  %v6586_v38 = vmax.f32 %v17794_v48, 0.0  ;;  %v6443_v46 = vrot.slane %v6442_v53, 4  ;;  %v6454_v29 = vsel %vm1171_vm3, %v17794_v48, -inf }
 0x904   :  { %20760 = vst [vmem:[#allocation96_spill] sm:$0xff] %v17797_v44  ;;  %v12937_v45 = vpop.f32.mrb[172].mxu0  ;;  %v7078_v43 = vunpack.c.l.b16 %v7054_v61  ;;  %v17810_v12 = vsel %vm2727_vm6, %v8254_v57, %v17715_v41  ;;  %v6450_v13 = vsel %vm1171_vm3, %v17797_v44, -inf  ;;  %v6584_v8 = vmax.f32 %v17797_v44, 0.0 }
 0x905   :  { %v5949_v33 = vpop.f32.mrb[173].mxu0  ;;  %v6632_v1 = vpack.c.bf16 %v6586_v38, %v6585_v47  ;;  %v6451_v56 = vmax.f32 %v6449_v9, %v6450_v13  ;;  %v6444_v4 = vmax.f32 %v6442_v53, %v6443_v46  ;;  %v13683_v41 = vadd.f32 %v12937_v45, %v17470_v36 }
 0x906   :  { %v12938_v25 = vpop.f32.mrb[174].mxu0  ;;  %v17819_v61 = vsel %vm2727_vm6, %v7078_v43, %v17728_v27  ;;  %v13685_v57 = vadd.f32 %v17470_v36, %v5949_v33  ;;  %v6631_v38 = vpack.c.bf16 %v6584_v8, %v6583_v32 }
 0x907   :  { %v5952_v50 = vpop.f32.mrb[175].mxu0  ;;  %v6453_v54 = vmax.f32 %v6451_v56, %v6452_v35  ;;  %v13687_v47 = vadd.f32 %v12938_v25, %v17470_v36  ;;  %v6445_v13 = vrot.slane %v6444_v4, 2  ;;  %v17828_v16 = vadd.f32 %v13683_v41, %v17762_v52 }
 0x908   :  { %v13689_v9 = vadd.f32 %v17470_v36, %v5952_v50  ;;  %v17831_v27 = vadd.f32 %v13685_v57, %v17762_v52  ;;  %13007 = vmatprep.mubr.msk.bf16.mxu1 %vm1171_vm3, %v6631_v38  ;;  %v17842_v25 = vrot.slane %v17758_v5, %v20724_v34 }
 0x909   :  { %20761 = vst [vmem:[#allocation79_spill] sm:$0xff] %v17828_v16  ;;  %v6455_v53 = vmax.f32 %v6453_v54, %v6454_v29  ;;  %v17834_v45 = vadd.f32 %v13687_v47, %v17762_v52  ;;  %v6446_v50 = vmax.f32 %v6444_v4, %v6445_v13  ;;  %v6460_v32 = vsel %vm1171_vm3, %v17828_v16, -inf  ;;  %13008 = vmatmul.mubr.msk.bf16.gmra.mrb[40].mxu1 %vm1171_vm3, %v6632_v1 }
 0x90a   :  { %20762 = vst [vmem:[#allocation77_spill] sm:$0xff] %v17831_v27  ;;  %v17837_v35 = vadd.f32 %v13689_v9, %v17762_v52  ;;  %v6456_v43 = vsel %vm1171_vm3, %v17831_v27, -inf  ;;  %v6589_v29 = vmax.f32 %v17828_v16, 0.0  ;;  %v6587_v52 = vmax.f32 %v17831_v27, 0.0 }
 0x90b   :  { %20763 = vst [vmem:[#allocation80_spill] sm:$0xff] %v17834_v45  ;;  %v6457_v54 = vmax.f32 %v6455_v53, %v6456_v43  ;;  %v6590_v46 = vmax.f32 %v17834_v45, 0.0  ;;  %v6447_v56 = vrot.slane %v6446_v50, 1  ;;  %v6462_v44 = vsel %vm1171_vm3, %v17834_v45, -inf }
 0x90c   :  { %20764 = vst [vmem:[#allocation81_spill] sm:$0xff] %v17837_v35  ;;  %v12941_v33 = vpop.f32.mrb[176].mxu0  ;;  %v6458_v8 = vsel %vm1171_vm3, %v17837_v35, -inf  ;;  %v6588_v41 = vmax.f32 %v17837_v35, 0.0 }
 0x90d   :  { %v5965_v57 = vpop.f32.mrb[177].mxu0  ;;  %v6634_v47 = vpack.c.bf16 %v6590_v46, %v6589_v29  ;;  %v6459_v1 = vmax.f32 %v6457_v54, %v6458_v8  ;;  %v13691_v38 = vadd.f32 %v12941_v33, %v17470_v36  ;;  %v6448_v53 = vmax.f32 %v6446_v50, %v6447_v56 }
 0x90e   :  { %v12942_v13 = vpop.f32.mrb[178].mxu0  ;;  %v13693_v43 = vadd.f32 %v17470_v36, %v5965_v57  ;;  %v6633_v16 = vpack.c.bf16 %v6588_v41, %v6587_v52  ;;  %v6194_v52 = vcombine.high %v17709_v19, %v17709_v19 }
 0x90f   :  { %v13695_v48 = vadd.f32 %v12942_v13, %v17470_v36  ;;  %v5968_v4 = vpop.f32.mrb[179].mxu0  ;;  %v6461_v10 = vmax.f32 %v6459_v1, %v6460_v32  ;;  %v17865_v29 = vadd.f32 %v13691_v38, %v17842_v25  ;;  %v7047_v46 = vmax.f32 %v6448_v53, 0.0 }
 0x910   :  { %v13697_v54 = vadd.f32 %v17470_v36, %v5968_v4  ;;  %v8239_v8 = vpack.c.bf16 %v6448_v53, %v6448_v53  ;;  %v17869_v33 = vadd.f32 %v13693_v43, %v17842_v25  ;;  %13011 = vmatprep.mubr.msk.bf16.mxu1 %vm1171_vm3, %v6633_v16 }
 0x911   :  { %20765 = vst [vmem:[#allocation83_spill] sm:$0xff] %v17865_v29  ;;  %v17872_v50 = vadd.f32 %v13695_v48, %v17842_v25  ;;  %v6463_v56 = vmax.f32 %v6461_v10, %v6462_v44  ;;  %v6473_v32 = vsel %vm1171_vm3, %v17865_v29, -inf  ;;  %v7055_v4 = vpack.c.bf16 %v7047_v46, %v7047_v46  ;;  %13012 = vmatmul.mubr.msk.bf16.gmra.mrb[44].mxu1 %vm1171_vm3, %v6634_v47 }
 0x912   :  { %20766 = vst [vmem:[#allocation78_spill] sm:$0xff] %v17869_v33  ;;  %v17880_v41 = vadd.f32 %v13697_v54, %v17842_v25  ;;  %v8255_v57 = vunpack.c.l.b16 %v8239_v8  ;;  %v6593_v1 = vmax.f32 %v17865_v29, 0.0  ;;  %v6470_v48 = vsel %vm1171_vm3, %v17869_v33, -inf }
 0x913   :  { %20767 = vst [vmem:[#allocation87_spill] sm:$0xff] %v17872_v50  ;;  %v6464_v16 = vrot.slane %v6463_v56, 4  ;;  %v6591_v38 = vmax.f32 %v17869_v33, 0.0  ;;  %v6594_v19 = vmax.f32 %v17872_v50, 0.0  ;;  %v7079_v13 = vunpack.c.l.b16 %v7055_v4 }
 0x914   :  { %20768 = vst [vmem:[#allocation85_spill] sm:$0xff] %v17880_v41  ;;  %v12945_v44 = vpop.f32.mrb[180].mxu0  ;;  %v17892_v53 = vsel %vm2729_vm7, %v8255_v57, %v17810_v12  ;;  %v6471_v43 = vsel %vm1171_vm3, %v17880_v41, -inf  ;;  %v6592_v54 = vmax.f32 %v17880_v41, 0.0 }
 0x915   :  { %v5981_v47 = vpop.f32.mrb[181].mxu0  ;;  %v6465_v46 = vmax.f32 %v6463_v56, %v6464_v16  ;;  %v6636_v8 = vpack.c.bf16 %v6594_v19, %v6593_v1  ;;  %v6472_v9 = vmax.f32 %v6470_v48, %v6471_v43  ;;  %v17901_v4 = vsel %vm2729_vm7, %v7079_v13, %v17819_v61 }
 0x916   :  { %v12946_v27 = vpop.f32.mrb[182].mxu0  ;;  %v13699_v12 = vadd.f32 %v12945_v44, %v17470_v36  ;;  %v13701_v57 = vadd.f32 %v17470_v36, %v5981_v47  ;;  %v6635_v1 = vpack.c.bf16 %v6592_v54, %v6591_v38  ;;  %v6475_v48 = vsel %vm1171_vm3, %v17872_v50, -inf }
 0x917   :  { %v13703_v10 = vadd.f32 %v12946_v27, %v17470_v36  ;;  %v5984_v29 = vpop.f32.mrb[183].mxu0  ;;  %v6466_v35 = vrot.slane %v6465_v46, 2  ;;  %v6474_v28 = vmax.f32 %v6472_v9, %v6473_v32  ;;  %v17923_v9 = vrot.slane %v6194_v52, %v20724_v34 }
 0x918   :  { %v13705_v56 = vadd.f32 %v17470_v36, %v5984_v29  ;;  %v17910_v16 = vadd.f32 %v13699_v12, %v17842_v25  ;;  %v17913_v61 = vadd.f32 %v13701_v57, %v17842_v25  ;;  %13015 = vmatprep.mubr.msk.bf16.mxu1 %vm1171_vm3, %v6635_v1 }
 0x919   :  { %v17916_v19 = vadd.f32 %v13703_v10, %v17842_v25  ;;  %v6467_v44 = vmax.f32 %v6465_v46, %v6466_v35  ;;  %v6476_v27 = vmax.f32 %v6474_v28, %v6475_v48  ;;  %13016 = vmatmul.mubr.msk.bf16.gmra.mrb[48].mxu1 %vm1171_vm3, %v6636_v8 }
 0x91a   :  { %20769 = vst [vmem:[#allocation97_spill] sm:$0xff] %v17910_v16  ;;  %20770 = vst [vmem:[#allocation82_spill] sm:$0xff] %v17913_v61  ;;  %v17919_v13 = vadd.f32 %v13705_v56, %v17842_v25  ;;  %v6597_v29 = vmax.f32 %v17910_v16, 0.0  ;;  %v6477_v32 = vsel %vm1171_vm3, %v17913_v61, -inf  ;;  %v6595_v35 = vmax.f32 %v17913_v61, 0.0 }
 0x91b   :  { %20771 = vst [vmem:[#allocation91_spill] sm:$0xff] %v17916_v19  ;;  %v6468_v38 = vrot.slane %v6467_v44, 1  ;;  %v6478_v10 = vmax.f32 %v6476_v27, %v6477_v32  ;;  %v6598_v28 = vmax.f32 %v17916_v19, 0.0  ;;  %v6481_v48 = vsel %vm1171_vm3, %v17910_v16, -inf }
 0x91c   :  { %20772 = vst [vmem:[#allocation86_spill] sm:$0xff] %v17919_v13  ;;  %v12949_v25 = vpop.f32.mrb[184].mxu0  ;;  %v6479_v52 = vsel %vm1171_vm3, %v17919_v13, -inf  ;;  %v6596_v54 = vmax.f32 %v17919_v13, 0.0 }
 0x91d   :  { %v5997_v46 = vpop.f32.mrb[185].mxu0  ;;  %v6469_v8 = vmax.f32 %v6467_v44, %v6468_v38  ;;  %v6638_v12 = vpack.c.bf16 %v6598_v28, %v6597_v29  ;;  %v6480_v57 = vmax.f32 %v6478_v10, %v6479_v52  ;;  %v13707_v56 = vadd.f32 %v12949_v25, %v17470_v36 }
 0x91e   :  { %v12950_v1 = vpop.f32.mrb[186].mxu0  ;;  %v13709_v27 = vadd.f32 %v17470_v36, %v5997_v46  ;;  %v6637_v45 = vpack.c.bf16 %v6596_v54, %v6595_v35  ;;  %v6483_v44 = vsel %vm1171_vm3, %v17916_v19, -inf  ;;  %v6196_v52 = vcombine.high %v17758_v5, %v17758_v5 }
 0x91f   :  { %v13711_v32 = vadd.f32 %v12950_v1, %v17470_v36  ;;  %v6000_v43 = vpop.f32.mrb[187].mxu0  ;;  %v7048_v50 = vmax.f32 %v6469_v8, 0.0  ;;  %v8240_v33 = vpack.c.bf16 %v6469_v8, %v6469_v8  ;;  %v6482_v41 = vmax.f32 %v6480_v57, %v6481_v48 }
 0x920   :  { %v17944_v47 = vadd.f32 %v13707_v56, %v17923_v9  ;;  %v17949_v29 = vadd.f32 %v13709_v27, %v17923_v9  ;;  %v13713_v10 = vadd.f32 %v17470_v36, %v6000_v43  ;;  %13019 = vmatprep.mubr.msk.bf16.mxu1 %vm1171_vm3, %v6637_v45 }
 0x921   :  { %v17952_v38 = vadd.f32 %v13711_v32, %v17923_v9  ;;  %v7056_v35 = vpack.c.bf16 %v7048_v50, %v7048_v50  ;;  %v8256_v28 = vunpack.c.l.b16 %v8240_v33  ;;  %v6484_v25 = vmax.f32 %v6482_v41, %v6483_v44  ;;  %13020 = vmatmul.mubr.msk.bf16.gmra.mrb[52].mxu1 %vm1171_vm3, %v6638_v12 }
 0x922   :  { %20773 = vst [vmem:[#allocation89_spill] sm:$0xff] %v17944_v47  ;;  %20774 = vst [vmem:[#allocation84_spill] sm:$0xff] %v17949_v29  ;;  %v6601_v54 = vmax.f32 %v17944_v47, 0.0  ;;  %v6491_v46 = vsel %vm1171_vm3, %v17949_v29, -inf  ;;  %v6599_v33 = vmax.f32 %v17949_v29, 0.0  ;;  %v17967_v41 = vadd.f32 %v13713_v10, %v17923_v9 }
 0x923   :  { %20775 = vst [vmem:[#allocation6_spill] sm:$0xff] %v17952_v38  ;;  %v7080_v8 = vunpack.c.l.b16 %v7056_v35  ;;  %v6485_v57 = vrot.slane %v6484_v25, 4  ;;  %v6602_v56 = vmax.f32 %v17952_v38, 0.0  ;;  %v17972_v1 = vsel %vm2731_vm8, %v8256_v28, %v17892_v53 }
 0x924   :  { %v12953_v50 = vpop.f32.mrb[188].mxu0  ;;  %20776 = vst [vmem:[#allocation90_spill] sm:$0xff] %v17967_v41  ;;  %v6492_v10 = vsel %vm1171_vm3, %v17967_v41, -inf  ;;  %v6600_v35 = vmax.f32 %v17967_v41, 0.0  ;;  %v6496_v29 = vsel %vm1171_vm3, %v17952_v38, -inf }
 0x925   :  { %v13715_v5 = vadd.f32 %v12953_v50, %v17470_v36  ;;  %v6013_v43 = vpop.f32.mrb[189].mxu0  ;;  %v17976_v12 = vsel %vm2731_vm8, %v7080_v8, %v17901_v4  ;;  %v6486_v48 = vmax.f32 %v6484_v25, %v6485_v57  ;;  %v6640_v27 = vpack.c.bf16 %v6602_v56, %v6601_v54 }
 0x926   :  { %v13717_v32 = vadd.f32 %v17470_v36, %v6013_v43  ;;  %v12954_v44 = vpop.f32.mrb[190].mxu0  ;;  %v6493_v4 = vmax.f32 %v6491_v46, %v6492_v10  ;;  %v6494_v8 = vsel %vm1171_vm3, %v17944_v47, -inf  ;;  %v6639_v56 = vpack.c.bf16 %v6600_v35, %v6599_v33 }
 0x927   :  { %v17985_v53 = vadd.f32 %v13715_v5, %v17923_v9  ;;  %v6016_v28 = vpop.f32.mrb[191].mxu0  ;;  %v6487_v45 = vrot.slane %v6486_v48, 2  ;;  %v13719_v54 = vadd.f32 %v12954_v44, %v17470_v36  ;;  %v17995_v43 = vrot.slane %v6196_v52, %v20724_v34 }
 0x928   :  { %v17988_v25 = vadd.f32 %v13717_v32, %v17923_v9  ;;  %v13721_v57 = vadd.f32 %v17470_v36, %v6016_v28  ;;  %v6495_v5 = vmax.f32 %v6493_v4, %v6494_v8  ;;  %13023 = vmatprep.mubr.msk.bf16.mxu1 %vm1171_vm3, %v6639_v56 }
 0x929   :  { %20777 = vst [vmem:[#allocation5_spill] sm:$0xff] %v17985_v53  ;;  %v6488_v50 = vmax.f32 %v6486_v48, %v6487_v45  ;;  %v18002_v32 = vadd.f32 %v13719_v54, %v17923_v9  ;;  %v6502_v52 = vsel %vm1171_vm3, %v17985_v53, -inf  ;;  %v6605_v45 = vmax.f32 %v17985_v53, 0.0  ;;  %13024 = vmatmul.mubr.msk.bf16.gmra.mrb[56].mxu1 %vm1171_vm3, %v6640_v27 }
 0x92a   :  { %20778 = vst [vmem:[#allocation88_spill] sm:$0xff] %v17988_v25  ;;  %v6498_v46 = vsel %vm1171_vm3, %v17988_v25, -inf  ;;  %v18005_v44 = vadd.f32 %v13721_v57, %v17923_v9  ;;  %v6497_v48 = vmax.f32 %v6495_v5, %v6496_v29  ;;  %v6603_v35 = vmax.f32 %v17988_v25, 0.0 }
 0x92b   :  { %20779 = vst [vmem:[#allocation10_spill] sm:$0xff] %v18002_v32  ;;  %v6489_v33 = vrot.slane %v6488_v50, 1  ;;  %v6606_v28 = vmax.f32 %v18002_v32, 0.0 }
 0x92c   :  { %20780 = vst [vmem:[#allocation8_spill] sm:$0xff] %v18005_v44  ;;  %v12957_v10 = vpop.f32.mrb[192].mxu0  ;;  %v6500_v4 = vsel %vm1171_vm3, %v18005_v44, -inf  ;;  %v6499_v57 = vmax.f32 %v6497_v48, %v6498_v46  ;;  %v6604_v56 = vmax.f32 %v18005_v44, 0.0 }
 0x92d   :  { %v6029_v54 = vpop.f32.mrb[193].mxu0  ;;  %v6490_v8 = vmax.f32 %v6488_v50, %v6489_v33  ;;  %v6642_v5 = vpack.c.bf16 %v6606_v28, %v6605_v45  ;;  %v13723_v47 = vadd.f32 %v12957_v10, %v17470_v36  ;;  %v14373_v50 = vld [vmem:[%s19909_s6 + $0x2] ss:$0 sm:$0xff]  ;;  %v6504_v28 = vsel %vm1171_vm3, %v18002_v32, -inf }
 0x92e   :  { %v12958_v27 = vpop.f32.mrb[194].mxu0  ;;  %v13725_v38 = vadd.f32 %v17470_v36, %v6029_v54  ;;  %v6501_v19 = vmax.f32 %v6499_v57, %v6500_v4  ;;  %v6641_v10 = vpack.c.bf16 %v6604_v56, %v6603_v35 }
 0x92f   :  { %v13727_v41 = vadd.f32 %v12958_v27, %v17470_v36  ;;  %v6032_v9 = vpop.f32.mrb[195].mxu0  ;;  %v7049_v53 = vmax.f32 %v6490_v8, 0.0  ;;  %v8241_v16 = vpack.c.bf16 %v6490_v8, %v6490_v8  ;;  %v18028_v33 = vadd.f32 %v13723_v47, %v17995_v43 }
 0x930   :  { %v13729_v46 = vadd.f32 %v14373_v50, %v6032_v9  ;;  %v18031_v45 = vadd.f32 %v13725_v38, %v17995_v43  ;;  %v6503_v4 = vmax.f32 %v6501_v19, %v6502_v52  ;;  %13027 = vmatprep.mubr.msk.bf16.mxu1 %vm1171_vm3, %v6641_v10 }
 0x931   :  { %20781 = vst [vmem:[#allocation9_spill] sm:$0xff] %v18028_v33  ;;  %v18034_v48 = vadd.f32 %v13727_v41, %v17995_v43  ;;  %v7057_v36 = vpack.c.bf16 %v7049_v53, %v7049_v53  ;;  %v8257_v8 = vunpack.c.l.b16 %v8241_v16  ;;  %v6515_v47 = vsel %vm1171_vm3, %v18028_v33, -inf  ;;  %13028 = vmatmul.mubr.msk.bf16.gmra.mrb[60].mxu1 %vm1171_vm3, %v6642_v5 }
 0x932   :  { %20782 = vst [vmem:[#allocation7_spill] sm:$0xff] %v18031_v45  ;;  %v18039_v54 = vadd.f32 %v13729_v46, %v17995_v43  ;;  %v6609_v9 = vmax.f32 %v18028_v33, 0.0  ;;  %v6512_v38 = vsel %vm1171_vm3, %v18031_v45, -inf  ;;  %v6505_v53 = vmax.f32 %v6503_v4, %v6504_v28 }
 0x933   :  { %20783 = vst [vmem:[#allocation14_spill] sm:$0xff] %v18034_v48  ;;  %v7081_v41 = vunpack.c.l.b16 %v7057_v36  ;;  %v6607_v35 = vmax.f32 %v18031_v45, 0.0  ;;  %v6610_v19 = vmax.f32 %v18034_v48, 0.0  ;;  %v8264_v42 = vsel %vm2733_vm9, %v8257_v8, %v17972_v1 }
 0x934   :  { %20784 = vst [vmem:[#allocation12_spill] sm:$0xff] %v18039_v54  ;;  %v12961_v52 = vpop.f32.mrb[196].mxu0  ;;  %v6513_v57 = vsel %vm1171_vm3, %v18039_v54, -inf  ;;  %v6608_v56 = vmax.f32 %v18039_v54, 0.0  ;;  %v6506_v36 = vrot.slane %v6505_v53, 4  ;;  %v6517_v27 = vsel %vm1171_vm3, %v18034_v48, -inf }
 0x935   :  { %v6045_v46 = vpop.f32.mrb[197].mxu0  ;;  %v7088_v10 = vsel %vm2733_vm9, %v7081_v41, %v17976_v12  ;;  %v6644_v28 = vpack.c.bf16 %v6610_v19, %v6609_v9  ;;  %v6514_v4 = vmax.f32 %v6512_v38, %v6513_v57  ;;  %v13731_v29 = vadd.f32 %v14373_v50, %v12961_v52 }
 0x936   :  { %v12962_v5 = vpop.f32.mrb[198].mxu0  ;;  %v13733_v32 = vadd.f32 %v14373_v50, %v6045_v46  ;;  %v6643_v33 = vpack.c.bf16 %v6608_v56, %v6607_v35  ;;  %v6507_v44 = vmax.f32 %v6505_v53, %v6506_v36 }
 0x937   :  { %v13735_v25 = vadd.f32 %v14373_v50, %v12962_v5  ;;  %v6048_v16 = vpop.f32.mrb[199].mxu0  ;;  %v6516_v61 = vmax.f32 %v6514_v4, %v6515_v47  ;;  %v18064_v12 = vadd.f32 %v13731_v29, %v17995_v43 }
 0x938   :  { %v13737_v13 = vadd.f32 %v14373_v50, %v6048_v16  ;;  %v18067_v9 = vadd.f32 %v13733_v32, %v17995_v43  ;;  %13031 = vmatprep.mubr.msk.bf16.mxu1 %vm1171_vm3, %v6643_v33  ;;  %v6508_v41 = vrot.slane %v6507_v44, 2 }
 0x939   :  { %20785 = vst [vmem:[#allocation13_spill] sm:$0xff] %v18064_v12  ;;  %v18070_v38 = vadd.f32 %v13735_v25, %v17995_v43  ;;  %v6518_v47 = vmax.f32 %v6516_v61, %v6517_v27  ;;  %v6613_v1 = vmax.f32 %v18064_v12, 0.0  ;;  %13032 = vmatmul.mubr.msk.bf16.gmra.mrb[64].mxu1 %vm1171_vm3, %v6644_v28  ;;  %v6523_v52 = vsel %vm1171_vm3, %v18064_v12, -inf }
 0x93a   :  { %20786 = vst [vmem:[#allocation11_spill] sm:$0xff] %v18067_v9  ;;  %v18074_v50 = vadd.f32 %v13737_v13, %v17995_v43  ;;  %v6519_v8 = vsel %vm1171_vm3, %v18067_v9, -inf  ;;  %v6509_v29 = vmax.f32 %v6507_v44, %v6508_v41  ;;  %v6611_v32 = vmax.f32 %v18067_v9, 0.0 }
 0x93b   :  { %20787 = vst [vmem:[#allocation18_spill] sm:$0xff] %v18070_v38  ;;  %v6520_v53 = vmax.f32 %v6518_v47, %v6519_v8  ;;  %v6614_v35 = vmax.f32 %v18070_v38, 0.0  ;;  %v6525_v27 = vsel %vm1171_vm3, %v18070_v38, -inf }
 0x93c   :  { %20788 = vst [vmem:[#allocation16_spill] sm:$0xff] %v18074_v50  ;;  %v6521_v61 = vsel %vm1171_vm3, %v18074_v50, -inf  ;;  %v6612_v13 = vmax.f32 %v18074_v50, 0.0  ;;  %v6510_v33 = vrot.slane %v6509_v29, 1 }
 0x93d   :  { %v6646_v44 = vpack.c.bf16 %v6614_v35, %v6613_v1  ;;  %v6522_v19 = vmax.f32 %v6520_v53, %v6521_v61 }
 0x93e   :  { %v6645_v16 = vpack.c.bf16 %v6612_v13, %v6611_v32  ;;  %v6511_v57 = vmax.f32 %v6509_v29, %v6510_v33 }
 0x93f   :  { %v6524_v56 = vmax.f32 %v6522_v19, %v6523_v52 }
 0x940   :  { %13035 = vmatprep.mubr.msk.bf16.mxu1 %vm1171_vm3, %v6645_v16  ;;  %v7050_v46 = vmax.f32 %v6511_v57, 0.0  ;;  %v8242_v36 = vpack.c.bf16 %v6511_v57, %v6511_v57 }
 0x941   :  { %v6526_v28 = vmax.f32 %v6524_v56, %v6525_v27  ;;  %13036 = vmatmul.mubr.msk.bf16.gmra.mrb[68].mxu1 %vm1171_vm3, %v6646_v44 }
 0x942   :  { %v7058_v4 = vpack.c.bf16 %v7050_v46, %v7050_v46  ;;  %v8258_v5 = vunpack.c.l.b16 %v8242_v36  ;;  %13043 = vmatprep.mubr.msk.bf16.mxu1 %vm14400_vm4, %v20354_v3 }
 0x943   :  { %v6527_v41 = vrot.slane %v6526_v28, 4 }
 0x944   :  { %v7082_v47 = vunpack.c.l.b16 %v7058_v4  ;;  %v8265_v8 = vsel %vm2735_vm10, %v8258_v5, %v8264_v42 }
 0x945   :  { %v6528_v1 = vmax.f32 %v6526_v28, %v6527_v41 }
 0x946   :  { %v7089_v29 = vsel %vm2735_vm10, %v7082_v47, %v7088_v10 }
 0x947   :  { %v6529_v53 = vrot.slane %v6528_v1, 2 }
 0x949   :  { %v6530_v32 = vmax.f32 %v6528_v1, %v6529_v53 }
 0x94b   :  { %v6531_v35 = vrot.slane %v6530_v32, 1 }
 0x94d   :  { %v6532_v61 = vmax.f32 %v6530_v32, %v6531_v35 }
 0x94f   :  { %v7051_v13 = vmax.f32 %v6532_v61, 0.0  ;;  %v8243_v33 = vpack.c.bf16 %v6532_v61, %v6532_v61 }
 0x951   :  { %v7059_v19 = vpack.c.bf16 %v7051_v13, %v7051_v13  ;;  %v8259_v52 = vunpack.c.l.b16 %v8243_v33  ;;  %v14356_v13 = vld [vmem:[%s19908_s5 + $0x30] sm:$0xff]   ;;  %v14357_v33 = vld [vmem:[%s19908_s5 + $0x38] sm:$0xff]  }
 0x952   :  { %13047 = vmatprep.subr.bf16.mxu1 %v14356_v13 }
 0x953   :  { %v7083_v16 = vunpack.c.l.b16 %v7059_v19  ;;  %v8266_v44 = vsel %vm2737_vm11, %v8259_v52, %v8265_v8 }
 0x954   :  { %v8267_v57 = vpack.c.b16 %v8266_v44, %v8266_v44  ;;  %v18150_v44 = vld [vmem:[%s19910_s7 + $0x60] sm:$0xff]  }
 0x955   :  { %v7090_v56 = vsel %vm2737_vm11, %v7083_v16, %v7089_v29 }
 0x956   :  { %v7091_v27 = vpack.c.b16 %v7090_v56, %v7090_v56  ;;  %13188 = vmatmul.mubr.msk.bf16.vlgmr.msra.gmra.mrb[200].mxu0 %vm1171_vm3, %v8267_v57 }
 0x958   :  { %13044 = vmatmul.mubr.msk.bf16.vlgmr.msra.gmra.mrb[72].mxu1 %vm1171_vm3, %v7091_v27 }
 0x959   :  { %13048 = vmatpush3.bf16.msra.mxu1 %v14356_v13 }
 0x95a   :  { %13049 = vmatprep.subr.bf16.mxu1 %v14357_v33 }
 0x95d   :  { %13050 = vmatpush3.bf16.msra.mxu1 %v14357_v33 }
 0x95e   :  { %13115 = vmatprep.subr.bf16.mxu1 %v18150_v44 }
 0x99c   :  { %v18103_v42 = vpop.f32.mrb[8].mxu1 }
 0x99d   :  { %v18105_v10 = vpop.f32.mrb[9].mxu1 }
 0x99e   :  { %v18107_v46 = vpop.f32.mrb[10].mxu1 }
 0x99f   :  { %v18109_v36 = vpop.f32.mrb[11].mxu1 }
 0x9a4   :  { %v18111_v28 = vpop.f32.mrb[12].mxu1 }
 0x9a5   :  { %v18113_v4 = vpop.f32.mrb[13].mxu1 }
 0x9a6   :  { %v18115_v5 = vpop.f32.mrb[14].mxu1 }
 0x9a7   :  { %v18117_v41 = vpop.f32.mrb[15].mxu1 }
 0x9ac   :  { %v18119_v47 = vpop.f32.mrb[16].mxu1 }
 0x9ad   :  { %v18121_v1 = vpop.f32.mrb[17].mxu1 }
 0x9ae   :  { %v18123_v8 = vpop.f32.mrb[18].mxu1 }
 0x9af   :  { %v18125_v29 = vpop.f32.mrb[19].mxu1 }
 0x9b4   :  { %v18127_v53 = vpop.f32.mrb[20].mxu1 }
 0x9b5   :  { %v18129_v32 = vpop.f32.mrb[21].mxu1 }
 0x9b6   :  { %v18131_v35 = vpop.f32.mrb[22].mxu1 }
 0x9b7   :  { %v18133_v61 = vpop.f32.mrb[23].mxu1 }
 0x9bc   :  { %v18141_v19 = vpop.f32.mrb[24].mxu1 }
 0x9bd   :  { %v18143_v52 = vpop.f32.mrb[25].mxu1 }
 0x9be   :  { %v18145_v16 = vpop.f32.mrb[26].mxu1 }
 0x9bf   :  { %v18152_v57 = vpop.f32.mrb[27].mxu1 }
 0x9c4   :  { %v18155_v56 = vpop.f32.mrb[28].mxu1 }
 0x9c5   :  { %v18157_v27 = vpop.f32.mrb[29].mxu1 }
 0x9c6   :  { %v18159_v13 = vpop.f32.mrb[30].mxu1 }
 0x9c7   :  { %v18161_v25 = vpop.f32.mrb[31].mxu1 }
 0x9cc   :  { %v18163_v43 = vpop.f32.mrb[32].mxu1 }
 0x9cd   :  { %v18165_v12 = vpop.f32.mrb[33].mxu1 }
 0x9ce   :  { %v18167_v38 = vpop.f32.mrb[34].mxu1 }
 0x9cf   :  { %v18169_v9 = vpop.f32.mrb[35].mxu1 }
 0x9d4   :  { %v18171_v50 = vpop.f32.mrb[36].mxu1 }
 0x9d5   :  { %v18173_v33 = vpop.f32.mrb[37].mxu1 }
 0x9d6   :  { %v18175_v48 = vpop.f32.mrb[38].mxu1 }
 0x9d7   :  { %v18177_v45 = vpop.f32.mrb[39].mxu1 }
 0x9dc   :  { %v18179_v54 = vpop.f32.mrb[40].mxu1 }
 0x9dd   :  { %v18181_v30 = vpop.f32.mrb[41].mxu1 }
 0x9de   :  { %v18183_v15 = vpop.f32.mrb[42].mxu1 }
 0x9df   :  { %v18185_v49 = vpop.f32.mrb[43].mxu1 }
 0x9e4   :  { %v18187_v40 = vpop.f32.mrb[44].mxu1 }
 0x9e5   :  { %v18189_v11 = vpop.f32.mrb[45].mxu1 }
 0x9e6   :  { %v18191_v23 = vpop.f32.mrb[46].mxu1 }
 0x9e7   :  { %v18193_v39 = vpop.f32.mrb[47].mxu1 }
 0x9ec   :  { %v18195_v2 = vpop.f32.mrb[48].mxu1 }
 0x9ed   :  { %20789 = vst [vmem:[#allocation17_spill] sm:$0xff] %v18195_v2  ;;  %v18197_v6 = vpop.f32.mrb[49].mxu1 }
 0x9ee   :  { %v18199_v18 = vpop.f32.mrb[50].mxu1 }
 0x9ef   :  { %20790 = vst [vmem:[#allocation15_spill] sm:$0xff] %v18199_v18  ;;  %v18201_v62 = vpop.f32.mrb[51].mxu1 }
 0x9f0   :  { %20791 = vst [vmem:[#allocation22_spill] sm:$0xff] %v18201_v62 }
 0x9f4   :  { %v18203_v51 = vpop.f32.mrb[52].mxu1 }
 0x9f5   :  { %20792 = vst [vmem:[#allocation20_spill] sm:$0xff] %v18203_v51  ;;  %v18205_v7 = vpop.f32.mrb[53].mxu1 }
 0x9f6   :  { %20793 = vst [vmem:[#allocation21_spill] sm:$0xff] %v18205_v7  ;;  %v18207_v63 = vpop.f32.mrb[54].mxu1 }
 0x9f7   :  { %20794 = vst [vmem:[#allocation19_spill] sm:$0xff] %v18207_v63  ;;  %v18209_v24 = vpop.f32.mrb[55].mxu1 }
 0x9f8   :  { %20795 = vst [vmem:[#allocation26_spill] sm:$0xff] %v18209_v24 }
 0x9fc   :  { %v18211_v59 = vpop.f32.mrb[56].mxu1 }
 0x9fd   :  { %20796 = vst [vmem:[#allocation24_spill] sm:$0xff] %v18211_v59  ;;  %v18213_v58 = vpop.f32.mrb[57].mxu1 }
 0x9fe   :  { %20797 = vst [vmem:[#allocation28_spill] sm:$0xff] %v18213_v58  ;;  %v18215_v26 = vpop.f32.mrb[58].mxu1 }
 0x9ff   :  { %20798 = vst [vmem:[#allocation23_spill] sm:$0xff] %v18215_v26  ;;  %v18217_v31 = vpop.f32.mrb[59].mxu1 }
 0xa00   :  { %20799 = vst [vmem:[#allocation30_spill] sm:$0xff] %v18217_v31 }
 0xa04   :  { %v18219_v20 = vpop.f32.mrb[60].mxu1 }
 0xa05   :  { %20800 = vst [vmem:[#allocation25_spill] sm:$0xff] %v18219_v20  ;;  %v18221_v22 = vpop.f32.mrb[61].mxu1 }
 0xa06   :  { %20801 = vst [vmem:[#allocation32_spill] sm:$0xff] %v18221_v22  ;;  %v18223_v55 = vpop.f32.mrb[62].mxu1 }
 0xa07   :  { %20802 = vst [vmem:[#allocation27_spill] sm:$0xff] %v18223_v55  ;;  %v18225_v21 = vpop.f32.mrb[63].mxu1 }
 0xa08   :  { %20803 = vst [vmem:[#allocation34_spill] sm:$0xff] %v18225_v21 }
 0xa0c   :  { %v18227_v17 = vpop.f32.mrb[64].mxu1 }
 0xa0d   :  { %20804 = vst [vmem:[#allocation29_spill] sm:$0xff] %v18227_v17  ;;  %v18229_v37 = vpop.f32.mrb[65].mxu1  ;;  %v11462_v17 = vld [vmem:[%s19907_s4 + $0x3] ss:$0 sm:$0xff] }
 0xa0e   :  { %20805 = vst [vmem:[#allocation36_spill] sm:$0xff] %v18229_v37  ;;  %v18231_v0 = vpop.f32.mrb[66].mxu1 }
 0xa0f   :  { %20806 = vst [vmem:[#allocation31_spill] sm:$0xff] %v18231_v0  ;;  %v18233_v14 = vpop.f32.mrb[67].mxu1 }
 0xa10   :  { %20807 = vst [vmem:[#allocation38_spill] sm:$0xff] %v18233_v14 }
 0xa14   :  { %v18235_v59 = vpop.f32.mrb[68].mxu1 }
 0xa15   :  { %20808 = vst [vmem:[#allocation33_spill] sm:$0xff] %v18235_v59  ;;  %v18237_v26 = vpop.f32.mrb[69].mxu1 }
 0xa16   :  { %20809 = vst [vmem:[#allocation40_spill] sm:$0xff] %v18237_v26  ;;  %v18239_v31 = vpop.f32.mrb[70].mxu1 }
 0xa17   :  { %20810 = vst [vmem:[#allocation35_spill] sm:$0xff] %v18239_v31  ;;  %v18241_v20 = vpop.f32.mrb[71].mxu1 }
 0xa18   :  { %20811 = vst [vmem:[#allocation42_spill] sm:$0xff] %v18241_v20 }
 0xa29   :  { %v18243_v22 = vpop.f32.mrb[200].mxu0 }
 0xa2a   :  { %20812 = vst [vmem:[#allocation37_spill] sm:$0xff] %v18243_v22  ;;  %v13189_v55 = vpop.f32.mrb[201].mxu0 }
 0xa2b   :  { %v7141_v37 = vpop.f32.mrb[72].mxu1  ;;  %v8320_v21 = vpop.f32.mrb[202].mxu0 }
 0xa2c   :  { %v7142_v0 = vadd.f32 %v11462_v17, %v7141_v37  ;;  %v13045_v58 = vpop.f32.mrb[73].mxu1  ;;  %v13190_v14 = vpop.f32.mrb[203].mxu0 }
 0xa2d   :  { %v7144_v63 = vpop.f32.mrb[74].mxu1 }
 0xa2e   :  { %v13046_v59 = vpop.f32.mrb[75].mxu1  ;;  %v7148_v51 = vcombine.high %v7142_v0, %v7142_v0  ;;  %v7155_v26 = vrot.slane %v7142_v0, %v20722_v60 }
 0xa30   :  { %v7162_v31 = vrot.slane %v7148_v51, %v20722_v60  ;;  %v7163_v20 = vcombine.high %v7155_v26, %v7155_v26  ;;  %v7171_v22 = vrot.slane %v7155_v26, %v20722_v60 }
 0xa32   :  { %v7164_v24 = vcombine.high %v7162_v31, %v7162_v31  ;;  %v7178_v7 = vrot.slane %v7162_v31, %v20722_v60  ;;  %v7185_v55 = vrot.slane %v7163_v20, %v20722_v60  ;;  %v7193_v17 = vcombine.high %v7171_v22, %v7171_v22 }
 0xa33   :  { %v7200_v59 = vrot.slane %v7171_v22, %v20724_v34 }
 0xa34   :  { %v7192_v21 = vrot.slane %v7164_v24, %v20722_v60  ;;  %v7194_v37 = vcombine.high %v7178_v7, %v7178_v7  ;;  %v7195_v14 = vcombine.high %v7185_v55, %v7185_v55  ;;  %v7204_v58 = vrot.slane %v7185_v55, %v20724_v34 }
 0xa35   :  { %v18257_v0 = vrot.slane %v7178_v7, %v20724_v34  ;;  %v18260_v63 = vrot.slane %v7193_v17, %v20724_v34  ;;  %v7239_v22 = vadd.f32 %v18103_v42, %v7200_v59  ;;  %v7240_v24 = vadd.f32 %v18107_v46, %v7200_v59 }
 0xa36   :  { %v7196_v51 = vcombine.high %v7192_v21, %v7192_v21  ;;  %v18263_v26 = vrot.slane %v7195_v14, %v20724_v34  ;;  %v18266_v20 = vrot.slane %v7192_v21, %v20724_v34  ;;  %v18269_v31 = vrot.slane %v7194_v37, %v20724_v34 }
 0xa37   :  { %v7237_v7 = vadd.f32 %v7200_v59, %v18105_v10  ;;  %v7238_v17 = vadd.f32 %v7200_v59, %v18109_v36  ;;  %v7241_v14 = vadd.f32 %v7200_v59, %v18113_v4  ;;  %v7242_v60 = vadd.f32 %v7200_v59, %v18117_v41 }
 0xa38   :  { %20813 = vst [vmem:[#allocation44_spill] sm:$0xff] %v18266_v20  ;;  %20814 = vst [vmem:[#allocation39_spill] sm:$0xff] %v18269_v31  ;;  %v18275_v55 = vrot.slane %v7196_v51, %v20724_v34  ;;  %v7303_v21 = vmax.f32 %v7239_v22, 0.0  ;;  %v7304_v18 = vmax.f32 %v7240_v24, 0.0  ;;  %v7243_v37 = vadd.f32 %v18111_v28, %v7200_v59 }
 0xa39   :  { %v7301_v2 = vmax.f32 %v7237_v7, 0.0  ;;  %v7302_v31 = vmax.f32 %v7238_v17, 0.0  ;;  %v7305_v42 = vmax.f32 %v7241_v14, 0.0  ;;  %v7306_v62 = vmax.f32 %v7242_v60, 0.0  ;;  %v14359_v60 = vld [vmem:[%s19910_s7 + $0x68] sm:$0xff]  }
 0xa3a   :  { %20815 = vst [vmem:[#allocation66_spill] sm:$0xff] %v18275_v55  ;;  %v7244_v46 = vadd.f32 %v18115_v5, %v7200_v59  ;;  %v7371_v10 = vpack.c.bf16 %v7304_v18, %v7303_v21  ;;  %v7307_v20 = vmax.f32 %v7243_v37, 0.0  ;;  %v7245_v51 = vadd.f32 %v7204_v58, %v18121_v1 }
 0xa3b   :  { %v7246_v36 = vadd.f32 %v7204_v58, %v18125_v29  ;;  %v7370_v34 = vpack.c.bf16 %v7302_v31, %v7301_v2  ;;  %v7372_v4 = vpack.c.bf16 %v7306_v62, %v7305_v42  ;;  %v7247_v41 = vadd.f32 %v18119_v47, %v7204_v58 }
 0xa3c   :  { %v7308_v55 = vmax.f32 %v7244_v46, 0.0  ;;  %v7309_v22 = vmax.f32 %v7245_v51, 0.0  ;;  %v7248_v28 = vadd.f32 %v18123_v8, %v7204_v58  ;;  %v7249_v7 = vadd.f32 %v7204_v58, %v18129_v32 }
 0xa3d   :  { %v7310_v24 = vmax.f32 %v7246_v36, 0.0  ;;  %13051 = vmatprep.mubr.msk.bf16.mxu1 %vm1171_vm3, %v7370_v34  ;;  %v7311_v5 = vmax.f32 %v7247_v41, 0.0  ;;  %v7250_v2 = vadd.f32 %v7204_v58, %v18133_v61  ;;  %v7251_v62 = vadd.f32 %v18127_v53, %v7204_v58 }
 0xa3e   :  { %v7373_v18 = vpack.c.bf16 %v7308_v55, %v7307_v20  ;;  %13052 = vmatmul.mubr.msk.bf16.vlgmr.msra.gmra.mrb[76].mxu1 %vm1171_vm3, %v7371_v10  ;;  %v7312_v1 = vmax.f32 %v7248_v28, 0.0  ;;  %v7313_v29 = vmax.f32 %v7249_v7, 0.0  ;;  %v7252_v8 = vadd.f32 %v18131_v35, %v7204_v58 }
 0xa3f   :  { %v7374_v47 = vpack.c.bf16 %v7310_v24, %v7309_v22  ;;  %13116 = vmatpush3.bf16.msra.mxu1 %v18150_v44  ;;  %13055 = vmatprep.mubr.msk.bf16.mxu1 %vm1171_vm3, %v7372_v4  ;;  %v7314_v32 = vmax.f32 %v7250_v2, 0.0  ;;  %v7315_v59 = vmax.f32 %v7251_v62, 0.0  ;;  %v7253_v34 = vadd.f32 %v18260_v63, %v18143_v52 }
 0xa40   :  { %v7254_v61 = vadd.f32 %v18260_v63, %v18152_v57  ;;  %v7375_v53 = vpack.c.bf16 %v7312_v1, %v7311_v5  ;;  %v7316_v20 = vmax.f32 %v7252_v8, 0.0  ;;  %v7255_v31 = vadd.f32 %v18141_v19, %v18260_v63  ;;  %13117 = vmatprep.subr.bf16.mxu1 %v14359_v60 }
 0xa41   :  { %v7256_v35 = vadd.f32 %v18145_v16, %v18260_v63  ;;  %v7376_v44 = vpack.c.bf16 %v7314_v32, %v7313_v29  ;;  %v7317_v58 = vmax.f32 %v7253_v34, 0.0  ;;  %v7257_v17 = vadd.f32 %v18260_v63, %v18157_v27 }
 0xa42   :  { %v7318_v55 = vmax.f32 %v7254_v61, 0.0  ;;  %v18307_v14 = vpack.c.bf16 %v7316_v20, %v7315_v59  ;;  %v7319_v52 = vmax.f32 %v7255_v31, 0.0  ;;  %v7258_v57 = vadd.f32 %v18260_v63, %v18161_v25  ;;  %v20816_v20 = vld [vmem:[#allocation44_spill] sm:$0xff] }
 0xa43   :  { %v7320_v21 = vmax.f32 %v7256_v35, 0.0  ;;  %v7321_v19 = vmax.f32 %v7257_v17, 0.0  ;;  %v7259_v16 = vadd.f32 %v18155_v56, %v18260_v63  ;;  %v7260_v42 = vadd.f32 %v18159_v13, %v18260_v63  ;;  %13118 = vmatpush3.bf16.msra.mxu1 %v14359_v60  ;;  %v20817_v35 = vld [vmem:[#allocation22_spill] sm:$0xff] }
 0xa44   :  { %v18311_v37 = vpack.c.bf16 %v7318_v55, %v7317_v58  ;;  %v7322_v27 = vmax.f32 %v7258_v57, 0.0  ;;  %v7261_v10 = vadd.f32 %v18263_v26, %v18165_v12  ;;  %v7262_v51 = vadd.f32 %v18263_v26, %v18169_v9  ;;  %13403 = vmatprep.subr.bf16.mxu1 %v20354_v3  ;;  %v20820_v57 = vld [vmem:[#allocation21_spill] sm:$0xff] }
 0xa45   :  { %v18317_v46 = vpack.c.bf16 %v7320_v21, %v7319_v52  ;;  %v7323_v25 = vmax.f32 %v7259_v16, 0.0  ;;  %v7324_v36 = vmax.f32 %v7260_v42, 0.0  ;;  %v7263_v56 = vadd.f32 %v18163_v43, %v18263_v26 }
 0xa46   :  { %v7264_v13 = vadd.f32 %v18167_v38, %v18263_v26  ;;  %13056 = vmatmul.mubr.msk.bf16.gmra.mrb[80].mxu1 %vm1171_vm3, %v7373_v18  ;;  %v18329_v63 = vpack.c.bf16 %v7322_v27, %v7321_v19  ;;  %v7325_v4 = vmax.f32 %v7261_v10, 0.0  ;;  %v7326_v41 = vmax.f32 %v7262_v51, 0.0 }
 0xa47   :  { %v7265_v12 = vadd.f32 %v18263_v26, %v18173_v33  ;;  %13059 = vmatprep.mubr.msk.bf16.mxu1 %vm1171_vm3, %v7374_v47  ;;  %v18334_v9 = vpack.c.bf16 %v7324_v36, %v7323_v25  ;;  %v7327_v22 = vmax.f32 %v7263_v56, 0.0  ;;  %v7266_v43 = vadd.f32 %v18263_v26, %v18177_v45  ;;  %v20822_v25 = vld [vmem:[#allocation20_spill] sm:$0xff]  ;;  %v20823_v56 = vld [vmem:[#allocation19_spill] sm:$0xff] }
 0xa48   :  { %v7328_v24 = vmax.f32 %v7264_v13, 0.0  ;;  %v18338_v28 = vpack.c.bf16 %v7326_v41, %v7325_v4  ;;  %v7267_v7 = vadd.f32 %v18171_v50, %v18263_v26  ;;  %v7268_v60 = vadd.f32 %v18175_v48, %v18263_v26 }
 0xa49   :  { %v7329_v38 = vmax.f32 %v7265_v12, 0.0  ;;  %v7330_v33 = vmax.f32 %v7266_v43, 0.0  ;;  %v7269_v5 = vadd.f32 %v18257_v0, %v18181_v30  ;;  %v7270_v2 = vadd.f32 %v18257_v0, %v18185_v49  ;;  %v20824_v12 = vld [vmem:[#allocation28_spill] sm:$0xff]  ;;  %v20826_v43 = vld [vmem:[#allocation30_spill] sm:$0xff] }
 0xa4a   :  { %v18344_v18 = vpack.c.bf16 %v7328_v24, %v7327_v22  ;;  %v7331_v62 = vmax.f32 %v7267_v7, 0.0  ;;  %v7332_v45 = vmax.f32 %v7268_v60, 0.0  ;;  %v7271_v47 = vadd.f32 %v18179_v54, %v18257_v0  ;;  %v20825_v22 = vld [vmem:[#allocation39_spill] sm:$0xff] }
 0xa4b   :  { %v7272_v50 = vadd.f32 %v18183_v15, %v18257_v0  ;;  %v18354_v1 = vpack.c.bf16 %v7330_v33, %v7329_v38  ;;  %v7333_v48 = vmax.f32 %v7269_v5, 0.0  ;;  %v7334_v26 = vmax.f32 %v7270_v2, 0.0  ;;  %v20827_v33 = vld [vmem:[#allocation24_spill] sm:$0xff]  ;;  %v20828_v2 = vld [vmem:[#allocation23_spill] sm:$0xff] }
 0xa4c   :  { %v7273_v29 = vadd.f32 %v18257_v0, %v18189_v11  ;;  %v18358_v8 = vpack.c.bf16 %v7332_v45, %v7331_v62  ;;  %v7335_v30 = vmax.f32 %v7271_v47, 0.0  ;;  %v7274_v49 = vadd.f32 %v18257_v0, %v18193_v39 }
 0xa4d   :  { %v7336_v32 = vmax.f32 %v7272_v50, 0.0  ;;  %v18362_v59 = vpack.c.bf16 %v7334_v26, %v7333_v48  ;;  %v7275_v15 = vadd.f32 %v18187_v40, %v18257_v0  ;;  %v7276_v34 = vadd.f32 %v18191_v23, %v18257_v0  ;;  %v20818_v40 = vld [vmem:[#allocation17_spill] sm:$0xff]  ;;  %v20819_v23 = vld [vmem:[#allocation15_spill] sm:$0xff]  ;;  %v20829_v48 = vld [vmem:[#allocation32_spill] sm:$0xff] }
 0xa4e   :  { %v7337_v54 = vmax.f32 %v7273_v29, 0.0  ;;  %13060 = vmatmul.mubr.msk.bf16.gmra.mrb[84].mxu1 %vm1171_vm3, %v7375_v53  ;;  %v7338_v11 = vmax.f32 %v7274_v49, 0.0  ;;  %v7277_v31 = vadd.f32 %v20816_v20, %v18197_v6  ;;  %v7278_v39 = vadd.f32 %v20816_v20, %v20817_v35  ;;  %v20830_v49 = vld [vmem:[#allocation34_spill] sm:$0xff] }
 0xa4f   :  { %v18369_v61 = vpack.c.bf16 %v7336_v32, %v7335_v30  ;;  %13063 = vmatprep.mubr.msk.bf16.mxu1 %vm1171_vm3, %v7376_v44  ;;  %v7339_v58 = vmax.f32 %v7275_v15, 0.0  ;;  %v7340_v55 = vmax.f32 %v7276_v34, 0.0  ;;  %v7279_v17 = vadd.f32 %v20818_v40, %v20816_v20  ;;  %v20821_v44 = vld [vmem:[#allocation26_spill] sm:$0xff] }
 0xa50   :  { %v7280_v0 = vadd.f32 %v20819_v23, %v20816_v20  ;;  %v18380_v53 = vpack.c.bf16 %v7338_v11, %v7337_v54  ;;  %v7341_v52 = vmax.f32 %v7277_v31, 0.0  ;;  %v7342_v21 = vmax.f32 %v7278_v39, 0.0  ;;  %v20831_v11 = vld [vmem:[#allocation25_spill] sm:$0xff]  ;;  %v20832_v31 = vld [vmem:[#allocation27_spill] sm:$0xff] }
 0xa51   :  { %v7281_v6 = vadd.f32 %v20816_v20, %v20820_v57  ;;  %v18384_v19 = vpack.c.bf16 %v7340_v55, %v7339_v58  ;;  %v7343_v16 = vmax.f32 %v7279_v17, 0.0  ;;  %v7282_v27 = vadd.f32 %v20816_v20, %v20821_v44  ;;  %v20834_v55 = vld [vmem:[#allocation66_spill] sm:$0xff]  ;;  %v20837_v57 = vld [vmem:[#allocation31_spill] sm:$0xff] }
 0xa52   :  { %v7344_v42 = vmax.f32 %v7280_v0, 0.0  ;;  %v18388_v10 = vpack.c.bf16 %v7342_v21, %v7341_v52  ;;  %v7283_v36 = vadd.f32 %v20822_v25, %v20816_v20  ;;  %v7284_v13 = vadd.f32 %v20823_v56, %v20816_v20  ;;  %v20835_v17 = vld [vmem:[#allocation38_spill] sm:$0xff] }
 0xa53   :  { %v7345_v51 = vmax.f32 %v7281_v6, 0.0  ;;  %v7346_v41 = vmax.f32 %v7282_v27, 0.0  ;;  %v7285_v24 = vadd.f32 %v20825_v22, %v20824_v12  ;;  %v7286_v38 = vadd.f32 %v20825_v22, %v20826_v43  ;;  %v20838_v27 = vld [vmem:[#allocation40_spill] sm:$0xff] }
 0xa54   :  { %v7391_v4 = vpack.c.bf16 %v7344_v42, %v7343_v16  ;;  %v7347_v7 = vmax.f32 %v7283_v36, 0.0  ;;  %v7348_v60 = vmax.f32 %v7284_v13, 0.0  ;;  %v7287_v5 = vadd.f32 %v20827_v33, %v20825_v22  ;;  %v20839_v13 = vld [vmem:[#allocation42_spill] sm:$0xff] }
 0xa55   :  { %v7288_v62 = vadd.f32 %v20828_v2, %v20825_v22  ;;  %v7392_v45 = vpack.c.bf16 %v7346_v41, %v7345_v51  ;;  %v7349_v47 = vmax.f32 %v7285_v24, 0.0  ;;  %v7350_v50 = vmax.f32 %v7286_v38, 0.0  ;;  %v20840_v24 = vld [vmem:[#allocation33_spill] sm:$0xff]  ;;  %v20841_v38 = vld [vmem:[#allocation35_spill] sm:$0xff] }
 0xa56   :  { %v7289_v26 = vadd.f32 %v20825_v22, %v20829_v48  ;;  %13064 = vmatmul.mubr.msk.bf16.gmra.mrb[88].mxu1 %vm1171_vm3, %v18307_v14  ;;  %v7393_v29 = vpack.c.bf16 %v7348_v60, %v7347_v7  ;;  %v7351_v30 = vmax.f32 %v7287_v5, 0.0  ;;  %v7290_v54 = vadd.f32 %v20825_v22, %v20830_v49  ;;  %v20833_v14 = vld [vmem:[#allocation36_spill] sm:$0xff] }
 0xa57   :  { %v7352_v32 = vmax.f32 %v7288_v62, 0.0  ;;  %13067 = vmatprep.mubr.msk.bf16.mxu1 %vm1171_vm3, %v18311_v37  ;;  %v7394_v15 = vpack.c.bf16 %v7350_v50, %v7349_v47  ;;  %v7291_v20 = vadd.f32 %v20831_v11, %v20825_v22  ;;  %v7292_v35 = vadd.f32 %v20832_v31, %v20825_v22  ;;  %v20836_v37 = vld [vmem:[#allocation29_spill] sm:$0xff]  ;;  %v20857_v48 = vld [vmem:[#allocation56_spill] sm:$0xff] }
 0xa58   :  { %v7353_v34 = vmax.f32 %v7289_v26, 0.0  ;;  %v7354_v58 = vmax.f32 %v7290_v54, 0.0  ;;  %v7293_v40 = vadd.f32 %v20834_v55, %v20833_v14  ;;  %v7294_v23 = vadd.f32 %v20834_v55, %v20835_v17  ;;  %v20858_v26 = vld [vmem:[#allocation51_spill] sm:$0xff]  ;;  %v20863_v54 = vld [vmem:[#allocation60_spill] sm:$0xff] }
 0xa59   :  { %v7395_v39 = vpack.c.bf16 %v7352_v32, %v7351_v30  ;;  %v7355_v0 = vmax.f32 %v7291_v20, 0.0  ;;  %v7356_v52 = vmax.f32 %v7292_v35, 0.0  ;;  %v7295_v21 = vadd.f32 %v20836_v37, %v20834_v55  ;;  %v20860_v30 = vld [vmem:[#allocation54_spill] sm:$0xff]  ;;  %v20861_v32 = vld [vmem:[#allocation55_spill] sm:$0xff]  ;;  %v20866_v11 = vld [vmem:[#allocation64_spill] sm:$0xff] }
 0xa5a   :  { %v7296_v6 = vadd.f32 %v20837_v57, %v20834_v55  ;;  %v7396_v16 = vpack.c.bf16 %v7354_v58, %v7353_v34  ;;  %v7357_v42 = vmax.f32 %v7293_v40, 0.0  ;;  %v7358_v44 = vmax.f32 %v7294_v23, 0.0  ;;  %v20867_v20 = vld [vmem:[#allocation59_spill] sm:$0xff]  ;;  %v20869_v35 = vld [vmem:[#allocation92_spill] sm:$0xff]  ;;  %v20876_v23 = vld [vmem:[#allocation58_spill] sm:$0xff] }
 0xa5b   :  { %v7297_v51 = vadd.f32 %v20834_v55, %v20838_v27  ;;  %v7397_v25 = vpack.c.bf16 %v7356_v52, %v7355_v0  ;;  %v7359_v36 = vmax.f32 %v7295_v21, 0.0  ;;  %v7298_v41 = vadd.f32 %v20834_v55, %v20839_v13  ;;  %v20872_v14 = vld [vmem:[#allocation68_spill] sm:$0xff]  ;;  %v20875_v17 = vld [vmem:[#allocation63_spill] sm:$0xff]  ;;  %v20879_v37 = vld [vmem:[#allocation61_spill] sm:$0xff] }
 0xa5c   :  { %v7360_v56 = vmax.f32 %v7296_v6, 0.0  ;;  %v7398_v12 = vpack.c.bf16 %v7358_v44, %v7357_v42  ;;  %v7299_v43 = vadd.f32 %v20840_v24, %v20834_v55  ;;  %v7300_v7 = vadd.f32 %v20841_v38, %v20834_v55  ;;  %v20873_v55 = vld [vmem:[#allocation57_spill] sm:$0xff]  ;;  %v20878_v52 = vld [vmem:[#allocation71_spill] sm:$0xff]  ;;  %v20881_v57 = vld [vmem:[#allocation70_spill] sm:$0xff] }
 0xa5d   :  { %v7361_v22 = vmax.f32 %v7297_v51, 0.0  ;;  %v7362_v33 = vmax.f32 %v7298_v41, 0.0  ;;  %v20862_v49 = vpack.c.bf16 %v20860_v30, %v20861_v32  ;;  %v20868_v31 = vpack.c.bf16 %v20866_v11, %v20867_v20  ;;  %v20882_v6 = vld [vmem:[#allocation62_spill] sm:$0xff]  ;;  %v20884_v42 = vld [vmem:[#allocation75_spill] sm:$0xff]  ;;  %v20891_v13 = vld [vmem:[#allocation73_spill] sm:$0xff] }
 0xa5e   :  { %v7399_v60 = vpack.c.bf16 %v7360_v56, %v7359_v36  ;;  %13068 = vmatmul.mubr.msk.bf16.gmra.mrb[92].mxu1 %vm1171_vm3, %v18317_v46  ;;  %v7363_v5 = vmax.f32 %v7299_v43, 0.0  ;;  %v7364_v2 = vmax.f32 %v7300_v7, 0.0  ;;  %v20842_v46 = vld [vmem:[#allocation41_spill] sm:$0xff]  ;;  %v20874_v40 = vpack.c.bf16 %v20872_v14, %v20873_v55  ;;  %v20885_v44 = vld [vmem:[#allocation95_spill] sm:$0xff]  ;;  %v20887_v51 = vld [vmem:[#allocation74_spill] sm:$0xff] }
 0xa5f   :  { %13071 = vmatprep.mubr.msk.bf16.mxu1 %vm1171_vm3, %v18329_v63  ;;  %v7400_v62 = vpack.c.bf16 %v7362_v33, %v7361_v22  ;;  %v20843_v63 = vld [vmem:[#allocation48_spill] sm:$0xff]  ;;  %v20877_v0 = vpack.c.bf16 %v20875_v17, %v20876_v23  ;;  %v20880_v21 = vpack.c.bf16 %v20878_v52, %v20879_v37  ;;  %v20886_v27 = vpack.c.bf16 %v20884_v42, %v20885_v44  ;;  %v20896_v43 = vld [vmem:[#allocation81_spill] sm:$0xff]  ;;  %v20900_v33 = vld [vmem:[#allocation79_spill] sm:$0xff] }
 0xa60   :  { %v7401_v47 = vpack.c.bf16 %v7364_v2, %v7363_v5  ;;  %v20890_v56 = vld [vmem:[#allocation96_spill] sm:$0xff]  ;;  %v20897_v38 = vld [vmem:[#allocation77_spill] sm:$0xff]  ;;  %v20927_v11 = vld [vmem:[#allocation7_spill] sm:$0xff] }
 0xa61   :  { %v20892_v41 = vpack.c.bf16 %v20890_v56, %v20891_v13  ;;  %v20894_v22 = vld [vmem:[#allocation72_spill] sm:$0xff]  ;;  %v20898_v7 = vpack.c.bf16 %v20896_v43, %v20897_v38  ;;  %v20902_v2 = vld [vmem:[#allocation85_spill] sm:$0xff]  ;;  %v20933_v14 = vld [vmem:[#allocation11_spill] sm:$0xff] }
 0xa62   :  { %v14361_v32 = vld [vmem:[%s19906_s3 + $0x88] sm:$0xff]  }
 0xa63   :  { %v20936_v17 = vld [vmem:[#allocation13_spill] sm:$0xff] }
 0xa64   :  { %v20939_v52 = vld [vmem:[#allocation37_spill] sm:$0xff] }
 0xa66   :  { %13072 = vmatmul.mubr.msk.bf16.gmra.mrb[96].mxu1 %vm1171_vm3, %v18334_v9  ;;  %v20844_v9 = vpack.c.bf16 %v20842_v46, %v20843_v63  ;;  %v20905_v46 = vld [vmem:[#allocation87_spill] sm:$0xff] }
 0xa67   :  { %13075 = vmatprep.mubr.msk.bf16.mxu1 %vm1171_vm3, %v18338_v28  ;;  %v20845_v28 = vld [vmem:[#allocation43_spill] sm:$0xff] }
 0xa68   :  { %v20906_v63 = vld [vmem:[#allocation83_spill] sm:$0xff] }
 0xa6e   :  { %13076 = vmatmul.mubr.msk.bf16.gmra.mrb[100].mxu1 %vm1171_vm3, %v18344_v18  ;;  %v20846_v18 = vld [vmem:[#allocation67_spill] sm:$0xff] }
 0xa6f   :  { %13079 = vmatprep.mubr.msk.bf16.mxu1 %vm1171_vm3, %v18354_v1  ;;  %v20847_v1 = vpack.c.bf16 %v20845_v28, %v20846_v18  ;;  %v20908_v28 = vld [vmem:[#allocation86_spill] sm:$0xff] }
 0xa70   :  { %v20909_v18 = vld [vmem:[#allocation82_spill] sm:$0xff] }
 0xa76   :  { %13080 = vmatmul.mubr.msk.bf16.gmra.mrb[104].mxu1 %vm1171_vm3, %v18358_v8  ;;  %v20848_v8 = vld [vmem:[#allocation45_spill] sm:$0xff] }
 0xa77   :  { %13083 = vmatprep.mubr.msk.bf16.mxu1 %vm1171_vm3, %v18362_v59  ;;  %v20849_v59 = vld [vmem:[#allocation52_spill] sm:$0xff] }
 0xa7e   :  { %13084 = vmatmul.mubr.msk.bf16.gmra.mrb[108].mxu1 %vm1171_vm3, %v18369_v61  ;;  %v20850_v61 = vpack.c.bf16 %v20848_v8, %v20849_v59  ;;  %v20911_v8 = vld [vmem:[#allocation91_spill] sm:$0xff]  ;;  %v20912_v59 = vld [vmem:[#allocation97_spill] sm:$0xff] }
 0xa7f   :  { %13087 = vmatprep.mubr.msk.bf16.mxu1 %vm1171_vm3, %v18380_v53  ;;  %v20851_v53 = vld [vmem:[#allocation46_spill] sm:$0xff] }
 0xa86   :  { %13088 = vmatmul.mubr.msk.bf16.gmra.mrb[112].mxu1 %vm1171_vm3, %v18384_v19  ;;  %v20852_v19 = vld [vmem:[#allocation47_spill] sm:$0xff] }
 0xa87   :  { %13091 = vmatprep.mubr.msk.bf16.mxu1 %vm1171_vm3, %v18388_v10  ;;  %v20853_v10 = vpack.c.bf16 %v20851_v53, %v20852_v19  ;;  %v20914_v53 = vld [vmem:[#allocation90_spill] sm:$0xff]  ;;  %v20915_v19 = vld [vmem:[#allocation84_spill] sm:$0xff] }
 0xa8e   :  { %13092 = vmatmul.mubr.msk.bf16.gmra.mrb[116].mxu1 %vm1171_vm3, %v7391_v4  ;;  %v20854_v4 = vld [vmem:[#allocation50_spill] sm:$0xff] }
 0xa8f   :  { %13095 = vmatprep.mubr.msk.bf16.mxu1 %vm1171_vm3, %v7392_v45  ;;  %v20855_v45 = vld [vmem:[#allocation65_spill] sm:$0xff] }
 0xa90   :  { %v20856_v50 = vpack.c.bf16 %v20854_v4, %v20855_v45  ;;  %v14360_v4 = vld [vmem:[%s19906_s3 + $0x80] sm:$0xff]   ;;  %v20917_v45 = vld [vmem:[#allocation6_spill] sm:$0xff] }
 0xa91   :  { %13191 = vmatprep.subr.bf16.mxu0 %v14360_v4 }
 0xa92   :  { %13192 = vmatpush3.bf16.msra.mxu0 %v14360_v4 }
 0xa93   :  { %13193 = vmatprep.subr.bf16.mxu0 %v14361_v32 }
 0xa96   :  { %13096 = vmatmul.mubr.msk.bf16.gmra.mrb[120].mxu1 %vm1171_vm3, %v7393_v29  ;;  %v20859_v29 = vpack.c.bf16 %v20857_v48, %v20858_v26  ;;  %v20920_v26 = vld [vmem:[#allocation8_spill] sm:$0xff]  ;;  %13194 = vmatpush3.bf16.msra.mxu0 %v14361_v32 }
 0xa97   :  { %13099 = vmatprep.mubr.msk.bf16.mxu1 %vm1171_vm3, %v7394_v15  ;;  %v20864_v15 = vld [vmem:[#allocation49_spill] sm:$0xff]  ;;  %13259 = vmatprep.subr.bf16.mxu0 %v20354_v3 }
 0xa98   :  { %v20865_v34 = vpack.c.bf16 %v20863_v54, %v20864_v15  ;;  %v20924_v54 = vld [vmem:[#allocation5_spill] sm:$0xff] }
 0xa9e   :  { %13100 = vmatmul.mubr.msk.bf16.gmra.mrb[124].mxu1 %vm1171_vm3, %v7395_v39  ;;  %v20870_v39 = vld [vmem:[#allocation53_spill] sm:$0xff] }
 0xa9f   :  { %13103 = vmatprep.mubr.msk.bf16.mxu1 %vm1171_vm3, %v7396_v16  ;;  %v20871_v58 = vpack.c.bf16 %v20869_v35, %v20870_v39  ;;  %v20883_v16 = vpack.c.bf16 %v20881_v57, %v20882_v6  ;;  %v20930_v35 = vld [vmem:[#allocation9_spill] sm:$0xff]  ;;  %v18610_v57 = vld [vmem:[%s19909_s6 + $0x3] ss:$0 sm:$0xff] }
 0xaa6   :  { %13104 = vmatmul.mubr.msk.bf16.gmra.mrb[128].mxu1 %vm1171_vm3, %v7397_v25  ;;  %v20888_v25 = vld [vmem:[#allocation69_spill] sm:$0xff] }
 0xaa7   :  { %13107 = vmatprep.mubr.msk.bf16.mxu1 %vm1171_vm3, %v7398_v12  ;;  %v20889_v36 = vpack.c.bf16 %v20887_v51, %v20888_v25  ;;  %v20893_v12 = vld [vmem:[#allocation76_spill] sm:$0xff] }
 0xaa8   :  { %v20895_v24 = vpack.c.bf16 %v20893_v12, %v20894_v22 }
 0xaae   :  { %13108 = vmatmul.mubr.msk.bf16.gmra.mrb[132].mxu1 %vm1171_vm3, %v7399_v60  ;;  %v20899_v60 = vld [vmem:[#allocation80_spill] sm:$0xff] }
 0xaaf   :  { %13111 = vmatprep.mubr.msk.bf16.mxu1 %vm1171_vm3, %v7400_v62  ;;  %v20901_v5 = vpack.c.bf16 %v20899_v60, %v20900_v33  ;;  %v20903_v62 = vld [vmem:[#allocation78_spill] sm:$0xff] }
 0xab6   :  { %13112 = vmatmul.mubr.msk.bf16.gmra.mrb[136].mxu1 %vm1171_vm3, %v7401_v47  ;;  %v20904_v47 = vpack.c.bf16 %v20902_v2, %v20903_v62 }
 0xab7   :  { %13119 = vmatprep.mubr.msk.bf16.mxu1 %vm1171_vm3, %v20844_v9  ;;  %v20907_v9 = vpack.c.bf16 %v20905_v46, %v20906_v63 }
 0xabe   :  { %13120 = vmatmul.mubr.msk.bf16.vlgmr.msra.gmra.mrb[76].mxu1 %vm1171_vm3, %v20847_v1  ;;  %v20910_v1 = vpack.c.bf16 %v20908_v28, %v20909_v18 }
 0xabf   :  { %13123 = vmatprep.mubr.msk.bf16.mxu1 %vm1171_vm3, %v20850_v61  ;;  %v20913_v61 = vpack.c.bf16 %v20911_v8, %v20912_v59 }
 0xac6   :  { %13124 = vmatmul.mubr.msk.bf16.gmra.mrb[80].mxu1 %vm1171_vm3, %v20853_v10  ;;  %v20916_v10 = vpack.c.bf16 %v20914_v53, %v20915_v19  ;;  %v14362_v53 = vld [vmem:[%s19906_s3 + $0x90] sm:$0xff]  }
 0xac7   :  { %13127 = vmatprep.mubr.msk.bf16.mxu1 %vm1171_vm3, %v20856_v50  ;;  %v20918_v50 = vld [vmem:[#allocation89_spill] sm:$0xff] }
 0xac8   :  { %v20919_v48 = vpack.c.bf16 %v20917_v45, %v20918_v50 }
 0xace   :  { %13128 = vmatmul.mubr.msk.bf16.gmra.mrb[84].mxu1 %vm1171_vm3, %v20859_v29  ;;  %v20921_v29 = vld [vmem:[#allocation88_spill] sm:$0xff] }
 0xacf   :  { %13131 = vmatprep.mubr.msk.bf16.mxu1 %vm1171_vm3, %v20862_v49  ;;  %v20922_v30 = vpack.c.bf16 %v20920_v26, %v20921_v29  ;;  %v20923_v49 = vld [vmem:[#allocation10_spill] sm:$0xff] }
 0xad0   :  { %v20925_v15 = vpack.c.bf16 %v20923_v49, %v20924_v54 }
 0xad6   :  { %13132 = vmatmul.mubr.msk.bf16.gmra.mrb[88].mxu1 %vm1171_vm3, %v20865_v34  ;;  %v20926_v34 = vld [vmem:[#allocation12_spill] sm:$0xff] }
 0xad7   :  { %13135 = vmatprep.mubr.msk.bf16.mxu1 %vm1171_vm3, %v20868_v31  ;;  %v20928_v20 = vpack.c.bf16 %v20926_v34, %v20927_v11  ;;  %v20929_v31 = vld [vmem:[#allocation14_spill] sm:$0xff] }
 0xad8   :  { %v20931_v39 = vpack.c.bf16 %v20929_v31, %v20930_v35 }
 0xade   :  { %13136 = vmatmul.mubr.msk.bf16.gmra.mrb[92].mxu1 %vm1171_vm3, %v20871_v58  ;;  %v20932_v58 = vld [vmem:[#allocation16_spill] sm:$0xff] }
 0xadf   :  { %13139 = vmatprep.mubr.msk.bf16.mxu1 %vm1171_vm3, %v20874_v40  ;;  %v20934_v55 = vpack.c.bf16 %v20932_v58, %v20933_v14  ;;  %v20935_v40 = vld [vmem:[#allocation18_spill] sm:$0xff] }
 0xae0   :  { %v20937_v23 = vpack.c.bf16 %v20935_v40, %v20936_v17 }
 0xae6   :  { %13140 = vmatmul.mubr.msk.bf16.gmra.mrb[96].mxu1 %vm1171_vm3, %v20877_v0  ;;  %v20938_v0 = vld [vmem:[#allocation93_spill] sm:$0xff] }
 0xae7   :  { %13143 = vmatprep.mubr.msk.bf16.mxu1 %vm1171_vm3, %v20880_v21  ;;  %v8331_v37 = vrot.slane %v20939_v52, %v20938_v0 }
 0xae9   :  { %v18605_v21 = vrot.slane %v8331_v37, %v20938_v0  ;;  %v8339_v46 = vcombine.high %v8331_v37, %v8331_v37 }
 0xaeb   :  { %v18655_v29 = vrot.slane %v8339_v46, %v20938_v0 }
 0xaee   :  { %13144 = vmatmul.mubr.msk.bf16.gmra.mrb[100].mxu1 %vm1171_vm3, %v20883_v16  ;;  %v20940_v16 = vld [vmem:[#allocation94_spill] sm:$0xff] }
 0xaef   :  { %13147 = vmatprep.mubr.msk.bf16.mxu1 %vm1171_vm3, %v20886_v27  ;;  %v8376_v42 = vrot.slane %v18605_v21, %v20940_v16  ;;  %v8380_v40 = vrot.slane %v18655_v29, %v20940_v16 }
 0xaf6   :  { %13148 = vmatmul.mubr.msk.bf16.gmra.mrb[104].mxu1 %vm1171_vm3, %v20889_v36 }
 0xaf7   :  { %13151 = vmatprep.mubr.msk.bf16.mxu1 %vm1171_vm3, %v20892_v41 }
 0xafe   :  { %13152 = vmatmul.mubr.msk.bf16.gmra.mrb[108].mxu1 %vm1171_vm3, %v20895_v24 }
 0xaff   :  { %13155 = vmatprep.mubr.msk.bf16.mxu1 %vm1171_vm3, %v20898_v7 }
 0xb06   :  { %13156 = vmatmul.mubr.msk.bf16.gmra.mrb[112].mxu1 %vm1171_vm3, %v20901_v5 }
 0xb07   :  { %13159 = vmatprep.mubr.msk.bf16.mxu1 %vm1171_vm3, %v20904_v47 }
 0xb0e   :  { %13160 = vmatmul.mubr.msk.bf16.gmra.mrb[116].mxu1 %vm1171_vm3, %v20907_v9 }
 0xb0f   :  { %13163 = vmatprep.mubr.msk.bf16.mxu1 %vm1171_vm3, %v20910_v1 }
 0xb16   :  { %13164 = vmatmul.mubr.msk.bf16.gmra.mrb[120].mxu1 %vm1171_vm3, %v20913_v61 }
 0xb17   :  { %13167 = vmatprep.mubr.msk.bf16.mxu1 %vm1171_vm3, %v20916_v10 }
 0xb1e   :  { %13168 = vmatmul.mubr.msk.bf16.gmra.mrb[124].mxu1 %vm1171_vm3, %v20919_v48 }
 0xb1f   :  { %13171 = vmatprep.mubr.msk.bf16.mxu1 %vm1171_vm3, %v20922_v30 }
 0xb26   :  { %13172 = vmatmul.mubr.msk.bf16.gmra.mrb[128].mxu1 %vm1171_vm3, %v20925_v15  ;;  %v14363_v15 = vld [vmem:[%s19906_s3 + $0x98] sm:$0xff]  }
 0xb27   :  { %13175 = vmatprep.mubr.msk.bf16.mxu1 %vm1171_vm3, %v20928_v20 }
 0xb2e   :  { %13176 = vmatmul.mubr.msk.bf16.gmra.mrb[132].mxu1 %vm1171_vm3, %v20931_v39 }
 0xb2f   :  { %13179 = vmatprep.mubr.msk.bf16.mxu1 %vm1171_vm3, %v20934_v55 }
 0xb36   :  { %13180 = vmatmul.mubr.msk.bf16.gmra.mrb[136].mxu1 %vm1171_vm3, %v20937_v23 }
 0xb37   :  { %13407 = vmatprep.mubr.msk.bf16.mxu1 %vm14400_vm4, %v20354_v3 }
 0xb91   :  { %v13121_v6 = vpop.f32.mrb[76].mxu1 }
 0xb92   :  { %v13739_v44 = vadd.f32 %v13121_v6, %v18610_v57  ;;  %v7981_v27 = vpop.f32.mrb[77].mxu1 }
 0xb93   :  { %v13741_v51 = vadd.f32 %v18610_v57, %v7981_v27  ;;  %v13122_v25 = vpop.f32.mrb[78].mxu1 }
 0xb94   :  { %v18616_v36 = vadd.f32 %v13739_v44, %v8376_v42  ;;  %v13743_v56 = vadd.f32 %v13122_v25, %v18610_v57  ;;  %v7984_v13 = vpop.f32.mrb[79].mxu1 }
 0xb95   :  { %v18619_v41 = vadd.f32 %v13741_v51, %v8376_v42  ;;  %v13745_v12 = vadd.f32 %v18610_v57, %v7984_v13 }
 0xb96   :  { %20941 = vst [vmem:[#allocation44_spill] sm:$0xff] %v18616_v36  ;;  %v18622_v22 = vadd.f32 %v13743_v56, %v8376_v42  ;;  %v8729_v43 = vmax.f32 %v18616_v36, 0.0  ;;  %v8544_v1 = vsel %vm1171_vm3, %v18616_v36, -inf }
 0xb97   :  { %20942 = vst [vmem:[#allocation22_spill] sm:$0xff] %v18619_v41  ;;  %v18624_v24 = vadd.f32 %v13745_v12, %v8376_v42  ;;  %v8541_v38 = vsel %vm1171_vm3, %v18619_v41, -inf  ;;  %v8727_v33 = vmax.f32 %v18619_v41, 0.0 }
 0xb98   :  { %20943 = vst [vmem:[#allocation17_spill] sm:$0xff] %v18622_v22  ;;  %v8730_v7 = vmax.f32 %v18622_v22, 0.0  ;;  %v8546_v50 = vsel %vm1171_vm3, %v18622_v22, -inf }
 0xb99   :  { %20944 = vst [vmem:[#allocation15_spill] sm:$0xff] %v18624_v24  ;;  %v8542_v5 = vsel %vm1171_vm3, %v18624_v24, -inf  ;;  %v8728_v2 = vmax.f32 %v18624_v24, 0.0  ;;  %v13125_v47 = vpop.f32.mrb[80].mxu1 }
 0xb9a   :  { %v8792_v63 = vpack.c.bf16 %v8730_v7, %v8729_v43  ;;  %v8543_v9 = vmax.f32 %v8541_v38, %v8542_v5  ;;  %v13747_v28 = vadd.f32 %v13125_v47, %v18610_v57  ;;  %v7997_v18 = vpop.f32.mrb[81].mxu1 }
 0xb9b   :  { %v13749_v8 = vadd.f32 %v18610_v57, %v7997_v18  ;;  %v13126_v59 = vpop.f32.mrb[82].mxu1  ;;  %v8791_v61 = vpack.c.bf16 %v8728_v2, %v8727_v33 }
 0xb9c   :  { %v8545_v19 = vmax.f32 %v8543_v9, %v8544_v1  ;;  %v18645_v10 = vadd.f32 %v13747_v28, %v8376_v42  ;;  %v13751_v4 = vadd.f32 %v13126_v59, %v18610_v57  ;;  %v8000_v45 = vpop.f32.mrb[83].mxu1 }
 0xb9d   :  { %v18650_v48 = vadd.f32 %v13749_v8, %v8376_v42  ;;  %v13753_v26 = vadd.f32 %v18610_v57, %v8000_v45  ;;  %13195 = vmatprep.mubr.msk.bf16.mxu0 %vm1171_vm3, %v8791_v61 }
 0xb9e   :  { %20945 = vst [vmem:[#allocation21_spill] sm:$0xff] %v18645_v10  ;;  %v8547_v30 = vmax.f32 %v8545_v19, %v8546_v50  ;;  %v18657_v32 = vadd.f32 %v13751_v4, %v8376_v42  ;;  %13196 = vmatmul.mubr.msk.bf16.vlgmr.msra.gmra.mrb[204].mxu0 %vm1171_vm3, %v8792_v63  ;;  %v8733_v34 = vmax.f32 %v18645_v10, 0.0 }
 0xb9f   :  { %20946 = vst [vmem:[#allocation26_spill] sm:$0xff] %v18650_v48  ;;  %v8548_v49 = vsel %vm1171_vm3, %v18650_v48, -inf  ;;  %v18662_v54 = vadd.f32 %v13753_v26, %v8376_v42  ;;  %13260 = vmatpush3.bf16.msra.mxu0 %v14362_v53  ;;  %v8731_v35 = vmax.f32 %v18650_v48, 0.0  ;;  %v8552_v42 = vsel %vm1171_vm3, %v18645_v10, -inf }
 0xba0   :  { %20947 = vst [vmem:[#allocation20_spill] sm:$0xff] %v18657_v32  ;;  %v8549_v11 = vmax.f32 %v8547_v30, %v8548_v49  ;;  %v8734_v20 = vmax.f32 %v18657_v32, 0.0  ;;  %13261 = vmatprep.subr.bf16.mxu0 %v20354_v3  ;;  %v8554_v43 = vsel %vm1171_vm3, %v18657_v32, -inf  ;;  %v8369_v26 = vcombine.high %v18605_v21, %v18605_v21 }
 0xba1   :  { %20948 = vst [vmem:[#allocation19_spill] sm:$0xff] %v18662_v54  ;;  %v8550_v39 = vsel %vm1171_vm3, %v18662_v54, -inf  ;;  %v8732_v58 = vmax.f32 %v18662_v54, 0.0  ;;  %v13129_v55 = vpop.f32.mrb[84].mxu1 }
 0xba2   :  { %v8551_v17 = vmax.f32 %v8549_v11, %v8550_v39  ;;  %v13755_v23 = vadd.f32 %v13129_v55, %v18610_v57  ;;  %v8013_v37 = vpop.f32.mrb[85].mxu1  ;;  %v8794_v6 = vpack.c.bf16 %v8734_v20, %v8733_v34 }
 0xba3   :  { %v13757_v44 = vadd.f32 %v18610_v57, %v8013_v37  ;;  %v13130_v27 = vpop.f32.mrb[86].mxu1  ;;  %v8793_v51 = vpack.c.bf16 %v8732_v58, %v8731_v35  ;;  %13262 = vmatpush3.bf16.msra.mxu0 %v14363_v15 }
 0xba4   :  { %v8553_v25 = vmax.f32 %v8551_v17, %v8552_v42  ;;  %v18684_v56 = vadd.f32 %v13755_v23, %v8380_v40  ;;  %v13759_v13 = vadd.f32 %v13130_v27, %v18610_v57  ;;  %v8016_v12 = vpop.f32.mrb[87].mxu1  ;;  %v14364_v23 = vld [vmem:[%s19910_s7 + $0x90] sm:$0xff]  }
 0xba5   :  { %v18689_v38 = vadd.f32 %v13757_v44, %v8380_v40  ;;  %v13761_v7 = vadd.f32 %v18610_v57, %v8016_v12  ;;  %13199 = vmatprep.mubr.msk.bf16.mxu0 %vm1171_vm3, %v8793_v51  ;;  %13404 = vmatpush3.bf16.msra.mxu1 %v14364_v23  ;;  %v14365_v51 = vld [vmem:[%s19910_s7 + $0x98] sm:$0xff]  }
 0xba6   :  { %20949 = vst [vmem:[#allocation28_spill] sm:$0xff] %v18684_v56  ;;  %v8555_v33 = vmax.f32 %v8553_v25, %v8554_v43  ;;  %v18693_v5 = vadd.f32 %v13759_v13, %v8380_v40  ;;  %13200 = vmatmul.mubr.msk.bf16.gmra.mrb[208].mxu0 %vm1171_vm3, %v8794_v6  ;;  %v8737_v2 = vmax.f32 %v18684_v56, 0.0  ;;  %v8565_v30 = vsel %vm1171_vm3, %v18684_v56, -inf  ;;  %13405 = vmatprep.subr.bf16.mxu1 %v20354_v3 }
 0xba7   :  { %20950 = vst [vmem:[#allocation39_spill] sm:$0xff] %v18689_v38  ;;  %v18697_v47 = vadd.f32 %v13761_v7, %v8380_v40  ;;  %v8562_v63 = vsel %vm1171_vm3, %v18689_v38, -inf  ;;  %v8735_v18 = vmax.f32 %v18689_v38, 0.0  ;;  %v18739_v25 = vrot.slane %v8369_v26, %v20940_v16 }
 0xba8   :  { %20951 = vst [vmem:[#allocation30_spill] sm:$0xff] %v18693_v5  ;;  %v8556_v46 = vrot.slane %v8555_v33, 4  ;;  %v8738_v9 = vmax.f32 %v18693_v5, 0.0  ;;  %v8567_v55 = vsel %vm1171_vm3, %v18693_v5, -inf }
 0xba9   :  { %20952 = vst [vmem:[#allocation24_spill] sm:$0xff] %v18697_v47  ;;  %v8563_v1 = vsel %vm1171_vm3, %v18697_v47, -inf  ;;  %v8736_v8 = vmax.f32 %v18697_v47, 0.0  ;;  %v13133_v61 = vpop.f32.mrb[88].mxu1  ;;  %13406 = vmatpush3.bf16.msra.mxu1 %v14365_v51 }
 0xbaa   :  { %v8557_v53 = vmax.f32 %v8555_v33, %v8556_v46  ;;  %v8564_v19 = vmax.f32 %v8562_v63, %v8563_v1  ;;  %v13763_v4 = vadd.f32 %v13133_v61, %v18610_v57  ;;  %v8029_v45 = vpop.f32.mrb[89].mxu1  ;;  %v8796_v50 = vpack.c.bf16 %v8738_v9, %v8737_v2  ;;  %13411 = vmatprep.subr.bf16.mxu1 %v20354_v3 }
 0xbab   :  { %v13765_v49 = vadd.f32 %v18610_v57, %v8029_v45  ;;  %v13134_v15 = vpop.f32.mrb[90].mxu1  ;;  %v8795_v34 = vpack.c.bf16 %v8736_v8, %v8735_v18 }
 0xbac   :  { %v8558_v11 = vrot.slane %v8557_v53, 2  ;;  %v8566_v20 = vmax.f32 %v8564_v19, %v8565_v30  ;;  %v18716_v35 = vadd.f32 %v13763_v4, %v8380_v40  ;;  %v13767_v39 = vadd.f32 %v13134_v15, %v18610_v57  ;;  %v8032_v58 = vpop.f32.mrb[91].mxu1 }
 0xbad   :  { %v18721_v17 = vadd.f32 %v13765_v49, %v8380_v40  ;;  %v13769_v21 = vadd.f32 %v18610_v57, %v8032_v58  ;;  %13203 = vmatprep.mubr.msk.bf16.mxu0 %vm1171_vm3, %v8795_v34 }
 0xbae   :  { %20953 = vst [vmem:[#allocation23_spill] sm:$0xff] %v18716_v35  ;;  %v8559_v37 = vmax.f32 %v8557_v53, %v8558_v11  ;;  %v8568_v6 = vmax.f32 %v8566_v20, %v8567_v55  ;;  %13204 = vmatmul.mubr.msk.bf16.gmra.mrb[212].mxu0 %vm1171_vm3, %v8796_v50  ;;  %v18731_v44 = vadd.f32 %v13767_v39, %v8380_v40  ;;  %v8741_v43 = vmax.f32 %v18716_v35, 0.0 }
 0xbaf   :  { %20954 = vst [vmem:[#allocation32_spill] sm:$0xff] %v18721_v17  ;;  %v8569_v42 = vsel %vm1171_vm3, %v18721_v17, -inf  ;;  %v18733_v27 = vadd.f32 %v13769_v21, %v8380_v40  ;;  %v8573_v46 = vsel %vm1171_vm3, %v18716_v35, -inf  ;;  %v8739_v8 = vmax.f32 %v18721_v17, 0.0 }
 0xbb0   :  { %20955 = vst [vmem:[#allocation34_spill] sm:$0xff] %v18731_v44  ;;  %v8560_v13 = vrot.slane %v8559_v37, 1  ;;  %v8570_v12 = vmax.f32 %v8568_v6, %v8569_v42  ;;  %v8742_v7 = vmax.f32 %v18731_v44, 0.0  ;;  %v8575_v50 = vsel %vm1171_vm3, %v18731_v44, -inf }
 0xbb1   :  { %20956 = vst [vmem:[#allocation25_spill] sm:$0xff] %v18733_v27  ;;  %v8571_v33 = vsel %vm1171_vm3, %v18733_v27, -inf  ;;  %v13137_v2 = vpop.f32.mrb[92].mxu1  ;;  %v8740_v9 = vmax.f32 %v18733_v27, 0.0  ;;  %v8324_v55 = vcombine.high %v20939_v52, %v20939_v52  ;;  %v8371_v21 = vcombine.high %v18655_v29, %v18655_v29 }
 0xbb2   :  { %v8572_v63 = vmax.f32 %v8570_v12, %v8571_v33  ;;  %v8045_v1 = vpop.f32.mrb[93].mxu1  ;;  %v13771_v61 = vadd.f32 %v13137_v2, %v18610_v57  ;;  %v8798_v4 = vpack.c.bf16 %v8742_v7, %v8741_v43  ;;  %v8561_v45 = vmax.f32 %v8559_v37, %v8560_v13 }
 0xbb3   :  { %v13773_v53 = vadd.f32 %v18610_v57, %v8045_v1  ;;  %v13138_v19 = vpop.f32.mrb[94].mxu1  ;;  %v8797_v20 = vpack.c.bf16 %v8740_v9, %v8739_v8 }
 0xbb4   :  { %v8574_v26 = vmax.f32 %v8572_v63, %v8573_v46  ;;  %v13775_v30 = vadd.f32 %v13138_v19, %v18610_v57  ;;  %v8048_v49 = vpop.f32.mrb[95].mxu1  ;;  %v18761_v15 = vadd.f32 %v13771_v61, %v18739_v25  ;;  %v9220_v23 = vmax.f32 %v8561_v45, 0.0 }
 0xbb5   :  { %v18764_v34 = vadd.f32 %v13773_v53, %v18739_v25  ;;  %v13777_v11 = vadd.f32 %v18610_v57, %v8048_v49  ;;  %13207 = vmatprep.mubr.msk.bf16.mxu0 %vm1171_vm3, %v8797_v20  ;;  %v10412_v51 = vpack.c.bf16 %v8561_v45, %v8561_v45 }
 0xbb6   :  { %20957 = vst [vmem:[#allocation27_spill] sm:$0xff] %v18761_v15  ;;  %v8576_v39 = vmax.f32 %v8574_v26, %v8575_v50  ;;  %v18768_v58 = vadd.f32 %v13775_v30, %v18739_v25  ;;  %v8745_v6 = vmax.f32 %v18761_v15, 0.0  ;;  %13208 = vmatmul.mubr.msk.bf16.gmra.mrb[216].mxu0 %vm1171_vm3, %v8798_v4  ;;  %v8586_v30 = vsel %vm1171_vm3, %v18761_v15, -inf }
 0xbb7   :  { %20958 = vst [vmem:[#allocation36_spill] sm:$0xff] %v18764_v34  ;;  %v8583_v13 = vsel %vm1171_vm3, %v18764_v34, -inf  ;;  %v18783_v43 = vadd.f32 %v13777_v11, %v18739_v25  ;;  %v8743_v33 = vmax.f32 %v18764_v34, 0.0 }
 0xbb8   :  { %20959 = vst [vmem:[#allocation66_spill] sm:$0xff] %v18768_v58  ;;  %v8577_v37 = vrot.slane %v8576_v39, 4  ;;  %v8746_v42 = vmax.f32 %v18768_v58, 0.0 }
 0xbb9   :  { %20960 = vst [vmem:[#allocation38_spill] sm:$0xff] %v18783_v43  ;;  %v13141_v29 = vpop.f32.mrb[96].mxu1  ;;  %v8584_v9 = vsel %vm1171_vm3, %v18783_v43, -inf  ;;  %v8744_v1 = vmax.f32 %v18783_v43, 0.0 }
 0xbba   :  { %v8578_v7 = vmax.f32 %v8576_v39, %v8577_v37  ;;  %v13779_v2 = vadd.f32 %v13141_v29, %v18610_v57  ;;  %v8061_v46 = vpop.f32.mrb[97].mxu1  ;;  %v8800_v63 = vpack.c.bf16 %v8746_v42, %v8745_v6  ;;  %v8585_v4 = vmax.f32 %v8583_v13, %v8584_v9 }
 0xbbb   :  { %v13781_v61 = vadd.f32 %v18610_v57, %v8061_v46  ;;  %v13142_v53 = vpop.f32.mrb[98].mxu1  ;;  %v8799_v20 = vpack.c.bf16 %v8744_v1, %v8743_v33  ;;  %v18804_v39 = vrot.slane %v8371_v21, %v20940_v16  ;;  %v9228_v37 = vpack.c.bf16 %v9220_v23, %v9220_v23 }
 0xbbc   :  { %v8579_v19 = vrot.slane %v8578_v7, 2  ;;  %v18794_v45 = vadd.f32 %v13779_v2, %v18739_v25  ;;  %v13783_v50 = vadd.f32 %v13142_v53, %v18610_v57  ;;  %v8064_v26 = vpop.f32.mrb[99].mxu1  ;;  %v8587_v42 = vmax.f32 %v8585_v4, %v8586_v30 }
 0xbbd   :  { %v18800_v49 = vadd.f32 %v13781_v61, %v18739_v25  ;;  %v13785_v11 = vadd.f32 %v18610_v57, %v8064_v26  ;;  %v8588_v13 = vsel %vm1171_vm3, %v18768_v58, -inf  ;;  %13211 = vmatprep.mubr.msk.bf16.mxu0 %vm1171_vm3, %v8799_v20  ;;  %v10428_v33 = vunpack.c.l.b16 %v10412_v51 }
 0xbbe   :  { %20961 = vst [vmem:[#allocation29_spill] sm:$0xff] %v18794_v45  ;;  %v8580_v6 = vmax.f32 %v8578_v7, %v8579_v19  ;;  %v18811_v2 = vadd.f32 %v13783_v50, %v18739_v25  ;;  %v8594_v23 = vsel %vm1171_vm3, %v18794_v45, -inf  ;;  %v8589_v7 = vmax.f32 %v8587_v42, %v8588_v13  ;;  %13212 = vmatmul.mubr.msk.bf16.gmra.mrb[220].mxu0 %vm1171_vm3, %v8800_v63 }
 0xbbf   :  { %20962 = vst [vmem:[#allocation31_spill] sm:$0xff] %v18800_v49  ;;  %v8590_v29 = vsel %vm1171_vm3, %v18800_v49, -inf  ;;  %v18814_v46 = vadd.f32 %v13785_v11, %v18739_v25  ;;  %v8749_v9 = vmax.f32 %v18794_v45, 0.0  ;;  %v8747_v63 = vmax.f32 %v18800_v49, 0.0 }
 0xbc0   :  { %20963 = vst [vmem:[#allocation40_spill] sm:$0xff] %v18811_v2  ;;  %v8581_v21 = vrot.slane %v8580_v6, 1  ;;  %v8750_v1 = vmax.f32 %v18811_v2, 0.0  ;;  %v8591_v51 = vmax.f32 %v8589_v7, %v8590_v29 }
 0xbc1   :  { %20964 = vst [vmem:[#allocation42_spill] sm:$0xff] %v18814_v46  ;;  %v8592_v25 = vsel %vm1171_vm3, %v18814_v46, -inf  ;;  %v13145_v53 = vpop.f32.mrb[100].mxu1  ;;  %v8748_v4 = vmax.f32 %v18814_v46, 0.0 }
 0xbc2   :  { %v8582_v19 = vmax.f32 %v8580_v6, %v8581_v21  ;;  %v8077_v26 = vpop.f32.mrb[101].mxu1  ;;  %v13787_v30 = vadd.f32 %v13145_v53, %v18610_v57  ;;  %v8802_v42 = vpack.c.bf16 %v8750_v1, %v8749_v9  ;;  %v8593_v12 = vmax.f32 %v8591_v51, %v8592_v25 }
 0xbc3   :  { %v13789_v11 = vadd.f32 %v18610_v57, %v8077_v26  ;;  %v13146_v20 = vpop.f32.mrb[102].mxu1  ;;  %v8801_v8 = vpack.c.bf16 %v8748_v4, %v8747_v63  ;;  %v18847_v1 = vrot.slane %v8324_v55, %v20938_v0  ;;  %v9252_v25 = vunpack.c.l.b16 %v9228_v37 }
 0xbc4   :  { %v9221_v13 = vmax.f32 %v8582_v19, 0.0  ;;  %v10413_v61 = vpack.c.bf16 %v8582_v19, %v8582_v19  ;;  %v13791_v6 = vadd.f32 %v13146_v20, %v18610_v57  ;;  %v8080_v29 = vpop.f32.mrb[103].mxu1  ;;  %v18834_v21 = vadd.f32 %v13787_v30, %v18804_v39 }
 0xbc5   :  { %v18837_v7 = vadd.f32 %v13789_v11, %v18804_v39  ;;  %v13793_v50 = vadd.f32 %v18610_v57, %v8080_v29  ;;  %v8595_v26 = vmax.f32 %v8593_v12, %v8594_v23  ;;  %v8596_v19 = vsel %vm1171_vm3, %v18811_v2, -inf  ;;  %13215 = vmatprep.mubr.msk.bf16.mxu0 %vm1171_vm3, %v8801_v8 }
 0xbc6   :  { %20965 = vst [vmem:[#allocation33_spill] sm:$0xff] %v18834_v21  ;;  %v9229_v53 = vpack.c.bf16 %v9221_v13, %v9221_v13  ;;  %v10429_v40 = vunpack.c.l.b16 %v10413_v61  ;;  %v18841_v9 = vadd.f32 %v13791_v6, %v18804_v39  ;;  %v8607_v51 = vsel %vm1171_vm3, %v18834_v21, -inf  ;;  %13216 = vmatmul.mubr.msk.bf16.gmra.mrb[224].mxu0 %vm1171_vm3, %v8802_v42 }
 0xbc7   :  { %20966 = vst [vmem:[#allocation35_spill] sm:$0xff] %v18837_v7  ;;  %v8597_v23 = vmax.f32 %v8595_v26, %v8596_v19  ;;  %v8753_v4 = vmax.f32 %v18834_v21, 0.0  ;;  %v8604_v52 = vsel %vm1171_vm3, %v18837_v7, -inf  ;;  %v18865_v63 = vadd.f32 %v13793_v50, %v18804_v39 }
 0xbc8   :  { %20967 = vst [vmem:[#allocation41_spill] sm:$0xff] %v18841_v9  ;;  %v9253_v61 = vunpack.c.l.b16 %v9229_v53  ;;  %v18855_v12 = vsel %vm2725_vm5, %v10429_v40, %v10428_v33  ;;  %v8754_v55 = vmax.f32 %v18841_v9, 0.0  ;;  %v8751_v30 = vmax.f32 %v18837_v7, 0.0 }
 0xbc9   :  { %20968 = vst [vmem:[#allocation48_spill] sm:$0xff] %v18865_v63  ;;  %v13149_v8 = vpop.f32.mrb[104].mxu1  ;;  %v8598_v33 = vrot.slane %v8597_v23, 4  ;;  %v8605_v42 = vsel %vm1171_vm3, %v18865_v63, -inf  ;;  %v8752_v13 = vmax.f32 %v18865_v63, 0.0  ;;  %v18888_v6 = vrot.slane %v18847_v1, %v20938_v0 }
 0xbca   :  { %v18868_v40 = vsel %vm2725_vm5, %v9253_v61, %v9252_v25  ;;  %v13795_v11 = vadd.f32 %v13149_v8, %v18610_v57  ;;  %v8093_v20 = vpop.f32.mrb[105].mxu1  ;;  %v8606_v26 = vmax.f32 %v8604_v52, %v8605_v42  ;;  %v8804_v28 = vpack.c.bf16 %v8754_v55, %v8753_v4 }
 0xbcb   :  { %v13797_v50 = vadd.f32 %v18610_v57, %v8093_v20  ;;  %v13150_v29 = vpop.f32.mrb[106].mxu1  ;;  %v8599_v53 = vmax.f32 %v8597_v23, %v8598_v33  ;;  %v8803_v18 = vpack.c.bf16 %v8752_v13, %v8751_v30  ;;  %v8609_v52 = vsel %vm1171_vm3, %v18841_v9, -inf }
 0xbcc   :  { %v18879_v25 = vadd.f32 %v13795_v11, %v18804_v39  ;;  %v13799_v19 = vadd.f32 %v13150_v29, %v18610_v57  ;;  %v8096_v61 = vpop.f32.mrb[107].mxu1  ;;  %v8608_v23 = vmax.f32 %v8606_v26, %v8607_v51 }
 0xbcd   :  { %v18883_v8 = vadd.f32 %v13797_v50, %v18804_v39  ;;  %v13801_v37 = vadd.f32 %v18610_v57, %v8096_v61  ;;  %v8600_v20 = vrot.slane %v8599_v53, 2  ;;  %13219 = vmatprep.mubr.msk.bf16.mxu0 %vm1171_vm3, %v8803_v18 }
 0xbce   :  { %20969 = vst [vmem:[#allocation43_spill] sm:$0xff] %v18879_v25  ;;  %v18895_v11 = vadd.f32 %v13799_v19, %v18804_v39  ;;  %v8757_v55 = vmax.f32 %v18879_v25, 0.0  ;;  %v8610_v30 = vmax.f32 %v8608_v23, %v8609_v52  ;;  %13220 = vmatmul.mubr.msk.bf16.gmra.mrb[228].mxu0 %vm1171_vm3, %v8804_v28  ;;  %v8392_v28 = vrot.slane %v18888_v6, %v20940_v16 }
 0xbcf   :  { %20970 = vst [vmem:[#allocation67_spill] sm:$0xff] %v18883_v8  ;;  %v8611_v33 = vsel %vm1171_vm3, %v18883_v8, -inf  ;;  %v18898_v42 = vadd.f32 %v13801_v37, %v18804_v39  ;;  %v8601_v4 = vmax.f32 %v8599_v53, %v8600_v20  ;;  %v8755_v51 = vmax.f32 %v18883_v8, 0.0 }
 0xbd0   :  { %20971 = vst [vmem:[#allocation45_spill] sm:$0xff] %v18895_v11  ;;  %v8758_v13 = vmax.f32 %v18895_v11, 0.0  ;;  %v8612_v26 = vmax.f32 %v8610_v30, %v8611_v33  ;;  %v8615_v14 = vsel %vm1171_vm3, %v18879_v25, -inf }
 0xbd1   :  { %20972 = vst [vmem:[#allocation52_spill] sm:$0xff] %v18898_v42  ;;  %v8613_v29 = vsel %vm1171_vm3, %v18898_v42, -inf  ;;  %v13153_v39 = vpop.f32.mrb[108].mxu1  ;;  %v8602_v37 = vrot.slane %v8601_v4, 1  ;;  %v8756_v18 = vmax.f32 %v18898_v42, 0.0 }
 0xbd2   :  { %v8109_v19 = vpop.f32.mrb[109].mxu1  ;;  %v13803_v61 = vadd.f32 %v13153_v39, %v18610_v57  ;;  %v8806_v52 = vpack.c.bf16 %v8758_v13, %v8757_v55  ;;  %v8614_v59 = vmax.f32 %v8612_v26, %v8613_v29  ;;  %v8617_v55 = vsel %vm1171_vm3, %v18895_v11, -inf }
 0xbd3   :  { %v13805_v20 = vadd.f32 %v18610_v57, %v8109_v19  ;;  %v13154_v23 = vpop.f32.mrb[110].mxu1  ;;  %v8603_v50 = vmax.f32 %v8601_v4, %v8602_v37  ;;  %v8805_v30 = vpack.c.bf16 %v8756_v18, %v8755_v51  ;;  %v8340_v4 = vcombine.high %v18847_v1, %v18847_v1 }
 0xbd4   :  { %v13807_v31 = vadd.f32 %v13154_v23, %v18610_v57  ;;  %v8112_v33 = vpop.f32.mrb[111].mxu1  ;;  %v18919_v53 = vadd.f32 %v13803_v61, %v8392_v28  ;;  %v8616_v19 = vmax.f32 %v8614_v59, %v8615_v14 }
 0xbd5   :  { %v18921_v60 = vadd.f32 %v13805_v20, %v8392_v28  ;;  %v13809_v62 = vadd.f32 %v18610_v57, %v8112_v33  ;;  %v9222_v39 = vmax.f32 %v8603_v50, 0.0  ;;  %v10414_v8 = vpack.c.bf16 %v8603_v50, %v8603_v50  ;;  %13223 = vmatprep.mubr.msk.bf16.mxu0 %vm1171_vm3, %v8805_v30 }
 0xbd6   :  { %20973 = vst [vmem:[#allocation46_spill] sm:$0xff] %v18919_v53  ;;  %v18924_v42 = vadd.f32 %v13807_v31, %v8392_v28  ;;  %v8628_v51 = vsel %vm1171_vm3, %v18919_v53, -inf  ;;  %v8618_v37 = vmax.f32 %v8616_v19, %v8617_v55  ;;  %13224 = vmatmul.mubr.msk.bf16.gmra.mrb[232].mxu0 %vm1171_vm3, %v8806_v52  ;;  %v18964_v30 = vrot.slane %v8340_v4, %v20938_v0 }
 0xbd7   :  { %20974 = vst [vmem:[#allocation47_spill] sm:$0xff] %v18921_v60  ;;  %v9230_v13 = vpack.c.bf16 %v9222_v39, %v9222_v39  ;;  %v10430_v29 = vunpack.c.l.b16 %v10414_v8  ;;  %v8625_v50 = vsel %vm1171_vm3, %v18921_v60, -inf  ;;  %v8759_v31 = vmax.f32 %v18921_v60, 0.0 }
 0xbd8   :  { %20975 = vst [vmem:[#allocation50_spill] sm:$0xff] %v18924_v42  ;;  %v8762_v14 = vmax.f32 %v18924_v42, 0.0  ;;  %v18940_v1 = vadd.f32 %v13809_v62, %v8392_v28  ;;  %v8619_v61 = vrot.slane %v8618_v37, 4  ;;  %v8761_v60 = vmax.f32 %v18919_v53, 0.0 }
 0xbd9   :  { %v13157_v26 = vpop.f32.mrb[112].mxu1  ;;  %v9254_v18 = vunpack.c.l.b16 %v9230_v13  ;;  %v18944_v8 = vsel %vm2727_vm6, %v10430_v29, %v18855_v12 }
 0xbda   :  { %20976 = vst [vmem:[#allocation65_spill] sm:$0xff] %v18940_v1  ;;  %v13811_v20 = vadd.f32 %v13157_v26, %v18610_v57  ;;  %v8125_v23 = vpop.f32.mrb[113].mxu1  ;;  %v8626_v52 = vsel %vm1171_vm3, %v18940_v1, -inf  ;;  %v8760_v33 = vmax.f32 %v18940_v1, 0.0  ;;  %v8620_v12 = vmax.f32 %v8618_v37, %v8619_v61 }
 0xbdb   :  { %v13813_v62 = vadd.f32 %v18610_v57, %v8125_v23  ;;  %v13158_v39 = vpop.f32.mrb[114].mxu1  ;;  %v18955_v19 = vsel %vm2727_vm6, %v9254_v18, %v18868_v40  ;;  %v8627_v55 = vmax.f32 %v8625_v50, %v8626_v52  ;;  %v8630_v37 = vsel %vm1171_vm3, %v18924_v42, -inf }
 0xbdc   :  { %v18957_v13 = vadd.f32 %v13811_v20, %v8392_v28  ;;  %v8128_v29 = vpop.f32.mrb[115].mxu1  ;;  %v13815_v59 = vadd.f32 %v13158_v39, %v18610_v57  ;;  %v8807_v11 = vpack.c.bf16 %v8760_v33, %v8759_v31  ;;  %v8621_v23 = vrot.slane %v8620_v12, 2 }
 0xbdd   :  { %v18959_v26 = vadd.f32 %v13813_v62, %v8392_v28  ;;  %v13817_v25 = vadd.f32 %v18610_v57, %v8128_v29  ;;  %v8629_v40 = vmax.f32 %v8627_v55, %v8628_v51  ;;  %v8808_v52 = vpack.c.bf16 %v8762_v14, %v8761_v60 }
 0xbde   :  { %20977 = vst [vmem:[#allocation56_spill] sm:$0xff] %v18957_v13  ;;  %v18971_v18 = vadd.f32 %v13815_v59, %v8392_v28  ;;  %13227 = vmatprep.mubr.msk.bf16.mxu0 %vm1171_vm3, %v8807_v11  ;;  %v8622_v31 = vmax.f32 %v8620_v12, %v8621_v23  ;;  %v8765_v4 = vmax.f32 %v18957_v13, 0.0  ;;  %v8396_v14 = vrot.slane %v18964_v30, %v20940_v16 }
 0xbdf   :  { %20978 = vst [vmem:[#allocation51_spill] sm:$0xff] %v18959_v26  ;;  %v8632_v50 = vsel %vm1171_vm3, %v18959_v26, -inf  ;;  %v18973_v61 = vadd.f32 %v13817_v25, %v8392_v28  ;;  %v8631_v20 = vmax.f32 %v8629_v40, %v8630_v37  ;;  %v8763_v33 = vmax.f32 %v18959_v26, 0.0  ;;  %13228 = vmatmul.mubr.msk.bf16.gmra.mrb[236].mxu0 %vm1171_vm3, %v8808_v52 }
 0xbe0   :  { %20979 = vst [vmem:[#allocation54_spill] sm:$0xff] %v18971_v18  ;;  %v8766_v51 = vmax.f32 %v18971_v18, 0.0  ;;  %v8623_v25 = vrot.slane %v8622_v31, 1  ;;  %v8636_v12 = vsel %vm1171_vm3, %v18957_v13, -inf }
 0xbe1   :  { %20980 = vst [vmem:[#allocation55_spill] sm:$0xff] %v18973_v61  ;;  %v8634_v59 = vsel %vm1171_vm3, %v18973_v61, -inf  ;;  %v13161_v39 = vpop.f32.mrb[116].mxu1  ;;  %v8633_v28 = vmax.f32 %v8631_v20, %v8632_v50  ;;  %v8764_v11 = vmax.f32 %v18973_v61, 0.0 }
 0xbe2   :  { %v8141_v60 = vpop.f32.mrb[117].mxu1  ;;  %v13819_v55 = vadd.f32 %v13161_v39, %v18610_v57  ;;  %v8810_v40 = vpack.c.bf16 %v8766_v51, %v8765_v4  ;;  %v8624_v37 = vmax.f32 %v8622_v31, %v8623_v25  ;;  %v8638_v31 = vsel %vm1171_vm3, %v18971_v18, -inf }
 0xbe3   :  { %v13821_v29 = vadd.f32 %v18610_v57, %v8141_v60  ;;  %v13162_v23 = vpop.f32.mrb[118].mxu1  ;;  %v8635_v62 = vmax.f32 %v8633_v28, %v8634_v59  ;;  %v8809_v53 = vpack.c.bf16 %v8764_v11, %v8763_v33 }
 0xbe4   :  { %v13823_v50 = vadd.f32 %v13162_v23, %v18610_v57  ;;  %v8144_v20 = vpop.f32.mrb[119].mxu1  ;;  %v18994_v52 = vadd.f32 %v13819_v55, %v8396_v14  ;;  %v9223_v39 = vmax.f32 %v8624_v37, 0.0  ;;  %v10415_v42 = vpack.c.bf16 %v8624_v37, %v8624_v37 }
 0xbe5   :  { %v18996_v26 = vadd.f32 %v13821_v29, %v8396_v14  ;;  %v13825_v61 = vadd.f32 %v18610_v57, %v8144_v20  ;;  %v8637_v60 = vmax.f32 %v8635_v62, %v8636_v12  ;;  %13231 = vmatprep.mubr.msk.bf16.mxu0 %vm1171_vm3, %v8809_v53 }
 0xbe6   :  { %20981 = vst [vmem:[#allocation60_spill] sm:$0xff] %v18994_v52  ;;  %v18999_v1 = vadd.f32 %v13823_v50, %v8396_v14  ;;  %v8649_v4 = vsel %vm1171_vm3, %v18994_v52, -inf  ;;  %v9231_v33 = vpack.c.bf16 %v9223_v39, %v9223_v39  ;;  %v10431_v51 = vunpack.c.l.b16 %v10415_v42 }
 0xbe7   :  { %20982 = vst [vmem:[#allocation49_spill] sm:$0xff] %v18996_v26  ;;  %v8639_v59 = vmax.f32 %v8637_v60, %v8638_v31  ;;  %v8646_v25 = vsel %vm1171_vm3, %v18996_v26, -inf  ;;  %v8767_v28 = vmax.f32 %v18996_v26, 0.0  ;;  %v19012_v53 = vadd.f32 %v13825_v61, %v8396_v14  ;;  %13232 = vmatmul.mubr.msk.bf16.gmra.mrb[240].mxu0 %vm1171_vm3, %v8810_v40 }
 0xbe8   :  { %20983 = vst [vmem:[#allocation64_spill] sm:$0xff] %v18999_v1  ;;  %v8770_v62 = vmax.f32 %v18999_v1, 0.0  ;;  %v9255_v55 = vunpack.c.l.b16 %v9231_v33  ;;  %v19016_v29 = vsel %vm2729_vm7, %v10431_v51, %v18944_v8  ;;  %v8769_v26 = vmax.f32 %v18994_v52, 0.0 }
 0xbe9   :  { %20984 = vst [vmem:[#allocation59_spill] sm:$0xff] %v19012_v53  ;;  %v13165_v12 = vpop.f32.mrb[120].mxu1  ;;  %v8640_v42 = vrot.slane %v8639_v59, 4  ;;  %v8647_v50 = vsel %vm1171_vm3, %v19012_v53, -inf  ;;  %v8768_v20 = vmax.f32 %v19012_v53, 0.0 }
 0xbea   :  { %v13827_v23 = vadd.f32 %v13165_v12, %v18610_v57  ;;  %v8157_v37 = vpop.f32.mrb[121].mxu1  ;;  %v19028_v8 = vsel %vm2729_vm7, %v9255_v55, %v18955_v19  ;;  %v8648_v40 = vmax.f32 %v8646_v25, %v8647_v50  ;;  %v8812_v50 = vpack.c.bf16 %v8770_v62, %v8769_v26 }
 0xbeb   :  { %v13829_v39 = vadd.f32 %v18610_v57, %v8157_v37  ;;  %v13166_v60 = vpop.f32.mrb[122].mxu1  ;;  %v8641_v31 = vmax.f32 %v8639_v59, %v8640_v42  ;;  %v8811_v18 = vpack.c.bf16 %v8768_v20, %v8767_v28  ;;  %v8370_v37 = vcombine.high %v18888_v6, %v18888_v6 }
 0xbec   :  { %v19030_v33 = vadd.f32 %v13827_v23, %v8396_v14  ;;  %v8160_v51 = vpop.f32.mrb[123].mxu1  ;;  %v13831_v11 = vadd.f32 %v13166_v60, %v18610_v57  ;;  %v8650_v19 = vmax.f32 %v8648_v40, %v8649_v4  ;;  %v8651_v59 = vsel %vm1171_vm3, %v18999_v1, -inf }
 0xbed   :  { %v19032_v12 = vadd.f32 %v13829_v39, %v8396_v14  ;;  %v13833_v13 = vadd.f32 %v18610_v57, %v8160_v51  ;;  %v8642_v61 = vrot.slane %v8641_v31, 2  ;;  %13235 = vmatprep.mubr.msk.bf16.mxu0 %vm1171_vm3, %v8811_v18  ;;  %v8400_v62 = vrot.slane %v8370_v37, %v20940_v16 }
 0xbee   :  { %20985 = vst [vmem:[#allocation92_spill] sm:$0xff] %v19030_v33  ;;  %v19043_v55 = vadd.f32 %v13831_v11, %v8396_v14  ;;  %v8773_v23 = vmax.f32 %v19030_v33, 0.0  ;;  %v8652_v6 = vmax.f32 %v8650_v19, %v8651_v59 }
 0xbef   :  { %20986 = vst [vmem:[#allocation53_spill] sm:$0xff] %v19032_v12  ;;  %v8653_v25 = vsel %vm1171_vm3, %v19032_v12, -inf  ;;  %v19045_v42 = vadd.f32 %v13833_v13, %v8396_v14  ;;  %v8643_v28 = vmax.f32 %v8641_v31, %v8642_v61  ;;  %v8771_v20 = vmax.f32 %v19032_v12, 0.0  ;;  %13236 = vmatmul.mubr.msk.bf16.gmra.mrb[244].mxu0 %vm1171_vm3, %v8812_v50 }
 0xbf0   :  { %20987 = vst [vmem:[#allocation68_spill] sm:$0xff] %v19043_v55  ;;  %v8774_v4 = vmax.f32 %v19043_v55, 0.0  ;;  %v8654_v14 = vmax.f32 %v8652_v6, %v8653_v25  ;;  %v8657_v61 = vsel %vm1171_vm3, %v19030_v33, -inf }
 0xbf1   :  { %20988 = vst [vmem:[#allocation57_spill] sm:$0xff] %v19045_v42  ;;  %v8655_v11 = vsel %vm1171_vm3, %v19045_v42, -inf  ;;  %v13169_v60 = vpop.f32.mrb[124].mxu1  ;;  %v8644_v13 = vrot.slane %v8643_v28, 1  ;;  %v8772_v18 = vmax.f32 %v19045_v42, 0.0 }
 0xbf2   :  { %v8173_v26 = vpop.f32.mrb[125].mxu1  ;;  %v13835_v31 = vadd.f32 %v13169_v60, %v18610_v57  ;;  %v8814_v19 = vpack.c.bf16 %v8774_v4, %v8773_v23  ;;  %v8656_v39 = vmax.f32 %v8654_v14, %v8655_v11 }
 0xbf3   :  { %v13837_v40 = vadd.f32 %v18610_v57, %v8173_v26  ;;  %v13170_v51 = vpop.f32.mrb[126].mxu1  ;;  %v8645_v59 = vmax.f32 %v8643_v28, %v8644_v13  ;;  %v8813_v52 = vpack.c.bf16 %v8772_v18, %v8771_v20  ;;  %v8659_v28 = vsel %vm1171_vm3, %v19043_v55, -inf }
 0xbf4   :  { %v13839_v25 = vadd.f32 %v13170_v51, %v18610_v57  ;;  %v8176_v6 = vpop.f32.mrb[127].mxu1  ;;  %v19065_v12 = vadd.f32 %v13835_v31, %v8400_v62  ;;  %v8658_v26 = vmax.f32 %v8656_v39, %v8657_v61 }
 0xbf5   :  { %v19067_v50 = vadd.f32 %v13837_v40, %v8400_v62  ;;  %v13841_v37 = vadd.f32 %v18610_v57, %v8176_v6  ;;  %v9224_v60 = vmax.f32 %v8645_v59, 0.0  ;;  %v10416_v42 = vpack.c.bf16 %v8645_v59, %v8645_v59  ;;  %13239 = vmatprep.mubr.msk.bf16.mxu0 %vm1171_vm3, %v8813_v52 }
 0xbf6   :  { %20989 = vst [vmem:[#allocation63_spill] sm:$0xff] %v19065_v12  ;;  %v19070_v1 = vadd.f32 %v13839_v25, %v8400_v62  ;;  %v8670_v23 = vsel %vm1171_vm3, %v19065_v12, -inf  ;;  %v8660_v11 = vmax.f32 %v8658_v26, %v8659_v28 }
 0xbf7   :  { %20990 = vst [vmem:[#allocation58_spill] sm:$0xff] %v19067_v50  ;;  %v9232_v20 = vpack.c.bf16 %v9224_v60, %v9224_v60  ;;  %v10432_v4 = vunpack.c.l.b16 %v10416_v42  ;;  %v8667_v13 = vsel %vm1171_vm3, %v19067_v50, -inf  ;;  %v8775_v14 = vmax.f32 %v19067_v50, 0.0  ;;  %13240 = vmatmul.mubr.msk.bf16.gmra.mrb[248].mxu0 %vm1171_vm3, %v8814_v19 }
 0xbf8   :  { %20991 = vst [vmem:[#allocation71_spill] sm:$0xff] %v19070_v1  ;;  %v8778_v39 = vmax.f32 %v19070_v1, 0.0  ;;  %v19083_v52 = vadd.f32 %v13841_v37, %v8400_v62  ;;  %v8661_v42 = vrot.slane %v8660_v11, 4  ;;  %v8777_v50 = vmax.f32 %v19065_v12, 0.0 }
 0xbf9   :  { %v13173_v61 = vpop.f32.mrb[128].mxu1  ;;  %v9256_v31 = vunpack.c.l.b16 %v9232_v20  ;;  %v19087_v40 = vsel %vm2731_vm8, %v10432_v4, %v19016_v29 }
 0xbfa   :  { %20992 = vst [vmem:[#allocation61_spill] sm:$0xff] %v19083_v52  ;;  %v13843_v51 = vadd.f32 %v13173_v61, %v18610_v57  ;;  %v8189_v59 = vpop.f32.mrb[129].mxu1  ;;  %v8668_v25 = vsel %vm1171_vm3, %v19083_v52, -inf  ;;  %v8776_v6 = vmax.f32 %v19083_v52, 0.0  ;;  %v8662_v28 = vmax.f32 %v8660_v11, %v8661_v42 }
 0xbfb   :  { %v13845_v60 = vadd.f32 %v18610_v57, %v8189_v59  ;;  %v13174_v26 = vpop.f32.mrb[130].mxu1  ;;  %v19099_v29 = vsel %vm2731_vm8, %v9256_v31, %v19028_v8  ;;  %v8669_v19 = vmax.f32 %v8667_v13, %v8668_v25  ;;  %v8372_v59 = vcombine.high %v18964_v30, %v18964_v30 }
 0xbfc   :  { %v19101_v20 = vadd.f32 %v13843_v51, %v8400_v62  ;;  %v8192_v4 = vpop.f32.mrb[131].mxu1  ;;  %v13847_v18 = vadd.f32 %v13174_v26, %v18610_v57  ;;  %v8815_v55 = vpack.c.bf16 %v8776_v6, %v8775_v14  ;;  %v8663_v37 = vrot.slane %v8662_v28, 2 }
 0xbfd   :  { %v19103_v61 = vadd.f32 %v13845_v60, %v8400_v62  ;;  %v13849_v33 = vadd.f32 %v18610_v57, %v8192_v4  ;;  %v8671_v8 = vmax.f32 %v8669_v19, %v8670_v23  ;;  %v8672_v11 = vsel %vm1171_vm3, %v19070_v1, -inf }
 0xbfe   :  { %20993 = vst [vmem:[#allocation70_spill] sm:$0xff] %v19101_v20  ;;  %v19114_v31 = vadd.f32 %v13847_v18, %v8400_v62  ;;  %13243 = vmatprep.mubr.msk.bf16.mxu0 %vm1171_vm3, %v8815_v55  ;;  %v8664_v14 = vmax.f32 %v8662_v28, %v8663_v37  ;;  %v8781_v51 = vmax.f32 %v19101_v20, 0.0  ;;  %v8816_v25 = vpack.c.bf16 %v8778_v39, %v8777_v50 }
 0xbff   :  { %20994 = vst [vmem:[#allocation62_spill] sm:$0xff] %v19103_v61  ;;  %v8674_v13 = vsel %vm1171_vm3, %v19103_v61, -inf  ;;  %v19116_v42 = vadd.f32 %v13849_v33, %v8400_v62  ;;  %v8673_v30 = vmax.f32 %v8671_v8, %v8672_v11  ;;  %v8779_v6 = vmax.f32 %v19103_v61, 0.0 }
 0xc00   :  { %20995 = vst [vmem:[#allocation75_spill] sm:$0xff] %v19114_v31  ;;  %v8782_v23 = vmax.f32 %v19114_v31, 0.0  ;;  %v8665_v33 = vrot.slane %v8664_v14, 1  ;;  %13244 = vmatmul.mubr.msk.bf16.gmra.mrb[252].mxu0 %vm1171_vm3, %v8816_v25  ;;  %v8404_v39 = vrot.slane %v8372_v59, %v20940_v16  ;;  %v8678_v37 = vsel %vm1171_vm3, %v19101_v20, -inf  ;;  %v14374_v59 = vld [vmem:[%s19909_s6 + $0x3] ss:$0 sm:$0xff] }
 0xc01   :  { %20996 = vst [vmem:[#allocation95_spill] sm:$0xff] %v19116_v42  ;;  %v8676_v18 = vsel %vm1171_vm3, %v19116_v42, -inf  ;;  %v13177_v26 = vpop.f32.mrb[132].mxu1  ;;  %v8675_v62 = vmax.f32 %v8673_v30, %v8674_v13  ;;  %v8780_v55 = vmax.f32 %v19116_v42, 0.0 }
 0xc02   :  { %v8205_v50 = vpop.f32.mrb[133].mxu1  ;;  %v8818_v28 = vpack.c.bf16 %v8782_v23, %v8781_v51  ;;  %v13851_v19 = vadd.f32 %v13177_v26, %v18610_v57  ;;  %v8666_v11 = vmax.f32 %v8664_v14, %v8665_v33 }
 0xc03   :  { %v13853_v4 = vadd.f32 %v18610_v57, %v8205_v50  ;;  %v13178_v8 = vpop.f32.mrb[134].mxu1  ;;  %v8677_v60 = vmax.f32 %v8675_v62, %v8676_v18  ;;  %v8817_v12 = vpack.c.bf16 %v8780_v55, %v8779_v6 }
 0xc04   :  { %v13855_v13 = vadd.f32 %v13178_v8, %v18610_v57  ;;  %v8208_v30 = vpop.f32.mrb[135].mxu1  ;;  %v19136_v61 = vadd.f32 %v13851_v19, %v8404_v39  ;;  %v9225_v23 = vmax.f32 %v8666_v11, 0.0  ;;  %v10417_v26 = vpack.c.bf16 %v8666_v11, %v8666_v11 }
 0xc05   :  { %v19138_v25 = vadd.f32 %v13853_v4, %v8404_v39  ;;  %v13857_v51 = vadd.f32 %v14374_v59, %v8208_v30  ;;  %v8679_v14 = vmax.f32 %v8677_v60, %v8678_v37  ;;  %13247 = vmatprep.mubr.msk.bf16.mxu0 %vm1171_vm3, %v8817_v12  ;;  %v8680_v57 = vsel %vm1171_vm3, %v19114_v31, -inf }
 0xc06   :  { %20997 = vst [vmem:[#allocation74_spill] sm:$0xff] %v19136_v61  ;;  %v19143_v18 = vadd.f32 %v13855_v13, %v8404_v39  ;;  %v8691_v6 = vsel %vm1171_vm3, %v19136_v61, -inf  ;;  %v8785_v33 = vmax.f32 %v19136_v61, 0.0  ;;  %v9233_v62 = vpack.c.bf16 %v9225_v23, %v9225_v23 }
 0xc07   :  { %20998 = vst [vmem:[#allocation69_spill] sm:$0xff] %v19138_v25  ;;  %v10433_v55 = vunpack.c.l.b16 %v10417_v26  ;;  %v8681_v50 = vmax.f32 %v8679_v14, %v8680_v57  ;;  %v8688_v19 = vsel %vm1171_vm3, %v19138_v25, -inf  ;;  %v8783_v60 = vmax.f32 %v19138_v25, 0.0 }
 0xc08   :  { %20999 = vst [vmem:[#allocation96_spill] sm:$0xff] %v19143_v18  ;;  %v8786_v37 = vmax.f32 %v19143_v18, 0.0  ;;  %v19157_v4 = vadd.f32 %v13857_v51, %v8404_v39  ;;  %v9257_v11 = vunpack.c.l.b16 %v9233_v62  ;;  %13248 = vmatmul.mubr.msk.bf16.gmra.mrb[0].mxu0 %vm1171_vm3, %v8818_v28  ;;  %v8693_v52 = vsel %vm1171_vm3, %v19143_v18, -inf }
 0xc09   :  { %v13181_v8 = vpop.f32.mrb[136].mxu1  ;;  %v10440_v13 = vsel %vm2733_vm9, %v10433_v55, %v19087_v40  ;;  %v8682_v30 = vrot.slane %v8681_v50, 4 }
 0xc0a   :  { %21000 = vst [vmem:[#allocation73_spill] sm:$0xff] %v19157_v4  ;;  %v13859_v23 = vadd.f32 %v14374_v59, %v13181_v8  ;;  %v8221_v26 = vpop.f32.mrb[137].mxu1  ;;  %v8820_v14 = vpack.c.bf16 %v8786_v37, %v8785_v33  ;;  %v8689_v57 = vsel %vm1171_vm3, %v19157_v4, -inf  ;;  %v8784_v20 = vmax.f32 %v19157_v4, 0.0 }
 0xc0b   :  { %v13182_v12 = vpop.f32.mrb[138].mxu1  ;;  %v9264_v62 = vsel %vm2733_vm9, %v9257_v11, %v19099_v29  ;;  %v8683_v61 = vmax.f32 %v8681_v50, %v8682_v30  ;;  %v8690_v40 = vmax.f32 %v8688_v19, %v8689_v57  ;;  %v13861_v8 = vadd.f32 %v14374_v59, %v8221_v26 }
 0xc0c   :  { %v19169_v55 = vadd.f32 %v13859_v23, %v8404_v39  ;;  %v8224_v28 = vpop.f32.mrb[139].mxu1  ;;  %v13863_v31 = vadd.f32 %v14374_v59, %v13182_v12  ;;  %v8819_v37 = vpack.c.bf16 %v8784_v20, %v8783_v60 }
 0xc0d   :  { %v13865_v33 = vadd.f32 %v14374_v59, %v8224_v28  ;;  %v8684_v42 = vrot.slane %v8683_v61, 2  ;;  %v8692_v1 = vmax.f32 %v8690_v40, %v8691_v6  ;;  %v19173_v53 = vadd.f32 %v13861_v8, %v8404_v39 }
 0xc0e   :  { %21001 = vst [vmem:[#allocation76_spill] sm:$0xff] %v19169_v55  ;;  %v19175_v51 = vadd.f32 %v13863_v31, %v8404_v39  ;;  %13251 = vmatprep.mubr.msk.bf16.mxu0 %vm1171_vm3, %v8819_v37  ;;  %v8789_v19 = vmax.f32 %v19169_v55, 0.0  ;;  %v8699_v30 = vsel %vm1171_vm3, %v19169_v55, -inf }
 0xc0f   :  { %21002 = vst [vmem:[#allocation72_spill] sm:$0xff] %v19173_v53  ;;  %v19177_v25 = vadd.f32 %v13865_v33, %v8404_v39  ;;  %v8685_v29 = vmax.f32 %v8683_v61, %v8684_v42  ;;  %v8694_v50 = vmax.f32 %v8692_v1, %v8693_v52  ;;  %v8695_v20 = vsel %vm1171_vm3, %v19173_v53, -inf }
 0xc10   :  { %21003 = vst [vmem:[#allocation81_spill] sm:$0xff] %v19175_v51  ;;  %v8790_v59 = vmax.f32 %v19175_v51, 0.0  ;;  %13252 = vmatmul.mubr.msk.bf16.gmra.mrb[4].mxu0 %vm1171_vm3, %v8820_v14  ;;  %v8787_v61 = vmax.f32 %v19173_v53, 0.0  ;;  %v8701_v14 = vsel %vm1171_vm3, %v19175_v51, -inf }
 0xc11   :  { %21004 = vst [vmem:[#allocation77_spill] sm:$0xff] %v19177_v25  ;;  %v8686_v6 = vrot.slane %v8685_v29, 1  ;;  %v8696_v60 = vmax.f32 %v8694_v50, %v8695_v20  ;;  %v8697_v31 = vsel %vm1171_vm3, %v19177_v25, -inf  ;;  %v8788_v52 = vmax.f32 %v19177_v25, 0.0 }
 0xc12   :  { %v8822_v1 = vpack.c.bf16 %v8790_v59, %v8789_v19 }
 0xc13   :  { %v8687_v39 = vmax.f32 %v8685_v29, %v8686_v6  ;;  %v8698_v11 = vmax.f32 %v8696_v60, %v8697_v31  ;;  %v8821_v23 = vpack.c.bf16 %v8788_v52, %v8787_v61 }
 0xc15   :  { %v9226_v26 = vmax.f32 %v8687_v39, 0.0  ;;  %v10418_v57 = vpack.c.bf16 %v8687_v39, %v8687_v39  ;;  %v8700_v40 = vmax.f32 %v8698_v11, %v8699_v30  ;;  %13255 = vmatprep.mubr.msk.bf16.mxu0 %vm1171_vm3, %v8821_v23 }
 0xc17   :  { %v9234_v28 = vpack.c.bf16 %v9226_v26, %v9226_v26  ;;  %v10434_v8 = vunpack.c.l.b16 %v10418_v57  ;;  %v8702_v33 = vmax.f32 %v8700_v40, %v8701_v14 }
 0xc18   :  { %13256 = vmatmul.mubr.msk.bf16.gmra.mrb[8].mxu0 %vm1171_vm3, %v8822_v1 }
 0xc19   :  { %v9258_v37 = vunpack.c.l.b16 %v9234_v28  ;;  %v10441_v50 = vsel %vm2735_vm10, %v10434_v8, %v10440_v13  ;;  %v8703_v29 = vrot.slane %v8702_v33, 4  ;;  %13263 = vmatprep.mubr.msk.bf16.mxu0 %vm14400_vm4, %v20354_v3 }
 0xc1b   :  { %v9265_v19 = vsel %vm2735_vm10, %v9258_v37, %v9264_v62  ;;  %v8704_v20 = vmax.f32 %v8702_v33, %v8703_v29 }
 0xc1d   :  { %v8705_v59 = vrot.slane %v8704_v20, 2 }
 0xc1f   :  { %v8706_v6 = vmax.f32 %v8704_v20, %v8705_v59 }
 0xc21   :  { %v8707_v60 = vrot.slane %v8706_v6, 1 }
 0xc23   :  { %v8708_v31 = vmax.f32 %v8706_v6, %v8707_v60 }
 0xc25   :  { %v9227_v61 = vmax.f32 %v8708_v31, 0.0  ;;  %v10419_v52 = vpack.c.bf16 %v8708_v31, %v8708_v31 }
 0xc27   :  { %v9235_v39 = vpack.c.bf16 %v9227_v61, %v9227_v61  ;;  %v10435_v11 = vunpack.c.l.b16 %v10419_v52  ;;  %v14366_v61 = vld [vmem:[%s19908_s5 + $0x40] sm:$0xff]   ;;  %v14367_v52 = vld [vmem:[%s19908_s5 + $0x48] sm:$0xff]  }
 0xc28   :  { %13267 = vmatprep.subr.bf16.mxu0 %v14366_v61 }
 0xc29   :  { %v9259_v30 = vunpack.c.l.b16 %v9235_v39  ;;  %v10442_v13 = vsel %vm2737_vm11, %v10435_v11, %v10441_v50 }
 0xc2a   :  { %v10443_v23 = vpack.c.b16 %v10442_v13, %v10442_v13 }
 0xc2b   :  { %v9266_v1 = vsel %vm2737_vm11, %v9259_v30, %v9265_v19 }
 0xc2c   :  { %v9267_v26 = vpack.c.b16 %v9266_v1, %v9266_v1  ;;  %13408 = vmatmul.mubr.msk.bf16.vlgmr.msra.gmra.mrb[140].mxu1 %vm1171_vm3, %v10443_v23  ;;  %v19258_v23 = vld [vmem:[%s19910_s7 + $0x80] sm:$0xff]  }
 0xc2d   :  { %13415 = vmatprep.mubr.msk.bf16.mxu1 %vm14400_vm4, %v20354_v3 }
 0xc2e   :  { %13264 = vmatmul.mubr.msk.bf16.vlgmr.msra.gmra.mrb[12].mxu0 %vm1171_vm3, %v9267_v26 }
 0xc2f   :  { %13268 = vmatpush3.bf16.msra.mxu0 %v14366_v61 }
 0xc30   :  { %13269 = vmatprep.subr.bf16.mxu0 %v14367_v52 }
 0xc33   :  { %13270 = vmatpush3.bf16.msra.mxu0 %v14367_v52 }
 0xc34   :  { %13335 = vmatprep.subr.bf16.mxu0 %v19258_v23 }
 0xc71   :  { %v19209_v62 = vpop.f32.mrb[204].mxu0 }
 0xc72   :  { %v19211_v57 = vpop.f32.mrb[205].mxu0 }
 0xc73   :  { %v19213_v40 = vpop.f32.mrb[206].mxu0 }
 0xc74   :  { %v19215_v14 = vpop.f32.mrb[207].mxu0 }
 0xc79   :  { %v19217_v28 = vpop.f32.mrb[208].mxu0 }
 0xc7a   :  { %v19219_v8 = vpop.f32.mrb[209].mxu0 }
 0xc7b   :  { %v19221_v33 = vpop.f32.mrb[210].mxu0 }
 0xc7c   :  { %v19223_v37 = vpop.f32.mrb[211].mxu0 }
 0xc81   :  { %v19225_v50 = vpop.f32.mrb[212].mxu0 }
 0xc82   :  { %v19227_v29 = vpop.f32.mrb[213].mxu0 }
 0xc83   :  { %v19229_v19 = vpop.f32.mrb[214].mxu0 }
 0xc84   :  { %v19231_v20 = vpop.f32.mrb[215].mxu0 }
 0xc89   :  { %v19233_v59 = vpop.f32.mrb[216].mxu0 }
 0xc8a   :  { %v19235_v6 = vpop.f32.mrb[217].mxu0 }
 0xc8b   :  { %v19237_v60 = vpop.f32.mrb[218].mxu0 }
 0xc8c   :  { %v19239_v31 = vpop.f32.mrb[219].mxu0 }
 0xc91   :  { %v19247_v39 = vpop.f32.mrb[220].mxu0 }
 0xc92   :  { %v19249_v11 = vpop.f32.mrb[221].mxu0 }
 0xc93   :  { %v19251_v30 = vpop.f32.mrb[222].mxu0 }
 0xc94   :  { %v19253_v13 = vpop.f32.mrb[223].mxu0 }
 0xc99   :  { %v19261_v1 = vpop.f32.mrb[224].mxu0 }
 0xc9a   :  { %v19263_v26 = vpop.f32.mrb[225].mxu0 }
 0xc9b   :  { %v19265_v12 = vpop.f32.mrb[226].mxu0 }
 0xc9c   :  { %v19267_v61 = vpop.f32.mrb[227].mxu0 }
 0xca1   :  { %v19269_v42 = vpop.f32.mrb[228].mxu0 }
 0xca2   :  { %v19271_v3 = vpop.f32.mrb[229].mxu0 }
 0xca3   :  { %v19273_v55 = vpop.f32.mrb[230].mxu0 }
 0xca4   :  { %v19275_v51 = vpop.f32.mrb[231].mxu0 }
 0xca9   :  { %v19277_v53 = vpop.f32.mrb[232].mxu0 }
 0xcaa   :  { %v19279_v52 = vpop.f32.mrb[233].mxu0 }
 0xcab   :  { %v19281_v25 = vpop.f32.mrb[234].mxu0 }
 0xcac   :  { %v19283_v18 = vpop.f32.mrb[235].mxu0 }
 0xcb2   :  { %v19285_v4 = vpop.f32.mrb[236].mxu0 }
 0xcb3   :  { %v19287_v21 = vpop.f32.mrb[237].mxu0 }
 0xcb4   :  { %v19289_v9 = vpop.f32.mrb[238].mxu0 }
 0xcb5   :  { %v19291_v7 = vpop.f32.mrb[239].mxu0 }
 0xcba   :  { %v19293_v63 = vpop.f32.mrb[240].mxu0 }
 0xcbb   :  { %v19295_v45 = vpop.f32.mrb[241].mxu0 }
 0xcbc   :  { %v19297_v2 = vpop.f32.mrb[242].mxu0 }
 0xcbd   :  { %v19299_v49 = vpop.f32.mrb[243].mxu0 }
 0xcc2   :  { %v19301_v46 = vpop.f32.mrb[244].mxu0 }
 0xcc3   :  { %21005 = vst [vmem:[#allocation80_spill] sm:$0xff] %v19301_v46  ;;  %v19303_v15 = vpop.f32.mrb[245].mxu0 }
 0xcc4   :  { %v19305_v58 = vpop.f32.mrb[246].mxu0 }
 0xcc5   :  { %21006 = vst [vmem:[#allocation79_spill] sm:$0xff] %v19305_v58  ;;  %v19307_v34 = vpop.f32.mrb[247].mxu0 }
 0xcc6   :  { %21007 = vst [vmem:[#allocation85_spill] sm:$0xff] %v19307_v34 }
 0xcca   :  { %v19309_v43 = vpop.f32.mrb[248].mxu0 }
 0xccb   :  { %21008 = vst [vmem:[#allocation78_spill] sm:$0xff] %v19309_v43  ;;  %v19311_v35 = vpop.f32.mrb[249].mxu0 }
 0xccc   :  { %21009 = vst [vmem:[#allocation87_spill] sm:$0xff] %v19311_v35  ;;  %v19313_v44 = vpop.f32.mrb[250].mxu0 }
 0xccd   :  { %21010 = vst [vmem:[#allocation83_spill] sm:$0xff] %v19313_v44  ;;  %v19315_v17 = vpop.f32.mrb[251].mxu0 }
 0xcce   :  { %21011 = vst [vmem:[#allocation86_spill] sm:$0xff] %v19315_v17 }
 0xcd3   :  { %v19317_v27 = vpop.f32.mrb[252].mxu0 }
 0xcd4   :  { %21012 = vst [vmem:[#allocation82_spill] sm:$0xff] %v19317_v27  ;;  %v19319_v56 = vpop.f32.mrb[253].mxu0 }
 0xcd5   :  { %21013 = vst [vmem:[#allocation91_spill] sm:$0xff] %v19319_v56  ;;  %v19321_v5 = vpop.f32.mrb[254].mxu0 }
 0xcd6   :  { %21014 = vst [vmem:[#allocation97_spill] sm:$0xff] %v19321_v5  ;;  %v19323_v38 = vpop.f32.mrb[255].mxu0 }
 0xcd7   :  { %21015 = vst [vmem:[#allocation90_spill] sm:$0xff] %v19323_v38 }
 0xcdb   :  { %v19325_v47 = vpop.f32.mrb[0].mxu0 }
 0xcdc   :  { %21016 = vst [vmem:[#allocation84_spill] sm:$0xff] %v19325_v47  ;;  %v19327_v10 = vpop.f32.mrb[1].mxu0 }
 0xcdd   :  { %21017 = vst [vmem:[#allocation6_spill] sm:$0xff] %v19327_v10  ;;  %v19329_v32 = vpop.f32.mrb[2].mxu0 }
 0xcde   :  { %21018 = vst [vmem:[#allocation89_spill] sm:$0xff] %v19329_v32  ;;  %v19331_v48 = vpop.f32.mrb[3].mxu0 }
 0xcdf   :  { %21019 = vst [vmem:[#allocation8_spill] sm:$0xff] %v19331_v48 }
 0xce3   :  { %v19333_v54 = vpop.f32.mrb[4].mxu0 }
 0xce4   :  { %21020 = vst [vmem:[#allocation88_spill] sm:$0xff] %v19333_v54  ;;  %v19335_v36 = vpop.f32.mrb[5].mxu0  ;;  %v11594_v54 = vld [vmem:[%s19907_s4 + $0x4] ss:$0 sm:$0xff] }
 0xce5   :  { %21021 = vst [vmem:[#allocation10_spill] sm:$0xff] %v19335_v36  ;;  %v19337_v22 = vpop.f32.mrb[6].mxu0 }
 0xce6   :  { %21022 = vst [vmem:[#allocation5_spill] sm:$0xff] %v19337_v22  ;;  %v19339_v41 = vpop.f32.mrb[7].mxu0 }
 0xce7   :  { %21023 = vst [vmem:[#allocation12_spill] sm:$0xff] %v19339_v41 }
 0xceb   :  { %v19341_v24 = vpop.f32.mrb[8].mxu0 }
 0xcec   :  { %21024 = vst [vmem:[#allocation7_spill] sm:$0xff] %v19341_v24  ;;  %v19343_v5 = vpop.f32.mrb[9].mxu0 }
 0xced   :  { %21025 = vst [vmem:[#allocation14_spill] sm:$0xff] %v19343_v5  ;;  %v19345_v27 = vpop.f32.mrb[10].mxu0 }
 0xcee   :  { %21026 = vst [vmem:[#allocation9_spill] sm:$0xff] %v19345_v27  ;;  %v19347_v47 = vpop.f32.mrb[11].mxu0 }
 0xcef   :  { %21027 = vst [vmem:[#allocation16_spill] sm:$0xff] %v19347_v47 }
 0xcff   :  { %v19349_v10 = vpop.f32.mrb[140].mxu1 }
 0xd00   :  { %21028 = vst [vmem:[#allocation11_spill] sm:$0xff] %v19349_v10  ;;  %v13409_v32 = vpop.f32.mrb[141].mxu1 }
 0xd01   :  { %v9317_v36 = vpop.f32.mrb[12].mxu0  ;;  %v10496_v48 = vpop.f32.mrb[142].mxu1 }
 0xd02   :  { %v9318_v22 = vadd.f32 %v11594_v54, %v9317_v36  ;;  %v13265_v38 = vpop.f32.mrb[13].mxu0  ;;  %v13410_v41 = vpop.f32.mrb[143].mxu1 }
 0xd03   :  { %v9320_v56 = vpop.f32.mrb[14].mxu0 }
 0xd04   :  { %v13266_v24 = vpop.f32.mrb[15].mxu0  ;;  %v9324_v44 = vcombine.high %v9318_v22, %v9318_v22  ;;  %v9331_v5 = vrot.slane %v9318_v22, %v20938_v0 }
 0xd06   :  { %v9338_v27 = vrot.slane %v9324_v44, %v20938_v0  ;;  %v9339_v47 = vcombine.high %v9331_v5, %v9331_v5  ;;  %v9347_v10 = vrot.slane %v9331_v5, %v20938_v0 }
 0xd08   :  { %v9340_v43 = vcombine.high %v9338_v27, %v9338_v27  ;;  %v9354_v17 = vrot.slane %v9338_v27, %v20938_v0  ;;  %v9361_v32 = vrot.slane %v9339_v47, %v20938_v0  ;;  %v9369_v36 = vcombine.high %v9347_v10, %v9347_v10 }
 0xd09   :  { %v9376_v24 = vrot.slane %v9347_v10, %v20940_v16 }
 0xd0a   :  { %v9368_v48 = vrot.slane %v9340_v43, %v20938_v0  ;;  %v9370_v54 = vcombine.high %v9354_v17, %v9354_v17  ;;  %v9371_v41 = vcombine.high %v9361_v32, %v9361_v32  ;;  %v9380_v56 = vrot.slane %v9361_v32, %v20940_v16 }
 0xd0b   :  { %v19363_v22 = vrot.slane %v9354_v17, %v20940_v16  ;;  %v19366_v44 = vrot.slane %v9369_v36, %v20940_v16  ;;  %v9415_v10 = vadd.f32 %v19209_v62, %v9376_v24  ;;  %v9416_v43 = vadd.f32 %v19213_v40, %v9376_v24 }
 0xd0c   :  { %v9372_v38 = vcombine.high %v9368_v48, %v9368_v48  ;;  %v19369_v5 = vrot.slane %v9371_v41, %v20940_v16  ;;  %v19372_v47 = vrot.slane %v9368_v48, %v20940_v16  ;;  %v19375_v27 = vrot.slane %v9370_v54, %v20940_v16 }
 0xd0d   :  { %v9413_v17 = vadd.f32 %v9376_v24, %v19211_v57  ;;  %v9414_v36 = vadd.f32 %v9376_v24, %v19215_v14  ;;  %v9417_v41 = vadd.f32 %v9376_v24, %v19219_v8  ;;  %v9418_v0 = vadd.f32 %v9376_v24, %v19223_v37 }
 0xd0e   :  { %21029 = vst [vmem:[#allocation18_spill] sm:$0xff] %v19375_v27  ;;  %v19381_v32 = vrot.slane %v9372_v38, %v20940_v16  ;;  %v9479_v48 = vmax.f32 %v9415_v10, 0.0  ;;  %v9480_v35 = vmax.f32 %v9416_v43, 0.0  ;;  %v9419_v54 = vadd.f32 %v19217_v28, %v9376_v24 }
 0xd0f   :  { %v9477_v58 = vmax.f32 %v9413_v17, 0.0  ;;  %v9478_v27 = vmax.f32 %v9414_v36, 0.0  ;;  %v9481_v62 = vmax.f32 %v9417_v41, 0.0  ;;  %v9482_v46 = vmax.f32 %v9418_v0, 0.0  ;;  %v14369_v0 = vld [vmem:[%s19910_s7 + $0x88] sm:$0xff]  }
 0xd10   :  { %21030 = vst [vmem:[#allocation13_spill] sm:$0xff] %v19381_v32  ;;  %v9420_v40 = vadd.f32 %v19221_v33, %v9376_v24  ;;  %v9547_v57 = vpack.c.bf16 %v9480_v35, %v9479_v48  ;;  %v9483_v34 = vmax.f32 %v9419_v54, 0.0  ;;  %v9421_v38 = vadd.f32 %v9380_v56, %v19227_v29 }
 0xd11   :  { %v9422_v14 = vadd.f32 %v9380_v56, %v19231_v20  ;;  %v9546_v16 = vpack.c.bf16 %v9478_v27, %v9477_v58  ;;  %v9548_v8 = vpack.c.bf16 %v9482_v46, %v9481_v62  ;;  %v9423_v37 = vadd.f32 %v19225_v50, %v9380_v56 }
 0xd12   :  { %v9484_v32 = vmax.f32 %v9420_v40, 0.0  ;;  %v9485_v10 = vmax.f32 %v9421_v38, 0.0  ;;  %v9424_v28 = vadd.f32 %v19229_v19, %v9380_v56  ;;  %v9425_v17 = vadd.f32 %v9380_v56, %v19235_v6 }
 0xd13   :  { %v9486_v43 = vmax.f32 %v9422_v14, 0.0  ;;  %13271 = vmatprep.mubr.msk.bf16.mxu0 %vm1171_vm3, %v9546_v16  ;;  %v9487_v33 = vmax.f32 %v9423_v37, 0.0  ;;  %v9426_v58 = vadd.f32 %v9380_v56, %v19239_v31  ;;  %v9427_v46 = vadd.f32 %v19233_v59, %v9380_v56 }
 0xd14   :  { %v9549_v35 = vpack.c.bf16 %v9484_v32, %v9483_v34  ;;  %13272 = vmatmul.mubr.msk.bf16.vlgmr.msra.gmra.mrb[16].mxu0 %vm1171_vm3, %v9547_v57  ;;  %v9488_v29 = vmax.f32 %v9424_v28, 0.0  ;;  %v9489_v20 = vmax.f32 %v9425_v17, 0.0  ;;  %v9428_v19 = vadd.f32 %v19237_v60, %v9380_v56 }
 0xd15   :  { %v9550_v50 = vpack.c.bf16 %v9486_v43, %v9485_v10  ;;  %13336 = vmatpush3.bf16.msra.mxu0 %v19258_v23  ;;  %13275 = vmatprep.mubr.msk.bf16.mxu0 %vm1171_vm3, %v9548_v8  ;;  %v9490_v6 = vmax.f32 %v9426_v58, 0.0  ;;  %v9491_v24 = vmax.f32 %v9427_v46, 0.0  ;;  %v9429_v16 = vadd.f32 %v19366_v44, %v19249_v11 }
 0xd16   :  { %v9430_v34 = vadd.f32 %v19366_v44, %v19253_v13  ;;  %v9551_v59 = vpack.c.bf16 %v9488_v29, %v9487_v33  ;;  %v9492_v31 = vmax.f32 %v9428_v19, 0.0  ;;  %v9431_v27 = vadd.f32 %v19247_v39, %v19366_v44  ;;  %13337 = vmatprep.subr.bf16.mxu0 %v14369_v0 }
 0xd17   :  { %v9432_v60 = vadd.f32 %v19251_v30, %v19366_v44  ;;  %v9552_v23 = vpack.c.bf16 %v9490_v6, %v9489_v20  ;;  %v9493_v56 = vmax.f32 %v9429_v16, 0.0  ;;  %v9433_v36 = vadd.f32 %v19366_v44, %v19263_v26 }
 0xd18   :  { %v9494_v32 = vmax.f32 %v9430_v34, 0.0  ;;  %v19413_v41 = vpack.c.bf16 %v9492_v31, %v9491_v24  ;;  %v9495_v11 = vmax.f32 %v9431_v27, 0.0  ;;  %v9434_v13 = vadd.f32 %v19366_v44, %v19267_v61  ;;  %v21031_v27 = vld [vmem:[#allocation85_spill] sm:$0xff] }
 0xd19   :  { %v9496_v48 = vmax.f32 %v9432_v60, 0.0  ;;  %v9497_v39 = vmax.f32 %v9433_v36, 0.0  ;;  %v9435_v30 = vadd.f32 %v19261_v1, %v19366_v44  ;;  %v9436_v62 = vadd.f32 %v19265_v12, %v19366_v44  ;;  %13338 = vmatpush3.bf16.msra.mxu0 %v14369_v0 }
 0xd1a   :  { %v19417_v54 = vpack.c.bf16 %v9494_v32, %v9493_v56  ;;  %v9498_v26 = vmax.f32 %v9434_v13, 0.0  ;;  %v9437_v57 = vadd.f32 %v19369_v5, %v19271_v3  ;;  %v9438_v38 = vadd.f32 %v19369_v5, %v19275_v51 }
 0xd1b   :  { %v19423_v40 = vpack.c.bf16 %v9496_v48, %v9495_v11  ;;  %v9499_v61 = vmax.f32 %v9435_v30, 0.0  ;;  %v9500_v14 = vmax.f32 %v9436_v62, 0.0  ;;  %v9439_v8 = vadd.f32 %v19269_v42, %v19369_v5  ;;  %v21034_v48 = vld [vmem:[#allocation87_spill] sm:$0xff] }
 0xd1c   :  { %v9440_v1 = vadd.f32 %v19273_v55, %v19369_v5  ;;  %13276 = vmatmul.mubr.msk.bf16.gmra.mrb[20].mxu0 %vm1171_vm3, %v9549_v35  ;;  %v19434_v12 = vpack.c.bf16 %v9498_v26, %v9497_v39  ;;  %v9501_v44 = vmax.f32 %v9437_v57, 0.0  ;;  %v9502_v37 = vmax.f32 %v9438_v38, 0.0  ;;  %v21036_v38 = vld [vmem:[#allocation78_spill] sm:$0xff] }
 0xd1d   :  { %v9441_v3 = vadd.f32 %v19369_v5, %v19279_v52  ;;  %13279 = vmatprep.mubr.msk.bf16.mxu0 %vm1171_vm3, %v9550_v50  ;;  %v19439_v51 = vpack.c.bf16 %v9500_v14, %v9499_v61  ;;  %v9503_v10 = vmax.f32 %v9439_v8, 0.0  ;;  %v9442_v42 = vadd.f32 %v19369_v5, %v19283_v18  ;;  %v21037_v14 = vld [vmem:[#allocation83_spill] sm:$0xff] }
 0xd1e   :  { %v9504_v43 = vmax.f32 %v9440_v1, 0.0  ;;  %v19443_v28 = vpack.c.bf16 %v9502_v37, %v9501_v44  ;;  %v9443_v17 = vadd.f32 %v19277_v53, %v19369_v5  ;;  %v9444_v0 = vadd.f32 %v19281_v25, %v19369_v5  ;;  %v21038_v37 = vld [vmem:[#allocation91_spill] sm:$0xff] }
 0xd1f   :  { %v9505_v55 = vmax.f32 %v9441_v3, 0.0  ;;  %v9506_v52 = vmax.f32 %v9442_v42, 0.0  ;;  %v9445_v33 = vadd.f32 %v19363_v22, %v19287_v21  ;;  %v9446_v58 = vadd.f32 %v19363_v22, %v19291_v7  ;;  %v21039_v3 = vld [vmem:[#allocation18_spill] sm:$0xff] }
 0xd20   :  { %v19449_v35 = vpack.c.bf16 %v9504_v43, %v9503_v10  ;;  %v9507_v46 = vmax.f32 %v9443_v17, 0.0  ;;  %v9508_v18 = vmax.f32 %v9444_v0, 0.0  ;;  %v9447_v50 = vadd.f32 %v19285_v4, %v19363_v22  ;;  %v21040_v43 = vld [vmem:[#allocation90_spill] sm:$0xff] }
 0xd21   :  { %v9448_v53 = vadd.f32 %v19289_v9, %v19363_v22  ;;  %v19459_v29 = vpack.c.bf16 %v9506_v52, %v9505_v55  ;;  %v9509_v25 = vmax.f32 %v9445_v33, 0.0  ;;  %v9510_v5 = vmax.f32 %v9446_v58, 0.0  ;;  %v21041_v0 = vld [vmem:[#allocation82_spill] sm:$0xff]  ;;  %v21042_v33 = vld [vmem:[#allocation97_spill] sm:$0xff] }
 0xd22   :  { %v9449_v20 = vadd.f32 %v19363_v22, %v19295_v45  ;;  %v19463_v19 = vpack.c.bf16 %v9508_v18, %v9507_v46  ;;  %v9511_v21 = vmax.f32 %v9447_v50, 0.0  ;;  %v9450_v7 = vadd.f32 %v19363_v22, %v19299_v49 }
 0xd23   :  { %v9512_v6 = vmax.f32 %v9448_v53, 0.0  ;;  %v19467_v24 = vpack.c.bf16 %v9510_v5, %v9509_v25  ;;  %v9451_v9 = vadd.f32 %v19293_v63, %v19363_v22  ;;  %v9452_v16 = vadd.f32 %v19297_v2, %v19363_v22  ;;  %v21032_v63 = vld [vmem:[#allocation80_spill] sm:$0xff]  ;;  %v21033_v2 = vld [vmem:[#allocation79_spill] sm:$0xff] }
 0xd24   :  { %v9513_v4 = vmax.f32 %v9449_v20, 0.0  ;;  %13280 = vmatmul.mubr.msk.bf16.gmra.mrb[24].mxu0 %vm1171_vm3, %v9551_v59  ;;  %v9514_v45 = vmax.f32 %v9450_v7, 0.0  ;;  %v9453_v31 = vadd.f32 %v19372_v47, %v19303_v15  ;;  %v9454_v49 = vadd.f32 %v19372_v47, %v21031_v27 }
 0xd25   :  { %v19474_v34 = vpack.c.bf16 %v9512_v6, %v9511_v21  ;;  %13283 = vmatprep.mubr.msk.bf16.mxu0 %vm1171_vm3, %v9552_v23  ;;  %v9515_v60 = vmax.f32 %v9451_v9, 0.0  ;;  %v9516_v56 = vmax.f32 %v9452_v16, 0.0  ;;  %v9455_v32 = vadd.f32 %v21032_v63, %v19372_v47  ;;  %v21035_v23 = vld [vmem:[#allocation86_spill] sm:$0xff]  ;;  %v21044_v21 = vld [vmem:[#allocation8_spill] sm:$0xff] }
 0xd26   :  { %v9456_v22 = vadd.f32 %v21033_v2, %v19372_v47  ;;  %v19485_v59 = vpack.c.bf16 %v9514_v45, %v9513_v4  ;;  %v9517_v36 = vmax.f32 %v9453_v31, 0.0  ;;  %v9518_v11 = vmax.f32 %v9454_v49, 0.0  ;;  %v21045_v9 = vld [vmem:[#allocation84_spill] sm:$0xff]  ;;  %v21046_v45 = vld [vmem:[#allocation89_spill] sm:$0xff] }
 0xd27   :  { %v9457_v15 = vadd.f32 %v19372_v47, %v21034_v48  ;;  %v19489_v13 = vpack.c.bf16 %v9516_v56, %v9515_v60  ;;  %v9519_v39 = vmax.f32 %v9455_v32, 0.0  ;;  %v9458_v62 = vadd.f32 %v19372_v47, %v21035_v23  ;;  %v21048_v60 = vld [vmem:[#allocation13_spill] sm:$0xff]  ;;  %v21049_v63 = vld [vmem:[#allocation12_spill] sm:$0xff]  ;;  %v21052_v23 = vld [vmem:[#allocation14_spill] sm:$0xff] }
 0xd28   :  { %v9520_v30 = vmax.f32 %v9456_v22, 0.0  ;;  %v19493_v26 = vpack.c.bf16 %v9518_v11, %v9517_v36  ;;  %v9459_v61 = vadd.f32 %v21036_v38, %v19372_v47  ;;  %v9460_v8 = vadd.f32 %v21037_v14, %v19372_v47  ;;  %v21043_v47 = vld [vmem:[#allocation6_spill] sm:$0xff]  ;;  %v21051_v11 = vld [vmem:[#allocation5_spill] sm:$0xff]  ;;  %v21053_v14 = vld [vmem:[#allocation16_spill] sm:$0xff] }
 0xd29   :  { %v9521_v57 = vmax.f32 %v9457_v15, 0.0  ;;  %v9522_v44 = vmax.f32 %v9458_v62, 0.0  ;;  %v9461_v10 = vadd.f32 %v21039_v3, %v21038_v37  ;;  %v9462_v42 = vadd.f32 %v21039_v3, %v21040_v43  ;;  %v21055_v43 = vld [vmem:[#allocation9_spill] sm:$0xff] }
 0xd2a   :  { %v9567_v1 = vpack.c.bf16 %v9520_v30, %v9519_v39  ;;  %v9523_v55 = vmax.f32 %v9459_v61, 0.0  ;;  %v9524_v17 = vmax.f32 %v9460_v8, 0.0  ;;  %v9463_v52 = vadd.f32 %v21041_v0, %v21039_v3 }
 0xd2b   :  { %v9464_v58 = vadd.f32 %v21042_v33, %v21039_v3  ;;  %v9568_v46 = vpack.c.bf16 %v9522_v44, %v9521_v57  ;;  %v9525_v18 = vmax.f32 %v9461_v10, 0.0  ;;  %v9526_v50 = vmax.f32 %v9462_v42, 0.0 }
 0xd2c   :  { %v9465_v53 = vadd.f32 %v21039_v3, %v21043_v47  ;;  %13284 = vmatmul.mubr.msk.bf16.gmra.mrb[28].mxu0 %vm1171_vm3, %v19413_v41  ;;  %v9569_v25 = vpack.c.bf16 %v9524_v17, %v9523_v55  ;;  %v9527_v5 = vmax.f32 %v9463_v52, 0.0  ;;  %v9466_v6 = vadd.f32 %v21039_v3, %v21044_v21  ;;  %v21047_v41 = vld [vmem:[#allocation10_spill] sm:$0xff]  ;;  %v21072_v47 = vld [vmem:[#allocation28_spill] sm:$0xff] }
 0xd2d   :  { %v9528_v20 = vmax.f32 %v9464_v58, 0.0  ;;  %13287 = vmatprep.mubr.msk.bf16.mxu0 %vm1171_vm3, %v19417_v54  ;;  %v9570_v7 = vpack.c.bf16 %v9526_v50, %v9525_v18  ;;  %v9467_v16 = vadd.f32 %v21045_v9, %v21039_v3  ;;  %v9468_v31 = vadd.f32 %v21046_v45, %v21039_v3  ;;  %v21050_v54 = vld [vmem:[#allocation88_spill] sm:$0xff]  ;;  %v21054_v3 = vld [vmem:[#allocation7_spill] sm:$0xff]  ;;  %v21071_v50 = vld [vmem:[#allocation30_spill] sm:$0xff] }
 0xd2e   :  { %v9529_v4 = vmax.f32 %v9465_v53, 0.0  ;;  %v9530_v49 = vmax.f32 %v9466_v6, 0.0  ;;  %v9469_v56 = vadd.f32 %v21048_v60, %v21047_v41  ;;  %v9470_v32 = vadd.f32 %v21048_v60, %v21049_v63  ;;  %v21077_v21 = vld [vmem:[#allocation34_spill] sm:$0xff]  ;;  %v21078_v6 = vld [vmem:[#allocation23_spill] sm:$0xff]  ;;  %v21081_v9 = vld [vmem:[#allocation36_spill] sm:$0xff] }
 0xd2f   :  { %v9571_v27 = vpack.c.bf16 %v9528_v20, %v9527_v5  ;;  %v9531_v2 = vmax.f32 %v9467_v16, 0.0  ;;  %v9532_v22 = vmax.f32 %v9468_v31, 0.0  ;;  %v9471_v36 = vadd.f32 %v21050_v54, %v21048_v60  ;;  %v21075_v5 = vld [vmem:[#allocation32_spill] sm:$0xff]  ;;  %v21083_v45 = vld [vmem:[#allocation66_spill] sm:$0xff]  ;;  %v21084_v31 = vld [vmem:[#allocation27_spill] sm:$0xff] }
 0xd30   :  { %v9472_v48 = vadd.f32 %v21051_v11, %v21048_v60  ;;  %v9572_v15 = vpack.c.bf16 %v9530_v49, %v9529_v4  ;;  %v9533_v39 = vmax.f32 %v9469_v56, 0.0  ;;  %v9534_v30 = vmax.f32 %v9470_v32, 0.0  ;;  %v21080_v4 = vld [vmem:[#allocation38_spill] sm:$0xff]  ;;  %v21087_v41 = vld [vmem:[#allocation31_spill] sm:$0xff]  ;;  %v21089_v56 = vld [vmem:[#allocation40_spill] sm:$0xff] }
 0xd31   :  { %v9473_v62 = vadd.f32 %v21048_v60, %v21052_v23  ;;  %v9573_v57 = vpack.c.bf16 %v9532_v22, %v9531_v2  ;;  %v9535_v38 = vmax.f32 %v9471_v36, 0.0  ;;  %v9474_v8 = vadd.f32 %v21048_v60, %v21053_v14  ;;  %v21086_v49 = vld [vmem:[#allocation42_spill] sm:$0xff]  ;;  %v21090_v63 = vld [vmem:[#allocation29_spill] sm:$0xff]  ;;  %v21092_v2 = vld [vmem:[#allocation48_spill] sm:$0xff] }
 0xd32   :  { %v9536_v61 = vmax.f32 %v9472_v48, 0.0  ;;  %v9574_v44 = vpack.c.bf16 %v9534_v30, %v9533_v39  ;;  %v9475_v10 = vadd.f32 %v21054_v3, %v21048_v60  ;;  %v9476_v42 = vadd.f32 %v21055_v43, %v21048_v60  ;;  %v21093_v22 = vld [vmem:[#allocation35_spill] sm:$0xff]  ;;  %v21095_v36 = vld [vmem:[#allocation41_spill] sm:$0xff] }
 0xd33   :  { %v9537_v37 = vmax.f32 %v9473_v62, 0.0  ;;  %v9538_v17 = vmax.f32 %v9474_v8, 0.0  ;;  %v21073_v53 = vpack.c.bf16 %v21071_v50, %v21072_v47  ;;  %v21082_v16 = vpack.c.bf16 %v21080_v4, %v21081_v9  ;;  %v21096_v11 = vld [vmem:[#allocation33_spill] sm:$0xff]  ;;  %v21099_v39 = vld [vmem:[#allocation67_spill] sm:$0xff]  ;;  %v21107_v8 = vld [vmem:[#allocation50_spill] sm:$0xff] }
 0xd34   :  { %v9575_v55 = vpack.c.bf16 %v9536_v61, %v9535_v38  ;;  %13288 = vmatmul.mubr.msk.bf16.gmra.mrb[32].mxu0 %vm1171_vm3, %v19423_v40  ;;  %v9539_v0 = vmax.f32 %v9475_v10, 0.0  ;;  %v9540_v52 = vmax.f32 %v9476_v42, 0.0  ;;  %v21056_v40 = vld [vmem:[#allocation15_spill] sm:$0xff]  ;;  %v21088_v60 = vpack.c.bf16 %v21086_v49, %v21087_v41  ;;  %v21101_v23 = vld [vmem:[#allocation45_spill] sm:$0xff]  ;;  %v21113_v42 = vld [vmem:[#allocation54_spill] sm:$0xff] }
 0xd35   :  { %13291 = vmatprep.mubr.msk.bf16.mxu0 %vm1171_vm3, %v19434_v12  ;;  %v9576_v33 = vpack.c.bf16 %v9538_v17, %v9537_v37  ;;  %v21057_v12 = vld [vmem:[#allocation22_spill] sm:$0xff]  ;;  %v21091_v32 = vpack.c.bf16 %v21089_v56, %v21090_v63  ;;  %v21094_v54 = vpack.c.bf16 %v21092_v2, %v21093_v22  ;;  %v21097_v48 = vpack.c.bf16 %v21095_v36, %v21096_v11  ;;  %v21102_v62 = vld [vmem:[#allocation43_spill] sm:$0xff]  ;;  %v21104_v38 = vld [vmem:[#allocation65_spill] sm:$0xff] }
 0xd36   :  { %v9577_v58 = vpack.c.bf16 %v9540_v52, %v9539_v0  ;;  %v21105_v61 = vld [vmem:[#allocation47_spill] sm:$0xff]  ;;  %v21117_v52 = vld [vmem:[#allocation49_spill] sm:$0xff]  ;;  %v21135_v50 = vld [vmem:[#allocation62_spill] sm:$0xff] }
 0xd37   :  { %v21106_v14 = vpack.c.bf16 %v21104_v38, %v21105_v61  ;;  %v21110_v3 = vld [vmem:[#allocation55_spill] sm:$0xff]  ;;  %v21144_v4 = vld [vmem:[#allocation74_spill] sm:$0xff]  ;;  %v21150_v49 = vld [vmem:[#allocation76_spill] sm:$0xff] }
 0xd38   :  { %v21111_v10 = vld [vmem:[#allocation51_spill] sm:$0xff]  ;;  %v19706_v2 = vld [vmem:[%s19909_s6 + $0x4] ss:$0 sm:$0xff] }
 0xd39   :  { %v21112_v43 = vpack.c.bf16 %v21110_v3, %v21111_v10  ;;  %v21116_v0 = vld [vmem:[#allocation59_spill] sm:$0xff] }
 0xd3a   :  { %v21153_v56 = vld [vmem:[#allocation11_spill] sm:$0xff] }
 0xd3c   :  { %13292 = vmatmul.mubr.msk.bf16.gmra.mrb[36].mxu0 %vm1171_vm3, %v19439_v51  ;;  %v21058_v51 = vpack.c.bf16 %v21056_v40, %v21057_v12  ;;  %v21120_v40 = vld [vmem:[#allocation60_spill] sm:$0xff] }
 0xd3d   :  { %13295 = vmatprep.mubr.msk.bf16.mxu0 %vm1171_vm3, %v19443_v28  ;;  %v21059_v28 = vld [vmem:[#allocation17_spill] sm:$0xff] }
 0xd44   :  { %13296 = vmatmul.mubr.msk.bf16.gmra.mrb[40].mxu0 %vm1171_vm3, %v19449_v35  ;;  %v21060_v35 = vld [vmem:[#allocation44_spill] sm:$0xff] }
 0xd45   :  { %13299 = vmatprep.mubr.msk.bf16.mxu0 %vm1171_vm3, %v19459_v29  ;;  %v21061_v29 = vpack.c.bf16 %v21059_v28, %v21060_v35  ;;  %v21123_v28 = vld [vmem:[#allocation53_spill] sm:$0xff] }
 0xd4c   :  { %13300 = vmatmul.mubr.msk.bf16.gmra.mrb[44].mxu0 %vm1171_vm3, %v19463_v19  ;;  %v21062_v19 = vld [vmem:[#allocation19_spill] sm:$0xff] }
 0xd4d   :  { %13303 = vmatprep.mubr.msk.bf16.mxu0 %vm1171_vm3, %v19467_v24  ;;  %v21063_v24 = vld [vmem:[#allocation26_spill] sm:$0xff] }
 0xd54   :  { %13304 = vmatmul.mubr.msk.bf16.gmra.mrb[48].mxu0 %vm1171_vm3, %v19474_v34  ;;  %v21064_v34 = vpack.c.bf16 %v21062_v19, %v21063_v24  ;;  %v21126_v19 = vld [vmem:[#allocation92_spill] sm:$0xff] }
 0xd55   :  { %13307 = vmatprep.mubr.msk.bf16.mxu0 %vm1171_vm3, %v19485_v59  ;;  %v21065_v59 = vld [vmem:[#allocation20_spill] sm:$0xff] }
 0xd5c   :  { %13308 = vmatmul.mubr.msk.bf16.gmra.mrb[52].mxu0 %vm1171_vm3, %v19489_v13  ;;  %v21066_v13 = vld [vmem:[#allocation21_spill] sm:$0xff] }
 0xd5d   :  { %13311 = vmatprep.mubr.msk.bf16.mxu0 %vm1171_vm3, %v19493_v26  ;;  %v21067_v26 = vpack.c.bf16 %v21065_v59, %v21066_v13  ;;  %v21129_v59 = vld [vmem:[#allocation58_spill] sm:$0xff] }
 0xd64   :  { %13312 = vmatmul.mubr.msk.bf16.gmra.mrb[56].mxu0 %vm1171_vm3, %v9567_v1  ;;  %v21068_v1 = vld [vmem:[#allocation24_spill] sm:$0xff] }
 0xd65   :  { %13315 = vmatprep.mubr.msk.bf16.mxu0 %vm1171_vm3, %v9568_v46  ;;  %v21069_v46 = vld [vmem:[#allocation39_spill] sm:$0xff] }
 0xd66   :  { %v21070_v18 = vpack.c.bf16 %v21068_v1, %v21069_v46  ;;  %v21132_v1 = vld [vmem:[#allocation63_spill] sm:$0xff] }
 0xd6c   :  { %13316 = vmatmul.mubr.msk.bf16.gmra.mrb[60].mxu0 %vm1171_vm3, %v9569_v25  ;;  %v21074_v25 = vld [vmem:[#allocation25_spill] sm:$0xff] }
 0xd6d   :  { %13319 = vmatprep.mubr.msk.bf16.mxu0 %vm1171_vm3, %v9570_v7  ;;  %v21076_v20 = vpack.c.bf16 %v21074_v25, %v21075_v5  ;;  %v21079_v7 = vpack.c.bf16 %v21077_v21, %v21078_v6  ;;  %v21138_v25 = vld [vmem:[#allocation70_spill] sm:$0xff]  ;;  %v21141_v21 = vld [vmem:[#allocation69_spill] sm:$0xff] }
 0xd74   :  { %13320 = vmatmul.mubr.msk.bf16.gmra.mrb[64].mxu0 %vm1171_vm3, %v9571_v27  ;;  %v21085_v27 = vpack.c.bf16 %v21083_v45, %v21084_v31  ;;  %v21147_v45 = vld [vmem:[#allocation72_spill] sm:$0xff] }
 0xd75   :  { %13323 = vmatprep.mubr.msk.bf16.mxu0 %vm1171_vm3, %v9572_v15  ;;  %v21098_v15 = vld [vmem:[#allocation52_spill] sm:$0xff] }
 0xd76   :  { %v21100_v30 = vpack.c.bf16 %v21098_v15, %v21099_v39 }
 0xd7c   :  { %13324 = vmatmul.mubr.msk.bf16.gmra.mrb[68].mxu0 %vm1171_vm3, %v9573_v57  ;;  %v21103_v57 = vpack.c.bf16 %v21101_v23, %v21102_v62 }
 0xd7d   :  { %13327 = vmatprep.mubr.msk.bf16.mxu0 %vm1171_vm3, %v9574_v44  ;;  %v21108_v44 = vld [vmem:[#allocation46_spill] sm:$0xff] }
 0xd7e   :  { %v21109_v37 = vpack.c.bf16 %v21107_v8, %v21108_v44 }
 0xd84   :  { %13328 = vmatmul.mubr.msk.bf16.gmra.mrb[72].mxu0 %vm1171_vm3, %v9575_v55  ;;  %v21114_v55 = vld [vmem:[#allocation56_spill] sm:$0xff] }
 0xd85   :  { %13331 = vmatprep.mubr.msk.bf16.mxu0 %vm1171_vm3, %v9576_v33  ;;  %v21115_v17 = vpack.c.bf16 %v21113_v42, %v21114_v55  ;;  %v21118_v33 = vpack.c.bf16 %v21116_v0, %v21117_v52 }
 0xd8c   :  { %13332 = vmatmul.mubr.msk.bf16.gmra.mrb[76].mxu0 %vm1171_vm3, %v9577_v58  ;;  %v21119_v58 = vld [vmem:[#allocation64_spill] sm:$0xff] }
 0xd8d   :  { %13339 = vmatprep.mubr.msk.bf16.mxu0 %vm1171_vm3, %v21058_v51  ;;  %v21121_v12 = vpack.c.bf16 %v21119_v58, %v21120_v40  ;;  %v21122_v51 = vld [vmem:[#allocation57_spill] sm:$0xff] }
 0xd8e   :  { %v21124_v35 = vpack.c.bf16 %v21122_v51, %v21123_v28 }
 0xd94   :  { %13340 = vmatmul.mubr.msk.bf16.vlgmr.msra.gmra.mrb[16].mxu0 %vm1171_vm3, %v21061_v29  ;;  %v21125_v29 = vld [vmem:[#allocation68_spill] sm:$0xff] }
 0xd95   :  { %13343 = vmatprep.mubr.msk.bf16.mxu0 %vm1171_vm3, %v21064_v34  ;;  %v21127_v24 = vpack.c.bf16 %v21125_v29, %v21126_v19  ;;  %v21128_v34 = vld [vmem:[#allocation61_spill] sm:$0xff] }
 0xd96   :  { %v21130_v13 = vpack.c.bf16 %v21128_v34, %v21129_v59 }
 0xd9c   :  { %13344 = vmatmul.mubr.msk.bf16.gmra.mrb[20].mxu0 %vm1171_vm3, %v21067_v26  ;;  %v21131_v26 = vld [vmem:[#allocation71_spill] sm:$0xff] }
 0xd9d   :  { %13347 = vmatprep.mubr.msk.bf16.mxu0 %vm1171_vm3, %v21070_v18  ;;  %v21133_v46 = vpack.c.bf16 %v21131_v26, %v21132_v1  ;;  %v21134_v18 = vld [vmem:[#allocation95_spill] sm:$0xff] }
 0xd9e   :  { %v21136_v47 = vpack.c.bf16 %v21134_v18, %v21135_v50 }
 0xda4   :  { %13348 = vmatmul.mubr.msk.bf16.gmra.mrb[24].mxu0 %vm1171_vm3, %v21073_v53  ;;  %v21137_v53 = vld [vmem:[#allocation75_spill] sm:$0xff] }
 0xda5   :  { %13351 = vmatprep.mubr.msk.bf16.mxu0 %vm1171_vm3, %v21076_v20  ;;  %v21139_v5 = vpack.c.bf16 %v21137_v53, %v21138_v25  ;;  %v21140_v20 = vld [vmem:[#allocation73_spill] sm:$0xff] }
 0xda6   :  { %v21142_v6 = vpack.c.bf16 %v21140_v20, %v21141_v21 }
 0xdac   :  { %13352 = vmatmul.mubr.msk.bf16.gmra.mrb[28].mxu0 %vm1171_vm3, %v21079_v7  ;;  %v21143_v7 = vld [vmem:[#allocation96_spill] sm:$0xff] }
 0xdad   :  { %13355 = vmatprep.mubr.msk.bf16.mxu0 %vm1171_vm3, %v21082_v16  ;;  %v21145_v9 = vpack.c.bf16 %v21143_v7, %v21144_v4  ;;  %v21146_v16 = vld [vmem:[#allocation77_spill] sm:$0xff] }
 0xdae   :  { %v21148_v31 = vpack.c.bf16 %v21146_v16, %v21147_v45 }
 0xdb4   :  { %13356 = vmatmul.mubr.msk.bf16.gmra.mrb[32].mxu0 %vm1171_vm3, %v21085_v27  ;;  %v21149_v27 = vld [vmem:[#allocation81_spill] sm:$0xff] }
 0xdb5   :  { %13359 = vmatprep.mubr.msk.bf16.mxu0 %vm1171_vm3, %v21088_v60  ;;  %v21151_v41 = vpack.c.bf16 %v21149_v27, %v21150_v49  ;;  %v21152_v60 = vld [vmem:[#allocation93_spill] sm:$0xff] }
 0xdb6   :  { %v10507_v63 = vrot.slane %v21153_v56, %v21152_v60 }
 0xdb8   :  { %v10515_v3 = vcombine.high %v10507_v63, %v10507_v63 }
 0xdbc   :  { %13360 = vmatmul.mubr.msk.bf16.gmra.mrb[36].mxu0 %vm1171_vm3, %v21091_v32  ;;  %v19701_v32 = vrot.slane %v10507_v63, %v21152_v60 }
 0xdbd   :  { %13363 = vmatprep.mubr.msk.bf16.mxu0 %vm1171_vm3, %v21094_v54  ;;  %v21154_v54 = vld [vmem:[#allocation94_spill] sm:$0xff] }
 0xdbe   :  { %v10552_v36 = vrot.slane %v19701_v32, %v21154_v54 }
 0xdc4   :  { %13364 = vmatmul.mubr.msk.bf16.gmra.mrb[40].mxu0 %vm1171_vm3, %v21097_v48 }
 0xdc5   :  { %13367 = vmatprep.mubr.msk.bf16.mxu0 %vm1171_vm3, %v21100_v30 }
 0xdcc   :  { %13368 = vmatmul.mubr.msk.bf16.gmra.mrb[44].mxu0 %vm1171_vm3, %v21103_v57 }
 0xdcd   :  { %13371 = vmatprep.mubr.msk.bf16.mxu0 %vm1171_vm3, %v21106_v14 }
 0xdd4   :  { %13372 = vmatmul.mubr.msk.bf16.gmra.mrb[48].mxu0 %vm1171_vm3, %v21109_v37 }
 0xdd5   :  { %13375 = vmatprep.mubr.msk.bf16.mxu0 %vm1171_vm3, %v21112_v43 }
 0xddc   :  { %13376 = vmatmul.mubr.msk.bf16.gmra.mrb[52].mxu0 %vm1171_vm3, %v21115_v17 }
 0xddd   :  { %13379 = vmatprep.mubr.msk.bf16.mxu0 %vm1171_vm3, %v21118_v33 }
 0xde4   :  { %13380 = vmatmul.mubr.msk.bf16.gmra.mrb[56].mxu0 %vm1171_vm3, %v21121_v12 }
 0xde5   :  { %13383 = vmatprep.mubr.msk.bf16.mxu0 %vm1171_vm3, %v21124_v35  ;;  %v19723_v35 = vrot.slane %v10515_v3, %v21152_v60  ;;  %v10545_v3 = vcombine.high %v19701_v32, %v19701_v32 }
 0xde7   :  { %v10556_v1 = vrot.slane %v19723_v35, %v21154_v54 }
 0xdec   :  { %13384 = vmatmul.mubr.msk.bf16.gmra.mrb[60].mxu0 %vm1171_vm3, %v21127_v24 }
 0xded   :  { %13387 = vmatprep.mubr.msk.bf16.mxu0 %vm1171_vm3, %v21130_v13 }
 0xdf4   :  { %13388 = vmatmul.mubr.msk.bf16.gmra.mrb[64].mxu0 %vm1171_vm3, %v21133_v46 }
 0xdf5   :  { %13391 = vmatprep.mubr.msk.bf16.mxu0 %vm1171_vm3, %v21136_v47 }
 0xdfc   :  { %13392 = vmatmul.mubr.msk.bf16.gmra.mrb[68].mxu0 %vm1171_vm3, %v21139_v5 }
 0xdfd   :  { %13395 = vmatprep.mubr.msk.bf16.mxu0 %vm1171_vm3, %v21142_v6 }
 0xe04   :  { %13396 = vmatmul.mubr.msk.bf16.gmra.mrb[72].mxu0 %vm1171_vm3, %v21145_v9 }
 0xe05   :  { %13399 = vmatprep.mubr.msk.bf16.mxu0 %vm1171_vm3, %v21148_v31 }
 0xe0c   :  { %13400 = vmatmul.mubr.msk.bf16.gmra.mrb[76].mxu0 %vm1171_vm3, %v21151_v41 }
 0xe67   :  { %v13341_v22 = vpop.f32.mrb[16].mxu0 }
 0xe68   :  { %v13867_v11 = vadd.f32 %v13341_v22, %v19706_v2  ;;  %v10157_v48 = vpop.f32.mrb[17].mxu0 }
 0xe69   :  { %v13869_v15 = vadd.f32 %v19706_v2, %v10157_v48  ;;  %v13342_v39 = vpop.f32.mrb[18].mxu0 }
 0xe6a   :  { %v13868_v30 = vadd.f32 %v13867_v11, %v10552_v36  ;;  %v13871_v23 = vadd.f32 %v13342_v39, %v19706_v2  ;;  %v10160_v62 = vpop.f32.mrb[19].mxu0 }
 0xe6b   :  { %v13870_v57 = vadd.f32 %v13869_v15, %v10552_v36  ;;  %v13873_v38 = vadd.f32 %v19706_v2, %v10160_v62 }
 0xe6c   :  { %v13872_v61 = vadd.f32 %v13871_v23, %v10552_v36  ;;  %v10720_v55 = vsel %vm1171_vm3, %v13868_v30, -inf  ;;  %v14370_v23 = vld [vmem:[%s19911_s8] sm:$0xff]  }
 0xe6d   :  { %v13874_v14 = vadd.f32 %v13873_v38, %v10552_v36  ;;  %v10717_v8 = vsel %vm1171_vm3, %v13870_v57, -inf  ;;  %13412 = vmatpush3.bf16.msra.mxu1 %v14370_v23 }
 0xe6e   :  { %v10722_v12 = vsel %vm1171_vm3, %v13872_v61, -inf }
 0xe6f   :  { %v10718_v44 = vsel %vm1171_vm3, %v13874_v14, -inf  ;;  %v13345_v37 = vpop.f32.mrb[20].mxu0 }
 0xe70   :  { %v10719_v10 = vmax.f32 %v10717_v8, %v10718_v44  ;;  %v13875_v43 = vadd.f32 %v13345_v37, %v19706_v2  ;;  %v10173_v42 = vpop.f32.mrb[21].mxu0  ;;  %v14371_v37 = vld [vmem:[%s19911_s8 + $0x8] sm:$0xff]  }
 0xe71   :  { %v13877_v17 = vadd.f32 %v19706_v2, %v10173_v42  ;;  %v13346_v0 = vpop.f32.mrb[22].mxu0  ;;  %v21155_v42 = vmov 0.0  }
 0xe72   :  { %v10721_v52 = vmax.f32 %v10719_v10, %v10720_v55  ;;  %v13876_v33 = vadd.f32 %v13875_v43, %v10552_v36  ;;  %v13879_v58 = vadd.f32 %v13346_v0, %v19706_v2  ;;  %v10176_v40 = vpop.f32.mrb[23].mxu0  ;;  %13413 = vmatprep.subr.bf16.mxu1 %v21155_v42 }
 0xe73   :  { %v13878_v51 = vadd.f32 %v13877_v17, %v10552_v36  ;;  %v13881_v28 = vadd.f32 %v19706_v2, %v10176_v40  ;;  %13414 = vmatpush3.bf16.msra.mxu1 %v14371_v37  ;;  %v10560_v40 = vrot.slane %v10545_v3, %v21154_v54 }
 0xe74   :  { %v10723_v29 = vmax.f32 %v10721_v52, %v10722_v12  ;;  %v13880_v19 = vadd.f32 %v13879_v58, %v10552_v36  ;;  %v10728_v47 = vsel %vm1171_vm3, %v13876_v33, -inf }
 0xe75   :  { %v10724_v24 = vsel %vm1171_vm3, %v13878_v51, -inf  ;;  %v13882_v34 = vadd.f32 %v13881_v28, %v10552_v36 }
 0xe76   :  { %v10725_v59 = vmax.f32 %v10723_v29, %v10724_v24  ;;  %v10730_v7 = vsel %vm1171_vm3, %v13880_v19, -inf }
 0xe77   :  { %v10726_v13 = vsel %vm1171_vm3, %v13882_v34, -inf  ;;  %v13349_v26 = vpop.f32.mrb[24].mxu0 }
 0xe78   :  { %v10727_v46 = vmax.f32 %v10725_v59, %v10726_v13  ;;  %v13883_v18 = vadd.f32 %v13349_v26, %v19706_v2  ;;  %v10189_v50 = vpop.f32.mrb[25].mxu0 }
 0xe79   :  { %v13885_v53 = vadd.f32 %v19706_v2, %v10189_v50  ;;  %v13350_v25 = vpop.f32.mrb[26].mxu0 }
 0xe7a   :  { %v10729_v5 = vmax.f32 %v10727_v46, %v10728_v47  ;;  %v13884_v20 = vadd.f32 %v13883_v18, %v10556_v1  ;;  %v13887_v21 = vadd.f32 %v13350_v25, %v19706_v2  ;;  %v10192_v6 = vpop.f32.mrb[27].mxu0 }
 0xe7b   :  { %v13886_v4 = vadd.f32 %v13885_v53, %v10556_v1  ;;  %v13889_v9 = vadd.f32 %v19706_v2, %v10192_v6 }
 0xe7c   :  { %v10731_v16 = vmax.f32 %v10729_v5, %v10730_v7  ;;  %v13888_v45 = vadd.f32 %v13887_v21, %v10556_v1  ;;  %v10741_v15 = vsel %vm1171_vm3, %v13884_v20, -inf }
 0xe7d   :  { %v13890_v31 = vadd.f32 %v13889_v9, %v10556_v1  ;;  %v10738_v49 = vsel %vm1171_vm3, %v13886_v4, -inf }
 0xe7e   :  { %v10732_v27 = vrot.slane %v10731_v16, 4  ;;  %v10743_v14 = vsel %vm1171_vm3, %v13888_v45, -inf }
 0xe7f   :  { %v10739_v41 = vsel %vm1171_vm3, %v13890_v31, -inf  ;;  %v13353_v63 = vpop.f32.mrb[28].mxu0 }
 0xe80   :  { %v10740_v22 = vmax.f32 %v10738_v49, %v10739_v41  ;;  %v13891_v36 = vadd.f32 %v13353_v63, %v19706_v2  ;;  %v10205_v11 = vpop.f32.mrb[29].mxu0  ;;  %v10733_v48 = vmax.f32 %v10731_v16, %v10732_v27 }
 0xe81   :  { %v13893_v39 = vadd.f32 %v19706_v2, %v10205_v11  ;;  %v13354_v30 = vpop.f32.mrb[30].mxu0 }
 0xe82   :  { %v10742_v62 = vmax.f32 %v10740_v22, %v10741_v15  ;;  %v13892_v57 = vadd.f32 %v13891_v36, %v10556_v1  ;;  %v13895_v38 = vadd.f32 %v13354_v30, %v19706_v2  ;;  %v10208_v61 = vpop.f32.mrb[31].mxu0  ;;  %v10734_v55 = vrot.slane %v10733_v48, 2 }
 0xe83   :  { %v13894_v8 = vadd.f32 %v13893_v39, %v10556_v1  ;;  %v13897_v44 = vadd.f32 %v19706_v2, %v10208_v61  ;;  %v10547_v30 = vcombine.high %v19723_v35, %v19723_v35 }
 0xe84   :  { %v10744_v10 = vmax.f32 %v10742_v62, %v10743_v14  ;;  %v13896_v43 = vadd.f32 %v13895_v38, %v10556_v1  ;;  %v10735_v32 = vmax.f32 %v10733_v48, %v10734_v55  ;;  %v10749_v29 = vsel %vm1171_vm3, %v13892_v57, -inf }
 0xe85   :  { %v10745_v17 = vsel %vm1171_vm3, %v13894_v8, -inf  ;;  %v13898_v0 = vadd.f32 %v13897_v44, %v10556_v1 }
 0xe86   :  { %v10746_v52 = vmax.f32 %v10744_v10, %v10745_v17  ;;  %v10751_v1 = vsel %vm1171_vm3, %v13896_v43, -inf  ;;  %v10736_v53 = vrot.slane %v10735_v32, 1  ;;  %v10564_v10 = vrot.slane %v10547_v30, %v21154_v54 }
 0xe87   :  { %v10747_v33 = vsel %vm1171_vm3, %v13898_v0, -inf  ;;  %v13357_v58 = vpop.f32.mrb[32].mxu0 }
 0xe88   :  { %v10748_v12 = vmax.f32 %v10746_v52, %v10747_v33  ;;  %v13899_v51 = vadd.f32 %v13357_v58, %v19706_v2  ;;  %v10221_v28 = vpop.f32.mrb[33].mxu0  ;;  %v10737_v45 = vmax.f32 %v10735_v32, %v10736_v53  ;;  %v10500_v32 = vcombine.high %v21153_v56, %v21153_v56 }
 0xe89   :  { %v13901_v19 = vadd.f32 %v19706_v2, %v10221_v28  ;;  %v13358_v24 = vpop.f32.mrb[34].mxu0 }
 0xe8a   :  { %v10750_v34 = vmax.f32 %v10748_v12, %v10749_v29  ;;  %v13900_v59 = vadd.f32 %v13899_v51, %v10560_v40  ;;  %v13903_v13 = vadd.f32 %v13358_v24, %v19706_v2  ;;  %v10224_v26 = vpop.f32.mrb[35].mxu0  ;;  %v10885_v38 = vmax.f32 %v10737_v45, 0.0 }
 0xe8b   :  { %v13902_v46 = vadd.f32 %v13901_v19, %v10560_v40  ;;  %v13905_v18 = vadd.f32 %v19706_v2, %v10224_v26 }
 0xe8c   :  { %v10752_v50 = vmax.f32 %v10750_v34, %v10751_v1  ;;  %v13904_v47 = vadd.f32 %v13903_v13, %v10560_v40  ;;  %v10762_v31 = vsel %vm1171_vm3, %v13900_v59, -inf  ;;  %v10897_v35 = vpack.c.bf16 %v10885_v38, %v10885_v38 }
 0xe8d   :  { %v13906_v25 = vadd.f32 %v13905_v18, %v10560_v40  ;;  %v10759_v20 = vsel %vm1171_vm3, %v13902_v46, -inf }
 0xe8e   :  { %v10753_v5 = vrot.slane %v10752_v50, 4  ;;  %v10764_v48 = vsel %vm1171_vm3, %v13904_v47, -inf  ;;  %v10920_v1 = vunpack.c.l.b16 %v10897_v35 }
 0xe8f   :  { %v10760_v21 = vsel %vm1171_vm3, %v13906_v25, -inf  ;;  %v13361_v6 = vpop.f32.mrb[36].mxu0 }
 0xe90   :  { %v10754_v7 = vmax.f32 %v10752_v50, %v10753_v5  ;;  %v10761_v4 = vmax.f32 %v10759_v20, %v10760_v21  ;;  %v13907_v9 = vadd.f32 %v13361_v6, %v19706_v2  ;;  %v10237_v16 = vpop.f32.mrb[37].mxu0  ;;  %v19783_v50 = vrot.slane %v10500_v32, %v21152_v60 }
 0xe91   :  { %v13909_v27 = vadd.f32 %v19706_v2, %v10237_v16  ;;  %v13362_v49 = vpop.f32.mrb[38].mxu0 }
 0xe92   :  { %v10755_v41 = vrot.slane %v10754_v7, 2  ;;  %v10763_v63 = vmax.f32 %v10761_v4, %v10762_v31  ;;  %v13908_v22 = vadd.f32 %v13907_v9, %v10560_v40  ;;  %v13911_v36 = vadd.f32 %v13362_v49, %v19706_v2  ;;  %v10240_v11 = vpop.f32.mrb[39].mxu0 }
 0xe93   :  { %v13910_v15 = vadd.f32 %v13909_v27, %v10560_v40  ;;  %v13913_v39 = vadd.f32 %v19706_v2, %v10240_v11 }
 0xe94   :  { %v10756_v23 = vmax.f32 %v10754_v7, %v10755_v41  ;;  %v10765_v62 = vmax.f32 %v10763_v63, %v10764_v48  ;;  %v13912_v57 = vadd.f32 %v13911_v36, %v10560_v40  ;;  %v10770_v0 = vsel %vm1171_vm3, %v13908_v22, -inf }
 0xe95   :  { %v10766_v61 = vsel %vm1171_vm3, %v13910_v15, -inf  ;;  %v13914_v14 = vadd.f32 %v13913_v39, %v10560_v40  ;;  %v19796_v36 = vrot.slane %v19783_v50, %v21152_v60 }
 0xe96   :  { %v10757_v8 = vrot.slane %v10756_v23, 1  ;;  %v10767_v44 = vmax.f32 %v10765_v62, %v10766_v61  ;;  %v10772_v29 = vsel %vm1171_vm3, %v13912_v57, -inf }
 0xe97   :  { %v10768_v37 = vsel %vm1171_vm3, %v13914_v14, -inf  ;;  %v13365_v3 = vpop.f32.mrb[40].mxu0  ;;  %v10568_v61 = vrot.slane %v19796_v36, %v21154_v54 }
 0xe98   :  { %v10758_v43 = vmax.f32 %v10756_v23, %v10757_v8  ;;  %v10769_v42 = vmax.f32 %v10767_v44, %v10768_v37  ;;  %v13915_v55 = vadd.f32 %v13365_v3, %v19706_v2  ;;  %v10253_v17 = vpop.f32.mrb[41].mxu0 }
 0xe99   :  { %v13917_v52 = vadd.f32 %v19706_v2, %v10253_v17  ;;  %v13366_v33 = vpop.f32.mrb[42].mxu0 }
 0xe9a   :  { %v10886_v58 = vmax.f32 %v10758_v43, 0.0  ;;  %v10771_v40 = vmax.f32 %v10769_v42, %v10770_v0  ;;  %v13916_v12 = vadd.f32 %v13915_v55, %v10564_v10  ;;  %v13919_v51 = vadd.f32 %v13366_v33, %v19706_v2  ;;  %v10256_v28 = vpop.f32.mrb[43].mxu0 }
 0xe9b   :  { %v13918_v19 = vadd.f32 %v13917_v52, %v10564_v10  ;;  %v13921_v24 = vadd.f32 %v19706_v2, %v10256_v28 }
 0xe9c   :  { %v10898_v34 = vpack.c.bf16 %v10886_v58, %v10886_v58  ;;  %v10773_v59 = vmax.f32 %v10771_v40, %v10772_v29  ;;  %v13920_v13 = vadd.f32 %v13919_v51, %v10564_v10  ;;  %v10783_v7 = vsel %vm1171_vm3, %v13916_v12, -inf }
 0xe9d   :  { %v13922_v26 = vadd.f32 %v13921_v24, %v10564_v10  ;;  %v10780_v47 = vsel %vm1171_vm3, %v13918_v19, -inf  ;;  %v10516_v19 = vcombine.high %v19783_v50, %v19783_v50 }
 0xe9e   :  { %v10921_v46 = vunpack.c.l.b16 %v10898_v34  ;;  %v10774_v18 = vrot.slane %v10773_v59, 4  ;;  %v10785_v41 = vsel %vm1171_vm3, %v13920_v13, -inf }
 0xe9f   :  { %v10781_v53 = vsel %vm1171_vm3, %v13922_v26, -inf  ;;  %v13369_v56 = vpop.f32.mrb[44].mxu0 }
 0xea0   :  { %v10928_v25 = vsel %vm2725_vm5, %v10921_v46, %v10920_v1  ;;  %v10775_v5 = vmax.f32 %v10773_v59, %v10774_v18  ;;  %v10782_v20 = vmax.f32 %v10780_v47, %v10781_v53  ;;  %v13923_v21 = vadd.f32 %v13369_v56, %v19706_v2  ;;  %v10269_v6 = vpop.f32.mrb[45].mxu0 }
 0xea1   :  { %v13925_v4 = vadd.f32 %v19706_v2, %v10269_v6  ;;  %v13370_v9 = vpop.f32.mrb[46].mxu0 }
 0xea2   :  { %v10776_v16 = vrot.slane %v10775_v5, 2  ;;  %v10784_v45 = vmax.f32 %v10782_v20, %v10783_v7  ;;  %v13924_v31 = vadd.f32 %v13923_v21, %v10564_v10  ;;  %v13927_v27 = vadd.f32 %v13370_v9, %v19706_v2  ;;  %v10272_v49 = vpop.f32.mrb[47].mxu0 }
 0xea3   :  { %v13926_v63 = vadd.f32 %v13925_v4, %v10564_v10  ;;  %v13929_v22 = vadd.f32 %v19706_v2, %v10272_v49  ;;  %v19820_v9 = vrot.slane %v10516_v19, %v21152_v60 }
 0xea4   :  { %v10777_v11 = vmax.f32 %v10775_v5, %v10776_v16  ;;  %v10786_v48 = vmax.f32 %v10784_v45, %v10785_v41  ;;  %v13928_v15 = vadd.f32 %v13927_v27, %v10564_v10  ;;  %v10791_v3 = vsel %vm1171_vm3, %v13924_v31, -inf }
 0xea5   :  { %v10787_v39 = vsel %vm1171_vm3, %v13926_v63, -inf  ;;  %v13930_v30 = vadd.f32 %v13929_v22, %v10564_v10 }
 0xea6   :  { %v10778_v23 = vrot.slane %v10777_v11, 1  ;;  %v10788_v62 = vmax.f32 %v10786_v48, %v10787_v39  ;;  %v10793_v52 = vsel %vm1171_vm3, %v13928_v15, -inf  ;;  %v10572_v48 = vrot.slane %v19820_v9, %v21154_v54 }
 0xea7   :  { %v10789_v57 = vsel %vm1171_vm3, %v13930_v30, -inf  ;;  %v13373_v38 = vpop.f32.mrb[48].mxu0 }
 0xea8   :  { %v10779_v14 = vmax.f32 %v10777_v11, %v10778_v23  ;;  %v10790_v8 = vmax.f32 %v10788_v62, %v10789_v57  ;;  %v13931_v44 = vadd.f32 %v13373_v38, %v19706_v2  ;;  %v10285_v37 = vpop.f32.mrb[49].mxu0 }
 0xea9   :  { %v13933_v43 = vadd.f32 %v19706_v2, %v10285_v37  ;;  %v13374_v42 = vpop.f32.mrb[50].mxu0 }
 0xeaa   :  { %v10887_v55 = vmax.f32 %v10779_v14, 0.0  ;;  %v10792_v10 = vmax.f32 %v10790_v8, %v10791_v3  ;;  %v13932_v17 = vadd.f32 %v13931_v44, %v10568_v61  ;;  %v13935_v35 = vadd.f32 %v13374_v42, %v19706_v2  ;;  %v10288_v0 = vpop.f32.mrb[51].mxu0 }
 0xeab   :  { %v13934_v33 = vadd.f32 %v13933_v43, %v10568_v61  ;;  %v13937_v58 = vadd.f32 %v19706_v2, %v10288_v0 }
 0xeac   :  { %v10899_v40 = vpack.c.bf16 %v10887_v55, %v10887_v55  ;;  %v10794_v12 = vmax.f32 %v10792_v10, %v10793_v52  ;;  %v13936_v51 = vadd.f32 %v13935_v35, %v10568_v61  ;;  %v10804_v47 = vsel %vm1171_vm3, %v13932_v17, -inf }
 0xead   :  { %v13938_v28 = vadd.f32 %v13937_v58, %v10568_v61  ;;  %v10801_v24 = vsel %vm1171_vm3, %v13934_v33, -inf }
 0xeae   :  { %v10922_v32 = vunpack.c.l.b16 %v10899_v40  ;;  %v10795_v29 = vrot.slane %v10794_v12, 4  ;;  %v10806_v7 = vsel %vm1171_vm3, %v13936_v51, -inf }
 0xeaf   :  { %v10802_v34 = vsel %vm1171_vm3, %v13938_v28, -inf  ;;  %v13377_v59 = vpop.f32.mrb[52].mxu0 }
 0xeb0   :  { %v10929_v13 = vsel %vm2727_vm6, %v10922_v32, %v10928_v25  ;;  %v10796_v26 = vmax.f32 %v10794_v12, %v10795_v29  ;;  %v10803_v1 = vmax.f32 %v10801_v24, %v10802_v34  ;;  %v13939_v46 = vadd.f32 %v13377_v59, %v19706_v2  ;;  %v10301_v18 = vpop.f32.mrb[53].mxu0 }
 0xeb1   :  { %v13941_v53 = vadd.f32 %v19706_v2, %v10301_v18  ;;  %v13378_v56 = vpop.f32.mrb[54].mxu0 }
 0xeb2   :  { %v10797_v5 = vrot.slane %v10796_v26, 2  ;;  %v10805_v20 = vmax.f32 %v10803_v1, %v10804_v47  ;;  %v13940_v50 = vadd.f32 %v13939_v46, %v10568_v61  ;;  %v13943_v21 = vadd.f32 %v13378_v56, %v19706_v2  ;;  %v10304_v6 = vpop.f32.mrb[55].mxu0 }
 0xeb3   :  { %v13942_v4 = vadd.f32 %v13941_v53, %v10568_v61  ;;  %v13945_v25 = vadd.f32 %v19706_v2, %v10304_v6  ;;  %v10546_v53 = vcombine.high %v19796_v36, %v19796_v36 }
 0xeb4   :  { %v10798_v16 = vmax.f32 %v10796_v26, %v10797_v5  ;;  %v10807_v45 = vmax.f32 %v10805_v20, %v10806_v7  ;;  %v13944_v31 = vadd.f32 %v13943_v21, %v10568_v61  ;;  %v10812_v23 = vsel %vm1171_vm3, %v13940_v50, -inf }
 0xeb5   :  { %v10808_v27 = vsel %vm1171_vm3, %v13942_v4, -inf  ;;  %v13946_v49 = vadd.f32 %v13945_v25, %v10568_v61 }
 0xeb6   :  { %v10799_v41 = vrot.slane %v10798_v16, 1  ;;  %v10809_v63 = vmax.f32 %v10807_v45, %v10808_v27  ;;  %v10814_v37 = vsel %vm1171_vm3, %v13944_v31, -inf }
 0xeb7   :  { %v10810_v22 = vsel %vm1171_vm3, %v13946_v49, -inf  ;;  %v13381_v11 = vpop.f32.mrb[56].mxu0 }
 0xeb8   :  { %v10800_v15 = vmax.f32 %v10798_v16, %v10799_v41  ;;  %v10811_v39 = vmax.f32 %v10809_v63, %v10810_v22  ;;  %v13947_v30 = vadd.f32 %v13381_v11, %v19706_v2  ;;  %v10317_v60 = vpop.f32.mrb[57].mxu0  ;;  %v10576_v16 = vrot.slane %v10546_v53, %v21154_v54 }
 0xeb9   :  { %v13949_v62 = vadd.f32 %v19706_v2, %v10317_v60  ;;  %v13382_v57 = vpop.f32.mrb[58].mxu0 }
 0xeba   :  { %v10888_v38 = vmax.f32 %v10800_v15, 0.0  ;;  %v10813_v61 = vmax.f32 %v10811_v39, %v10812_v23  ;;  %v13948_v14 = vadd.f32 %v13947_v30, %v10572_v48  ;;  %v13951_v8 = vadd.f32 %v13382_v57, %v19706_v2  ;;  %v10320_v44 = vpop.f32.mrb[59].mxu0 }
 0xebb   :  { %v13950_v3 = vadd.f32 %v13949_v62, %v10572_v48  ;;  %v13953_v43 = vadd.f32 %v19706_v2, %v10320_v44 }
 0xebc   :  { %v10900_v42 = vpack.c.bf16 %v10888_v38, %v10888_v38  ;;  %v10815_v55 = vmax.f32 %v10813_v61, %v10814_v37  ;;  %v13952_v10 = vadd.f32 %v13951_v8, %v10572_v48  ;;  %v10825_v29 = vsel %vm1171_vm3, %v13948_v14, -inf }
 0xebd   :  { %v13954_v17 = vadd.f32 %v13953_v43, %v10572_v48  ;;  %v10822_v52 = vsel %vm1171_vm3, %v13950_v3, -inf }
 0xebe   :  { %v10923_v35 = vunpack.c.l.b16 %v10900_v42  ;;  %v10816_v0 = vrot.slane %v10815_v55, 4  ;;  %v10827_v18 = vsel %vm1171_vm3, %v13952_v10, -inf }
 0xebf   :  { %v10823_v33 = vsel %vm1171_vm3, %v13954_v17, -inf  ;;  %v13385_v58 = vpop.f32.mrb[60].mxu0 }
 0xec0   :  { %v10930_v40 = vsel %vm2729_vm7, %v10923_v35, %v10929_v13  ;;  %v10817_v12 = vmax.f32 %v10815_v55, %v10816_v0  ;;  %v10824_v51 = vmax.f32 %v10822_v52, %v10823_v33  ;;  %v13955_v28 = vadd.f32 %v13385_v58, %v19706_v2  ;;  %v10333_v32 = vpop.f32.mrb[61].mxu0 }
 0xec1   :  { %v13957_v19 = vadd.f32 %v19706_v2, %v10333_v32  ;;  %v13386_v24 = vpop.f32.mrb[62].mxu0 }
 0xec2   :  { %v10818_v34 = vrot.slane %v10817_v12, 2  ;;  %v10826_v59 = vmax.f32 %v10824_v51, %v10825_v29  ;;  %v13956_v26 = vadd.f32 %v13955_v28, %v10572_v48  ;;  %v13959_v1 = vadd.f32 %v13386_v24, %v19706_v2  ;;  %v10336_v46 = vpop.f32.mrb[63].mxu0 }
 0xec3   :  { %v13958_v47 = vadd.f32 %v13957_v19, %v10572_v48  ;;  %v13961_v13 = vadd.f32 %v19706_v2, %v10336_v46  ;;  %v10548_v19 = vcombine.high %v19820_v9, %v19820_v9 }
 0xec4   :  { %v10819_v56 = vmax.f32 %v10817_v12, %v10818_v34  ;;  %v10828_v5 = vmax.f32 %v10826_v59, %v10827_v18  ;;  %v13960_v20 = vadd.f32 %v13959_v1, %v10572_v48  ;;  %v10833_v36 = vsel %vm1171_vm3, %v13956_v26, -inf }
 0xec5   :  { %v10829_v50 = vsel %vm1171_vm3, %v13958_v47, -inf  ;;  %v13962_v21 = vadd.f32 %v13961_v13, %v10572_v48  ;;  %v10580_v53 = vrot.slane %v10548_v19, %v21154_v54 }
 0xec6   :  { %v10820_v6 = vrot.slane %v10819_v56, 1  ;;  %v10830_v7 = vmax.f32 %v10828_v5, %v10829_v50  ;;  %v10835_v30 = vsel %vm1171_vm3, %v13960_v20, -inf }
 0xec7   :  { %v10831_v4 = vsel %vm1171_vm3, %v13962_v21, -inf  ;;  %v13389_v25 = vpop.f32.mrb[64].mxu0 }
 0xec8   :  { %v10821_v45 = vmax.f32 %v10819_v56, %v10820_v6  ;;  %v10832_v31 = vmax.f32 %v10830_v7, %v10831_v4  ;;  %v13963_v27 = vadd.f32 %v13389_v25, %v19706_v2  ;;  %v10349_v49 = vpop.f32.mrb[65].mxu0 }
 0xec9   :  { %v13965_v41 = vadd.f32 %v19706_v2, %v10349_v49  ;;  %v13390_v63 = vpop.f32.mrb[66].mxu0 }
 0xeca   :  { %v10889_v22 = vmax.f32 %v10821_v45, 0.0  ;;  %v10834_v11 = vmax.f32 %v10832_v31, %v10833_v36  ;;  %v13964_v48 = vadd.f32 %v13963_v27, %v10576_v16  ;;  %v13967_v15 = vadd.f32 %v13390_v63, %v19706_v2  ;;  %v10352_v39 = vpop.f32.mrb[67].mxu0 }
 0xecb   :  { %v13966_v60 = vadd.f32 %v13965_v41, %v10576_v16  ;;  %v13969_v23 = vadd.f32 %v19706_v2, %v10352_v39 }
 0xecc   :  { %v10901_v62 = vpack.c.bf16 %v10889_v22, %v10889_v22  ;;  %v10836_v57 = vmax.f32 %v10834_v11, %v10835_v30  ;;  %v13968_v38 = vadd.f32 %v13967_v15, %v10576_v16  ;;  %v10846_v35 = vsel %vm1171_vm3, %v13964_v48, -inf }
 0xecd   :  { %v13970_v61 = vadd.f32 %v13969_v23, %v10576_v16  ;;  %v10843_v44 = vsel %vm1171_vm3, %v13966_v60, -inf }
 0xece   :  { %v10924_v14 = vunpack.c.l.b16 %v10901_v62  ;;  %v10837_v8 = vrot.slane %v10836_v57, 4  ;;  %v10848_v32 = vsel %vm1171_vm3, %v13968_v38, -inf }
 0xecf   :  { %v10844_v37 = vsel %vm1171_vm3, %v13970_v61, -inf  ;;  %v13393_v3 = vpop.f32.mrb[68].mxu0 }
 0xed0   :  { %v10931_v43 = vsel %vm2731_vm8, %v10924_v14, %v10930_v40  ;;  %v10838_v42 = vmax.f32 %v10836_v57, %v10837_v8  ;;  %v10845_v55 = vmax.f32 %v10843_v44, %v10844_v37  ;;  %v13971_v10 = vadd.f32 %v13393_v3, %v19706_v2  ;;  %v10365_v17 = vpop.f32.mrb[69].mxu0 }
 0xed1   :  { %v13973_v0 = vadd.f32 %v19706_v2, %v10365_v17  ;;  %v13394_v52 = vpop.f32.mrb[70].mxu0 }
 0xed2   :  { %v10839_v33 = vrot.slane %v10838_v42, 2  ;;  %v10847_v58 = vmax.f32 %v10845_v55, %v10846_v35  ;;  %v13972_v12 = vadd.f32 %v13971_v10, %v10576_v16  ;;  %v13975_v51 = vadd.f32 %v13394_v52, %v19706_v2  ;;  %v10368_v28 = vpop.f32.mrb[71].mxu0 }
 0xed3   :  { %v13974_v29 = vadd.f32 %v13973_v0, %v10576_v16  ;;  %v13977_v40 = vadd.f32 %v19706_v2, %v10368_v28 }
 0xed4   :  { %v10840_v24 = vmax.f32 %v10838_v42, %v10839_v33  ;;  %v10849_v34 = vmax.f32 %v10847_v58, %v10848_v32  ;;  %v13976_v59 = vadd.f32 %v13975_v51, %v10576_v16  ;;  %v10854_v9 = vsel %vm1171_vm3, %v13972_v12, -inf }
 0xed5   :  { %v10850_v26 = vsel %vm1171_vm3, %v13974_v29, -inf  ;;  %v13978_v1 = vadd.f32 %v13977_v40, %v10576_v16 }
 0xed6   :  { %v10841_v46 = vrot.slane %v10840_v24, 1  ;;  %v10851_v18 = vmax.f32 %v10849_v34, %v10850_v26  ;;  %v10856_v31 = vsel %vm1171_vm3, %v13976_v59, -inf }
 0xed7   :  { %v10852_v47 = vsel %vm1171_vm3, %v13978_v1, -inf  ;;  %v13397_v13 = vpop.f32.mrb[72].mxu0 }
 0xed8   :  { %v10842_v56 = vmax.f32 %v10840_v24, %v10841_v46  ;;  %v10853_v5 = vmax.f32 %v10851_v18, %v10852_v47  ;;  %v13979_v20 = vadd.f32 %v13397_v13, %v19706_v2  ;;  %v10381_v50 = vpop.f32.mrb[73].mxu0 }
 0xed9   :  { %v13981_v21 = vadd.f32 %v19706_v2, %v10381_v50  ;;  %v13398_v6 = vpop.f32.mrb[74].mxu0 }
 0xeda   :  { %v10890_v7 = vmax.f32 %v10842_v56, 0.0  ;;  %v10855_v4 = vmax.f32 %v10853_v5, %v10854_v9  ;;  %v13980_v25 = vadd.f32 %v13979_v20, %v10580_v53  ;;  %v13983_v16 = vadd.f32 %v13398_v6, %v19706_v2  ;;  %v10384_v45 = vpop.f32.mrb[75].mxu0 }
 0xedb   :  { %v13982_v27 = vadd.f32 %v13981_v21, %v10580_v53  ;;  %v13985_v54 = vadd.f32 %v19706_v2, %v10384_v45  ;;  %v11675_v21 = vld [vmem:[%s19912_s9] ss:$0 sm:$0xff] }
 0xedc   :  { %v10902_v49 = vpack.c.bf16 %v10890_v7, %v10890_v7  ;;  %v10857_v36 = vmax.f32 %v10855_v4, %v10856_v31  ;;  %v13984_v41 = vadd.f32 %v13983_v16, %v10580_v53  ;;  %v10867_v38 = vsel %vm1171_vm3, %v13980_v25, -inf }
 0xedd   :  { %v13986_v63 = vadd.f32 %v13985_v54, %v10580_v53  ;;  %v10864_v48 = vsel %vm1171_vm3, %v13982_v27, -inf }
 0xede   :  { %v10925_v22 = vunpack.c.l.b16 %v10902_v49  ;;  %v10858_v11 = vrot.slane %v10857_v36, 4  ;;  %v10869_v55 = vsel %vm1171_vm3, %v13984_v41, -inf }
 0xedf   :  { %v10865_v15 = vsel %vm1171_vm3, %v13986_v63, -inf  ;;  %v13401_v39 = vpop.f32.mrb[76].mxu0 }
 0xee0   :  { %v10932_v30 = vsel %vm2733_vm9, %v10925_v22, %v10931_v43  ;;  %v10859_v60 = vmax.f32 %v10857_v36, %v10858_v11  ;;  %v10866_v23 = vmax.f32 %v10864_v48, %v10865_v15  ;;  %v13987_v62 = vadd.f32 %v13401_v39, %v19706_v2  ;;  %v10397_v57 = vpop.f32.mrb[77].mxu0 }
 0xee1   :  { %v13989_v61 = vadd.f32 %v19706_v2, %v10397_v57  ;;  %v13402_v14 = vpop.f32.mrb[78].mxu0 }
 0xee2   :  { %v10860_v8 = vrot.slane %v10859_v60, 2  ;;  %v10868_v44 = vmax.f32 %v10866_v23, %v10867_v38  ;;  %v13988_v37 = vadd.f32 %v13987_v62, %v10580_v53  ;;  %v13991_v3 = vadd.f32 %v13402_v14, %v19706_v2  ;;  %v10400_v42 = vpop.f32.mrb[79].mxu0 }
 0xee3   :  { %v13990_v10 = vadd.f32 %v13989_v61, %v10580_v53  ;;  %v13993_v43 = vadd.f32 %v19706_v2, %v10400_v42 }
 0xee4   :  { %v10861_v17 = vmax.f32 %v10859_v60, %v10860_v8  ;;  %v10870_v35 = vmax.f32 %v10868_v44, %v10869_v55  ;;  %v13992_v0 = vadd.f32 %v13991_v3, %v10580_v53  ;;  %v10875_v29 = vsel %vm1171_vm3, %v13988_v37, -inf }
 0xee5   :  { %v10871_v52 = vsel %vm1171_vm3, %v13990_v10, -inf  ;;  %v13994_v33 = vadd.f32 %v13993_v43, %v10580_v53 }
 0xee6   :  { %v10862_v58 = vrot.slane %v10861_v17, 1  ;;  %v10872_v12 = vmax.f32 %v10870_v35, %v10871_v52  ;;  %v10877_v24 = vsel %vm1171_vm3, %v13992_v0, -inf }
 0xee7   :  { %v10873_v51 = vsel %vm1171_vm3, %v13994_v33, -inf }
 0xee8   :  { %v10863_v28 = vmax.f32 %v10861_v17, %v10862_v58  ;;  %v10874_v32 = vmax.f32 %v10872_v12, %v10873_v51 }
 0xeea   :  { %v10891_v40 = vmax.f32 %v10863_v28, 0.0  ;;  %v10876_v19 = vmax.f32 %v10874_v32, %v10875_v29 }
 0xeec   :  { %v10903_v34 = vpack.c.bf16 %v10891_v40, %v10891_v40  ;;  %v10878_v2 = vmax.f32 %v10876_v19, %v10877_v24 }
 0xeee   :  { %v10926_v59 = vunpack.c.l.b16 %v10903_v34  ;;  %v10879_v26 = vrot.slane %v10878_v2, 4 }
 0xef0   :  { %v10933_v1 = vsel %vm2735_vm10, %v10926_v59, %v10932_v30  ;;  %v10880_v46 = vmax.f32 %v10878_v2, %v10879_v26 }
 0xef2   :  { %v10881_v18 = vrot.slane %v10880_v46, 2 }
 0xef4   :  { %v10882_v47 = vmax.f32 %v10880_v46, %v10881_v18 }
 0xef6   :  { %v10883_v13 = vrot.slane %v10882_v47, 1 }
 0xef8   :  { %v10884_v53 = vmax.f32 %v10882_v47, %v10883_v13 }
 0xefa   :  { %v10892_v56 = vmax.f32 %v10884_v53, 0.0 }
 0xefc   :  { %v10904_v5 = vpack.c.bf16 %v10892_v56, %v10892_v56 }
 0xefe   :  { %v10927_v20 = vunpack.c.l.b16 %v10904_v5 }
 0xf00   :  { %v10934_v50 = vsel %vm2737_vm11, %v10927_v20, %v10933_v1 }
 0xf01   :  { %v10935_v9 = vpack.c.b16 %v10934_v50, %v10934_v50 }
 0xf03   :  { %13416 = vmatmul.mubr.msk.bf16.vlgmr.msra.gmra.mrb[144].mxu1 %vm1171_vm3, %v10935_v9 }
 0xfd6   :  { %v10985_v6 = vpop.f32.mrb[144].mxu1 }
 0xfd7   :  { %v10986_v7 = vadd.f32 %v11675_v21, %v10985_v6  ;;  %v13417_v4 = vpop.f32.mrb[145].mxu1 }
 0xfd8   :  { %v10988_v25 = vpop.f32.mrb[146].mxu1 }
 0xfd9   :  { %10991 = vst [vmem:[#allocation2] sm:$0xff] %v10986_v7  ;;  %v13418_v16 = vpop.f32.mrb[147].mxu1 }
 0xfda   :  { %14386 = shalt.err (!%p14383_p4)
}
 0xfdb   :  { %s14387_s9 = scalar_lea.hbm %s19913_s10, 128 }
 0xfdc   :  { %p14388_p5 = scmp.ne.s32.totalorder %s19913_s10, %s14387_s9  ;;  %p14391_p6 = scmp.lt.u32.totalorder %s14387_s9, %s19913_s10 }
 0xfde   :  { %p14393_p7 = pnand %p14391_p6, %p14388_p5 }
 0xfe0   :  { %14396 = shalt.err (!%p14393_p7)
}
 0xfe1   :  { %11001 = dma.vmem_to_hbm [thread:$0]  %s10999_s28, 128, %s19913_s10, [#allocation3]  }
 0xfe2   :  { %14397 = dma.done.wait [#allocation3], 128  }
 0xfe3   :  { %14398 = vsyncadd [#allocation3], 4294967168 }
 0xfe4   :  { %11005 = vsyncpa [#allocation3], 1 }

</bundles_post_ra>
